<compile_context>
chip_gen: v6e
topology: v6e:2x2x1
jax: 0.10.0
libtpu: 0.0.40
codegen_flags: <defaults>
</compile_context>

<pallas_src>
import functools

import numpy as np

import jax
import jax.numpy as jnp
from jax.experimental import pallas as pl
from jax.experimental.pallas import tpu as pltpu

NEG_SLOPE = 0.01  # PyTorch nn.LeakyReLU() default


# ---------------------------------------------------------------------------
# Fused kernel.  Layout conventions (per batch tile of TB samples):
#   activation rows:  act[row, b, w*C + c]          (lane dim = w*C + c)
#   conv layer      :  per-output-row sum of <=3 matmuls with banded weights
#                      wb[kh] : (W_in*Cin, W_out*Cout)
# ---------------------------------------------------------------------------
def _fused_cnn_kernel(x_ref, wb1, bb1, wb2, bb2, wb3, bb3, wh, bh,
                      out_ref, act2, act3):
    f32 = jnp.float32

    def lrelu(v):
        return jnp.where(v > 0, v, NEG_SLOPE * v)

    def conv_row(read_row, n_in_rows, band_ref, bias_ref, i):
        s = bias_ref[...].astype(f32)                       # (1, N), broadcasts
        for kh in range(3):
            r = 2 * i + kh - 1                              # unpadded input row
            if 0 <= r < n_in_rows:                          # skip the top pad row
                s = s + jnp.dot(read_row(r), band_ref[kh],
                                preferred_element_type=f32)
        return lrelu(s)                                     # (TB, N) f32

    # conv1: 32 input rows -> 16 output rows, kept in VMEM scratch (bf16)
    for i in range(16):
        row = conv_row(lambda r: x_ref[r], 32, wb1, bb1, i)
        act2[i] = row.astype(jnp.bfloat16)

    # conv2: 16 -> 8
    for i in range(8):
        row = conv_row(lambda r: act2[r], 16, wb2, bb2, i)
        act3[i] = row.astype(jnp.bfloat16)

    # conv3 (8 -> 4) fused with all six Linear heads: each output row is
    # immediately contracted with its head-weight chunk, so the 4x4xC3 map
    # is never materialized.
    heads = bh[...].astype(f32)                             # (1, 128)
    for i in range(4):
        row = conv_row(lambda r: act3[r], 8, wb3, bb3, i)   # (TB, 4*C3) f32
        heads = heads + jnp.dot(row.astype(jnp.bfloat16), wh[i],
                                preferred_element_type=f32)
    out_ref[...] = heads.astype(out_ref.dtype)


def _run_fused(x1, fp, TB):
    Bp = x1.shape[1]
    l_in = x1.shape[2]
    n1 = fp["wb1"].shape[2]
    n2 = fp["wb2"].shape[2]
    n3 = fp["wb3"].shape[2]
    return pl.pallas_call(
        _fused_cnn_kernel,
        out_shape=jax.ShapeDtypeStruct((Bp, 128), jnp.float32),
        grid=(Bp // TB,),
        in_specs=[
            pl.BlockSpec((32, TB, l_in), lambda i: (0, i, 0)),
            pl.BlockSpec(fp["wb1"].shape, lambda i: (0, 0, 0)),
            pl.BlockSpec((1, n1), lambda i: (0, 0)),
            pl.BlockSpec(fp["wb2"].shape, lambda i: (0, 0, 0)),
            pl.BlockSpec((1, n2), lambda i: (0, 0)),
            pl.BlockSpec(fp["wb3"].shape, lambda i: (0, 0, 0)),
            pl.BlockSpec((1, n3), lambda i: (0, 0)),
            pl.BlockSpec(fp["wh"].shape, lambda i: (0, 0, 0)),
            pl.BlockSpec((1, 128), lambda i: (0, 0)),
        ],
        out_specs=pl.BlockSpec((TB, 128), lambda i: (i, 0)),
        scratch_shapes=[
            pltpu.VMEM((16, TB, n1), jnp.bfloat16),   # conv1 output rows
            pltpu.VMEM((8, TB, n2), jnp.bfloat16),    # conv2 output rows
        ],
        compiler_params=pltpu.CompilerParams(
            dimension_semantics=("parallel",),
            vmem_limit_bytes=32 * 1024 * 1024,
        ),
    )(x1, fp["wb1"], fp["bb1"], fp["wb2"], fp["bb2"],
      fp["wb3"], fp["bb3"], fp["wh"], fp["bh"])


# ---------------------------------------------------------------------------
# Module forward (uses prepared/fused parameters)
# ---------------------------------------------------------------------------
def cnn_aux_classifier_exp_forward(x_nchw, fp, cl_num, do_num):
    B, Cin, H, W = x_nchw.shape
    assert H == 32 and W == 32, "module hard-codes a 4x4 feature map -> 32x32 input"

    # Batch tile: full batch when B <= 8 (one grid step), otherwise a multiple
    # of 8 so the "parallel" grid axis has >=2 steps (engages both v7x TCs).
    if B <= 8:
        TB, Bp = B, B
    else:
        Bp = ((B + 7) // 8) * 8
        TB = next(t for t in (64, 32, 16, 8) if Bp % t == 0)

    x = x_nchw
    if Bp != B:
        x = jnp.pad(x, ((0, Bp - B), (0, 0), (0, 0), (0, 0)))

    # Single small re-layout of the raw input: NCHW -> (H, B, W*Cin), bf16.
    x1 = jnp.transpose(x, (2, 0, 3, 1)).reshape(H, Bp, W * Cin).astype(jnp.bfloat16)

    heads = _run_fused(x1, fp, TB)[:B]

    cl, do = cl_num, do_num
    n_main = 2 * cl + 2 * do + 1
    o_c = heads[:, 0:cl]
    o_c_tw = heads[:, cl:2 * cl]
    o_d = heads[:, 2 * cl:2 * cl + do]
    o_d_tw = heads[:, 2 * cl + do:2 * cl + 2 * do]
    o_disc = heads[:, 2 * cl + 2 * do:n_main]
    o_cls = heads[:, n_main:n_main + cl]
    return (o_c, o_c_tw, o_d, o_d_tw, o_cls, o_disc)


# ---------------------------------------------------------------------------
# One-time parameter preparation (outside jit):
#   - fuse main/cls conv stacks (concat Cout for layer 1, block-diag for 2/3)
#   - fold kw / stride-2 / left-pad into banded per-kh weights
#   - permute + fuse + zero-pad all six Linear heads to 128 columns, split
#     into 4 per-spatial-row chunks matching conv3's row-major output
# ---------------------------------------------------------------------------
def prepare_params(p, cl_num, do_num, ch):
    g = lambda k: np.asarray(p[k], np.float32)

    def block_diag_oihw(wm, wc):
        om, im = wm.shape[:2]
        oc, ic = wc.shape[:2]
        w = np.zeros((om + oc, im + ic, 3, 3), np.float32)
        w[:om, :im] = wm
        w[om:, im:] = wc
        return w

    def band(w_oihw, w_in):
        w_h = np.transpose(w_oihw, (2, 3, 1, 0))            # OIHW -> HWIO
        cin, cout = w_h.shape[2], w_h.shape[3]
        wo = w_in // 2
        bd = np.zeros((3, w_in * cin, wo * cout), np.float32)
        for kh in range(3):
            for kw in range(3):
                for j in range(wo):
                    col = 2 * j + kw - 1                     # unpadded input col
                    if 0 <= col < w_in:
                        bd[kh, col * cin:(col + 1) * cin,
                           j * cout:(j + 1) * cout] = w_h[kh, kw]
        return bd

    # fused conv stacks
    w1 = np.concatenate([g("main_w1"), g("cls_w1")], axis=0)
    b1 = np.concatenate([g("main_b1"), g("cls_b1")])
    w2 = block_diag_oihw(g("main_w2"), g("cls_w2"))
    b2 = np.concatenate([g("main_b2"), g("cls_b2")])
    w3 = block_diag_oihw(g("main_w3"), g("cls_w3"))
    b3 = np.concatenate([g("main_b3"), g("cls_b3")])

    wb1, wb2, wb3 = band(w1, 32), band(w2, 16), band(w3, 8)
    bb1 = np.tile(b1, 16)[None, :]
    bb2 = np.tile(b2, 8)[None, :]
    bb3 = np.tile(b3, 4)[None, :]

    # fused / permuted / padded heads
    C4 = 4 * ch
    C3f = 8 * ch                                            # fused conv3 channels
    n_main = 2 * cl_num + 2 * do_num + 1
    n_all = n_main + cl_num
    assert n_all <= 128, "head fan-out exceeds one lane tile; extend padding"

    # torch Linear weights are (dout, din); transpose to (din, dout).
    w_main = np.concatenate(
        [g("aux_c_w").T, g("aux_c_tw_w").T, g("aux_d_w").T,
         g("aux_d_tw_w").T, g("disc_w").T], axis=1)          # (16*C4, n_main)
    w_cls = g("cls_aux_c_w").T                               # (16*C4, cl_num)

    def chw_to_hwc(w):                                       # rows (c,h,w) -> (h,w,c,n)
        n = w.shape[1]
        return np.transpose(w.reshape(C4, 4, 4, n), (1, 2, 0, 3))

    # NOTE: half of the head's K rows are structurally zero (main/cls split);
    # acceptable here because the MXU is idle — do not grow this for large ch.
    wh = np.zeros((4, 4, C3f, 128), np.float32)
    wh[:, :, :C4, :n_main] = chw_to_hwc(w_main)
    wh[:, :, C4:, n_main:n_all] = chw_to_hwc(w_cls)
    wh = wh.reshape(4, 4 * C3f, 128)

    bh = np.zeros((1, 128), np.float32)
    bh[0, :n_main] = np.concatenate([g("aux_c_b"), g("aux_c_tw_b"), g("aux_d_b"),
                                     g("aux_d_tw_b"), g("disc_b")])
    bh[0, n_main:n_all] = g("cls_aux_c_b")

    bf16 = jnp.bfloat16
    return {
        "wb1": jnp.asarray(wb1, bf16), "bb1": jnp.asarray(bb1, jnp.float32),
        "wb2": jnp.asarray(wb2, bf16), "bb2": jnp.asarray(bb2, jnp.float32),
        "wb3": jnp.asarray(wb3, bf16), "bb3": jnp.asarray(bb3, jnp.float32),
        "wh": jnp.asarray(wh, bf16), "bh": jnp.asarray(bh, jnp.float32),
    }


# ---------------------------------------------------------------------------
# Deterministic synthetic parameters (torch layout: conv OIHW, linear (dout,din))
# ---------------------------------------------------------------------------
def init_params(key, i_dim, cl_num, do_num, ch):
    feat = 4 * 4 * 4 * ch
    keys = iter(jax.random.split(key, 40))

    def conv_w(cout, cin):
        return jax.random.normal(next(keys), (cout, cin, 3, 3), jnp.float32) * 0.05

    def vec(n):
        return jax.random.normal(next(keys), (n,), jnp.float32) * 0.05

    def lin_w(dout, din):
        return jax.random.normal(next(keys), (dout, din), jnp.float32) * 0.05

    p = {}
    for pre in ("main_", "cls_"):
        p[pre + "w1"] = conv_w(ch, i_dim);      p[pre + "b1"] = vec(ch)
        p[pre + "w2"] = conv_w(2 * ch, ch);     p[pre + "b2"] = vec(2 * ch)
        p[pre + "w3"] = conv_w(4 * ch, 2 * ch); p[pre + "b3"] = vec(4 * ch)

    p["aux_c_w"] = lin_w(cl_num, feat);      p["aux_c_b"] = vec(cl_num)
    p["aux_c_tw_w"] = lin_w(cl_num, feat);   p["aux_c_tw_b"] = vec(cl_num)
    p["aux_d_w"] = lin_w(do_num, feat);      p["aux_d_b"] = vec(do_num)
    p["aux_d_tw_w"] = lin_w(do_num, feat);   p["aux_d_tw_b"] = vec(do_num)
    p["disc_w"] = lin_w(1, feat);            p["disc_b"] = vec(1)
    p["cls_aux_c_w"] = lin_w(cl_num, feat);  p["cls_aux_c_b"] = vec(cl_num)
    return p


# ---------------------------------------------------------------------------
# Pure-JAX f32 reference (mirrors the PyTorch module exactly)
# ---------------------------------------------------------------------------
def reference_forward(x, p, cl_num, do_num, ch):
    def conv(x_, w, b):
        y = jax.lax.conv_general_dilated(
            x_, w, window_strides=(2, 2), padding=((1, 1), (1, 1)),
            dimension_numbers=("NCHW", "OIHW", "NCHW"))
        y = y + b[None, :, None, None]
        return jnp.where(y > 0, y, NEG_SLOPE * y)

    def branch(x_, pre):
        h = conv(x_, p[pre + "w1"], p[pre + "b1"])
        h = conv(h, p[pre + "w2"], p[pre + "b2"])
        h = conv(h, p[pre + "w3"], p[pre + "b3"])
        return h.reshape(x_.shape[0], -1)                    # torch .view order (c,h,w)

    z = branch(x, "main_")
    zc = branch(x, "cls_")
    lin = lambda z_, w, b: z_ @ p[w].T + p[b]
    return (lin(z, "aux_c_w", "aux_c_b"),
            lin(z, "aux_c_tw_w", "aux_c_tw_b"),
            lin(z, "aux_d_w", "aux_d_b"),
            lin(z, "aux_d_tw_w", "aux_d_tw_b"),
            lin(zc, "cls_aux_c_w", "cls_aux_c_b"),
            lin(z, "disc_w", "disc_b"))


if __name__ == "__main__":
    # Spatial must be 32 so three stride-2 convs give the 4x4 map hard-coded
    # in the module (4*4*4*ch).
    B, i_dim, ch, cl_num, do_num = 2, 3, 8, 5, 3

    key = jax.random.PRNGKey(0)
    kx, kp = jax.random.split(key)
    x = jax.random.normal(kx, (B, i_dim, 32, 32), jnp.float32)

    raw = init_params(kp, i_dim, cl_num, do_num, ch)
    fused = prepare_params(raw, cl_num, do_num, ch)          # once, outside jit

    fwd = jax.jit(functools.partial(cnn_aux_classifier_exp_forward,
                                    cl_num=cl_num, do_num=do_num))
    outs = fwd(x, fused)
    jax.block_until_ready(outs)

    expected_shapes = [(B, cl_num), (B, cl_num), (B, do_num), (B, do_num),
                       (B, cl_num), (B, 1)]
    assert [tuple(o.shape) for o in outs] == expected_shapes, \
        [tuple(o.shape) for o in outs]

    refs = reference_forward(x, raw, cl_num, do_num, ch)
    for o, r in zip(outs, refs):
        # bf16 MXU operands (f32 accumulate) -> small deliberate precision delta.
        np.testing.assert_allclose(np.asarray(o), np.asarray(r),
                                   rtol=2e-2, atol=2e-2)

    print("KERNEL_OK")
</pallas_src>

<mosaic_0001>
module attributes {stable_mosaic.version = 11 : i64} {
  func.func @_fused_cnn_kernel(%arg0: i32, %arg1: memref<32x2x96xbf16, #tpu.memory_space<vmem>>, %arg2: memref<3x96x256xbf16, #tpu.memory_space<vmem>>, %arg3: memref<1x256xf32, #tpu.memory_space<vmem>>, %arg4: memref<3x256x256xbf16, #tpu.memory_space<vmem>>, %arg5: memref<1x256xf32, #tpu.memory_space<vmem>>, %arg6: memref<3x256x256xbf16, #tpu.memory_space<vmem>>, %arg7: memref<1x256xf32, #tpu.memory_space<vmem>>, %arg8: memref<4x256x128xbf16, #tpu.memory_space<vmem>>, %arg9: memref<1x128xf32, #tpu.memory_space<vmem>>, %arg10: memref<2x128xf32, #tpu.memory_space<vmem>>, %arg11: memref<16x2x256xbf16, #tpu.memory_space<vmem>>, %arg12: memref<8x2x256xbf16, #tpu.memory_space<vmem>>) attributes {dimension_semantics = [#tpu.dimension_semantics<parallel>], iteration_bounds = array<i64: 1>, scalar_prefetch = 0 : i64, scratch_operands = 2 : i64, tpu.core_type = #tpu.core_type<tc>, window_params = [{transform_indices = @transform_0, window_bounds = array<i64: 32, 2, 96>}, {pipeline_mode = #tpu.pipeline_mode<synchronous>, transform_indices = @transform_1, window_bounds = array<i64: 3, 96, 256>}, {pipeline_mode = #tpu.pipeline_mode<synchronous>, transform_indices = @transform_2, window_bounds = array<i64: 1, 256>}, {pipeline_mode = #tpu.pipeline_mode<synchronous>, transform_indices = @transform_3, window_bounds = array<i64: 3, 256, 256>}, {pipeline_mode = #tpu.pipeline_mode<synchronous>, transform_indices = @transform_4, window_bounds = array<i64: 1, 256>}, {pipeline_mode = #tpu.pipeline_mode<synchronous>, transform_indices = @transform_5, window_bounds = array<i64: 3, 256, 256>}, {pipeline_mode = #tpu.pipeline_mode<synchronous>, transform_indices = @transform_6, window_bounds = array<i64: 1, 256>}, {pipeline_mode = #tpu.pipeline_mode<synchronous>, transform_indices = @transform_7, window_bounds = array<i64: 4, 256, 128>}, {pipeline_mode = #tpu.pipeline_mode<synchronous>, transform_indices = @transform_8, window_bounds = array<i64: 1, 128>}, {transform_indices = @transform_9, window_bounds = array<i64: 2, 128>}]} {
    %c0 = arith.constant 0 : index
    %c0_0 = arith.constant 0 : index
    %0 = vector.load %arg3[%c0, %c0_0] : memref<1x256xf32, #tpu.memory_space<vmem>>, vector<1x256xf32>
    %c0_1 = arith.constant 0 : index
    %c0_2 = arith.constant 0 : index
    %c0_3 = arith.constant 0 : index
    %1 = vector.load %arg1[%c0_1, %c0_2, %c0_3] : memref<32x2x96xbf16, #tpu.memory_space<vmem>>, vector<1x2x96xbf16>
    %2 = vector.shape_cast %1 : vector<1x2x96xbf16> to vector<2x96xbf16>
    %c1 = arith.constant 1 : index
    %c0_4 = arith.constant 0 : index
    %c0_5 = arith.constant 0 : index
    %3 = vector.load %arg2[%c1, %c0_4, %c0_5] : memref<3x96x256xbf16, #tpu.memory_space<vmem>>, vector<1x96x256xbf16>
    %4 = vector.shape_cast %3 : vector<1x96x256xbf16> to vector<96x256xbf16>
    %cst = arith.constant dense<0.000000e+00> : vector<2x256xf32>
    %5 = tpu.matmul %2, %4, %cst {dimension_numbers = #tpu.dot_dimension_numbers<[1], [0], [0], [1], [0, 0, 1, 1], [], []>} : vector<2x96xbf16>, vector<96x256xbf16>, vector<2x256xf32> -> vector<2x256xf32>
    %6 = vector.broadcast %0 : vector<1x256xf32> to vector<2x256xf32>
    %7 = arith.addf %6, %5 : vector<2x256xf32>
    %c1_6 = arith.constant 1 : index
    %c0_7 = arith.constant 0 : index
    %c0_8 = arith.constant 0 : index
    %8 = vector.load %arg1[%c1_6, %c0_7, %c0_8] : memref<32x2x96xbf16, #tpu.memory_space<vmem>>, vector<1x2x96xbf16>
    %9 = vector.shape_cast %8 : vector<1x2x96xbf16> to vector<2x96xbf16>
    %c2 = arith.constant 2 : index
    %c0_9 = arith.constant 0 : index
    %c0_10 = arith.constant 0 : index
    %10 = vector.load %arg2[%c2, %c0_9, %c0_10] : memref<3x96x256xbf16, #tpu.memory_space<vmem>>, vector<1x96x256xbf16>
    %11 = vector.shape_cast %10 : vector<1x96x256xbf16> to vector<96x256xbf16>
    %cst_11 = arith.constant dense<0.000000e+00> : vector<2x256xf32>
    %12 = tpu.matmul %9, %11, %cst_11 {dimension_numbers = #tpu.dot_dimension_numbers<[1], [0], [0], [1], [0, 0, 1, 1], [], []>} : vector<2x96xbf16>, vector<96x256xbf16>, vector<2x256xf32> -> vector<2x256xf32>
    %13 = arith.addf %7, %12 : vector<2x256xf32>
    %cst_12 = arith.constant 0.000000e+00 : f32
    %14 = vector.broadcast %cst_12 : f32 to vector<2x256xf32>
    %15 = arith.cmpf ogt, %13, %14 : vector<2x256xf32>
    %cst_13 = arith.constant 0.00999999977 : f32
    %16 = vector.broadcast %cst_13 : f32 to vector<2x256xf32>
    %17 = arith.mulf %16, %13 : vector<2x256xf32>
    %18 = arith.select %15, %13, %17 : vector<2x256xi1>, vector<2x256xf32>
    %19 = arith.truncf %18 : vector<2x256xf32> to vector<2x256xbf16>
    %c0_14 = arith.constant 0 : index
    %c0_15 = arith.constant 0 : index
    %c0_16 = arith.constant 0 : index
    %20 = vector.load %arg11[%c0_14, %c0_15, %c0_16] : memref<16x2x256xbf16, #tpu.memory_space<vmem>>, vector<1x2x256xbf16>
    %21 = vector.shape_cast %20 : vector<1x2x256xbf16> to vector<2x256xbf16>
    %22 = vector.shape_cast %19 : vector<2x256xbf16> to vector<1x2x256xbf16>
    tpu.vector_store %arg11[%c0_14, %c0_15, %c0_16], %22 {strides = array<i32>} : memref<16x2x256xbf16, #tpu.memory_space<vmem>>, vector<1x2x256xbf16>,
    %c0_17 = arith.constant 0 : index
    %c0_18 = arith.constant 0 : index
    %23 = vector.load %arg3[%c0_17, %c0_18] : memref<1x256xf32, #tpu.memory_space<vmem>>, vector<1x256xf32>
    %c1_19 = arith.constant 1 : index
    %c0_20 = arith.constant 0 : index
    %c0_21 = arith.constant 0 : index
    %24 = vector.load %arg1[%c1_19, %c0_20, %c0_21] : memref<32x2x96xbf16, #tpu.memory_space<vmem>>, vector<1x2x96xbf16>
    %25 = vector.shape_cast %24 : vector<1x2x96xbf16> to vector<2x96xbf16>
    %c0_22 = arith.constant 0 : index
    %c0_23 = arith.constant 0 : index
    %c0_24 = arith.constant 0 : index
    %26 = vector.load %arg2[%c0_22, %c0_23, %c0_24] : memref<3x96x256xbf16, #tpu.memory_space<vmem>>, vector<1x96x256xbf16>
    %27 = vector.shape_cast %26 : vector<1x96x256xbf16> to vector<96x256xbf16>
    %cst_25 = arith.constant dense<0.000000e+00> : vector<2x256xf32>
    %28 = tpu.matmul %25, %27, %cst_25 {dimension_numbers = #tpu.dot_dimension_numbers<[1], [0], [0], [1], [0, 0, 1, 1], [], []>} : vector<2x96xbf16>, vector<96x256xbf16>, vector<2x256xf32> -> vector<2x256xf32>
    %29 = vector.broadcast %23 : vector<1x256xf32> to vector<2x256xf32>
    %30 = arith.addf %29, %28 : vector<2x256xf32>
    %c2_26 = arith.constant 2 : index
    %c0_27 = arith.constant 0 : index
    %c0_28 = arith.constant 0 : index
    %31 = vector.load %arg1[%c2_26, %c0_27, %c0_28] : memref<32x2x96xbf16, #tpu.memory_space<vmem>>, vector<1x2x96xbf16>
    %32 = vector.shape_cast %31 : vector<1x2x96xbf16> to vector<2x96xbf16>
    %c1_29 = arith.constant 1 : index
    %c0_30 = arith.constant 0 : index
    %c0_31 = arith.constant 0 : index
    %33 = vector.load %arg2[%c1_29, %c0_30, %c0_31] : memref<3x96x256xbf16, #tpu.memory_space<vmem>>, vector<1x96x256xbf16>
    %34 = vector.shape_cast %33 : vector<1x96x256xbf16> to vector<96x256xbf16>
    %cst_32 = arith.constant dense<0.000000e+00> : vector<2x256xf32>
    %35 = tpu.matmul %32, %34, %cst_32 {dimension_numbers = #tpu.dot_dimension_numbers<[1], [0], [0], [1], [0, 0, 1, 1], [], []>} : vector<2x96xbf16>, vector<96x256xbf16>, vector<2x256xf32> -> vector<2x256xf32>
    %36 = arith.addf %30, %35 : vector<2x256xf32>
    %c3 = arith.constant 3 : index
    %c0_33 = arith.constant 0 : index
    %c0_34 = arith.constant 0 : index
    %37 = vector.load %arg1[%c3, %c0_33, %c0_34] : memref<32x2x96xbf16, #tpu.memory_space<vmem>>, vector<1x2x96xbf16>
    %38 = vector.shape_cast %37 : vector<1x2x96xbf16> to vector<2x96xbf16>
    %c2_35 = arith.constant 2 : index
    %c0_36 = arith.constant 0 : index
    %c0_37 = arith.constant 0 : index
    %39 = vector.load %arg2[%c2_35, %c0_36, %c0_37] : memref<3x96x256xbf16, #tpu.memory_space<vmem>>, vector<1x96x256xbf16>
    %40 = vector.shape_cast %39 : vector<1x96x256xbf16> to vector<96x256xbf16>
    %cst_38 = arith.constant dense<0.000000e+00> : vector<2x256xf32>
    %41 = tpu.matmul %38, %40, %cst_38 {dimension_numbers = #tpu.dot_dimension_numbers<[1], [0], [0], [1], [0, 0, 1, 1], [], []>} : vector<2x96xbf16>, vector<96x256xbf16>, vector<2x256xf32> -> vector<2x256xf32>
    %42 = arith.addf %36, %41 : vector<2x256xf32>
    %cst_39 = arith.constant 0.000000e+00 : f32
    %43 = vector.broadcast %cst_39 : f32 to vector<2x256xf32>
    %44 = arith.cmpf ogt, %42, %43 : vector<2x256xf32>
    %cst_40 = arith.constant 0.00999999977 : f32
    %45 = vector.broadcast %cst_40 : f32 to vector<2x256xf32>
    %46 = arith.mulf %45, %42 : vector<2x256xf32>
    %47 = arith.select %44, %42, %46 : vector<2x256xi1>, vector<2x256xf32>
    %48 = arith.truncf %47 : vector<2x256xf32> to vector<2x256xbf16>
    %c1_41 = arith.constant 1 : index
    %c0_42 = arith.constant 0 : index
    %c0_43 = arith.constant 0 : index
    %49 = vector.load %arg11[%c1_41, %c0_42, %c0_43] : memref<16x2x256xbf16, #tpu.memory_space<vmem>>, vector<1x2x256xbf16>
    %50 = vector.shape_cast %49 : vector<1x2x256xbf16> to vector<2x256xbf16>
    %51 = vector.shape_cast %48 : vector<2x256xbf16> to vector<1x2x256xbf16>
    tpu.vector_store %arg11[%c1_41, %c0_42, %c0_43], %51 {strides = array<i32>} : memref<16x2x256xbf16, #tpu.memory_space<vmem>>, vector<1x2x256xbf16>,
    %c0_44 = arith.constant 0 : index
    %c0_45 = arith.constant 0 : index
    %52 = vector.load %arg3[%c0_44, %c0_45] : memref<1x256xf32, #tpu.memory_space<vmem>>, vector<1x256xf32>
    %c3_46 = arith.constant 3 : index
    %c0_47 = arith.constant 0 : index
    %c0_48 = arith.constant 0 : index
    %53 = vector.load %arg1[%c3_46, %c0_47, %c0_48] : memref<32x2x96xbf16, #tpu.memory_space<vmem>>, vector<1x2x96xbf16>
    %54 = vector.shape_cast %53 : vector<1x2x96xbf16> to vector<2x96xbf16>
    %c0_49 = arith.constant 0 : index
    %c0_50 = arith.constant 0 : index
    %c0_51 = arith.constant 0 : index
    %55 = vector.load %arg2[%c0_49, %c0_50, %c0_51] : memref<3x96x256xbf16, #tpu.memory_space<vmem>>, vector<1x96x256xbf16>
    %56 = vector.shape_cast %55 : vector<1x96x256xbf16> to vector<96x256xbf16>
    %cst_52 = arith.constant dense<0.000000e+00> : vector<2x256xf32>
    %57 = tpu.matmul %54, %56, %cst_52 {dimension_numbers = #tpu.dot_dimension_numbers<[1], [0], [0], [1], [0, 0, 1, 1], [], []>} : vector<2x96xbf16>, vector<96x256xbf16>, vector<2x256xf32> -> vector<2x256xf32>
    %58 = vector.broadcast %52 : vector<1x256xf32> to vector<2x256xf32>
    %59 = arith.addf %58, %57 : vector<2x256xf32>
    %c4 = arith.constant 4 : index
    %c0_53 = arith.constant 0 : index
    %c0_54 = arith.constant 0 : index
    %60 = vector.load %arg1[%c4, %c0_53, %c0_54] : memref<32x2x96xbf16, #tpu.memory_space<vmem>>, vector<1x2x96xbf16>
    %61 = vector.shape_cast %60 : vector<1x2x96xbf16> to vector<2x96xbf16>
    %c1_55 = arith.constant 1 : index
    %c0_56 = arith.constant 0 : index
    %c0_57 = arith.constant 0 : index
    %62 = vector.load %arg2[%c1_55, %c0_56, %c0_57] : memref<3x96x256xbf16, #tpu.memory_space<vmem>>, vector<1x96x256xbf16>
    %63 = vector.shape_cast %62 : vector<1x96x256xbf16> to vector<96x256xbf16>
    %cst_58 = arith.constant dense<0.000000e+00> : vector<2x256xf32>
    %64 = tpu.matmul %61, %63, %cst_58 {dimension_numbers = #tpu.dot_dimension_numbers<[1], [0], [0], [1], [0, 0, 1, 1], [], []>} : vector<2x96xbf16>, vector<96x256xbf16>, vector<2x256xf32> -> vector<2x256xf32>
    %65 = arith.addf %59, %64 : vector<2x256xf32>
    %c5 = arith.constant 5 : index
    %c0_59 = arith.constant 0 : index
    %c0_60 = arith.constant 0 : index
    %66 = vector.load %arg1[%c5, %c0_59, %c0_60] : memref<32x2x96xbf16, #tpu.memory_space<vmem>>, vector<1x2x96xbf16>
    %67 = vector.shape_cast %66 : vector<1x2x96xbf16> to vector<2x96xbf16>
    %c2_61 = arith.constant 2 : index
    %c0_62 = arith.constant 0 : index
    %c0_63 = arith.constant 0 : index
    %68 = vector.load %arg2[%c2_61, %c0_62, %c0_63] : memref<3x96x256xbf16, #tpu.memory_space<vmem>>, vector<1x96x256xbf16>
    %69 = vector.shape_cast %68 : vector<1x96x256xbf16> to vector<96x256xbf16>
    %cst_64 = arith.constant dense<0.000000e+00> : vector<2x256xf32>
    %70 = tpu.matmul %67, %69, %cst_64 {dimension_numbers = #tpu.dot_dimension_numbers<[1], [0], [0], [1], [0, 0, 1, 1], [], []>} : vector<2x96xbf16>, vector<96x256xbf16>, vector<2x256xf32> -> vector<2x256xf32>
    %71 = arith.addf %65, %70 : vector<2x256xf32>
    %cst_65 = arith.constant 0.000000e+00 : f32
    %72 = vector.broadcast %cst_65 : f32 to vector<2x256xf32>
    %73 = arith.cmpf ogt, %71, %72 : vector<2x256xf32>
    %cst_66 = arith.constant 0.00999999977 : f32
    %74 = vector.broadcast %cst_66 : f32 to vector<2x256xf32>
    %75 = arith.mulf %74, %71 : vector<2x256xf32>
    %76 = arith.select %73, %71, %75 : vector<2x256xi1>, vector<2x256xf32>
    %77 = arith.truncf %76 : vector<2x256xf32> to vector<2x256xbf16>
    %c2_67 = arith.constant 2 : index
    %c0_68 = arith.constant 0 : index
    %c0_69 = arith.constant 0 : index
    %78 = vector.load %arg11[%c2_67, %c0_68, %c0_69] : memref<16x2x256xbf16, #tpu.memory_space<vmem>>, vector<1x2x256xbf16>
    %79 = vector.shape_cast %78 : vector<1x2x256xbf16> to vector<2x256xbf16>
    %80 = vector.shape_cast %77 : vector<2x256xbf16> to vector<1x2x256xbf16>
    tpu.vector_store %arg11[%c2_67, %c0_68, %c0_69], %80 {strides = array<i32>} : memref<16x2x256xbf16, #tpu.memory_space<vmem>>, vector<1x2x256xbf16>,
    %c0_70 = arith.constant 0 : index
    %c0_71 = arith.constant 0 : index
    %81 = vector.load %arg3[%c0_70, %c0_71] : memref<1x256xf32, #tpu.memory_space<vmem>>, vector<1x256xf32>
    %c5_72 = arith.constant 5 : index
    %c0_73 = arith.constant 0 : index
    %c0_74 = arith.constant 0 : index
    %82 = vector.load %arg1[%c5_72, %c0_73, %c0_74] : memref<32x2x96xbf16, #tpu.memory_space<vmem>>, vector<1x2x96xbf16>
    %83 = vector.shape_cast %82 : vector<1x2x96xbf16> to vector<2x96xbf16>
    %c0_75 = arith.constant 0 : index
    %c0_76 = arith.constant 0 : index
    %c0_77 = arith.constant 0 : index
    %84 = vector.load %arg2[%c0_75, %c0_76, %c0_77] : memref<3x96x256xbf16, #tpu.memory_space<vmem>>, vector<1x96x256xbf16>
    %85 = vector.shape_cast %84 : vector<1x96x256xbf16> to vector<96x256xbf16>
    %cst_78 = arith.constant dense<0.000000e+00> : vector<2x256xf32>
    %86 = tpu.matmul %83, %85, %cst_78 {dimension_numbers = #tpu.dot_dimension_numbers<[1], [0], [0], [1], [0, 0, 1, 1], [], []>} : vector<2x96xbf16>, vector<96x256xbf16>, vector<2x256xf32> -> vector<2x256xf32>
    %87 = vector.broadcast %81 : vector<1x256xf32> to vector<2x256xf32>
    %88 = arith.addf %87, %86 : vector<2x256xf32>
    %c6 = arith.constant 6 : index
    %c0_79 = arith.constant 0 : index
    %c0_80 = arith.constant 0 : index
    %89 = vector.load %arg1[%c6, %c0_79, %c0_80] : memref<32x2x96xbf16, #tpu.memory_space<vmem>>, vector<1x2x96xbf16>
    %90 = vector.shape_cast %89 : vector<1x2x96xbf16> to vector<2x96xbf16>
    %c1_81 = arith.constant 1 : index
    %c0_82 = arith.constant 0 : index
    %c0_83 = arith.constant 0 : index
    %91 = vector.load %arg2[%c1_81, %c0_82, %c0_83] : memref<3x96x256xbf16, #tpu.memory_space<vmem>>, vector<1x96x256xbf16>
    %92 = vector.shape_cast %91 : vector<1x96x256xbf16> to vector<96x256xbf16>
    %cst_84 = arith.constant dense<0.000000e+00> : vector<2x256xf32>
    %93 = tpu.matmul %90, %92, %cst_84 {dimension_numbers = #tpu.dot_dimension_numbers<[1], [0], [0], [1], [0, 0, 1, 1], [], []>} : vector<2x96xbf16>, vector<96x256xbf16>, vector<2x256xf32> -> vector<2x256xf32>
    %94 = arith.addf %88, %93 : vector<2x256xf32>
    %c7 = arith.constant 7 : index
    %c0_85 = arith.constant 0 : index
    %c0_86 = arith.constant 0 : index
    %95 = vector.load %arg1[%c7, %c0_85, %c0_86] : memref<32x2x96xbf16, #tpu.memory_space<vmem>>, vector<1x2x96xbf16>
    %96 = vector.shape_cast %95 : vector<1x2x96xbf16> to vector<2x96xbf16>
    %c2_87 = arith.constant 2 : index
    %c0_88 = arith.constant 0 : index
    %c0_89 = arith.constant 0 : index
    %97 = vector.load %arg2[%c2_87, %c0_88, %c0_89] : memref<3x96x256xbf16, #tpu.memory_space<vmem>>, vector<1x96x256xbf16>
    %98 = vector.shape_cast %97 : vector<1x96x256xbf16> to vector<96x256xbf16>
    %cst_90 = arith.constant dense<0.000000e+00> : vector<2x256xf32>
    %99 = tpu.matmul %96, %98, %cst_90 {dimension_numbers = #tpu.dot_dimension_numbers<[1], [0], [0], [1], [0, 0, 1, 1], [], []>} : vector<2x96xbf16>, vector<96x256xbf16>, vector<2x256xf32> -> vector<2x256xf32>
    %100 = arith.addf %94, %99 : vector<2x256xf32>
    %cst_91 = arith.constant 0.000000e+00 : f32
    %101 = vector.broadcast %cst_91 : f32 to vector<2x256xf32>
    %102 = arith.cmpf ogt, %100, %101 : vector<2x256xf32>
    %cst_92 = arith.constant 0.00999999977 : f32
    %103 = vector.broadcast %cst_92 : f32 to vector<2x256xf32>
    %104 = arith.mulf %103, %100 : vector<2x256xf32>
    %105 = arith.select %102, %100, %104 : vector<2x256xi1>, vector<2x256xf32>
    %106 = arith.truncf %105 : vector<2x256xf32> to vector<2x256xbf16>
    %c3_93 = arith.constant 3 : index
    %c0_94 = arith.constant 0 : index
    %c0_95 = arith.constant 0 : index
    %107 = vector.load %arg11[%c3_93, %c0_94, %c0_95] : memref<16x2x256xbf16, #tpu.memory_space<vmem>>, vector<1x2x256xbf16>
    %108 = vector.shape_cast %107 : vector<1x2x256xbf16> to vector<2x256xbf16>
    %109 = vector.shape_cast %106 : vector<2x256xbf16> to vector<1x2x256xbf16>
    tpu.vector_store %arg11[%c3_93, %c0_94, %c0_95], %109 {strides = array<i32>} : memref<16x2x256xbf16, #tpu.memory_space<vmem>>, vector<1x2x256xbf16>,
    %c0_96 = arith.constant 0 : index
    %c0_97 = arith.constant 0 : index
    %110 = vector.load %arg3[%c0_96, %c0_97] : memref<1x256xf32, #tpu.memory_space<vmem>>, vector<1x256xf32>
    %c7_98 = arith.constant 7 : index
    %c0_99 = arith.constant 0 : index
    %c0_100 = arith.constant 0 : index
    %111 = vector.load %arg1[%c7_98, %c0_99, %c0_100] : memref<32x2x96xbf16, #tpu.memory_space<vmem>>, vector<1x2x96xbf16>
    %112 = vector.shape_cast %111 : vector<1x2x96xbf16> to vector<2x96xbf16>
    %c0_101 = arith.constant 0 : index
    %c0_102 = arith.constant 0 : index
    %c0_103 = arith.constant 0 : index
    %113 = vector.load %arg2[%c0_101, %c0_102, %c0_103] : memref<3x96x256xbf16, #tpu.memory_space<vmem>>, vector<1x96x256xbf16>
    %114 = vector.shape_cast %113 : vector<1x96x256xbf16> to vector<96x256xbf16>
    %cst_104 = arith.constant dense<0.000000e+00> : vector<2x256xf32>
    %115 = tpu.matmul %112, %114, %cst_104 {dimension_numbers = #tpu.dot_dimension_numbers<[1], [0], [0], [1], [0, 0, 1, 1], [], []>} : vector<2x96xbf16>, vector<96x256xbf16>, vector<2x256xf32> -> vector<2x256xf32>
    %116 = vector.broadcast %110 : vector<1x256xf32> to vector<2x256xf32>
    %117 = arith.addf %116, %115 : vector<2x256xf32>
    %c8 = arith.constant 8 : index
    %c0_105 = arith.constant 0 : index
    %c0_106 = arith.constant 0 : index
    %118 = vector.load %arg1[%c8, %c0_105, %c0_106] : memref<32x2x96xbf16, #tpu.memory_space<vmem>>, vector<1x2x96xbf16>
    %119 = vector.shape_cast %118 : vector<1x2x96xbf16> to vector<2x96xbf16>
    %c1_107 = arith.constant 1 : index
    %c0_108 = arith.constant 0 : index
    %c0_109 = arith.constant 0 : index
    %120 = vector.load %arg2[%c1_107, %c0_108, %c0_109] : memref<3x96x256xbf16, #tpu.memory_space<vmem>>, vector<1x96x256xbf16>
    %121 = vector.shape_cast %120 : vector<1x96x256xbf16> to vector<96x256xbf16>
    %cst_110 = arith.constant dense<0.000000e+00> : vector<2x256xf32>
    %122 = tpu.matmul %119, %121, %cst_110 {dimension_numbers = #tpu.dot_dimension_numbers<[1], [0], [0], [1], [0, 0, 1, 1], [], []>} : vector<2x96xbf16>, vector<96x256xbf16>, vector<2x256xf32> -> vector<2x256xf32>
    %123 = arith.addf %117, %122 : vector<2x256xf32>
    %c9 = arith.constant 9 : index
    %c0_111 = arith.constant 0 : index
    %c0_112 = arith.constant 0 : index
    %124 = vector.load %arg1[%c9, %c0_111, %c0_112] : memref<32x2x96xbf16, #tpu.memory_space<vmem>>, vector<1x2x96xbf16>
    %125 = vector.shape_cast %124 : vector<1x2x96xbf16> to vector<2x96xbf16>
    %c2_113 = arith.constant 2 : index
    %c0_114 = arith.constant 0 : index
    %c0_115 = arith.constant 0 : index
    %126 = vector.load %arg2[%c2_113, %c0_114, %c0_115] : memref<3x96x256xbf16, #tpu.memory_space<vmem>>, vector<1x96x256xbf16>
    %127 = vector.shape_cast %126 : vector<1x96x256xbf16> to vector<96x256xbf16>
    %cst_116 = arith.constant dense<0.000000e+00> : vector<2x256xf32>
    %128 = tpu.matmul %125, %127, %cst_116 {dimension_numbers = #tpu.dot_dimension_numbers<[1], [0], [0], [1], [0, 0, 1, 1], [], []>} : vector<2x96xbf16>, vector<96x256xbf16>, vector<2x256xf32> -> vector<2x256xf32>
    %129 = arith.addf %123, %128 : vector<2x256xf32>
    %cst_117 = arith.constant 0.000000e+00 : f32
    %130 = vector.broadcast %cst_117 : f32 to vector<2x256xf32>
    %131 = arith.cmpf ogt, %129, %130 : vector<2x256xf32>
    %cst_118 = arith.constant 0.00999999977 : f32
    %132 = vector.broadcast %cst_118 : f32 to vector<2x256xf32>
    %133 = arith.mulf %132, %129 : vector<2x256xf32>
    %134 = arith.select %131, %129, %133 : vector<2x256xi1>, vector<2x256xf32>
    %135 = arith.truncf %134 : vector<2x256xf32> to vector<2x256xbf16>
    %c4_119 = arith.constant 4 : index
    %c0_120 = arith.constant 0 : index
    %c0_121 = arith.constant 0 : index
    %136 = vector.load %arg11[%c4_119, %c0_120, %c0_121] : memref<16x2x256xbf16, #tpu.memory_space<vmem>>, vector<1x2x256xbf16>
    %137 = vector.shape_cast %136 : vector<1x2x256xbf16> to vector<2x256xbf16>
    %138 = vector.shape_cast %135 : vector<2x256xbf16> to vector<1x2x256xbf16>
    tpu.vector_store %arg11[%c4_119, %c0_120, %c0_121], %138 {strides = array<i32>} : memref<16x2x256xbf16, #tpu.memory_space<vmem>>, vector<1x2x256xbf16>,
    %c0_122 = arith.constant 0 : index
    %c0_123 = arith.constant 0 : index
    %139 = vector.load %arg3[%c0_122, %c0_123] : memref<1x256xf32, #tpu.memory_space<vmem>>, vector<1x256xf32>
    %c9_124 = arith.constant 9 : index
    %c0_125 = arith.constant 0 : index
    %c0_126 = arith.constant 0 : index
    %140 = vector.load %arg1[%c9_124, %c0_125, %c0_126] : memref<32x2x96xbf16, #tpu.memory_space<vmem>>, vector<1x2x96xbf16>
    %141 = vector.shape_cast %140 : vector<1x2x96xbf16> to vector<2x96xbf16>
    %c0_127 = arith.constant 0 : index
    %c0_128 = arith.constant 0 : index
    %c0_129 = arith.constant 0 : index
    %142 = vector.load %arg2[%c0_127, %c0_128, %c0_129] : memref<3x96x256xbf16, #tpu.memory_space<vmem>>, vector<1x96x256xbf16>
    %143 = vector.shape_cast %142 : vector<1x96x256xbf16> to vector<96x256xbf16>
    %cst_130 = arith.constant dense<0.000000e+00> : vector<2x256xf32>
    %144 = tpu.matmul %141, %143, %cst_130 {dimension_numbers = #tpu.dot_dimension_numbers<[1], [0], [0], [1], [0, 0, 1, 1], [], []>} : vector<2x96xbf16>, vector<96x256xbf16>, vector<2x256xf32> -> vector<2x256xf32>
    %145 = vector.broadcast %139 : vector<1x256xf32> to vector<2x256xf32>
    %146 = arith.addf %145, %144 : vector<2x256xf32>
    %c10 = arith.constant 10 : index
    %c0_131 = arith.constant 0 : index
    %c0_132 = arith.constant 0 : index
    %147 = vector.load %arg1[%c10, %c0_131, %c0_132] : memref<32x2x96xbf16, #tpu.memory_space<vmem>>, vector<1x2x96xbf16>
    %148 = vector.shape_cast %147 : vector<1x2x96xbf16> to vector<2x96xbf16>
    %c1_133 = arith.constant 1 : index
    %c0_134 = arith.constant 0 : index
    %c0_135 = arith.constant 0 : index
    %149 = vector.load %arg2[%c1_133, %c0_134, %c0_135] : memref<3x96x256xbf16, #tpu.memory_space<vmem>>, vector<1x96x256xbf16>
    %150 = vector.shape_cast %149 : vector<1x96x256xbf16> to vector<96x256xbf16>
    %cst_136 = arith.constant dense<0.000000e+00> : vector<2x256xf32>
    %151 = tpu.matmul %148, %150, %cst_136 {dimension_numbers = #tpu.dot_dimension_numbers<[1], [0], [0], [1], [0, 0, 1, 1], [], []>} : vector<2x96xbf16>, vector<96x256xbf16>, vector<2x256xf32> -> vector<2x256xf32>
    %152 = arith.addf %146, %151 : vector<2x256xf32>
    %c11 = arith.constant 11 : index
    %c0_137 = arith.constant 0 : index
    %c0_138 = arith.constant 0 : index
    %153 = vector.load %arg1[%c11, %c0_137, %c0_138] : memref<32x2x96xbf16, #tpu.memory_space<vmem>>, vector<1x2x96xbf16>
    %154 = vector.shape_cast %153 : vector<1x2x96xbf16> to vector<2x96xbf16>
    %c2_139 = arith.constant 2 : index
    %c0_140 = arith.constant 0 : index
    %c0_141 = arith.constant 0 : index
    %155 = vector.load %arg2[%c2_139, %c0_140, %c0_141] : memref<3x96x256xbf16, #tpu.memory_space<vmem>>, vector<1x96x256xbf16>
    %156 = vector.shape_cast %155 : vector<1x96x256xbf16> to vector<96x256xbf16>
    %cst_142 = arith.constant dense<0.000000e+00> : vector<2x256xf32>
    %157 = tpu.matmul %154, %156, %cst_142 {dimension_numbers = #tpu.dot_dimension_numbers<[1], [0], [0], [1], [0, 0, 1, 1], [], []>} : vector<2x96xbf16>, vector<96x256xbf16>, vector<2x256xf32> -> vector<2x256xf32>
    %158 = arith.addf %152, %157 : vector<2x256xf32>
    %cst_143 = arith.constant 0.000000e+00 : f32
    %159 = vector.broadcast %cst_143 : f32 to vector<2x256xf32>
    %160 = arith.cmpf ogt, %158, %159 : vector<2x256xf32>
    %cst_144 = arith.constant 0.00999999977 : f32
    %161 = vector.broadcast %cst_144 : f32 to vector<2x256xf32>
    %162 = arith.mulf %161, %158 : vector<2x256xf32>
    %163 = arith.select %160, %158, %162 : vector<2x256xi1>, vector<2x256xf32>
    %164 = arith.truncf %163 : vector<2x256xf32> to vector<2x256xbf16>
    %c5_145 = arith.constant 5 : index
    %c0_146 = arith.constant 0 : index
    %c0_147 = arith.constant 0 : index
    %165 = vector.load %arg11[%c5_145, %c0_146, %c0_147] : memref<16x2x256xbf16, #tpu.memory_space<vmem>>, vector<1x2x256xbf16>
    %166 = vector.shape_cast %165 : vector<1x2x256xbf16> to vector<2x256xbf16>
    %167 = vector.shape_cast %164 : vector<2x256xbf16> to vector<1x2x256xbf16>
    tpu.vector_store %arg11[%c5_145, %c0_146, %c0_147], %167 {strides = array<i32>} : memref<16x2x256xbf16, #tpu.memory_space<vmem>>, vector<1x2x256xbf16>,
    %c0_148 = arith.constant 0 : index
    %c0_149 = arith.constant 0 : index
    %168 = vector.load %arg3[%c0_148, %c0_149] : memref<1x256xf32, #tpu.memory_space<vmem>>, vector<1x256xf32>
    %c11_150 = arith.constant 11 : index
    %c0_151 = arith.constant 0 : index
    %c0_152 = arith.constant 0 : index
    %169 = vector.load %arg1[%c11_150, %c0_151, %c0_152] : memref<32x2x96xbf16, #tpu.memory_space<vmem>>, vector<1x2x96xbf16>
    %170 = vector.shape_cast %169 : vector<1x2x96xbf16> to vector<2x96xbf16>
    %c0_153 = arith.constant 0 : index
    %c0_154 = arith.constant 0 : index
    %c0_155 = arith.constant 0 : index
    %171 = vector.load %arg2[%c0_153, %c0_154, %c0_155] : memref<3x96x256xbf16, #tpu.memory_space<vmem>>, vector<1x96x256xbf16>
    %172 = vector.shape_cast %171 : vector<1x96x256xbf16> to vector<96x256xbf16>
    %cst_156 = arith.constant dense<0.000000e+00> : vector<2x256xf32>
    %173 = tpu.matmul %170, %172, %cst_156 {dimension_numbers = #tpu.dot_dimension_numbers<[1], [0], [0], [1], [0, 0, 1, 1], [], []>} : vector<2x96xbf16>, vector<96x256xbf16>, vector<2x256xf32> -> vector<2x256xf32>
    %174 = vector.broadcast %168 : vector<1x256xf32> to vector<2x256xf32>
    %175 = arith.addf %174, %173 : vector<2x256xf32>
    %c12 = arith.constant 12 : index
    %c0_157 = arith.constant 0 : index
    %c0_158 = arith.constant 0 : index
    %176 = vector.load %arg1[%c12, %c0_157, %c0_158] : memref<32x2x96xbf16, #tpu.memory_space<vmem>>, vector<1x2x96xbf16>
    %177 = vector.shape_cast %176 : vector<1x2x96xbf16> to vector<2x96xbf16>
    %c1_159 = arith.constant 1 : index
    %c0_160 = arith.constant 0 : index
    %c0_161 = arith.constant 0 : index
    %178 = vector.load %arg2[%c1_159, %c0_160, %c0_161] : memref<3x96x256xbf16, #tpu.memory_space<vmem>>, vector<1x96x256xbf16>
    %179 = vector.shape_cast %178 : vector<1x96x256xbf16> to vector<96x256xbf16>
    %cst_162 = arith.constant dense<0.000000e+00> : vector<2x256xf32>
    %180 = tpu.matmul %177, %179, %cst_162 {dimension_numbers = #tpu.dot_dimension_numbers<[1], [0], [0], [1], [0, 0, 1, 1], [], []>} : vector<2x96xbf16>, vector<96x256xbf16>, vector<2x256xf32> -> vector<2x256xf32>
    %181 = arith.addf %175, %180 : vector<2x256xf32>
    %c13 = arith.constant 13 : index
    %c0_163 = arith.constant 0 : index
    %c0_164 = arith.constant 0 : index
    %182 = vector.load %arg1[%c13, %c0_163, %c0_164] : memref<32x2x96xbf16, #tpu.memory_space<vmem>>, vector<1x2x96xbf16>
    %183 = vector.shape_cast %182 : vector<1x2x96xbf16> to vector<2x96xbf16>
    %c2_165 = arith.constant 2 : index
    %c0_166 = arith.constant 0 : index
    %c0_167 = arith.constant 0 : index
    %184 = vector.load %arg2[%c2_165, %c0_166, %c0_167] : memref<3x96x256xbf16, #tpu.memory_space<vmem>>, vector<1x96x256xbf16>
    %185 = vector.shape_cast %184 : vector<1x96x256xbf16> to vector<96x256xbf16>
    %cst_168 = arith.constant dense<0.000000e+00> : vector<2x256xf32>
    %186 = tpu.matmul %183, %185, %cst_168 {dimension_numbers = #tpu.dot_dimension_numbers<[1], [0], [0], [1], [0, 0, 1, 1], [], []>} : vector<2x96xbf16>, vector<96x256xbf16>, vector<2x256xf32> -> vector<2x256xf32>
    %187 = arith.addf %181, %186 : vector<2x256xf32>
    %cst_169 = arith.constant 0.000000e+00 : f32
    %188 = vector.broadcast %cst_169 : f32 to vector<2x256xf32>
    %189 = arith.cmpf ogt, %187, %188 : vector<2x256xf32>
    %cst_170 = arith.constant 0.00999999977 : f32
    %190 = vector.broadcast %cst_170 : f32 to vector<2x256xf32>
    %191 = arith.mulf %190, %187 : vector<2x256xf32>
    %192 = arith.select %189, %187, %191 : vector<2x256xi1>, vector<2x256xf32>
    %193 = arith.truncf %192 : vector<2x256xf32> to vector<2x256xbf16>
    %c6_171 = arith.constant 6 : index
    %c0_172 = arith.constant 0 : index
    %c0_173 = arith.constant 0 : index
    %194 = vector.load %arg11[%c6_171, %c0_172, %c0_173] : memref<16x2x256xbf16, #tpu.memory_space<vmem>>, vector<1x2x256xbf16>
    %195 = vector.shape_cast %194 : vector<1x2x256xbf16> to vector<2x256xbf16>
    %196 = vector.shape_cast %193 : vector<2x256xbf16> to vector<1x2x256xbf16>
    tpu.vector_store %arg11[%c6_171, %c0_172, %c0_173], %196 {strides = array<i32>} : memref<16x2x256xbf16, #tpu.memory_space<vmem>>, vector<1x2x256xbf16>,
    %c0_174 = arith.constant 0 : index
    %c0_175 = arith.constant 0 : index
    %197 = vector.load %arg3[%c0_174, %c0_175] : memref<1x256xf32, #tpu.memory_space<vmem>>, vector<1x256xf32>
    %c13_176 = arith.constant 13 : index
    %c0_177 = arith.constant 0 : index
    %c0_178 = arith.constant 0 : index
    %198 = vector.load %arg1[%c13_176, %c0_177, %c0_178] : memref<32x2x96xbf16, #tpu.memory_space<vmem>>, vector<1x2x96xbf16>
    %199 = vector.shape_cast %198 : vector<1x2x96xbf16> to vector<2x96xbf16>
    %c0_179 = arith.constant 0 : index
    %c0_180 = arith.constant 0 : index
    %c0_181 = arith.constant 0 : index
    %200 = vector.load %arg2[%c0_179, %c0_180, %c0_181] : memref<3x96x256xbf16, #tpu.memory_space<vmem>>, vector<1x96x256xbf16>
    %201 = vector.shape_cast %200 : vector<1x96x256xbf16> to vector<96x256xbf16>
    %cst_182 = arith.constant dense<0.000000e+00> : vector<2x256xf32>
    %202 = tpu.matmul %199, %201, %cst_182 {dimension_numbers = #tpu.dot_dimension_numbers<[1], [0], [0], [1], [0, 0, 1, 1], [], []>} : vector<2x96xbf16>, vector<96x256xbf16>, vector<2x256xf32> -> vector<2x256xf32>
    %203 = vector.broadcast %197 : vector<1x256xf32> to vector<2x256xf32>
    %204 = arith.addf %203, %202 : vector<2x256xf32>
    %c14 = arith.constant 14 : index
    %c0_183 = arith.constant 0 : index
    %c0_184 = arith.constant 0 : index
    %205 = vector.load %arg1[%c14, %c0_183, %c0_184] : memref<32x2x96xbf16, #tpu.memory_space<vmem>>, vector<1x2x96xbf16>
    %206 = vector.shape_cast %205 : vector<1x2x96xbf16> to vector<2x96xbf16>
    %c1_185 = arith.constant 1 : index
    %c0_186 = arith.constant 0 : index
    %c0_187 = arith.constant 0 : index
    %207 = vector.load %arg2[%c1_185, %c0_186, %c0_187] : memref<3x96x256xbf16, #tpu.memory_space<vmem>>, vector<1x96x256xbf16>
    %208 = vector.shape_cast %207 : vector<1x96x256xbf16> to vector<96x256xbf16>
    %cst_188 = arith.constant dense<0.000000e+00> : vector<2x256xf32>
    %209 = tpu.matmul %206, %208, %cst_188 {dimension_numbers = #tpu.dot_dimension_numbers<[1], [0], [0], [1], [0, 0, 1, 1], [], []>} : vector<2x96xbf16>, vector<96x256xbf16>, vector<2x256xf32> -> vector<2x256xf32>
    %210 = arith.addf %204, %209 : vector<2x256xf32>
    %c15 = arith.constant 15 : index
    %c0_189 = arith.constant 0 : index
    %c0_190 = arith.constant 0 : index
    %211 = vector.load %arg1[%c15, %c0_189, %c0_190] : memref<32x2x96xbf16, #tpu.memory_space<vmem>>, vector<1x2x96xbf16>
    %212 = vector.shape_cast %211 : vector<1x2x96xbf16> to vector<2x96xbf16>
    %c2_191 = arith.constant 2 : index
    %c0_192 = arith.constant 0 : index
    %c0_193 = arith.constant 0 : index
    %213 = vector.load %arg2[%c2_191, %c0_192, %c0_193] : memref<3x96x256xbf16, #tpu.memory_space<vmem>>, vector<1x96x256xbf16>
    %214 = vector.shape_cast %213 : vector<1x96x256xbf16> to vector<96x256xbf16>
    %cst_194 = arith.constant dense<0.000000e+00> : vector<2x256xf32>
    %215 = tpu.matmul %212, %214, %cst_194 {dimension_numbers = #tpu.dot_dimension_numbers<[1], [0], [0], [1], [0, 0, 1, 1], [], []>} : vector<2x96xbf16>, vector<96x256xbf16>, vector<2x256xf32> -> vector<2x256xf32>
    %216 = arith.addf %210, %215 : vector<2x256xf32>
    %cst_195 = arith.constant 0.000000e+00 : f32
    %217 = vector.broadcast %cst_195 : f32 to vector<2x256xf32>
    %218 = arith.cmpf ogt, %216, %217 : vector<2x256xf32>
    %cst_196 = arith.constant 0.00999999977 : f32
    %219 = vector.broadcast %cst_196 : f32 to vector<2x256xf32>
    %220 = arith.mulf %219, %216 : vector<2x256xf32>
    %221 = arith.select %218, %216, %220 : vector<2x256xi1>, vector<2x256xf32>
    %222 = arith.truncf %221 : vector<2x256xf32> to vector<2x256xbf16>
    %c7_197 = arith.constant 7 : index
    %c0_198 = arith.constant 0 : index
    %c0_199 = arith.constant 0 : index
    %223 = vector.load %arg11[%c7_197, %c0_198, %c0_199] : memref<16x2x256xbf16, #tpu.memory_space<vmem>>, vector<1x2x256xbf16>
    %224 = vector.shape_cast %223 : vector<1x2x256xbf16> to vector<2x256xbf16>
    %225 = vector.shape_cast %222 : vector<2x256xbf16> to vector<1x2x256xbf16>
    tpu.vector_store %arg11[%c7_197, %c0_198, %c0_199], %225 {strides = array<i32>} : memref<16x2x256xbf16, #tpu.memory_space<vmem>>, vector<1x2x256xbf16>,
    %c0_200 = arith.constant 0 : index
    %c0_201 = arith.constant 0 : index
    %226 = vector.load %arg3[%c0_200, %c0_201] : memref<1x256xf32, #tpu.memory_space<vmem>>, vector<1x256xf32>
    %c15_202 = arith.constant 15 : index
    %c0_203 = arith.constant 0 : index
    %c0_204 = arith.constant 0 : index
    %227 = vector.load %arg1[%c15_202, %c0_203, %c0_204] : memref<32x2x96xbf16, #tpu.memory_space<vmem>>, vector<1x2x96xbf16>
    %228 = vector.shape_cast %227 : vector<1x2x96xbf16> to vector<2x96xbf16>
    %c0_205 = arith.constant 0 : index
    %c0_206 = arith.constant 0 : index
    %c0_207 = arith.constant 0 : index
    %229 = vector.load %arg2[%c0_205, %c0_206, %c0_207] : memref<3x96x256xbf16, #tpu.memory_space<vmem>>, vector<1x96x256xbf16>
    %230 = vector.shape_cast %229 : vector<1x96x256xbf16> to vector<96x256xbf16>
    %cst_208 = arith.constant dense<0.000000e+00> : vector<2x256xf32>
    %231 = tpu.matmul %228, %230, %cst_208 {dimension_numbers = #tpu.dot_dimension_numbers<[1], [0], [0], [1], [0, 0, 1, 1], [], []>} : vector<2x96xbf16>, vector<96x256xbf16>, vector<2x256xf32> -> vector<2x256xf32>
    %232 = vector.broadcast %226 : vector<1x256xf32> to vector<2x256xf32>
    %233 = arith.addf %232, %231 : vector<2x256xf32>
    %c16 = arith.constant 16 : index
    %c0_209 = arith.constant 0 : index
    %c0_210 = arith.constant 0 : index
    %234 = vector.load %arg1[%c16, %c0_209, %c0_210] : memref<32x2x96xbf16, #tpu.memory_space<vmem>>, vector<1x2x96xbf16>
    %235 = vector.shape_cast %234 : vector<1x2x96xbf16> to vector<2x96xbf16>
    %c1_211 = arith.constant 1 : index
    %c0_212 = arith.constant 0 : index
    %c0_213 = arith.constant 0 : index
    %236 = vector.load %arg2[%c1_211, %c0_212, %c0_213] : memref<3x96x256xbf16, #tpu.memory_space<vmem>>, vector<1x96x256xbf16>
    %237 = vector.shape_cast %236 : vector<1x96x256xbf16> to vector<96x256xbf16>
    %cst_214 = arith.constant dense<0.000000e+00> : vector<2x256xf32>
    %238 = tpu.matmul %235, %237, %cst_214 {dimension_numbers = #tpu.dot_dimension_numbers<[1], [0], [0], [1], [0, 0, 1, 1], [], []>} : vector<2x96xbf16>, vector<96x256xbf16>, vector<2x256xf32> -> vector<2x256xf32>
    %239 = arith.addf %233, %238 : vector<2x256xf32>
    %c17 = arith.constant 17 : index
    %c0_215 = arith.constant 0 : index
    %c0_216 = arith.constant 0 : index
    %240 = vector.load %arg1[%c17, %c0_215, %c0_216] : memref<32x2x96xbf16, #tpu.memory_space<vmem>>, vector<1x2x96xbf16>
    %241 = vector.shape_cast %240 : vector<1x2x96xbf16> to vector<2x96xbf16>
    %c2_217 = arith.constant 2 : index
    %c0_218 = arith.constant 0 : index
    %c0_219 = arith.constant 0 : index
    %242 = vector.load %arg2[%c2_217, %c0_218, %c0_219] : memref<3x96x256xbf16, #tpu.memory_space<vmem>>, vector<1x96x256xbf16>
    %243 = vector.shape_cast %242 : vector<1x96x256xbf16> to vector<96x256xbf16>
    %cst_220 = arith.constant dense<0.000000e+00> : vector<2x256xf32>
    %244 = tpu.matmul %241, %243, %cst_220 {dimension_numbers = #tpu.dot_dimension_numbers<[1], [0], [0], [1], [0, 0, 1, 1], [], []>} : vector<2x96xbf16>, vector<96x256xbf16>, vector<2x256xf32> -> vector<2x256xf32>
    %245 = arith.addf %239, %244 : vector<2x256xf32>
    %cst_221 = arith.constant 0.000000e+00 : f32
    %246 = vector.broadcast %cst_221 : f32 to vector<2x256xf32>
    %247 = arith.cmpf ogt, %245, %246 : vector<2x256xf32>
    %cst_222 = arith.constant 0.00999999977 : f32
    %248 = vector.broadcast %cst_222 : f32 to vector<2x256xf32>
    %249 = arith.mulf %248, %245 : vector<2x256xf32>
    %250 = arith.select %247, %245, %249 : vector<2x256xi1>, vector<2x256xf32>
    %251 = arith.truncf %250 : vector<2x256xf32> to vector<2x256xbf16>
    %c8_223 = arith.constant 8 : index
    %c0_224 = arith.constant 0 : index
    %c0_225 = arith.constant 0 : index
    %252 = vector.load %arg11[%c8_223, %c0_224, %c0_225] : memref<16x2x256xbf16, #tpu.memory_space<vmem>>, vector<1x2x256xbf16>
    %253 = vector.shape_cast %252 : vector<1x2x256xbf16> to vector<2x256xbf16>
    %254 = vector.shape_cast %251 : vector<2x256xbf16> to vector<1x2x256xbf16>
    tpu.vector_store %arg11[%c8_223, %c0_224, %c0_225], %254 {strides = array<i32>} : memref<16x2x256xbf16, #tpu.memory_space<vmem>>, vector<1x2x256xbf16>,
    %c0_226 = arith.constant 0 : index
    %c0_227 = arith.constant 0 : index
    %255 = vector.load %arg3[%c0_226, %c0_227] : memref<1x256xf32, #tpu.memory_space<vmem>>, vector<1x256xf32>
    %c17_228 = arith.constant 17 : index
    %c0_229 = arith.constant 0 : index
    %c0_230 = arith.constant 0 : index
    %256 = vector.load %arg1[%c17_228, %c0_229, %c0_230] : memref<32x2x96xbf16, #tpu.memory_space<vmem>>, vector<1x2x96xbf16>
    %257 = vector.shape_cast %256 : vector<1x2x96xbf16> to vector<2x96xbf16>
    %c0_231 = arith.constant 0 : index
    %c0_232 = arith.constant 0 : index
    %c0_233 = arith.constant 0 : index
    %258 = vector.load %arg2[%c0_231, %c0_232, %c0_233] : memref<3x96x256xbf16, #tpu.memory_space<vmem>>, vector<1x96x256xbf16>
    %259 = vector.shape_cast %258 : vector<1x96x256xbf16> to vector<96x256xbf16>
    %cst_234 = arith.constant dense<0.000000e+00> : vector<2x256xf32>
    %260 = tpu.matmul %257, %259, %cst_234 {dimension_numbers = #tpu.dot_dimension_numbers<[1], [0], [0], [1], [0, 0, 1, 1], [], []>} : vector<2x96xbf16>, vector<96x256xbf16>, vector<2x256xf32> -> vector<2x256xf32>
    %261 = vector.broadcast %255 : vector<1x256xf32> to vector<2x256xf32>
    %262 = arith.addf %261, %260 : vector<2x256xf32>
    %c18 = arith.constant 18 : index
    %c0_235 = arith.constant 0 : index
    %c0_236 = arith.constant 0 : index
    %263 = vector.load %arg1[%c18, %c0_235, %c0_236] : memref<32x2x96xbf16, #tpu.memory_space<vmem>>, vector<1x2x96xbf16>
    %264 = vector.shape_cast %263 : vector<1x2x96xbf16> to vector<2x96xbf16>
    %c1_237 = arith.constant 1 : index
    %c0_238 = arith.constant 0 : index
    %c0_239 = arith.constant 0 : index
    %265 = vector.load %arg2[%c1_237, %c0_238, %c0_239] : memref<3x96x256xbf16, #tpu.memory_space<vmem>>, vector<1x96x256xbf16>
    %266 = vector.shape_cast %265 : vector<1x96x256xbf16> to vector<96x256xbf16>
    %cst_240 = arith.constant dense<0.000000e+00> : vector<2x256xf32>
    %267 = tpu.matmul %264, %266, %cst_240 {dimension_numbers = #tpu.dot_dimension_numbers<[1], [0], [0], [1], [0, 0, 1, 1], [], []>} : vector<2x96xbf16>, vector<96x256xbf16>, vector<2x256xf32> -> vector<2x256xf32>
    %268 = arith.addf %262, %267 : vector<2x256xf32>
    %c19 = arith.constant 19 : index
    %c0_241 = arith.constant 0 : index
    %c0_242 = arith.constant 0 : index
    %269 = vector.load %arg1[%c19, %c0_241, %c0_242] : memref<32x2x96xbf16, #tpu.memory_space<vmem>>, vector<1x2x96xbf16>
    %270 = vector.shape_cast %269 : vector<1x2x96xbf16> to vector<2x96xbf16>
    %c2_243 = arith.constant 2 : index
    %c0_244 = arith.constant 0 : index
    %c0_245 = arith.constant 0 : index
    %271 = vector.load %arg2[%c2_243, %c0_244, %c0_245] : memref<3x96x256xbf16, #tpu.memory_space<vmem>>, vector<1x96x256xbf16>
    %272 = vector.shape_cast %271 : vector<1x96x256xbf16> to vector<96x256xbf16>
    %cst_246 = arith.constant dense<0.000000e+00> : vector<2x256xf32>
    %273 = tpu.matmul %270, %272, %cst_246 {dimension_numbers = #tpu.dot_dimension_numbers<[1], [0], [0], [1], [0, 0, 1, 1], [], []>} : vector<2x96xbf16>, vector<96x256xbf16>, vector<2x256xf32> -> vector<2x256xf32>
    %274 = arith.addf %268, %273 : vector<2x256xf32>
    %cst_247 = arith.constant 0.000000e+00 : f32
    %275 = vector.broadcast %cst_247 : f32 to vector<2x256xf32>
    %276 = arith.cmpf ogt, %274, %275 : vector<2x256xf32>
    %cst_248 = arith.constant 0.00999999977 : f32
    %277 = vector.broadcast %cst_248 : f32 to vector<2x256xf32>
    %278 = arith.mulf %277, %274 : vector<2x256xf32>
    %279 = arith.select %276, %274, %278 : vector<2x256xi1>, vector<2x256xf32>
    %280 = arith.truncf %279 : vector<2x256xf32> to vector<2x256xbf16>
    %c9_249 = arith.constant 9 : index
    %c0_250 = arith.constant 0 : index
    %c0_251 = arith.constant 0 : index
    %281 = vector.load %arg11[%c9_249, %c0_250, %c0_251] : memref<16x2x256xbf16, #tpu.memory_space<vmem>>, vector<1x2x256xbf16>
    %282 = vector.shape_cast %281 : vector<1x2x256xbf16> to vector<2x256xbf16>
    %283 = vector.shape_cast %280 : vector<2x256xbf16> to vector<1x2x256xbf16>
    tpu.vector_store %arg11[%c9_249, %c0_250, %c0_251], %283 {strides = array<i32>} : memref<16x2x256xbf16, #tpu.memory_space<vmem>>, vector<1x2x256xbf16>,
    %c0_252 = arith.constant 0 : index
    %c0_253 = arith.constant 0 : index
    %284 = vector.load %arg3[%c0_252, %c0_253] : memref<1x256xf32, #tpu.memory_space<vmem>>, vector<1x256xf32>
    %c19_254 = arith.constant 19 : index
    %c0_255 = arith.constant 0 : index
    %c0_256 = arith.constant 0 : index
    %285 = vector.load %arg1[%c19_254, %c0_255, %c0_256] : memref<32x2x96xbf16, #tpu.memory_space<vmem>>, vector<1x2x96xbf16>
    %286 = vector.shape_cast %285 : vector<1x2x96xbf16> to vector<2x96xbf16>
    %c0_257 = arith.constant 0 : index
    %c0_258 = arith.constant 0 : index
    %c0_259 = arith.constant 0 : index
    %287 = vector.load %arg2[%c0_257, %c0_258, %c0_259] : memref<3x96x256xbf16, #tpu.memory_space<vmem>>, vector<1x96x256xbf16>
    %288 = vector.shape_cast %287 : vector<1x96x256xbf16> to vector<96x256xbf16>
    %cst_260 = arith.constant dense<0.000000e+00> : vector<2x256xf32>
    %289 = tpu.matmul %286, %288, %cst_260 {dimension_numbers = #tpu.dot_dimension_numbers<[1], [0], [0], [1], [0, 0, 1, 1], [], []>} : vector<2x96xbf16>, vector<96x256xbf16>, vector<2x256xf32> -> vector<2x256xf32>
    %290 = vector.broadcast %284 : vector<1x256xf32> to vector<2x256xf32>
    %291 = arith.addf %290, %289 : vector<2x256xf32>
    %c20 = arith.constant 20 : index
    %c0_261 = arith.constant 0 : index
    %c0_262 = arith.constant 0 : index
    %292 = vector.load %arg1[%c20, %c0_261, %c0_262] : memref<32x2x96xbf16, #tpu.memory_space<vmem>>, vector<1x2x96xbf16>
    %293 = vector.shape_cast %292 : vector<1x2x96xbf16> to vector<2x96xbf16>
    %c1_263 = arith.constant 1 : index
    %c0_264 = arith.constant 0 : index
    %c0_265 = arith.constant 0 : index
    %294 = vector.load %arg2[%c1_263, %c0_264, %c0_265] : memref<3x96x256xbf16, #tpu.memory_space<vmem>>, vector<1x96x256xbf16>
    %295 = vector.shape_cast %294 : vector<1x96x256xbf16> to vector<96x256xbf16>
    %cst_266 = arith.constant dense<0.000000e+00> : vector<2x256xf32>
    %296 = tpu.matmul %293, %295, %cst_266 {dimension_numbers = #tpu.dot_dimension_numbers<[1], [0], [0], [1], [0, 0, 1, 1], [], []>} : vector<2x96xbf16>, vector<96x256xbf16>, vector<2x256xf32> -> vector<2x256xf32>
    %297 = arith.addf %291, %296 : vector<2x256xf32>
    %c21 = arith.constant 21 : index
    %c0_267 = arith.constant 0 : index
    %c0_268 = arith.constant 0 : index
    %298 = vector.load %arg1[%c21, %c0_267, %c0_268] : memref<32x2x96xbf16, #tpu.memory_space<vmem>>, vector<1x2x96xbf16>
    %299 = vector.shape_cast %298 : vector<1x2x96xbf16> to vector<2x96xbf16>
    %c2_269 = arith.constant 2 : index
    %c0_270 = arith.constant 0 : index
    %c0_271 = arith.constant 0 : index
    %300 = vector.load %arg2[%c2_269, %c0_270, %c0_271] : memref<3x96x256xbf16, #tpu.memory_space<vmem>>, vector<1x96x256xbf16>
    %301 = vector.shape_cast %300 : vector<1x96x256xbf16> to vector<96x256xbf16>
    %cst_272 = arith.constant dense<0.000000e+00> : vector<2x256xf32>
    %302 = tpu.matmul %299, %301, %cst_272 {dimension_numbers = #tpu.dot_dimension_numbers<[1], [0], [0], [1], [0, 0, 1, 1], [], []>} : vector<2x96xbf16>, vector<96x256xbf16>, vector<2x256xf32> -> vector<2x256xf32>
    %303 = arith.addf %297, %302 : vector<2x256xf32>
    %cst_273 = arith.constant 0.000000e+00 : f32
    %304 = vector.broadcast %cst_273 : f32 to vector<2x256xf32>
    %305 = arith.cmpf ogt, %303, %304 : vector<2x256xf32>
    %cst_274 = arith.constant 0.00999999977 : f32
    %306 = vector.broadcast %cst_274 : f32 to vector<2x256xf32>
    %307 = arith.mulf %306, %303 : vector<2x256xf32>
    %308 = arith.select %305, %303, %307 : vector<2x256xi1>, vector<2x256xf32>
    %309 = arith.truncf %308 : vector<2x256xf32> to vector<2x256xbf16>
    %c10_275 = arith.constant 10 : index
    %c0_276 = arith.constant 0 : index
    %c0_277 = arith.constant 0 : index
    %310 = vector.load %arg11[%c10_275, %c0_276, %c0_277] : memref<16x2x256xbf16, #tpu.memory_space<vmem>>, vector<1x2x256xbf16>
    %311 = vector.shape_cast %310 : vector<1x2x256xbf16> to vector<2x256xbf16>
    %312 = vector.shape_cast %309 : vector<2x256xbf16> to vector<1x2x256xbf16>
    tpu.vector_store %arg11[%c10_275, %c0_276, %c0_277], %312 {strides = array<i32>} : memref<16x2x256xbf16, #tpu.memory_space<vmem>>, vector<1x2x256xbf16>,
    %c0_278 = arith.constant 0 : index
    %c0_279 = arith.constant 0 : index
    %313 = vector.load %arg3[%c0_278, %c0_279] : memref<1x256xf32, #tpu.memory_space<vmem>>, vector<1x256xf32>
    %c21_280 = arith.constant 21 : index
    %c0_281 = arith.constant 0 : index
    %c0_282 = arith.constant 0 : index
    %314 = vector.load %arg1[%c21_280, %c0_281, %c0_282] : memref<32x2x96xbf16, #tpu.memory_space<vmem>>, vector<1x2x96xbf16>
    %315 = vector.shape_cast %314 : vector<1x2x96xbf16> to vector<2x96xbf16>
    %c0_283 = arith.constant 0 : index
    %c0_284 = arith.constant 0 : index
    %c0_285 = arith.constant 0 : index
    %316 = vector.load %arg2[%c0_283, %c0_284, %c0_285] : memref<3x96x256xbf16, #tpu.memory_space<vmem>>, vector<1x96x256xbf16>
    %317 = vector.shape_cast %316 : vector<1x96x256xbf16> to vector<96x256xbf16>
    %cst_286 = arith.constant dense<0.000000e+00> : vector<2x256xf32>
    %318 = tpu.matmul %315, %317, %cst_286 {dimension_numbers = #tpu.dot_dimension_numbers<[1], [0], [0], [1], [0, 0, 1, 1], [], []>} : vector<2x96xbf16>, vector<96x256xbf16>, vector<2x256xf32> -> vector<2x256xf32>
    %319 = vector.broadcast %313 : vector<1x256xf32> to vector<2x256xf32>
    %320 = arith.addf %319, %318 : vector<2x256xf32>
    %c22 = arith.constant 22 : index
    %c0_287 = arith.constant 0 : index
    %c0_288 = arith.constant 0 : index
    %321 = vector.load %arg1[%c22, %c0_287, %c0_288] : memref<32x2x96xbf16, #tpu.memory_space<vmem>>, vector<1x2x96xbf16>
    %322 = vector.shape_cast %321 : vector<1x2x96xbf16> to vector<2x96xbf16>
    %c1_289 = arith.constant 1 : index
    %c0_290 = arith.constant 0 : index
    %c0_291 = arith.constant 0 : index
    %323 = vector.load %arg2[%c1_289, %c0_290, %c0_291] : memref<3x96x256xbf16, #tpu.memory_space<vmem>>, vector<1x96x256xbf16>
    %324 = vector.shape_cast %323 : vector<1x96x256xbf16> to vector<96x256xbf16>
    %cst_292 = arith.constant dense<0.000000e+00> : vector<2x256xf32>
    %325 = tpu.matmul %322, %324, %cst_292 {dimension_numbers = #tpu.dot_dimension_numbers<[1], [0], [0], [1], [0, 0, 1, 1], [], []>} : vector<2x96xbf16>, vector<96x256xbf16>, vector<2x256xf32> -> vector<2x256xf32>
    %326 = arith.addf %320, %325 : vector<2x256xf32>
    %c23 = arith.constant 23 : index
    %c0_293 = arith.constant 0 : index
    %c0_294 = arith.constant 0 : index
    %327 = vector.load %arg1[%c23, %c0_293, %c0_294] : memref<32x2x96xbf16, #tpu.memory_space<vmem>>, vector<1x2x96xbf16>
    %328 = vector.shape_cast %327 : vector<1x2x96xbf16> to vector<2x96xbf16>
    %c2_295 = arith.constant 2 : index
    %c0_296 = arith.constant 0 : index
    %c0_297 = arith.constant 0 : index
    %329 = vector.load %arg2[%c2_295, %c0_296, %c0_297] : memref<3x96x256xbf16, #tpu.memory_space<vmem>>, vector<1x96x256xbf16>
    %330 = vector.shape_cast %329 : vector<1x96x256xbf16> to vector<96x256xbf16>
    %cst_298 = arith.constant dense<0.000000e+00> : vector<2x256xf32>
    %331 = tpu.matmul %328, %330, %cst_298 {dimension_numbers = #tpu.dot_dimension_numbers<[1], [0], [0], [1], [0, 0, 1, 1], [], []>} : vector<2x96xbf16>, vector<96x256xbf16>, vector<2x256xf32> -> vector<2x256xf32>
    %332 = arith.addf %326, %331 : vector<2x256xf32>
    %cst_299 = arith.constant 0.000000e+00 : f32
    %333 = vector.broadcast %cst_299 : f32 to vector<2x256xf32>
    %334 = arith.cmpf ogt, %332, %333 : vector<2x256xf32>
    %cst_300 = arith.constant 0.00999999977 : f32
    %335 = vector.broadcast %cst_300 : f32 to vector<2x256xf32>
    %336 = arith.mulf %335, %332 : vector<2x256xf32>
    %337 = arith.select %334, %332, %336 : vector<2x256xi1>, vector<2x256xf32>
    %338 = arith.truncf %337 : vector<2x256xf32> to vector<2x256xbf16>
    %c11_301 = arith.constant 11 : index
    %c0_302 = arith.constant 0 : index
    %c0_303 = arith.constant 0 : index
    %339 = vector.load %arg11[%c11_301, %c0_302, %c0_303] : memref<16x2x256xbf16, #tpu.memory_space<vmem>>, vector<1x2x256xbf16>
    %340 = vector.shape_cast %339 : vector<1x2x256xbf16> to vector<2x256xbf16>
    %341 = vector.shape_cast %338 : vector<2x256xbf16> to vector<1x2x256xbf16>
    tpu.vector_store %arg11[%c11_301, %c0_302, %c0_303], %341 {strides = array<i32>} : memref<16x2x256xbf16, #tpu.memory_space<vmem>>, vector<1x2x256xbf16>,
    %c0_304 = arith.constant 0 : index
    %c0_305 = arith.constant 0 : index
    %342 = vector.load %arg3[%c0_304, %c0_305] : memref<1x256xf32, #tpu.memory_space<vmem>>, vector<1x256xf32>
    %c23_306 = arith.constant 23 : index
    %c0_307 = arith.constant 0 : index
    %c0_308 = arith.constant 0 : index
    %343 = vector.load %arg1[%c23_306, %c0_307, %c0_308] : memref<32x2x96xbf16, #tpu.memory_space<vmem>>, vector<1x2x96xbf16>
    %344 = vector.shape_cast %343 : vector<1x2x96xbf16> to vector<2x96xbf16>
    %c0_309 = arith.constant 0 : index
    %c0_310 = arith.constant 0 : index
    %c0_311 = arith.constant 0 : index
    %345 = vector.load %arg2[%c0_309, %c0_310, %c0_311] : memref<3x96x256xbf16, #tpu.memory_space<vmem>>, vector<1x96x256xbf16>
    %346 = vector.shape_cast %345 : vector<1x96x256xbf16> to vector<96x256xbf16>
    %cst_312 = arith.constant dense<0.000000e+00> : vector<2x256xf32>
    %347 = tpu.matmul %344, %346, %cst_312 {dimension_numbers = #tpu.dot_dimension_numbers<[1], [0], [0], [1], [0, 0, 1, 1], [], []>} : vector<2x96xbf16>, vector<96x256xbf16>, vector<2x256xf32> -> vector<2x256xf32>
    %348 = vector.broadcast %342 : vector<1x256xf32> to vector<2x256xf32>
    %349 = arith.addf %348, %347 : vector<2x256xf32>
    %c24 = arith.constant 24 : index
    %c0_313 = arith.constant 0 : index
    %c0_314 = arith.constant 0 : index
    %350 = vector.load %arg1[%c24, %c0_313, %c0_314] : memref<32x2x96xbf16, #tpu.memory_space<vmem>>, vector<1x2x96xbf16>
    %351 = vector.shape_cast %350 : vector<1x2x96xbf16> to vector<2x96xbf16>
    %c1_315 = arith.constant 1 : index
    %c0_316 = arith.constant 0 : index
    %c0_317 = arith.constant 0 : index
    %352 = vector.load %arg2[%c1_315, %c0_316, %c0_317] : memref<3x96x256xbf16, #tpu.memory_space<vmem>>, vector<1x96x256xbf16>
    %353 = vector.shape_cast %352 : vector<1x96x256xbf16> to vector<96x256xbf16>
    %cst_318 = arith.constant dense<0.000000e+00> : vector<2x256xf32>
    %354 = tpu.matmul %351, %353, %cst_318 {dimension_numbers = #tpu.dot_dimension_numbers<[1], [0], [0], [1], [0, 0, 1, 1], [], []>} : vector<2x96xbf16>, vector<96x256xbf16>, vector<2x256xf32> -> vector<2x256xf32>
    %355 = arith.addf %349, %354 : vector<2x256xf32>
    %c25 = arith.constant 25 : index
    %c0_319 = arith.constant 0 : index
    %c0_320 = arith.constant 0 : index
    %356 = vector.load %arg1[%c25, %c0_319, %c0_320] : memref<32x2x96xbf16, #tpu.memory_space<vmem>>, vector<1x2x96xbf16>
    %357 = vector.shape_cast %356 : vector<1x2x96xbf16> to vector<2x96xbf16>
    %c2_321 = arith.constant 2 : index
    %c0_322 = arith.constant 0 : index
    %c0_323 = arith.constant 0 : index
    %358 = vector.load %arg2[%c2_321, %c0_322, %c0_323] : memref<3x96x256xbf16, #tpu.memory_space<vmem>>, vector<1x96x256xbf16>
    %359 = vector.shape_cast %358 : vector<1x96x256xbf16> to vector<96x256xbf16>
    %cst_324 = arith.constant dense<0.000000e+00> : vector<2x256xf32>
    %360 = tpu.matmul %357, %359, %cst_324 {dimension_numbers = #tpu.dot_dimension_numbers<[1], [0], [0], [1], [0, 0, 1, 1], [], []>} : vector<2x96xbf16>, vector<96x256xbf16>, vector<2x256xf32> -> vector<2x256xf32>
    %361 = arith.addf %355, %360 : vector<2x256xf32>
    %cst_325 = arith.constant 0.000000e+00 : f32
    %362 = vector.broadcast %cst_325 : f32 to vector<2x256xf32>
    %363 = arith.cmpf ogt, %361, %362 : vector<2x256xf32>
    %cst_326 = arith.constant 0.00999999977 : f32
    %364 = vector.broadcast %cst_326 : f32 to vector<2x256xf32>
    %365 = arith.mulf %364, %361 : vector<2x256xf32>
    %366 = arith.select %363, %361, %365 : vector<2x256xi1>, vector<2x256xf32>
    %367 = arith.truncf %366 : vector<2x256xf32> to vector<2x256xbf16>
    %c12_327 = arith.constant 12 : index
    %c0_328 = arith.constant 0 : index
    %c0_329 = arith.constant 0 : index
    %368 = vector.load %arg11[%c12_327, %c0_328, %c0_329] : memref<16x2x256xbf16, #tpu.memory_space<vmem>>, vector<1x2x256xbf16>
    %369 = vector.shape_cast %368 : vector<1x2x256xbf16> to vector<2x256xbf16>
    %370 = vector.shape_cast %367 : vector<2x256xbf16> to vector<1x2x256xbf16>
    tpu.vector_store %arg11[%c12_327, %c0_328, %c0_329], %370 {strides = array<i32>} : memref<16x2x256xbf16, #tpu.memory_space<vmem>>, vector<1x2x256xbf16>,
    %c0_330 = arith.constant 0 : index
    %c0_331 = arith.constant 0 : index
    %371 = vector.load %arg3[%c0_330, %c0_331] : memref<1x256xf32, #tpu.memory_space<vmem>>, vector<1x256xf32>
    %c25_332 = arith.constant 25 : index
    %c0_333 = arith.constant 0 : index
    %c0_334 = arith.constant 0 : index
    %372 = vector.load %arg1[%c25_332, %c0_333, %c0_334] : memref<32x2x96xbf16, #tpu.memory_space<vmem>>, vector<1x2x96xbf16>
    %373 = vector.shape_cast %372 : vector<1x2x96xbf16> to vector<2x96xbf16>
    %c0_335 = arith.constant 0 : index
    %c0_336 = arith.constant 0 : index
    %c0_337 = arith.constant 0 : index
    %374 = vector.load %arg2[%c0_335, %c0_336, %c0_337] : memref<3x96x256xbf16, #tpu.memory_space<vmem>>, vector<1x96x256xbf16>
    %375 = vector.shape_cast %374 : vector<1x96x256xbf16> to vector<96x256xbf16>
    %cst_338 = arith.constant dense<0.000000e+00> : vector<2x256xf32>
    %376 = tpu.matmul %373, %375, %cst_338 {dimension_numbers = #tpu.dot_dimension_numbers<[1], [0], [0], [1], [0, 0, 1, 1], [], []>} : vector<2x96xbf16>, vector<96x256xbf16>, vector<2x256xf32> -> vector<2x256xf32>
    %377 = vector.broadcast %371 : vector<1x256xf32> to vector<2x256xf32>
    %378 = arith.addf %377, %376 : vector<2x256xf32>
    %c26 = arith.constant 26 : index
    %c0_339 = arith.constant 0 : index
    %c0_340 = arith.constant 0 : index
    %379 = vector.load %arg1[%c26, %c0_339, %c0_340] : memref<32x2x96xbf16, #tpu.memory_space<vmem>>, vector<1x2x96xbf16>
    %380 = vector.shape_cast %379 : vector<1x2x96xbf16> to vector<2x96xbf16>
    %c1_341 = arith.constant 1 : index
    %c0_342 = arith.constant 0 : index
    %c0_343 = arith.constant 0 : index
    %381 = vector.load %arg2[%c1_341, %c0_342, %c0_343] : memref<3x96x256xbf16, #tpu.memory_space<vmem>>, vector<1x96x256xbf16>
    %382 = vector.shape_cast %381 : vector<1x96x256xbf16> to vector<96x256xbf16>
    %cst_344 = arith.constant dense<0.000000e+00> : vector<2x256xf32>
    %383 = tpu.matmul %380, %382, %cst_344 {dimension_numbers = #tpu.dot_dimension_numbers<[1], [0], [0], [1], [0, 0, 1, 1], [], []>} : vector<2x96xbf16>, vector<96x256xbf16>, vector<2x256xf32> -> vector<2x256xf32>
    %384 = arith.addf %378, %383 : vector<2x256xf32>
    %c27 = arith.constant 27 : index
    %c0_345 = arith.constant 0 : index
    %c0_346 = arith.constant 0 : index
    %385 = vector.load %arg1[%c27, %c0_345, %c0_346] : memref<32x2x96xbf16, #tpu.memory_space<vmem>>, vector<1x2x96xbf16>
    %386 = vector.shape_cast %385 : vector<1x2x96xbf16> to vector<2x96xbf16>
    %c2_347 = arith.constant 2 : index
    %c0_348 = arith.constant 0 : index
    %c0_349 = arith.constant 0 : index
    %387 = vector.load %arg2[%c2_347, %c0_348, %c0_349] : memref<3x96x256xbf16, #tpu.memory_space<vmem>>, vector<1x96x256xbf16>
    %388 = vector.shape_cast %387 : vector<1x96x256xbf16> to vector<96x256xbf16>
    %cst_350 = arith.constant dense<0.000000e+00> : vector<2x256xf32>
    %389 = tpu.matmul %386, %388, %cst_350 {dimension_numbers = #tpu.dot_dimension_numbers<[1], [0], [0], [1], [0, 0, 1, 1], [], []>} : vector<2x96xbf16>, vector<96x256xbf16>, vector<2x256xf32> -> vector<2x256xf32>
    %390 = arith.addf %384, %389 : vector<2x256xf32>
    %cst_351 = arith.constant 0.000000e+00 : f32
    %391 = vector.broadcast %cst_351 : f32 to vector<2x256xf32>
    %392 = arith.cmpf ogt, %390, %391 : vector<2x256xf32>
    %cst_352 = arith.constant 0.00999999977 : f32
    %393 = vector.broadcast %cst_352 : f32 to vector<2x256xf32>
    %394 = arith.mulf %393, %390 : vector<2x256xf32>
    %395 = arith.select %392, %390, %394 : vector<2x256xi1>, vector<2x256xf32>
    %396 = arith.truncf %395 : vector<2x256xf32> to vector<2x256xbf16>
    %c13_353 = arith.constant 13 : index
    %c0_354 = arith.constant 0 : index
    %c0_355 = arith.constant 0 : index
    %397 = vector.load %arg11[%c13_353, %c0_354, %c0_355] : memref<16x2x256xbf16, #tpu.memory_space<vmem>>, vector<1x2x256xbf16>
    %398 = vector.shape_cast %397 : vector<1x2x256xbf16> to vector<2x256xbf16>
    %399 = vector.shape_cast %396 : vector<2x256xbf16> to vector<1x2x256xbf16>
    tpu.vector_store %arg11[%c13_353, %c0_354, %c0_355], %399 {strides = array<i32>} : memref<16x2x256xbf16, #tpu.memory_space<vmem>>, vector<1x2x256xbf16>,
    %c0_356 = arith.constant 0 : index
    %c0_357 = arith.constant 0 : index
    %400 = vector.load %arg3[%c0_356, %c0_357] : memref<1x256xf32, #tpu.memory_space<vmem>>, vector<1x256xf32>
    %c27_358 = arith.constant 27 : index
    %c0_359 = arith.constant 0 : index
    %c0_360 = arith.constant 0 : index
    %401 = vector.load %arg1[%c27_358, %c0_359, %c0_360] : memref<32x2x96xbf16, #tpu.memory_space<vmem>>, vector<1x2x96xbf16>
    %402 = vector.shape_cast %401 : vector<1x2x96xbf16> to vector<2x96xbf16>
    %c0_361 = arith.constant 0 : index
    %c0_362 = arith.constant 0 : index
    %c0_363 = arith.constant 0 : index
    %403 = vector.load %arg2[%c0_361, %c0_362, %c0_363] : memref<3x96x256xbf16, #tpu.memory_space<vmem>>, vector<1x96x256xbf16>
    %404 = vector.shape_cast %403 : vector<1x96x256xbf16> to vector<96x256xbf16>
    %cst_364 = arith.constant dense<0.000000e+00> : vector<2x256xf32>
    %405 = tpu.matmul %402, %404, %cst_364 {dimension_numbers = #tpu.dot_dimension_numbers<[1], [0], [0], [1], [0, 0, 1, 1], [], []>} : vector<2x96xbf16>, vector<96x256xbf16>, vector<2x256xf32> -> vector<2x256xf32>
    %406 = vector.broadcast %400 : vector<1x256xf32> to vector<2x256xf32>
    %407 = arith.addf %406, %405 : vector<2x256xf32>
    %c28 = arith.constant 28 : index
    %c0_365 = arith.constant 0 : index
    %c0_366 = arith.constant 0 : index
    %408 = vector.load %arg1[%c28, %c0_365, %c0_366] : memref<32x2x96xbf16, #tpu.memory_space<vmem>>, vector<1x2x96xbf16>
    %409 = vector.shape_cast %408 : vector<1x2x96xbf16> to vector<2x96xbf16>
    %c1_367 = arith.constant 1 : index
    %c0_368 = arith.constant 0 : index
    %c0_369 = arith.constant 0 : index
    %410 = vector.load %arg2[%c1_367, %c0_368, %c0_369] : memref<3x96x256xbf16, #tpu.memory_space<vmem>>, vector<1x96x256xbf16>
    %411 = vector.shape_cast %410 : vector<1x96x256xbf16> to vector<96x256xbf16>
    %cst_370 = arith.constant dense<0.000000e+00> : vector<2x256xf32>
    %412 = tpu.matmul %409, %411, %cst_370 {dimension_numbers = #tpu.dot_dimension_numbers<[1], [0], [0], [1], [0, 0, 1, 1], [], []>} : vector<2x96xbf16>, vector<96x256xbf16>, vector<2x256xf32> -> vector<2x256xf32>
    %413 = arith.addf %407, %412 : vector<2x256xf32>
    %c29 = arith.constant 29 : index
    %c0_371 = arith.constant 0 : index
    %c0_372 = arith.constant 0 : index
    %414 = vector.load %arg1[%c29, %c0_371, %c0_372] : memref<32x2x96xbf16, #tpu.memory_space<vmem>>, vector<1x2x96xbf16>
    %415 = vector.shape_cast %414 : vector<1x2x96xbf16> to vector<2x96xbf16>
    %c2_373 = arith.constant 2 : index
    %c0_374 = arith.constant 0 : index
    %c0_375 = arith.constant 0 : index
    %416 = vector.load %arg2[%c2_373, %c0_374, %c0_375] : memref<3x96x256xbf16, #tpu.memory_space<vmem>>, vector<1x96x256xbf16>
    %417 = vector.shape_cast %416 : vector<1x96x256xbf16> to vector<96x256xbf16>
    %cst_376 = arith.constant dense<0.000000e+00> : vector<2x256xf32>
    %418 = tpu.matmul %415, %417, %cst_376 {dimension_numbers = #tpu.dot_dimension_numbers<[1], [0], [0], [1], [0, 0, 1, 1], [], []>} : vector<2x96xbf16>, vector<96x256xbf16>, vector<2x256xf32> -> vector<2x256xf32>
    %419 = arith.addf %413, %418 : vector<2x256xf32>
    %cst_377 = arith.constant 0.000000e+00 : f32
    %420 = vector.broadcast %cst_377 : f32 to vector<2x256xf32>
    %421 = arith.cmpf ogt, %419, %420 : vector<2x256xf32>
    %cst_378 = arith.constant 0.00999999977 : f32
    %422 = vector.broadcast %cst_378 : f32 to vector<2x256xf32>
    %423 = arith.mulf %422, %419 : vector<2x256xf32>
    %424 = arith.select %421, %419, %423 : vector<2x256xi1>, vector<2x256xf32>
    %425 = arith.truncf %424 : vector<2x256xf32> to vector<2x256xbf16>
    %c14_379 = arith.constant 14 : index
    %c0_380 = arith.constant 0 : index
    %c0_381 = arith.constant 0 : index
    %426 = vector.load %arg11[%c14_379, %c0_380, %c0_381] : memref<16x2x256xbf16, #tpu.memory_space<vmem>>, vector<1x2x256xbf16>
    %427 = vector.shape_cast %426 : vector<1x2x256xbf16> to vector<2x256xbf16>
    %428 = vector.shape_cast %425 : vector<2x256xbf16> to vector<1x2x256xbf16>
    tpu.vector_store %arg11[%c14_379, %c0_380, %c0_381], %428 {strides = array<i32>} : memref<16x2x256xbf16, #tpu.memory_space<vmem>>, vector<1x2x256xbf16>,
    %c0_382 = arith.constant 0 : index
    %c0_383 = arith.constant 0 : index
    %429 = vector.load %arg3[%c0_382, %c0_383] : memref<1x256xf32, #tpu.memory_space<vmem>>, vector<1x256xf32>
    %c29_384 = arith.constant 29 : index
    %c0_385 = arith.constant 0 : index
    %c0_386 = arith.constant 0 : index
    %430 = vector.load %arg1[%c29_384, %c0_385, %c0_386] : memref<32x2x96xbf16, #tpu.memory_space<vmem>>, vector<1x2x96xbf16>
    %431 = vector.shape_cast %430 : vector<1x2x96xbf16> to vector<2x96xbf16>
    %c0_387 = arith.constant 0 : index
    %c0_388 = arith.constant 0 : index
    %c0_389 = arith.constant 0 : index
    %432 = vector.load %arg2[%c0_387, %c0_388, %c0_389] : memref<3x96x256xbf16, #tpu.memory_space<vmem>>, vector<1x96x256xbf16>
    %433 = vector.shape_cast %432 : vector<1x96x256xbf16> to vector<96x256xbf16>
    %cst_390 = arith.constant dense<0.000000e+00> : vector<2x256xf32>
    %434 = tpu.matmul %431, %433, %cst_390 {dimension_numbers = #tpu.dot_dimension_numbers<[1], [0], [0], [1], [0, 0, 1, 1], [], []>} : vector<2x96xbf16>, vector<96x256xbf16>, vector<2x256xf32> -> vector<2x256xf32>
    %435 = vector.broadcast %429 : vector<1x256xf32> to vector<2x256xf32>
    %436 = arith.addf %435, %434 : vector<2x256xf32>
    %c30 = arith.constant 30 : index
    %c0_391 = arith.constant 0 : index
    %c0_392 = arith.constant 0 : index
    %437 = vector.load %arg1[%c30, %c0_391, %c0_392] : memref<32x2x96xbf16, #tpu.memory_space<vmem>>, vector<1x2x96xbf16>
    %438 = vector.shape_cast %437 : vector<1x2x96xbf16> to vector<2x96xbf16>
    %c1_393 = arith.constant 1 : index
    %c0_394 = arith.constant 0 : index
    %c0_395 = arith.constant 0 : index
    %439 = vector.load %arg2[%c1_393, %c0_394, %c0_395] : memref<3x96x256xbf16, #tpu.memory_space<vmem>>, vector<1x96x256xbf16>
    %440 = vector.shape_cast %439 : vector<1x96x256xbf16> to vector<96x256xbf16>
    %cst_396 = arith.constant dense<0.000000e+00> : vector<2x256xf32>
    %441 = tpu.matmul %438, %440, %cst_396 {dimension_numbers = #tpu.dot_dimension_numbers<[1], [0], [0], [1], [0, 0, 1, 1], [], []>} : vector<2x96xbf16>, vector<96x256xbf16>, vector<2x256xf32> -> vector<2x256xf32>
    %442 = arith.addf %436, %441 : vector<2x256xf32>
    %c31 = arith.constant 31 : index
    %c0_397 = arith.constant 0 : index
    %c0_398 = arith.constant 0 : index
    %443 = vector.load %arg1[%c31, %c0_397, %c0_398] : memref<32x2x96xbf16, #tpu.memory_space<vmem>>, vector<1x2x96xbf16>
    %444 = vector.shape_cast %443 : vector<1x2x96xbf16> to vector<2x96xbf16>
    %c2_399 = arith.constant 2 : index
    %c0_400 = arith.constant 0 : index
    %c0_401 = arith.constant 0 : index
    %445 = vector.load %arg2[%c2_399, %c0_400, %c0_401] : memref<3x96x256xbf16, #tpu.memory_space<vmem>>, vector<1x96x256xbf16>
    %446 = vector.shape_cast %445 : vector<1x96x256xbf16> to vector<96x256xbf16>
    %cst_402 = arith.constant dense<0.000000e+00> : vector<2x256xf32>
    %447 = tpu.matmul %444, %446, %cst_402 {dimension_numbers = #tpu.dot_dimension_numbers<[1], [0], [0], [1], [0, 0, 1, 1], [], []>} : vector<2x96xbf16>, vector<96x256xbf16>, vector<2x256xf32> -> vector<2x256xf32>
    %448 = arith.addf %442, %447 : vector<2x256xf32>
    %cst_403 = arith.constant 0.000000e+00 : f32
    %449 = vector.broadcast %cst_403 : f32 to vector<2x256xf32>
    %450 = arith.cmpf ogt, %448, %449 : vector<2x256xf32>
    %cst_404 = arith.constant 0.00999999977 : f32
    %451 = vector.broadcast %cst_404 : f32 to vector<2x256xf32>
    %452 = arith.mulf %451, %448 : vector<2x256xf32>
    %453 = arith.select %450, %448, %452 : vector<2x256xi1>, vector<2x256xf32>
    %454 = arith.truncf %453 : vector<2x256xf32> to vector<2x256xbf16>
    %c15_405 = arith.constant 15 : index
    %c0_406 = arith.constant 0 : index
    %c0_407 = arith.constant 0 : index
    %455 = vector.load %arg11[%c15_405, %c0_406, %c0_407] : memref<16x2x256xbf16, #tpu.memory_space<vmem>>, vector<1x2x256xbf16>
    %456 = vector.shape_cast %455 : vector<1x2x256xbf16> to vector<2x256xbf16>
    %457 = vector.shape_cast %454 : vector<2x256xbf16> to vector<1x2x256xbf16>
    tpu.vector_store %arg11[%c15_405, %c0_406, %c0_407], %457 {strides = array<i32>} : memref<16x2x256xbf16, #tpu.memory_space<vmem>>, vector<1x2x256xbf16>,
    %c0_408 = arith.constant 0 : index
    %c0_409 = arith.constant 0 : index
    %458 = vector.load %arg5[%c0_408, %c0_409] : memref<1x256xf32, #tpu.memory_space<vmem>>, vector<1x256xf32>
    %c0_410 = arith.constant 0 : index
    %c0_411 = arith.constant 0 : index
    %c0_412 = arith.constant 0 : index
    %459 = vector.load %arg11[%c0_410, %c0_411, %c0_412] : memref<16x2x256xbf16, #tpu.memory_space<vmem>>, vector<1x2x256xbf16>
    %460 = vector.shape_cast %459 : vector<1x2x256xbf16> to vector<2x256xbf16>
    %c1_413 = arith.constant 1 : index
    %c0_414 = arith.constant 0 : index
    %c0_415 = arith.constant 0 : index
    %461 = vector.load %arg4[%c1_413, %c0_414, %c0_415] : memref<3x256x256xbf16, #tpu.memory_space<vmem>>, vector<1x256x256xbf16>
    %462 = vector.shape_cast %461 : vector<1x256x256xbf16> to vector<256x256xbf16>
    %cst_416 = arith.constant dense<0.000000e+00> : vector<2x256xf32>
    %463 = tpu.matmul %460, %462, %cst_416 {dimension_numbers = #tpu.dot_dimension_numbers<[1], [0], [0], [1], [0, 0, 1, 1], [], []>} : vector<2x256xbf16>, vector<256x256xbf16>, vector<2x256xf32> -> vector<2x256xf32>
    %464 = vector.broadcast %458 : vector<1x256xf32> to vector<2x256xf32>
    %465 = arith.addf %464, %463 : vector<2x256xf32>
    %c1_417 = arith.constant 1 : index
    %c0_418 = arith.constant 0 : index
    %c0_419 = arith.constant 0 : index
    %466 = vector.load %arg11[%c1_417, %c0_418, %c0_419] : memref<16x2x256xbf16, #tpu.memory_space<vmem>>, vector<1x2x256xbf16>
    %467 = vector.shape_cast %466 : vector<1x2x256xbf16> to vector<2x256xbf16>
    %c2_420 = arith.constant 2 : index
    %c0_421 = arith.constant 0 : index
    %c0_422 = arith.constant 0 : index
    %468 = vector.load %arg4[%c2_420, %c0_421, %c0_422] : memref<3x256x256xbf16, #tpu.memory_space<vmem>>, vector<1x256x256xbf16>
    %469 = vector.shape_cast %468 : vector<1x256x256xbf16> to vector<256x256xbf16>
    %cst_423 = arith.constant dense<0.000000e+00> : vector<2x256xf32>
    %470 = tpu.matmul %467, %469, %cst_423 {dimension_numbers = #tpu.dot_dimension_numbers<[1], [0], [0], [1], [0, 0, 1, 1], [], []>} : vector<2x256xbf16>, vector<256x256xbf16>, vector<2x256xf32> -> vector<2x256xf32>
    %471 = arith.addf %465, %470 : vector<2x256xf32>
    %cst_424 = arith.constant 0.000000e+00 : f32
    %472 = vector.broadcast %cst_424 : f32 to vector<2x256xf32>
    %473 = arith.cmpf ogt, %471, %472 : vector<2x256xf32>
    %cst_425 = arith.constant 0.00999999977 : f32
    %474 = vector.broadcast %cst_425 : f32 to vector<2x256xf32>
    %475 = arith.mulf %474, %471 : vector<2x256xf32>
    %476 = arith.select %473, %471, %475 : vector<2x256xi1>, vector<2x256xf32>
    %477 = arith.truncf %476 : vector<2x256xf32> to vector<2x256xbf16>
    %c0_426 = arith.constant 0 : index
    %c0_427 = arith.constant 0 : index
    %c0_428 = arith.constant 0 : index
    %478 = vector.load %arg12[%c0_426, %c0_427, %c0_428] : memref<8x2x256xbf16, #tpu.memory_space<vmem>>, vector<1x2x256xbf16>
    %479 = vector.shape_cast %478 : vector<1x2x256xbf16> to vector<2x256xbf16>
    %480 = vector.shape_cast %477 : vector<2x256xbf16> to vector<1x2x256xbf16>
    tpu.vector_store %arg12[%c0_426, %c0_427, %c0_428], %480 {strides = array<i32>} : memref<8x2x256xbf16, #tpu.memory_space<vmem>>, vector<1x2x256xbf16>,
    %c0_429 = arith.constant 0 : index
    %c0_430 = arith.constant 0 : index
    %481 = vector.load %arg5[%c0_429, %c0_430] : memref<1x256xf32, #tpu.memory_space<vmem>>, vector<1x256xf32>
    %c1_431 = arith.constant 1 : index
    %c0_432 = arith.constant 0 : index
    %c0_433 = arith.constant 0 : index
    %482 = vector.load %arg11[%c1_431, %c0_432, %c0_433] : memref<16x2x256xbf16, #tpu.memory_space<vmem>>, vector<1x2x256xbf16>
    %483 = vector.shape_cast %482 : vector<1x2x256xbf16> to vector<2x256xbf16>
    %c0_434 = arith.constant 0 : index
    %c0_435 = arith.constant 0 : index
    %c0_436 = arith.constant 0 : index
    %484 = vector.load %arg4[%c0_434, %c0_435, %c0_436] : memref<3x256x256xbf16, #tpu.memory_space<vmem>>, vector<1x256x256xbf16>
    %485 = vector.shape_cast %484 : vector<1x256x256xbf16> to vector<256x256xbf16>
    %cst_437 = arith.constant dense<0.000000e+00> : vector<2x256xf32>
    %486 = tpu.matmul %483, %485, %cst_437 {dimension_numbers = #tpu.dot_dimension_numbers<[1], [0], [0], [1], [0, 0, 1, 1], [], []>} : vector<2x256xbf16>, vector<256x256xbf16>, vector<2x256xf32> -> vector<2x256xf32>
    %487 = vector.broadcast %481 : vector<1x256xf32> to vector<2x256xf32>
    %488 = arith.addf %487, %486 : vector<2x256xf32>
    %c2_438 = arith.constant 2 : index
    %c0_439 = arith.constant 0 : index
    %c0_440 = arith.constant 0 : index
    %489 = vector.load %arg11[%c2_438, %c0_439, %c0_440] : memref<16x2x256xbf16, #tpu.memory_space<vmem>>, vector<1x2x256xbf16>
    %490 = vector.shape_cast %489 : vector<1x2x256xbf16> to vector<2x256xbf16>
    %c1_441 = arith.constant 1 : index
    %c0_442 = arith.constant 0 : index
    %c0_443 = arith.constant 0 : index
    %491 = vector.load %arg4[%c1_441, %c0_442, %c0_443] : memref<3x256x256xbf16, #tpu.memory_space<vmem>>, vector<1x256x256xbf16>
    %492 = vector.shape_cast %491 : vector<1x256x256xbf16> to vector<256x256xbf16>
    %cst_444 = arith.constant dense<0.000000e+00> : vector<2x256xf32>
    %493 = tpu.matmul %490, %492, %cst_444 {dimension_numbers = #tpu.dot_dimension_numbers<[1], [0], [0], [1], [0, 0, 1, 1], [], []>} : vector<2x256xbf16>, vector<256x256xbf16>, vector<2x256xf32> -> vector<2x256xf32>
    %494 = arith.addf %488, %493 : vector<2x256xf32>
    %c3_445 = arith.constant 3 : index
    %c0_446 = arith.constant 0 : index
    %c0_447 = arith.constant 0 : index
    %495 = vector.load %arg11[%c3_445, %c0_446, %c0_447] : memref<16x2x256xbf16, #tpu.memory_space<vmem>>, vector<1x2x256xbf16>
    %496 = vector.shape_cast %495 : vector<1x2x256xbf16> to vector<2x256xbf16>
    %c2_448 = arith.constant 2 : index
    %c0_449 = arith.constant 0 : index
    %c0_450 = arith.constant 0 : index
    %497 = vector.load %arg4[%c2_448, %c0_449, %c0_450] : memref<3x256x256xbf16, #tpu.memory_space<vmem>>, vector<1x256x256xbf16>
    %498 = vector.shape_cast %497 : vector<1x256x256xbf16> to vector<256x256xbf16>
    %cst_451 = arith.constant dense<0.000000e+00> : vector<2x256xf32>
    %499 = tpu.matmul %496, %498, %cst_451 {dimension_numbers = #tpu.dot_dimension_numbers<[1], [0], [0], [1], [0, 0, 1, 1], [], []>} : vector<2x256xbf16>, vector<256x256xbf16>, vector<2x256xf32> -> vector<2x256xf32>
    %500 = arith.addf %494, %499 : vector<2x256xf32>
    %cst_452 = arith.constant 0.000000e+00 : f32
    %501 = vector.broadcast %cst_452 : f32 to vector<2x256xf32>
    %502 = arith.cmpf ogt, %500, %501 : vector<2x256xf32>
    %cst_453 = arith.constant 0.00999999977 : f32
    %503 = vector.broadcast %cst_453 : f32 to vector<2x256xf32>
    %504 = arith.mulf %503, %500 : vector<2x256xf32>
    %505 = arith.select %502, %500, %504 : vector<2x256xi1>, vector<2x256xf32>
    %506 = arith.truncf %505 : vector<2x256xf32> to vector<2x256xbf16>
    %c1_454 = arith.constant 1 : index
    %c0_455 = arith.constant 0 : index
    %c0_456 = arith.constant 0 : index
    %507 = vector.load %arg12[%c1_454, %c0_455, %c0_456] : memref<8x2x256xbf16, #tpu.memory_space<vmem>>, vector<1x2x256xbf16>
    %508 = vector.shape_cast %507 : vector<1x2x256xbf16> to vector<2x256xbf16>
    %509 = vector.shape_cast %506 : vector<2x256xbf16> to vector<1x2x256xbf16>
    tpu.vector_store %arg12[%c1_454, %c0_455, %c0_456], %509 {strides = array<i32>} : memref<8x2x256xbf16, #tpu.memory_space<vmem>>, vector<1x2x256xbf16>,
    %c0_457 = arith.constant 0 : index
    %c0_458 = arith.constant 0 : index
    %510 = vector.load %arg5[%c0_457, %c0_458] : memref<1x256xf32, #tpu.memory_space<vmem>>, vector<1x256xf32>
    %c3_459 = arith.constant 3 : index
    %c0_460 = arith.constant 0 : index
    %c0_461 = arith.constant 0 : index
    %511 = vector.load %arg11[%c3_459, %c0_460, %c0_461] : memref<16x2x256xbf16, #tpu.memory_space<vmem>>, vector<1x2x256xbf16>
    %512 = vector.shape_cast %511 : vector<1x2x256xbf16> to vector<2x256xbf16>
    %c0_462 = arith.constant 0 : index
    %c0_463 = arith.constant 0 : index
    %c0_464 = arith.constant 0 : index
    %513 = vector.load %arg4[%c0_462, %c0_463, %c0_464] : memref<3x256x256xbf16, #tpu.memory_space<vmem>>, vector<1x256x256xbf16>
    %514 = vector.shape_cast %513 : vector<1x256x256xbf16> to vector<256x256xbf16>
    %cst_465 = arith.constant dense<0.000000e+00> : vector<2x256xf32>
    %515 = tpu.matmul %512, %514, %cst_465 {dimension_numbers = #tpu.dot_dimension_numbers<[1], [0], [0], [1], [0, 0, 1, 1], [], []>} : vector<2x256xbf16>, vector<256x256xbf16>, vector<2x256xf32> -> vector<2x256xf32>
    %516 = vector.broadcast %510 : vector<1x256xf32> to vector<2x256xf32>
    %517 = arith.addf %516, %515 : vector<2x256xf32>
    %c4_466 = arith.constant 4 : index
    %c0_467 = arith.constant 0 : index
    %c0_468 = arith.constant 0 : index
    %518 = vector.load %arg11[%c4_466, %c0_467, %c0_468] : memref<16x2x256xbf16, #tpu.memory_space<vmem>>, vector<1x2x256xbf16>
    %519 = vector.shape_cast %518 : vector<1x2x256xbf16> to vector<2x256xbf16>
    %c1_469 = arith.constant 1 : index
    %c0_470 = arith.constant 0 : index
    %c0_471 = arith.constant 0 : index
    %520 = vector.load %arg4[%c1_469, %c0_470, %c0_471] : memref<3x256x256xbf16, #tpu.memory_space<vmem>>, vector<1x256x256xbf16>
    %521 = vector.shape_cast %520 : vector<1x256x256xbf16> to vector<256x256xbf16>
    %cst_472 = arith.constant dense<0.000000e+00> : vector<2x256xf32>
    %522 = tpu.matmul %519, %521, %cst_472 {dimension_numbers = #tpu.dot_dimension_numbers<[1], [0], [0], [1], [0, 0, 1, 1], [], []>} : vector<2x256xbf16>, vector<256x256xbf16>, vector<2x256xf32> -> vector<2x256xf32>
    %523 = arith.addf %517, %522 : vector<2x256xf32>
    %c5_473 = arith.constant 5 : index
    %c0_474 = arith.constant 0 : index
    %c0_475 = arith.constant 0 : index
    %524 = vector.load %arg11[%c5_473, %c0_474, %c0_475] : memref<16x2x256xbf16, #tpu.memory_space<vmem>>, vector<1x2x256xbf16>
    %525 = vector.shape_cast %524 : vector<1x2x256xbf16> to vector<2x256xbf16>
    %c2_476 = arith.constant 2 : index
    %c0_477 = arith.constant 0 : index
    %c0_478 = arith.constant 0 : index
    %526 = vector.load %arg4[%c2_476, %c0_477, %c0_478] : memref<3x256x256xbf16, #tpu.memory_space<vmem>>, vector<1x256x256xbf16>
    %527 = vector.shape_cast %526 : vector<1x256x256xbf16> to vector<256x256xbf16>
    %cst_479 = arith.constant dense<0.000000e+00> : vector<2x256xf32>
    %528 = tpu.matmul %525, %527, %cst_479 {dimension_numbers = #tpu.dot_dimension_numbers<[1], [0], [0], [1], [0, 0, 1, 1], [], []>} : vector<2x256xbf16>, vector<256x256xbf16>, vector<2x256xf32> -> vector<2x256xf32>
    %529 = arith.addf %523, %528 : vector<2x256xf32>
    %cst_480 = arith.constant 0.000000e+00 : f32
    %530 = vector.broadcast %cst_480 : f32 to vector<2x256xf32>
    %531 = arith.cmpf ogt, %529, %530 : vector<2x256xf32>
    %cst_481 = arith.constant 0.00999999977 : f32
    %532 = vector.broadcast %cst_481 : f32 to vector<2x256xf32>
    %533 = arith.mulf %532, %529 : vector<2x256xf32>
    %534 = arith.select %531, %529, %533 : vector<2x256xi1>, vector<2x256xf32>
    %535 = arith.truncf %534 : vector<2x256xf32> to vector<2x256xbf16>
    %c2_482 = arith.constant 2 : index
    %c0_483 = arith.constant 0 : index
    %c0_484 = arith.constant 0 : index
    %536 = vector.load %arg12[%c2_482, %c0_483, %c0_484] : memref<8x2x256xbf16, #tpu.memory_space<vmem>>, vector<1x2x256xbf16>
    %537 = vector.shape_cast %536 : vector<1x2x256xbf16> to vector<2x256xbf16>
    %538 = vector.shape_cast %535 : vector<2x256xbf16> to vector<1x2x256xbf16>
    tpu.vector_store %arg12[%c2_482, %c0_483, %c0_484], %538 {strides = array<i32>} : memref<8x2x256xbf16, #tpu.memory_space<vmem>>, vector<1x2x256xbf16>,
    %c0_485 = arith.constant 0 : index
    %c0_486 = arith.constant 0 : index
    %539 = vector.load %arg5[%c0_485, %c0_486] : memref<1x256xf32, #tpu.memory_space<vmem>>, vector<1x256xf32>
    %c5_487 = arith.constant 5 : index
    %c0_488 = arith.constant 0 : index
    %c0_489 = arith.constant 0 : index
    %540 = vector.load %arg11[%c5_487, %c0_488, %c0_489] : memref<16x2x256xbf16, #tpu.memory_space<vmem>>, vector<1x2x256xbf16>
    %541 = vector.shape_cast %540 : vector<1x2x256xbf16> to vector<2x256xbf16>
    %c0_490 = arith.constant 0 : index
    %c0_491 = arith.constant 0 : index
    %c0_492 = arith.constant 0 : index
    %542 = vector.load %arg4[%c0_490, %c0_491, %c0_492] : memref<3x256x256xbf16, #tpu.memory_space<vmem>>, vector<1x256x256xbf16>
    %543 = vector.shape_cast %542 : vector<1x256x256xbf16> to vector<256x256xbf16>
    %cst_493 = arith.constant dense<0.000000e+00> : vector<2x256xf32>
    %544 = tpu.matmul %541, %543, %cst_493 {dimension_numbers = #tpu.dot_dimension_numbers<[1], [0], [0], [1], [0, 0, 1, 1], [], []>} : vector<2x256xbf16>, vector<256x256xbf16>, vector<2x256xf32> -> vector<2x256xf32>
    %545 = vector.broadcast %539 : vector<1x256xf32> to vector<2x256xf32>
    %546 = arith.addf %545, %544 : vector<2x256xf32>
    %c6_494 = arith.constant 6 : index
    %c0_495 = arith.constant 0 : index
    %c0_496 = arith.constant 0 : index
    %547 = vector.load %arg11[%c6_494, %c0_495, %c0_496] : memref<16x2x256xbf16, #tpu.memory_space<vmem>>, vector<1x2x256xbf16>
    %548 = vector.shape_cast %547 : vector<1x2x256xbf16> to vector<2x256xbf16>
    %c1_497 = arith.constant 1 : index
    %c0_498 = arith.constant 0 : index
    %c0_499 = arith.constant 0 : index
    %549 = vector.load %arg4[%c1_497, %c0_498, %c0_499] : memref<3x256x256xbf16, #tpu.memory_space<vmem>>, vector<1x256x256xbf16>
    %550 = vector.shape_cast %549 : vector<1x256x256xbf16> to vector<256x256xbf16>
    %cst_500 = arith.constant dense<0.000000e+00> : vector<2x256xf32>
    %551 = tpu.matmul %548, %550, %cst_500 {dimension_numbers = #tpu.dot_dimension_numbers<[1], [0], [0], [1], [0, 0, 1, 1], [], []>} : vector<2x256xbf16>, vector<256x256xbf16>, vector<2x256xf32> -> vector<2x256xf32>
    %552 = arith.addf %546, %551 : vector<2x256xf32>
    %c7_501 = arith.constant 7 : index
    %c0_502 = arith.constant 0 : index
    %c0_503 = arith.constant 0 : index
    %553 = vector.load %arg11[%c7_501, %c0_502, %c0_503] : memref<16x2x256xbf16, #tpu.memory_space<vmem>>, vector<1x2x256xbf16>
    %554 = vector.shape_cast %553 : vector<1x2x256xbf16> to vector<2x256xbf16>
    %c2_504 = arith.constant 2 : index
    %c0_505 = arith.constant 0 : index
    %c0_506 = arith.constant 0 : index
    %555 = vector.load %arg4[%c2_504, %c0_505, %c0_506] : memref<3x256x256xbf16, #tpu.memory_space<vmem>>, vector<1x256x256xbf16>
    %556 = vector.shape_cast %555 : vector<1x256x256xbf16> to vector<256x256xbf16>
    %cst_507 = arith.constant dense<0.000000e+00> : vector<2x256xf32>
    %557 = tpu.matmul %554, %556, %cst_507 {dimension_numbers = #tpu.dot_dimension_numbers<[1], [0], [0], [1], [0, 0, 1, 1], [], []>} : vector<2x256xbf16>, vector<256x256xbf16>, vector<2x256xf32> -> vector<2x256xf32>
    %558 = arith.addf %552, %557 : vector<2x256xf32>
    %cst_508 = arith.constant 0.000000e+00 : f32
    %559 = vector.broadcast %cst_508 : f32 to vector<2x256xf32>
    %560 = arith.cmpf ogt, %558, %559 : vector<2x256xf32>
    %cst_509 = arith.constant 0.00999999977 : f32
    %561 = vector.broadcast %cst_509 : f32 to vector<2x256xf32>
    %562 = arith.mulf %561, %558 : vector<2x256xf32>
    %563 = arith.select %560, %558, %562 : vector<2x256xi1>, vector<2x256xf32>
    %564 = arith.truncf %563 : vector<2x256xf32> to vector<2x256xbf16>
    %c3_510 = arith.constant 3 : index
    %c0_511 = arith.constant 0 : index
    %c0_512 = arith.constant 0 : index
    %565 = vector.load %arg12[%c3_510, %c0_511, %c0_512] : memref<8x2x256xbf16, #tpu.memory_space<vmem>>, vector<1x2x256xbf16>
    %566 = vector.shape_cast %565 : vector<1x2x256xbf16> to vector<2x256xbf16>
    %567 = vector.shape_cast %564 : vector<2x256xbf16> to vector<1x2x256xbf16>
    tpu.vector_store %arg12[%c3_510, %c0_511, %c0_512], %567 {strides = array<i32>} : memref<8x2x256xbf16, #tpu.memory_space<vmem>>, vector<1x2x256xbf16>,
    %c0_513 = arith.constant 0 : index
    %c0_514 = arith.constant 0 : index
    %568 = vector.load %arg5[%c0_513, %c0_514] : memref<1x256xf32, #tpu.memory_space<vmem>>, vector<1x256xf32>
    %c7_515 = arith.constant 7 : index
    %c0_516 = arith.constant 0 : index
    %c0_517 = arith.constant 0 : index
    %569 = vector.load %arg11[%c7_515, %c0_516, %c0_517] : memref<16x2x256xbf16, #tpu.memory_space<vmem>>, vector<1x2x256xbf16>
    %570 = vector.shape_cast %569 : vector<1x2x256xbf16> to vector<2x256xbf16>
    %c0_518 = arith.constant 0 : index
    %c0_519 = arith.constant 0 : index
    %c0_520 = arith.constant 0 : index
    %571 = vector.load %arg4[%c0_518, %c0_519, %c0_520] : memref<3x256x256xbf16, #tpu.memory_space<vmem>>, vector<1x256x256xbf16>
    %572 = vector.shape_cast %571 : vector<1x256x256xbf16> to vector<256x256xbf16>
    %cst_521 = arith.constant dense<0.000000e+00> : vector<2x256xf32>
    %573 = tpu.matmul %570, %572, %cst_521 {dimension_numbers = #tpu.dot_dimension_numbers<[1], [0], [0], [1], [0, 0, 1, 1], [], []>} : vector<2x256xbf16>, vector<256x256xbf16>, vector<2x256xf32> -> vector<2x256xf32>
    %574 = vector.broadcast %568 : vector<1x256xf32> to vector<2x256xf32>
    %575 = arith.addf %574, %573 : vector<2x256xf32>
    %c8_522 = arith.constant 8 : index
    %c0_523 = arith.constant 0 : index
    %c0_524 = arith.constant 0 : index
    %576 = vector.load %arg11[%c8_522, %c0_523, %c0_524] : memref<16x2x256xbf16, #tpu.memory_space<vmem>>, vector<1x2x256xbf16>
    %577 = vector.shape_cast %576 : vector<1x2x256xbf16> to vector<2x256xbf16>
    %c1_525 = arith.constant 1 : index
    %c0_526 = arith.constant 0 : index
    %c0_527 = arith.constant 0 : index
    %578 = vector.load %arg4[%c1_525, %c0_526, %c0_527] : memref<3x256x256xbf16, #tpu.memory_space<vmem>>, vector<1x256x256xbf16>
    %579 = vector.shape_cast %578 : vector<1x256x256xbf16> to vector<256x256xbf16>
    %cst_528 = arith.constant dense<0.000000e+00> : vector<2x256xf32>
    %580 = tpu.matmul %577, %579, %cst_528 {dimension_numbers = #tpu.dot_dimension_numbers<[1], [0], [0], [1], [0, 0, 1, 1], [], []>} : vector<2x256xbf16>, vector<256x256xbf16>, vector<2x256xf32> -> vector<2x256xf32>
    %581 = arith.addf %575, %580 : vector<2x256xf32>
    %c9_529 = arith.constant 9 : index
    %c0_530 = arith.constant 0 : index
    %c0_531 = arith.constant 0 : index
    %582 = vector.load %arg11[%c9_529, %c0_530, %c0_531] : memref<16x2x256xbf16, #tpu.memory_space<vmem>>, vector<1x2x256xbf16>
    %583 = vector.shape_cast %582 : vector<1x2x256xbf16> to vector<2x256xbf16>
    %c2_532 = arith.constant 2 : index
    %c0_533 = arith.constant 0 : index
    %c0_534 = arith.constant 0 : index
    %584 = vector.load %arg4[%c2_532, %c0_533, %c0_534] : memref<3x256x256xbf16, #tpu.memory_space<vmem>>, vector<1x256x256xbf16>
    %585 = vector.shape_cast %584 : vector<1x256x256xbf16> to vector<256x256xbf16>
    %cst_535 = arith.constant dense<0.000000e+00> : vector<2x256xf32>
    %586 = tpu.matmul %583, %585, %cst_535 {dimension_numbers = #tpu.dot_dimension_numbers<[1], [0], [0], [1], [0, 0, 1, 1], [], []>} : vector<2x256xbf16>, vector<256x256xbf16>, vector<2x256xf32> -> vector<2x256xf32>
    %587 = arith.addf %581, %586 : vector<2x256xf32>
    %cst_536 = arith.constant 0.000000e+00 : f32
    %588 = vector.broadcast %cst_536 : f32 to vector<2x256xf32>
    %589 = arith.cmpf ogt, %587, %588 : vector<2x256xf32>
    %cst_537 = arith.constant 0.00999999977 : f32
    %590 = vector.broadcast %cst_537 : f32 to vector<2x256xf32>
    %591 = arith.mulf %590, %587 : vector<2x256xf32>
    %592 = arith.select %589, %587, %591 : vector<2x256xi1>, vector<2x256xf32>
    %593 = arith.truncf %592 : vector<2x256xf32> to vector<2x256xbf16>
    %c4_538 = arith.constant 4 : index
    %c0_539 = arith.constant 0 : index
    %c0_540 = arith.constant 0 : index
    %594 = vector.load %arg12[%c4_538, %c0_539, %c0_540] : memref<8x2x256xbf16, #tpu.memory_space<vmem>>, vector<1x2x256xbf16>
    %595 = vector.shape_cast %594 : vector<1x2x256xbf16> to vector<2x256xbf16>
    %596 = vector.shape_cast %593 : vector<2x256xbf16> to vector<1x2x256xbf16>
    tpu.vector_store %arg12[%c4_538, %c0_539, %c0_540], %596 {strides = array<i32>} : memref<8x2x256xbf16, #tpu.memory_space<vmem>>, vector<1x2x256xbf16>,
    %c0_541 = arith.constant 0 : index
    %c0_542 = arith.constant 0 : index
    %597 = vector.load %arg5[%c0_541, %c0_542] : memref<1x256xf32, #tpu.memory_space<vmem>>, vector<1x256xf32>
    %c9_543 = arith.constant 9 : index
    %c0_544 = arith.constant 0 : index
    %c0_545 = arith.constant 0 : index
    %598 = vector.load %arg11[%c9_543, %c0_544, %c0_545] : memref<16x2x256xbf16, #tpu.memory_space<vmem>>, vector<1x2x256xbf16>
    %599 = vector.shape_cast %598 : vector<1x2x256xbf16> to vector<2x256xbf16>
    %c0_546 = arith.constant 0 : index
    %c0_547 = arith.constant 0 : index
    %c0_548 = arith.constant 0 : index
    %600 = vector.load %arg4[%c0_546, %c0_547, %c0_548] : memref<3x256x256xbf16, #tpu.memory_space<vmem>>, vector<1x256x256xbf16>
    %601 = vector.shape_cast %600 : vector<1x256x256xbf16> to vector<256x256xbf16>
    %cst_549 = arith.constant dense<0.000000e+00> : vector<2x256xf32>
    %602 = tpu.matmul %599, %601, %cst_549 {dimension_numbers = #tpu.dot_dimension_numbers<[1], [0], [0], [1], [0, 0, 1, 1], [], []>} : vector<2x256xbf16>, vector<256x256xbf16>, vector<2x256xf32> -> vector<2x256xf32>
    %603 = vector.broadcast %597 : vector<1x256xf32> to vector<2x256xf32>
    %604 = arith.addf %603, %602 : vector<2x256xf32>
    %c10_550 = arith.constant 10 : index
    %c0_551 = arith.constant 0 : index
    %c0_552 = arith.constant 0 : index
    %605 = vector.load %arg11[%c10_550, %c0_551, %c0_552] : memref<16x2x256xbf16, #tpu.memory_space<vmem>>, vector<1x2x256xbf16>
    %606 = vector.shape_cast %605 : vector<1x2x256xbf16> to vector<2x256xbf16>
    %c1_553 = arith.constant 1 : index
    %c0_554 = arith.constant 0 : index
    %c0_555 = arith.constant 0 : index
    %607 = vector.load %arg4[%c1_553, %c0_554, %c0_555] : memref<3x256x256xbf16, #tpu.memory_space<vmem>>, vector<1x256x256xbf16>
    %608 = vector.shape_cast %607 : vector<1x256x256xbf16> to vector<256x256xbf16>
    %cst_556 = arith.constant dense<0.000000e+00> : vector<2x256xf32>
    %609 = tpu.matmul %606, %608, %cst_556 {dimension_numbers = #tpu.dot_dimension_numbers<[1], [0], [0], [1], [0, 0, 1, 1], [], []>} : vector<2x256xbf16>, vector<256x256xbf16>, vector<2x256xf32> -> vector<2x256xf32>
    %610 = arith.addf %604, %609 : vector<2x256xf32>
    %c11_557 = arith.constant 11 : index
    %c0_558 = arith.constant 0 : index
    %c0_559 = arith.constant 0 : index
    %611 = vector.load %arg11[%c11_557, %c0_558, %c0_559] : memref<16x2x256xbf16, #tpu.memory_space<vmem>>, vector<1x2x256xbf16>
    %612 = vector.shape_cast %611 : vector<1x2x256xbf16> to vector<2x256xbf16>
    %c2_560 = arith.constant 2 : index
    %c0_561 = arith.constant 0 : index
    %c0_562 = arith.constant 0 : index
    %613 = vector.load %arg4[%c2_560, %c0_561, %c0_562] : memref<3x256x256xbf16, #tpu.memory_space<vmem>>, vector<1x256x256xbf16>
    %614 = vector.shape_cast %613 : vector<1x256x256xbf16> to vector<256x256xbf16>
    %cst_563 = arith.constant dense<0.000000e+00> : vector<2x256xf32>
    %615 = tpu.matmul %612, %614, %cst_563 {dimension_numbers = #tpu.dot_dimension_numbers<[1], [0], [0], [1], [0, 0, 1, 1], [], []>} : vector<2x256xbf16>, vector<256x256xbf16>, vector<2x256xf32> -> vector<2x256xf32>
    %616 = arith.addf %610, %615 : vector<2x256xf32>
    %cst_564 = arith.constant 0.000000e+00 : f32
    %617 = vector.broadcast %cst_564 : f32 to vector<2x256xf32>
    %618 = arith.cmpf ogt, %616, %617 : vector<2x256xf32>
    %cst_565 = arith.constant 0.00999999977 : f32
    %619 = vector.broadcast %cst_565 : f32 to vector<2x256xf32>
    %620 = arith.mulf %619, %616 : vector<2x256xf32>
    %621 = arith.select %618, %616, %620 : vector<2x256xi1>, vector<2x256xf32>
    %622 = arith.truncf %621 : vector<2x256xf32> to vector<2x256xbf16>
    %c5_566 = arith.constant 5 : index
    %c0_567 = arith.constant 0 : index
    %c0_568 = arith.constant 0 : index
    %623 = vector.load %arg12[%c5_566, %c0_567, %c0_568] : memref<8x2x256xbf16, #tpu.memory_space<vmem>>, vector<1x2x256xbf16>
    %624 = vector.shape_cast %623 : vector<1x2x256xbf16> to vector<2x256xbf16>
    %625 = vector.shape_cast %622 : vector<2x256xbf16> to vector<1x2x256xbf16>
    tpu.vector_store %arg12[%c5_566, %c0_567, %c0_568], %625 {strides = array<i32>} : memref<8x2x256xbf16, #tpu.memory_space<vmem>>, vector<1x2x256xbf16>,
    %c0_569 = arith.constant 0 : index
    %c0_570 = arith.constant 0 : index
    %626 = vector.load %arg5[%c0_569, %c0_570] : memref<1x256xf32, #tpu.memory_space<vmem>>, vector<1x256xf32>
    %c11_571 = arith.constant 11 : index
    %c0_572 = arith.constant 0 : index
    %c0_573 = arith.constant 0 : index
    %627 = vector.load %arg11[%c11_571, %c0_572, %c0_573] : memref<16x2x256xbf16, #tpu.memory_space<vmem>>, vector<1x2x256xbf16>
    %628 = vector.shape_cast %627 : vector<1x2x256xbf16> to vector<2x256xbf16>
    %c0_574 = arith.constant 0 : index
    %c0_575 = arith.constant 0 : index
    %c0_576 = arith.constant 0 : index
    %629 = vector.load %arg4[%c0_574, %c0_575, %c0_576] : memref<3x256x256xbf16, #tpu.memory_space<vmem>>, vector<1x256x256xbf16>
    %630 = vector.shape_cast %629 : vector<1x256x256xbf16> to vector<256x256xbf16>
    %cst_577 = arith.constant dense<0.000000e+00> : vector<2x256xf32>
    %631 = tpu.matmul %628, %630, %cst_577 {dimension_numbers = #tpu.dot_dimension_numbers<[1], [0], [0], [1], [0, 0, 1, 1], [], []>} : vector<2x256xbf16>, vector<256x256xbf16>, vector<2x256xf32> -> vector<2x256xf32>
    %632 = vector.broadcast %626 : vector<1x256xf32> to vector<2x256xf32>
    %633 = arith.addf %632, %631 : vector<2x256xf32>
    %c12_578 = arith.constant 12 : index
    %c0_579 = arith.constant 0 : index
    %c0_580 = arith.constant 0 : index
    %634 = vector.load %arg11[%c12_578, %c0_579, %c0_580] : memref<16x2x256xbf16, #tpu.memory_space<vmem>>, vector<1x2x256xbf16>
    %635 = vector.shape_cast %634 : vector<1x2x256xbf16> to vector<2x256xbf16>
    %c1_581 = arith.constant 1 : index
    %c0_582 = arith.constant 0 : index
    %c0_583 = arith.constant 0 : index
    %636 = vector.load %arg4[%c1_581, %c0_582, %c0_583] : memref<3x256x256xbf16, #tpu.memory_space<vmem>>, vector<1x256x256xbf16>
    %637 = vector.shape_cast %636 : vector<1x256x256xbf16> to vector<256x256xbf16>
    %cst_584 = arith.constant dense<0.000000e+00> : vector<2x256xf32>
    %638 = tpu.matmul %635, %637, %cst_584 {dimension_numbers = #tpu.dot_dimension_numbers<[1], [0], [0], [1], [0, 0, 1, 1], [], []>} : vector<2x256xbf16>, vector<256x256xbf16>, vector<2x256xf32> -> vector<2x256xf32>
    %639 = arith.addf %633, %638 : vector<2x256xf32>
    %c13_585 = arith.constant 13 : index
    %c0_586 = arith.constant 0 : index
    %c0_587 = arith.constant 0 : index
    %640 = vector.load %arg11[%c13_585, %c0_586, %c0_587] : memref<16x2x256xbf16, #tpu.memory_space<vmem>>, vector<1x2x256xbf16>
    %641 = vector.shape_cast %640 : vector<1x2x256xbf16> to vector<2x256xbf16>
    %c2_588 = arith.constant 2 : index
    %c0_589 = arith.constant 0 : index
    %c0_590 = arith.constant 0 : index
    %642 = vector.load %arg4[%c2_588, %c0_589, %c0_590] : memref<3x256x256xbf16, #tpu.memory_space<vmem>>, vector<1x256x256xbf16>
    %643 = vector.shape_cast %642 : vector<1x256x256xbf16> to vector<256x256xbf16>
    %cst_591 = arith.constant dense<0.000000e+00> : vector<2x256xf32>
    %644 = tpu.matmul %641, %643, %cst_591 {dimension_numbers = #tpu.dot_dimension_numbers<[1], [0], [0], [1], [0, 0, 1, 1], [], []>} : vector<2x256xbf16>, vector<256x256xbf16>, vector<2x256xf32> -> vector<2x256xf32>
    %645 = arith.addf %639, %644 : vector<2x256xf32>
    %cst_592 = arith.constant 0.000000e+00 : f32
    %646 = vector.broadcast %cst_592 : f32 to vector<2x256xf32>
    %647 = arith.cmpf ogt, %645, %646 : vector<2x256xf32>
    %cst_593 = arith.constant 0.00999999977 : f32
    %648 = vector.broadcast %cst_593 : f32 to vector<2x256xf32>
    %649 = arith.mulf %648, %645 : vector<2x256xf32>
    %650 = arith.select %647, %645, %649 : vector<2x256xi1>, vector<2x256xf32>
    %651 = arith.truncf %650 : vector<2x256xf32> to vector<2x256xbf16>
    %c6_594 = arith.constant 6 : index
    %c0_595 = arith.constant 0 : index
    %c0_596 = arith.constant 0 : index
    %652 = vector.load %arg12[%c6_594, %c0_595, %c0_596] : memref<8x2x256xbf16, #tpu.memory_space<vmem>>, vector<1x2x256xbf16>
    %653 = vector.shape_cast %652 : vector<1x2x256xbf16> to vector<2x256xbf16>
    %654 = vector.shape_cast %651 : vector<2x256xbf16> to vector<1x2x256xbf16>
    tpu.vector_store %arg12[%c6_594, %c0_595, %c0_596], %654 {strides = array<i32>} : memref<8x2x256xbf16, #tpu.memory_space<vmem>>, vector<1x2x256xbf16>,
    %c0_597 = arith.constant 0 : index
    %c0_598 = arith.constant 0 : index
    %655 = vector.load %arg5[%c0_597, %c0_598] : memref<1x256xf32, #tpu.memory_space<vmem>>, vector<1x256xf32>
    %c13_599 = arith.constant 13 : index
    %c0_600 = arith.constant 0 : index
    %c0_601 = arith.constant 0 : index
    %656 = vector.load %arg11[%c13_599, %c0_600, %c0_601] : memref<16x2x256xbf16, #tpu.memory_space<vmem>>, vector<1x2x256xbf16>
    %657 = vector.shape_cast %656 : vector<1x2x256xbf16> to vector<2x256xbf16>
    %c0_602 = arith.constant 0 : index
    %c0_603 = arith.constant 0 : index
    %c0_604 = arith.constant 0 : index
    %658 = vector.load %arg4[%c0_602, %c0_603, %c0_604] : memref<3x256x256xbf16, #tpu.memory_space<vmem>>, vector<1x256x256xbf16>
    %659 = vector.shape_cast %658 : vector<1x256x256xbf16> to vector<256x256xbf16>
    %cst_605 = arith.constant dense<0.000000e+00> : vector<2x256xf32>
    %660 = tpu.matmul %657, %659, %cst_605 {dimension_numbers = #tpu.dot_dimension_numbers<[1], [0], [0], [1], [0, 0, 1, 1], [], []>} : vector<2x256xbf16>, vector<256x256xbf16>, vector<2x256xf32> -> vector<2x256xf32>
    %661 = vector.broadcast %655 : vector<1x256xf32> to vector<2x256xf32>
    %662 = arith.addf %661, %660 : vector<2x256xf32>
    %c14_606 = arith.constant 14 : index
    %c0_607 = arith.constant 0 : index
    %c0_608 = arith.constant 0 : index
    %663 = vector.load %arg11[%c14_606, %c0_607, %c0_608] : memref<16x2x256xbf16, #tpu.memory_space<vmem>>, vector<1x2x256xbf16>
    %664 = vector.shape_cast %663 : vector<1x2x256xbf16> to vector<2x256xbf16>
    %c1_609 = arith.constant 1 : index
    %c0_610 = arith.constant 0 : index
    %c0_611 = arith.constant 0 : index
    %665 = vector.load %arg4[%c1_609, %c0_610, %c0_611] : memref<3x256x256xbf16, #tpu.memory_space<vmem>>, vector<1x256x256xbf16>
    %666 = vector.shape_cast %665 : vector<1x256x256xbf16> to vector<256x256xbf16>
    %cst_612 = arith.constant dense<0.000000e+00> : vector<2x256xf32>
    %667 = tpu.matmul %664, %666, %cst_612 {dimension_numbers = #tpu.dot_dimension_numbers<[1], [0], [0], [1], [0, 0, 1, 1], [], []>} : vector<2x256xbf16>, vector<256x256xbf16>, vector<2x256xf32> -> vector<2x256xf32>
    %668 = arith.addf %662, %667 : vector<2x256xf32>
    %c15_613 = arith.constant 15 : index
    %c0_614 = arith.constant 0 : index
    %c0_615 = arith.constant 0 : index
    %669 = vector.load %arg11[%c15_613, %c0_614, %c0_615] : memref<16x2x256xbf16, #tpu.memory_space<vmem>>, vector<1x2x256xbf16>
    %670 = vector.shape_cast %669 : vector<1x2x256xbf16> to vector<2x256xbf16>
    %c2_616 = arith.constant 2 : index
    %c0_617 = arith.constant 0 : index
    %c0_618 = arith.constant 0 : index
    %671 = vector.load %arg4[%c2_616, %c0_617, %c0_618] : memref<3x256x256xbf16, #tpu.memory_space<vmem>>, vector<1x256x256xbf16>
    %672 = vector.shape_cast %671 : vector<1x256x256xbf16> to vector<256x256xbf16>
    %cst_619 = arith.constant dense<0.000000e+00> : vector<2x256xf32>
    %673 = tpu.matmul %670, %672, %cst_619 {dimension_numbers = #tpu.dot_dimension_numbers<[1], [0], [0], [1], [0, 0, 1, 1], [], []>} : vector<2x256xbf16>, vector<256x256xbf16>, vector<2x256xf32> -> vector<2x256xf32>
    %674 = arith.addf %668, %673 : vector<2x256xf32>
    %cst_620 = arith.constant 0.000000e+00 : f32
    %675 = vector.broadcast %cst_620 : f32 to vector<2x256xf32>
    %676 = arith.cmpf ogt, %674, %675 : vector<2x256xf32>
    %cst_621 = arith.constant 0.00999999977 : f32
    %677 = vector.broadcast %cst_621 : f32 to vector<2x256xf32>
    %678 = arith.mulf %677, %674 : vector<2x256xf32>
    %679 = arith.select %676, %674, %678 : vector<2x256xi1>, vector<2x256xf32>
    %680 = arith.truncf %679 : vector<2x256xf32> to vector<2x256xbf16>
    %c7_622 = arith.constant 7 : index
    %c0_623 = arith.constant 0 : index
    %c0_624 = arith.constant 0 : index
    %681 = vector.load %arg12[%c7_622, %c0_623, %c0_624] : memref<8x2x256xbf16, #tpu.memory_space<vmem>>, vector<1x2x256xbf16>
    %682 = vector.shape_cast %681 : vector<1x2x256xbf16> to vector<2x256xbf16>
    %683 = vector.shape_cast %680 : vector<2x256xbf16> to vector<1x2x256xbf16>
    tpu.vector_store %arg12[%c7_622, %c0_623, %c0_624], %683 {strides = array<i32>} : memref<8x2x256xbf16, #tpu.memory_space<vmem>>, vector<1x2x256xbf16>,
    %c0_625 = arith.constant 0 : index
    %c0_626 = arith.constant 0 : index
    %684 = vector.load %arg9[%c0_625, %c0_626] : memref<1x128xf32, #tpu.memory_space<vmem>>, vector<1x128xf32>
    %c0_627 = arith.constant 0 : index
    %c0_628 = arith.constant 0 : index
    %685 = vector.load %arg7[%c0_627, %c0_628] : memref<1x256xf32, #tpu.memory_space<vmem>>, vector<1x256xf32>
    %c0_629 = arith.constant 0 : index
    %c0_630 = arith.constant 0 : index
    %c0_631 = arith.constant 0 : index
    %686 = vector.load %arg12[%c0_629, %c0_630, %c0_631] : memref<8x2x256xbf16, #tpu.memory_space<vmem>>, vector<1x2x256xbf16>
    %687 = vector.shape_cast %686 : vector<1x2x256xbf16> to vector<2x256xbf16>
    %c1_632 = arith.constant 1 : index
    %c0_633 = arith.constant 0 : index
    %c0_634 = arith.constant 0 : index
    %688 = vector.load %arg6[%c1_632, %c0_633, %c0_634] : memref<3x256x256xbf16, #tpu.memory_space<vmem>>, vector<1x256x256xbf16>
    %689 = vector.shape_cast %688 : vector<1x256x256xbf16> to vector<256x256xbf16>
    %cst_635 = arith.constant dense<0.000000e+00> : vector<2x256xf32>
    %690 = tpu.matmul %687, %689, %cst_635 {dimension_numbers = #tpu.dot_dimension_numbers<[1], [0], [0], [1], [0, 0, 1, 1], [], []>} : vector<2x256xbf16>, vector<256x256xbf16>, vector<2x256xf32> -> vector<2x256xf32>
    %691 = vector.broadcast %685 : vector<1x256xf32> to vector<2x256xf32>
    %692 = arith.addf %691, %690 : vector<2x256xf32>
    %c1_636 = arith.constant 1 : index
    %c0_637 = arith.constant 0 : index
    %c0_638 = arith.constant 0 : index
    %693 = vector.load %arg12[%c1_636, %c0_637, %c0_638] : memref<8x2x256xbf16, #tpu.memory_space<vmem>>, vector<1x2x256xbf16>
    %694 = vector.shape_cast %693 : vector<1x2x256xbf16> to vector<2x256xbf16>
    %c2_639 = arith.constant 2 : index
    %c0_640 = arith.constant 0 : index
    %c0_641 = arith.constant 0 : index
    %695 = vector.load %arg6[%c2_639, %c0_640, %c0_641] : memref<3x256x256xbf16, #tpu.memory_space<vmem>>, vector<1x256x256xbf16>
    %696 = vector.shape_cast %695 : vector<1x256x256xbf16> to vector<256x256xbf16>
    %cst_642 = arith.constant dense<0.000000e+00> : vector<2x256xf32>
    %697 = tpu.matmul %694, %696, %cst_642 {dimension_numbers = #tpu.dot_dimension_numbers<[1], [0], [0], [1], [0, 0, 1, 1], [], []>} : vector<2x256xbf16>, vector<256x256xbf16>, vector<2x256xf32> -> vector<2x256xf32>
    %698 = arith.addf %692, %697 : vector<2x256xf32>
    %cst_643 = arith.constant 0.000000e+00 : f32
    %699 = vector.broadcast %cst_643 : f32 to vector<2x256xf32>
    %700 = arith.cmpf ogt, %698, %699 : vector<2x256xf32>
    %cst_644 = arith.constant 0.00999999977 : f32
    %701 = vector.broadcast %cst_644 : f32 to vector<2x256xf32>
    %702 = arith.mulf %701, %698 : vector<2x256xf32>
    %703 = arith.select %700, %698, %702 : vector<2x256xi1>, vector<2x256xf32>
    %704 = arith.truncf %703 : vector<2x256xf32> to vector<2x256xbf16>
    %c0_645 = arith.constant 0 : index
    %c0_646 = arith.constant 0 : index
    %c0_647 = arith.constant 0 : index
    %705 = vector.load %arg8[%c0_645, %c0_646, %c0_647] : memref<4x256x128xbf16, #tpu.memory_space<vmem>>, vector<1x256x128xbf16>
    %706 = vector.shape_cast %705 : vector<1x256x128xbf16> to vector<256x128xbf16>
    %cst_648 = arith.constant dense<0.000000e+00> : vector<2x128xf32>
    %707 = tpu.matmul %704, %706, %cst_648 {dimension_numbers = #tpu.dot_dimension_numbers<[1], [0], [0], [1], [0, 0, 1, 1], [], []>} : vector<2x256xbf16>, vector<256x128xbf16>, vector<2x128xf32> -> vector<2x128xf32>
    %708 = vector.broadcast %684 : vector<1x128xf32> to vector<2x128xf32>
    %709 = arith.addf %708, %707 : vector<2x128xf32>
    %c0_649 = arith.constant 0 : index
    %c0_650 = arith.constant 0 : index
    %710 = vector.load %arg7[%c0_649, %c0_650] : memref<1x256xf32, #tpu.memory_space<vmem>>, vector<1x256xf32>
    %c1_651 = arith.constant 1 : index
    %c0_652 = arith.constant 0 : index
    %c0_653 = arith.constant 0 : index
    %711 = vector.load %arg12[%c1_651, %c0_652, %c0_653] : memref<8x2x256xbf16, #tpu.memory_space<vmem>>, vector<1x2x256xbf16>
    %712 = vector.shape_cast %711 : vector<1x2x256xbf16> to vector<2x256xbf16>
    %c0_654 = arith.constant 0 : index
    %c0_655 = arith.constant 0 : index
    %c0_656 = arith.constant 0 : index
    %713 = vector.load %arg6[%c0_654, %c0_655, %c0_656] : memref<3x256x256xbf16, #tpu.memory_space<vmem>>, vector<1x256x256xbf16>
    %714 = vector.shape_cast %713 : vector<1x256x256xbf16> to vector<256x256xbf16>
    %cst_657 = arith.constant dense<0.000000e+00> : vector<2x256xf32>
    %715 = tpu.matmul %712, %714, %cst_657 {dimension_numbers = #tpu.dot_dimension_numbers<[1], [0], [0], [1], [0, 0, 1, 1], [], []>} : vector<2x256xbf16>, vector<256x256xbf16>, vector<2x256xf32> -> vector<2x256xf32>
    %716 = vector.broadcast %710 : vector<1x256xf32> to vector<2x256xf32>
    %717 = arith.addf %716, %715 : vector<2x256xf32>
    %c2_658 = arith.constant 2 : index
    %c0_659 = arith.constant 0 : index
    %c0_660 = arith.constant 0 : index
    %718 = vector.load %arg12[%c2_658, %c0_659, %c0_660] : memref<8x2x256xbf16, #tpu.memory_space<vmem>>, vector<1x2x256xbf16>
    %719 = vector.shape_cast %718 : vector<1x2x256xbf16> to vector<2x256xbf16>
    %c1_661 = arith.constant 1 : index
    %c0_662 = arith.constant 0 : index
    %c0_663 = arith.constant 0 : index
    %720 = vector.load %arg6[%c1_661, %c0_662, %c0_663] : memref<3x256x256xbf16, #tpu.memory_space<vmem>>, vector<1x256x256xbf16>
    %721 = vector.shape_cast %720 : vector<1x256x256xbf16> to vector<256x256xbf16>
    %cst_664 = arith.constant dense<0.000000e+00> : vector<2x256xf32>
    %722 = tpu.matmul %719, %721, %cst_664 {dimension_numbers = #tpu.dot_dimension_numbers<[1], [0], [0], [1], [0, 0, 1, 1], [], []>} : vector<2x256xbf16>, vector<256x256xbf16>, vector<2x256xf32> -> vector<2x256xf32>
    %723 = arith.addf %717, %722 : vector<2x256xf32>
    %c3_665 = arith.constant 3 : index
    %c0_666 = arith.constant 0 : index
    %c0_667 = arith.constant 0 : index
    %724 = vector.load %arg12[%c3_665, %c0_666, %c0_667] : memref<8x2x256xbf16, #tpu.memory_space<vmem>>, vector<1x2x256xbf16>
    %725 = vector.shape_cast %724 : vector<1x2x256xbf16> to vector<2x256xbf16>
    %c2_668 = arith.constant 2 : index
    %c0_669 = arith.constant 0 : index
    %c0_670 = arith.constant 0 : index
    %726 = vector.load %arg6[%c2_668, %c0_669, %c0_670] : memref<3x256x256xbf16, #tpu.memory_space<vmem>>, vector<1x256x256xbf16>
    %727 = vector.shape_cast %726 : vector<1x256x256xbf16> to vector<256x256xbf16>
    %cst_671 = arith.constant dense<0.000000e+00> : vector<2x256xf32>
    %728 = tpu.matmul %725, %727, %cst_671 {dimension_numbers = #tpu.dot_dimension_numbers<[1], [0], [0], [1], [0, 0, 1, 1], [], []>} : vector<2x256xbf16>, vector<256x256xbf16>, vector<2x256xf32> -> vector<2x256xf32>
    %729 = arith.addf %723, %728 : vector<2x256xf32>
    %cst_672 = arith.constant 0.000000e+00 : f32
    %730 = vector.broadcast %cst_672 : f32 to vector<2x256xf32>
    %731 = arith.cmpf ogt, %729, %730 : vector<2x256xf32>
    %cst_673 = arith.constant 0.00999999977 : f32
    %732 = vector.broadcast %cst_673 : f32 to vector<2x256xf32>
    %733 = arith.mulf %732, %729 : vector<2x256xf32>
    %734 = arith.select %731, %729, %733 : vector<2x256xi1>, vector<2x256xf32>
    %735 = arith.truncf %734 : vector<2x256xf32> to vector<2x256xbf16>
    %c1_674 = arith.constant 1 : index
    %c0_675 = arith.constant 0 : index
    %c0_676 = arith.constant 0 : index
    %736 = vector.load %arg8[%c1_674, %c0_675, %c0_676] : memref<4x256x128xbf16, #tpu.memory_space<vmem>>, vector<1x256x128xbf16>
    %737 = vector.shape_cast %736 : vector<1x256x128xbf16> to vector<256x128xbf16>
    %cst_677 = arith.constant dense<0.000000e+00> : vector<2x128xf32>
    %738 = tpu.matmul %735, %737, %cst_677 {dimension_numbers = #tpu.dot_dimension_numbers<[1], [0], [0], [1], [0, 0, 1, 1], [], []>} : vector<2x256xbf16>, vector<256x128xbf16>, vector<2x128xf32> -> vector<2x128xf32>
    %739 = arith.addf %709, %738 : vector<2x128xf32>
    %c0_678 = arith.constant 0 : index
    %c0_679 = arith.constant 0 : index
    %740 = vector.load %arg7[%c0_678, %c0_679] : memref<1x256xf32, #tpu.memory_space<vmem>>, vector<1x256xf32>
    %c3_680 = arith.constant 3 : index
    %c0_681 = arith.constant 0 : index
    %c0_682 = arith.constant 0 : index
    %741 = vector.load %arg12[%c3_680, %c0_681, %c0_682] : memref<8x2x256xbf16, #tpu.memory_space<vmem>>, vector<1x2x256xbf16>
    %742 = vector.shape_cast %741 : vector<1x2x256xbf16> to vector<2x256xbf16>
    %c0_683 = arith.constant 0 : index
    %c0_684 = arith.constant 0 : index
    %c0_685 = arith.constant 0 : index
    %743 = vector.load %arg6[%c0_683, %c0_684, %c0_685] : memref<3x256x256xbf16, #tpu.memory_space<vmem>>, vector<1x256x256xbf16>
    %744 = vector.shape_cast %743 : vector<1x256x256xbf16> to vector<256x256xbf16>
    %cst_686 = arith.constant dense<0.000000e+00> : vector<2x256xf32>
    %745 = tpu.matmul %742, %744, %cst_686 {dimension_numbers = #tpu.dot_dimension_numbers<[1], [0], [0], [1], [0, 0, 1, 1], [], []>} : vector<2x256xbf16>, vector<256x256xbf16>, vector<2x256xf32> -> vector<2x256xf32>
    %746 = vector.broadcast %740 : vector<1x256xf32> to vector<2x256xf32>
    %747 = arith.addf %746, %745 : vector<2x256xf32>
    %c4_687 = arith.constant 4 : index
    %c0_688 = arith.constant 0 : index
    %c0_689 = arith.constant 0 : index
    %748 = vector.load %arg12[%c4_687, %c0_688, %c0_689] : memref<8x2x256xbf16, #tpu.memory_space<vmem>>, vector<1x2x256xbf16>
    %749 = vector.shape_cast %748 : vector<1x2x256xbf16> to vector<2x256xbf16>
    %c1_690 = arith.constant 1 : index
    %c0_691 = arith.constant 0 : index
    %c0_692 = arith.constant 0 : index
    %750 = vector.load %arg6[%c1_690, %c0_691, %c0_692] : memref<3x256x256xbf16, #tpu.memory_space<vmem>>, vector<1x256x256xbf16>
    %751 = vector.shape_cast %750 : vector<1x256x256xbf16> to vector<256x256xbf16>
    %cst_693 = arith.constant dense<0.000000e+00> : vector<2x256xf32>
    %752 = tpu.matmul %749, %751, %cst_693 {dimension_numbers = #tpu.dot_dimension_numbers<[1], [0], [0], [1], [0, 0, 1, 1], [], []>} : vector<2x256xbf16>, vector<256x256xbf16>, vector<2x256xf32> -> vector<2x256xf32>
    %753 = arith.addf %747, %752 : vector<2x256xf32>
    %c5_694 = arith.constant 5 : index
    %c0_695 = arith.constant 0 : index
    %c0_696 = arith.constant 0 : index
    %754 = vector.load %arg12[%c5_694, %c0_695, %c0_696] : memref<8x2x256xbf16, #tpu.memory_space<vmem>>, vector<1x2x256xbf16>
    %755 = vector.shape_cast %754 : vector<1x2x256xbf16> to vector<2x256xbf16>
    %c2_697 = arith.constant 2 : index
    %c0_698 = arith.constant 0 : index
    %c0_699 = arith.constant 0 : index
    %756 = vector.load %arg6[%c2_697, %c0_698, %c0_699] : memref<3x256x256xbf16, #tpu.memory_space<vmem>>, vector<1x256x256xbf16>
    %757 = vector.shape_cast %756 : vector<1x256x256xbf16> to vector<256x256xbf16>
    %cst_700 = arith.constant dense<0.000000e+00> : vector<2x256xf32>
    %758 = tpu.matmul %755, %757, %cst_700 {dimension_numbers = #tpu.dot_dimension_numbers<[1], [0], [0], [1], [0, 0, 1, 1], [], []>} : vector<2x256xbf16>, vector<256x256xbf16>, vector<2x256xf32> -> vector<2x256xf32>
    %759 = arith.addf %753, %758 : vector<2x256xf32>
    %cst_701 = arith.constant 0.000000e+00 : f32
    %760 = vector.broadcast %cst_701 : f32 to vector<2x256xf32>
    %761 = arith.cmpf ogt, %759, %760 : vector<2x256xf32>
    %cst_702 = arith.constant 0.00999999977 : f32
    %762 = vector.broadcast %cst_702 : f32 to vector<2x256xf32>
    %763 = arith.mulf %762, %759 : vector<2x256xf32>
    %764 = arith.select %761, %759, %763 : vector<2x256xi1>, vector<2x256xf32>
    %765 = arith.truncf %764 : vector<2x256xf32> to vector<2x256xbf16>
    %c2_703 = arith.constant 2 : index
    %c0_704 = arith.constant 0 : index
    %c0_705 = arith.constant 0 : index
    %766 = vector.load %arg8[%c2_703, %c0_704, %c0_705] : memref<4x256x128xbf16, #tpu.memory_space<vmem>>, vector<1x256x128xbf16>
    %767 = vector.shape_cast %766 : vector<1x256x128xbf16> to vector<256x128xbf16>
    %cst_706 = arith.constant dense<0.000000e+00> : vector<2x128xf32>
    %768 = tpu.matmul %765, %767, %cst_706 {dimension_numbers = #tpu.dot_dimension_numbers<[1], [0], [0], [1], [0, 0, 1, 1], [], []>} : vector<2x256xbf16>, vector<256x128xbf16>, vector<2x128xf32> -> vector<2x128xf32>
    %769 = arith.addf %739, %768 : vector<2x128xf32>
    %c0_707 = arith.constant 0 : index
    %c0_708 = arith.constant 0 : index
    %770 = vector.load %arg7[%c0_707, %c0_708] : memref<1x256xf32, #tpu.memory_space<vmem>>, vector<1x256xf32>
    %c5_709 = arith.constant 5 : index
    %c0_710 = arith.constant 0 : index
    %c0_711 = arith.constant 0 : index
    %771 = vector.load %arg12[%c5_709, %c0_710, %c0_711] : memref<8x2x256xbf16, #tpu.memory_space<vmem>>, vector<1x2x256xbf16>
    %772 = vector.shape_cast %771 : vector<1x2x256xbf16> to vector<2x256xbf16>
    %c0_712 = arith.constant 0 : index
    %c0_713 = arith.constant 0 : index
    %c0_714 = arith.constant 0 : index
    %773 = vector.load %arg6[%c0_712, %c0_713, %c0_714] : memref<3x256x256xbf16, #tpu.memory_space<vmem>>, vector<1x256x256xbf16>
    %774 = vector.shape_cast %773 : vector<1x256x256xbf16> to vector<256x256xbf16>
    %cst_715 = arith.constant dense<0.000000e+00> : vector<2x256xf32>
    %775 = tpu.matmul %772, %774, %cst_715 {dimension_numbers = #tpu.dot_dimension_numbers<[1], [0], [0], [1], [0, 0, 1, 1], [], []>} : vector<2x256xbf16>, vector<256x256xbf16>, vector<2x256xf32> -> vector<2x256xf32>
    %776 = vector.broadcast %770 : vector<1x256xf32> to vector<2x256xf32>
    %777 = arith.addf %776, %775 : vector<2x256xf32>
    %c6_716 = arith.constant 6 : index
    %c0_717 = arith.constant 0 : index
    %c0_718 = arith.constant 0 : index
    %778 = vector.load %arg12[%c6_716, %c0_717, %c0_718] : memref<8x2x256xbf16, #tpu.memory_space<vmem>>, vector<1x2x256xbf16>
    %779 = vector.shape_cast %778 : vector<1x2x256xbf16> to vector<2x256xbf16>
    %c1_719 = arith.constant 1 : index
    %c0_720 = arith.constant 0 : index
    %c0_721 = arith.constant 0 : index
    %780 = vector.load %arg6[%c1_719, %c0_720, %c0_721] : memref<3x256x256xbf16, #tpu.memory_space<vmem>>, vector<1x256x256xbf16>
    %781 = vector.shape_cast %780 : vector<1x256x256xbf16> to vector<256x256xbf16>
    %cst_722 = arith.constant dense<0.000000e+00> : vector<2x256xf32>
    %782 = tpu.matmul %779, %781, %cst_722 {dimension_numbers = #tpu.dot_dimension_numbers<[1], [0], [0], [1], [0, 0, 1, 1], [], []>} : vector<2x256xbf16>, vector<256x256xbf16>, vector<2x256xf32> -> vector<2x256xf32>
    %783 = arith.addf %777, %782 : vector<2x256xf32>
    %c7_723 = arith.constant 7 : index
    %c0_724 = arith.constant 0 : index
    %c0_725 = arith.constant 0 : index
    %784 = vector.load %arg12[%c7_723, %c0_724, %c0_725] : memref<8x2x256xbf16, #tpu.memory_space<vmem>>, vector<1x2x256xbf16>
    %785 = vector.shape_cast %784 : vector<1x2x256xbf16> to vector<2x256xbf16>
    %c2_726 = arith.constant 2 : index
    %c0_727 = arith.constant 0 : index
    %c0_728 = arith.constant 0 : index
    %786 = vector.load %arg6[%c2_726, %c0_727, %c0_728] : memref<3x256x256xbf16, #tpu.memory_space<vmem>>, vector<1x256x256xbf16>
    %787 = vector.shape_cast %786 : vector<1x256x256xbf16> to vector<256x256xbf16>
    %cst_729 = arith.constant dense<0.000000e+00> : vector<2x256xf32>
    %788 = tpu.matmul %785, %787, %cst_729 {dimension_numbers = #tpu.dot_dimension_numbers<[1], [0], [0], [1], [0, 0, 1, 1], [], []>} : vector<2x256xbf16>, vector<256x256xbf16>, vector<2x256xf32> -> vector<2x256xf32>
    %789 = arith.addf %783, %788 : vector<2x256xf32>
    %cst_730 = arith.constant 0.000000e+00 : f32
    %790 = vector.broadcast %cst_730 : f32 to vector<2x256xf32>
    %791 = arith.cmpf ogt, %789, %790 : vector<2x256xf32>
    %cst_731 = arith.constant 0.00999999977 : f32
    %792 = vector.broadcast %cst_731 : f32 to vector<2x256xf32>
    %793 = arith.mulf %792, %789 : vector<2x256xf32>
    %794 = arith.select %791, %789, %793 : vector<2x256xi1>, vector<2x256xf32>
    %795 = arith.truncf %794 : vector<2x256xf32> to vector<2x256xbf16>
    %c3_732 = arith.constant 3 : index
    %c0_733 = arith.constant 0 : index
    %c0_734 = arith.constant 0 : index
    %796 = vector.load %arg8[%c3_732, %c0_733, %c0_734] : memref<4x256x128xbf16, #tpu.memory_space<vmem>>, vector<1x256x128xbf16>
    %797 = vector.shape_cast %796 : vector<1x256x128xbf16> to vector<256x128xbf16>
    %cst_735 = arith.constant dense<0.000000e+00> : vector<2x128xf32>
    %798 = tpu.matmul %795, %797, %cst_735 {dimension_numbers = #tpu.dot_dimension_numbers<[1], [0], [0], [1], [0, 0, 1, 1], [], []>} : vector<2x256xbf16>, vector<256x128xbf16>, vector<2x128xf32> -> vector<2x128xf32>
    %799 = arith.addf %769, %798 : vector<2x128xf32>
    %c0_736 = arith.constant 0 : index
    %c0_737 = arith.constant 0 : index
    %800 = vector.load %arg10[%c0_736, %c0_737] : memref<2x128xf32, #tpu.memory_space<vmem>>, vector<2x128xf32>
    tpu.vector_store %arg10[%c0_736, %c0_737], %799 {strides = array<i32>} : memref<2x128xf32, #tpu.memory_space<vmem>>, vector<2x128xf32>,
    return
  }
  func.func @transform_0(%arg0: i32) -> (i32, i32, i32) {
    %c0_i32 = arith.constant 0 : i32
    %c0_i32_0 = arith.constant 0 : i32
    %c0_i32_1 = arith.constant 0 : i32
    return %c0_i32, %arg0, %c0_i32_0 : i32, i32, i32
  }
  func.func @transform_1(%arg0: i32) -> (i32, i32, i32) {
    %c0_i32 = arith.constant 0 : i32
    %c0_i32_0 = arith.constant 0 : i32
    %c0_i32_1 = arith.constant 0 : i32
    %c0_i32_2 = arith.constant 0 : i32
    return %c0_i32, %c0_i32_0, %c0_i32_1 : i32, i32, i32
  }
  func.func @transform_2(%arg0: i32) -> (i32, i32) {
    %c0_i32 = arith.constant 0 : i32
    %c0_i32_0 = arith.constant 0 : i32
    %c0_i32_1 = arith.constant 0 : i32
    return %c0_i32, %c0_i32_0 : i32, i32
  }
  func.func @transform_3(%arg0: i32) -> (i32, i32, i32) {
    %c0_i32 = arith.constant 0 : i32
    %c0_i32_0 = arith.constant 0 : i32
    %c0_i32_1 = arith.constant 0 : i32
    %c0_i32_2 = arith.constant 0 : i32
    return %c0_i32, %c0_i32_0, %c0_i32_1 : i32, i32, i32
  }
  func.func @transform_4(%arg0: i32) -> (i32, i32) {
    %c0_i32 = arith.constant 0 : i32
    %c0_i32_0 = arith.constant 0 : i32
    %c0_i32_1 = arith.constant 0 : i32
    return %c0_i32, %c0_i32_0 : i32, i32
  }
  func.func @transform_5(%arg0: i32) -> (i32, i32, i32) {
    %c0_i32 = arith.constant 0 : i32
    %c0_i32_0 = arith.constant 0 : i32
    %c0_i32_1 = arith.constant 0 : i32
    %c0_i32_2 = arith.constant 0 : i32
    return %c0_i32, %c0_i32_0, %c0_i32_1 : i32, i32, i32
  }
  func.func @transform_6(%arg0: i32) -> (i32, i32) {
    %c0_i32 = arith.constant 0 : i32
    %c0_i32_0 = arith.constant 0 : i32
    %c0_i32_1 = arith.constant 0 : i32
    return %c0_i32, %c0_i32_0 : i32, i32
  }
  func.func @transform_7(%arg0: i32) -> (i32, i32, i32) {
    %c0_i32 = arith.constant 0 : i32
    %c0_i32_0 = arith.constant 0 : i32
    %c0_i32_1 = arith.constant 0 : i32
    %c0_i32_2 = arith.constant 0 : i32
    return %c0_i32, %c0_i32_0, %c0_i32_1 : i32, i32, i32
  }
  func.func @transform_8(%arg0: i32) -> (i32, i32) {
    %c0_i32 = arith.constant 0 : i32
    %c0_i32_0 = arith.constant 0 : i32
    %c0_i32_1 = arith.constant 0 : i32
    return %c0_i32, %c0_i32_0 : i32, i32
  }
  func.func @transform_9(%arg0: i32) -> (i32, i32) {
    %c0_i32 = arith.constant 0 : i32
    %c0_i32_0 = arith.constant 0 : i32
    return %arg0, %c0_i32 : i32, i32
  }
}

</mosaic_0001>

<bundles_post_ra>
// kernel: cnn_aux_classifier_exp_forward.1
= control target key start
LH: loop header
LB: loop body
LE: loop exit
PB: predicated region body
PF: predicated region fallthrough
CT: control target
= control target key end

     0   :  { %14 = vsyncpa [#allocation5], 0  ;;  %s21345_s0 = inlined_call_operand.vmem [shape: bf16[32,2,96], index: 0, kind: input, shape index: {}]   ;;  %s21346_s1 = inlined_call_operand.hbm [shape: bf16[3,96,256], index: 1, kind: input, shape index: {}]   ;;  %s21347_s2 = inlined_call_operand.vmem [shape: f32[1,256], index: 2, kind: input, shape index: {}]   ;;  %s21348_s3 = inlined_call_operand.hbm [shape: bf16[3,256,256], index: 3, kind: input, shape index: {}]   ;;  %s21349_s4 = inlined_call_operand.vmem [shape: f32[1,256], index: 4, kind: input, shape index: {}]   ;;  %s21350_s5 = inlined_call_operand.hbm [shape: bf16[3,256,256], index: 5, kind: input, shape index: {}]   ;;  %s21351_s6 = inlined_call_operand.vmem [shape: f32[1,256], index: 6, kind: input, shape index: {}]   ;;  %s21352_s7 = inlined_call_operand.vmem [shape: bf16[4,256,128], index: 7, kind: input, shape index: {}]   ;;  %s21353_s8 = inlined_call_operand.vmem [shape: f32[1,128], index: 8, kind: input, shape index: {}]   ;;  %s21354_s9 = inlined_call_operand.vmem [shape: f32[2,128], index: 9, kind: output, shape index: {}]  }
   0x1   :  { %15 = vsyncpa [#allocation7], 0  ;;  %s17670_s30 = smov [#allocation6]   ;;  %s17671_s11 = smov [#allocation4]  }
   0x2   :  { %s37_s10 = sshll.u32 %s17670_s30, 4  ;;  %s23_s12 = sshll.u32 %s17671_s11, 4  ;;  %s38_s10 = int_to_ptr.vmem [resolvable:$true] %s37_s10  ;;  %s24_s12 = int_to_ptr.vmem [resolvable:$true] %s23_s12 }
   0x3   :  { %s17614_s13 = scalar_lea.vmem %s38_s10, 12288  ;;  %p17619_p1 = scmp.lt.s32.totalorder %s38_s10, %s38_s10 }
   0x4   :  { %p17615_p0 = scmp.ne.s32.totalorder %s38_s10, %s17614_s13  ;;  %p17620_p2 = scmp.lt.s32.totalorder %s17614_s13, %s17614_s13 }
   0x6   :  { %p17621_p3 = por %p17620_p2, %p17619_p1 }
   0x8   :  { %p17622_p4 = pnand %p17621_p3, %p17615_p0 }
   0xa   :  { %17625 = shalt.err (!%p17622_p4)
}
   0xb   :  { %s17672_s14 = smov 128   ;;  %s17673_s15 = smov 8  }
   0xc   :  { %43 = dma.hbm_to_vmem [thread:$0]  %s21348_s3, 12288, %s38_s10, [#allocation7], %s17672_s14, %s17672_s14, %s17673_s15  }
   0xd   :  { %s17634_s18 = scalar_lea.vmem %s24_s12, 4608  ;;  %p17639_p6 = scmp.lt.s32.totalorder %s24_s12, %s24_s12 }
   0xe   :  { %p17635_p5 = scmp.ne.s32.totalorder %s24_s12, %s17634_s18  ;;  %p17640_p7 = scmp.lt.s32.totalorder %s17634_s18, %s17634_s18 }
  0x10   :  { %p17641_p8 = por %p17640_p7, %p17639_p6 }
  0x12   :  { %p17642_p9 = pnand %p17641_p8, %p17635_p5 }
  0x14   :  { %17645 = shalt.err (!%p17642_p9)
}
  0x15   :  { %29 = dma.hbm_to_vmem [thread:$0]  %s21346_s1, 4608, %s24_s12, [#allocation5], %s17672_s14, %s17672_s14, %s17673_s15  }
  0x16   :  { %s17674_s21 = smov [#allocation8]  }
  0x17   :  { %s51_s22 = sshll.u32 %s17674_s21, 4  ;;  %s52_s22 = int_to_ptr.vmem [resolvable:$true] %s51_s22 }
  0x18   :  { %s17654_s23 = scalar_lea.vmem %s52_s22, 12288  ;;  %p17659_p11 = scmp.lt.s32.totalorder %s52_s22, %s52_s22 }
  0x19   :  { %p17655_p10 = scmp.ne.s32.totalorder %s52_s22, %s17654_s23  ;;  %p17660_p12 = scmp.lt.s32.totalorder %s17654_s23, %s17654_s23 }
  0x1b   :  { %p17661_p13 = por %p17660_p12, %p17659_p11 }
  0x1d   :  { %p17662_p0 = pnand %p17661_p13, %p17655_p10 }
  0x1f   :  { %17665 = shalt.err (!%p17662_p0)
}
  0x20   :  { %57 = dma.hbm_to_vmem [thread:$0]  %s21350_s5, 12288, %s52_s22, [#allocation7], %s17672_s14, %s17672_s14, %s17673_s15  }
  0x21   :  { %17666 = dma.done.wait [#allocation5], 4608  }
  0x22   :  { %17667 = vsyncadd [#allocation5], 4294962688 }
  0x23   :  { %17668 = dma.done.wait [#allocation7], 24576  }
  0x24   :  { %17669 = vsyncadd [#allocation7], 4294942720  ;;  %v17675_v0 = vmov 0   ;;  %v17738_v1 = vld [vmem:[#allocation4 + $0xb4] ss:$8 sps:$4 sm:$0xff]   ;;  %vm149_vm0 = vcmask 785408  }
  0x25   :  { %185 = vmatprep.mubr.bf16.mxu0 %v17675_v0  ;;  %317 = vmatprep.mubr.bf16.mxu1 %v17675_v0  ;;  %v17740_v2 = vld [vmem:[#allocation4 + $0x114] ss:$8 sps:$4 sm:$0xff]   ;;  %v17743_v3 = vld [vmem:[#allocation4 + $0xb0] ss:$8 sps:$4 sm:$0xff]   ;;  %v17748_v5 = vld [vmem:[#allocation4 + $0xa4] ss:$8 sps:$4 sm:$0xff]  }
  0x26   :  { %157 = vmatprep.subr.bf16.mxu0 %v17738_v1  ;;  %v17745_v4 = vld [vmem:[#allocation4 + $0x110] ss:$8 sps:$4 sm:$0xff]   ;;  %289 = vmatprep.subr.bf16.mxu1 %v17740_v2  ;;  %v17752_v6 = vld [vmem:[#allocation4 + $0x104] ss:$8 sps:$4 sm:$0xff]   ;;  %v17754_v7 = vld [vmem:[#allocation4 + $0xa0] ss:$8 sps:$4 sm:$0xff]  }
  0x27   :  { %158 = vmatpush1.bf16.msra.mxu0 %v17743_v3  ;;  %290 = vmatpush1.bf16.msra.mxu1 %v17745_v4  ;;  %v17757_v8 = vld [vmem:[#allocation4 + $0x100] ss:$8 sps:$4 sm:$0xff]   ;;  %v17760_v9 = vld [vmem:[#allocation4 + $0x94] ss:$8 sps:$4 sm:$0xff]   ;;  %v17764_v11 = vld [vmem:[#allocation4 + $0x90] ss:$8 sps:$4 sm:$0xff]  }
  0x28   :  { %159 = vmatprep.subr.bf16.mxu0 %v17748_v5  ;;  %291 = vmatprep.subr.bf16.mxu1 %v17752_v6  ;;  %v17762_v10 = vld [vmem:[#allocation4 + $0xf4] ss:$8 sps:$4 sm:$0xff]   ;;  %v17766_v12 = vld [vmem:[#allocation4 + $0xf0] ss:$8 sps:$4 sm:$0xff]   ;;  %v17770_v13 = vld [vmem:[#allocation4 + $0x84] ss:$8 sps:$4 sm:$0xff]  }
  0x29   :  { %v17774_v14 = vld [vmem:[#allocation4 + $0xe4] ss:$8 sps:$4 sm:$0xff]   ;;  %v17776_v15 = vld [vmem:[#allocation4 + $0x80] ss:$8 sps:$4 sm:$0xff]   ;;  %v17782_v17 = vld [vmem:[#allocation4 + $0x74] ss:$8 sps:$4 sm:$0xff]  }
  0x2a   :  { %v17780_v16 = vld [vmem:[#allocation4 + $0xe0] ss:$8 sps:$4 sm:$0xff]   ;;  %v17786_v18 = vld [vmem:[#allocation4 + $0xd4] ss:$8 sps:$4 sm:$0xff]   ;;  %v17790_v19 = vld [vmem:[#allocation4 + $0x70] ss:$8 sps:$4 sm:$0xff]  }
  0x2b   :  { %160 = vmatpush1.bf16.msra.mxu0 %v17754_v7  ;;  %292 = vmatpush1.bf16.msra.mxu1 %v17757_v8  ;;  %v17792_v20 = vld [vmem:[#allocation4 + $0xd0] ss:$8 sps:$4 sm:$0xff]   ;;  %v17796_v21 = vld [vmem:[#allocation4 + $0x64] ss:$8 sps:$4 sm:$0xff]   ;;  %v17802_v23 = vld [vmem:[#allocation4 + $0x60] ss:$8 sps:$4 sm:$0xff]  }
  0x2c   :  { %161 = vmatprep.subr.bf16.mxu0 %v17760_v9  ;;  %293 = vmatprep.subr.bf16.mxu1 %v17762_v10  ;;  %v17798_v22 = vld [vmem:[#allocation4 + $0xc4] ss:$8 sps:$4 sm:$0xff]   ;;  %v17804_v24 = vld [vmem:[#allocation4 + $0xc0] ss:$8 sps:$4 sm:$0xff]   ;;  %v17808_v25 = vld [vmem:[#allocation4 + $0x54] ss:$8 sps:$4 sm:$0xff]  }
  0x2d   :  { %v75_v26 = vld [vmem:[%s21345_s0] sm:$0x1]  ;;  %v14673_v27 = vld [vmem:[%s21345_s0 + $0x1] sm:$0x1]  ;;  %v17822_v29 = vld [vmem:[#allocation4 + $0x44] ss:$8 sps:$4 sm:$0xff]  }
  0x2e   :  { %v17818_v28 = vld [vmem:[#allocation4 + $0x50] ss:$8 sps:$4 sm:$0xff]   ;;  %v17826_v30 = vld [vmem:[#allocation4 + $0x40] ss:$8 sps:$4 sm:$0xff]   ;;  %v17828_v31 = vld [vmem:[#allocation4 + $0x34] ss:$8 sps:$4 sm:$0xff]  }
  0x2f   :  { %162 = vmatpush1.bf16.msra.mxu0 %v17764_v11  ;;  %294 = vmatpush1.bf16.msra.mxu1 %v17766_v12  ;;  %v17834_v32 = vld [vmem:[#allocation4 + $0x30] ss:$8 sps:$4 sm:$0xff]   ;;  %v17838_v33 = vld [vmem:[#allocation4 + $0x24] ss:$8 sps:$4 sm:$0xff]   ;;  %v17844_v34 = vld [vmem:[#allocation4 + $0x20] ss:$8 sps:$4 sm:$0xff]  }
  0x30   :  { %163 = vmatprep.subr.bf16.mxu0 %v17770_v13  ;;  %295 = vmatprep.subr.bf16.mxu1 %v17774_v14  ;;  %v17846_v35 = vld [vmem:[#allocation4 + $0x14] ss:$8 sps:$4 sm:$0xff]   ;;  %v17854_v36 = vld [vmem:[#allocation4 + $0x10] ss:$8 sps:$4 sm:$0xff]   ;;  %v17858_v37 = vld [vmem:[#allocation4 + $0x4] ss:$8 sps:$4 sm:$0xff]  }
  0x31   :  { %v17860_v38 = vld [vmem:[#allocation4] ss:$8 sps:$4 sm:$0xff]   ;;  %v14689_v39 = vld [vmem:[%s21345_s0 + $0x1] sm:$0x1]  ;;  %v14703_v40 = vld [vmem:[%s21345_s0 + $0x2] sm:$0x1] }
  0x32   :  { %v14717_v41 = vld [vmem:[%s21345_s0 + $0x3] sm:$0x1]  ;;  %v14747_v43 = vld [vmem:[%s21345_s0 + $0x4] sm:$0x1]  ;;  %v14761_v44 = vld [vmem:[%s21345_s0 + $0x5] sm:$0x1] }
  0x33   :  { %164 = vmatpush1.bf16.msra.mxu0 %v17776_v15  ;;  %296 = vmatpush1.bf16.msra.mxu1 %v17780_v16  ;;  %v14733_v42 = vld [vmem:[%s21345_s0 + $0x3] sm:$0x1]  ;;  %v14777_v45 = vld [vmem:[%s21345_s0 + $0x5] sm:$0x1]  ;;  %v14791_v46 = vld [vmem:[%s21345_s0 + $0x6] sm:$0x1] }
  0x34   :  { %165 = vmatprep.subr.bf16.mxu0 %v17782_v17  ;;  %297 = vmatprep.subr.bf16.mxu1 %v17786_v18  ;;  %v14805_v47 = vld [vmem:[%s21345_s0 + $0x7] sm:$0x1]  ;;  %v17486_v51 = vld [vmem:[#allocation4 + $0xb0] ss:$8 sps:$4 sm:$0xff]   ;;  %v17488_v53 = vld [vmem:[#allocation4 + $0xa4] ss:$8 sps:$4 sm:$0xff]  }
  0x35   :  { %v14821_v48 = vld [vmem:[%s21345_s0 + $0x7] sm:$0x1]  ;;  %v17487_v52 = vld [vmem:[#allocation4 + $0x110] ss:$8 sps:$4 sm:$0xff]   ;;  %v17489_v54 = vld [vmem:[#allocation4 + $0x104] ss:$8 sps:$4 sm:$0xff]  }
  0x36   :  { %v17484_v49 = vld [vmem:[#allocation4 + $0xb4] ss:$8 sps:$4 sm:$0xff]   ;;  %v17490_v55 = vld [vmem:[#allocation4 + $0xa0] ss:$8 sps:$4 sm:$0xff]   ;;  %v17494_v59 = vld [vmem:[#allocation4 + $0x90] ss:$8 sps:$4 sm:$0xff]  }
  0x37   :  { %166 = vmatpush1.bf16.msra.mxu0 %v17790_v19  ;;  %298 = vmatpush1.bf16.msra.mxu1 %v17792_v20  ;;  %v17485_v50 = vld [vmem:[#allocation4 + $0x114] ss:$8 sps:$4 sm:$0xff]   ;;  %v17491_v56 = vld [vmem:[#allocation4 + $0x100] ss:$8 sps:$4 sm:$0xff]   ;;  %v17495_v60 = vld [vmem:[#allocation4 + $0xf0] ss:$8 sps:$4 sm:$0xff]  }
  0x38   :  { %167 = vmatprep.subr.bf16.mxu0 %v17796_v21  ;;  %299 = vmatprep.subr.bf16.mxu1 %v17798_v22  ;;  %v17492_v57 = vld [vmem:[#allocation4 + $0x94] ss:$8 sps:$4 sm:$0xff]   ;;  %v17496_v61 = vld [vmem:[#allocation4 + $0x84] ss:$8 sps:$4 sm:$0xff]   ;;  %v17498_v63 = vld [vmem:[#allocation4 + $0x80] ss:$8 sps:$4 sm:$0xff]  }
  0x39   :  { %v17493_v58 = vld [vmem:[#allocation4 + $0xf4] ss:$8 sps:$4 sm:$0xff]   ;;  %v17497_v62 = vld [vmem:[#allocation4 + $0xe4] ss:$8 sps:$4 sm:$0xff]  }
  0x3b   :  { %168 = vmatpush1.bf16.msra.mxu0 %v17802_v23  ;;  %300 = vmatpush1.bf16.msra.mxu1 %v17804_v24 }
  0x3c   :  { %436 = vmatprep.subr.bf16.mxu0 %v17808_v25  ;;  %567 = vmatprep.subr.bf16.mxu1 %v17738_v1 }
  0x3e   :  { %14672 = vmatmul.mubr.msk.bf16.vlgmr.msra.gmra.mxu0 %vm149_vm0, %v75_v26  ;;  %14686 = vmatmul.mubr.msk.bf16.vlgmr.msra.gmra.mxu1 %vm149_vm0, %v14673_v27  ;;  %v17513_v26 = vld [vmem:[#allocation4 + $0x30] ss:$8 sps:$4 sm:$0xff]   ;;  %v17514_v27 = vld [vmem:[#allocation4 + $0x24] ss:$8 sps:$4 sm:$0xff]  }
  0x3f   :  { %437 = vmatpush1.bf16.msra.mxu0 %v17818_v28  ;;  %568 = vmatpush1.bf16.msra.mxu1 %v17743_v3 }
  0x40   :  { %438 = vmatprep.subr.bf16.mxu0 %v17822_v29  ;;  %569 = vmatprep.subr.bf16.mxu1 %v17748_v5 }
  0x41   :  { %464 = vmatprep.mubr.bf16.mxu0 %v17675_v0  ;;  %595 = vmatprep.mubr.bf16.mxu1 %v17675_v0 }
  0x43   :  { %439 = vmatpush1.bf16.msra.mxu0 %v17826_v30  ;;  %570 = vmatpush1.bf16.msra.mxu1 %v17754_v7 }
  0x44   :  { %440 = vmatprep.subr.bf16.mxu0 %v17828_v31  ;;  %571 = vmatprep.subr.bf16.mxu1 %v17760_v9 }
  0x47   :  { %441 = vmatpush1.bf16.msra.mxu0 %v17834_v32  ;;  %572 = vmatpush1.bf16.msra.mxu1 %v17764_v11 }
  0x48   :  { %442 = vmatprep.subr.bf16.mxu0 %v17838_v33  ;;  %573 = vmatprep.subr.bf16.mxu1 %v17770_v13 }
  0x4b   :  { %443 = vmatpush1.bf16.msra.mxu0 %v17844_v34  ;;  %574 = vmatpush1.bf16.msra.mxu1 %v17776_v15 }
  0x4c   :  { %444 = vmatprep.subr.bf16.mxu0 %v17846_v35  ;;  %575 = vmatprep.subr.bf16.mxu1 %v17782_v17 }
  0x4f   :  { %445 = vmatpush1.bf16.msra.mxu0 %v17854_v36  ;;  %576 = vmatpush1.bf16.msra.mxu1 %v17790_v19 }
  0x50   :  { %446 = vmatprep.subr.bf16.mxu0 %v17858_v37  ;;  %577 = vmatprep.subr.bf16.mxu1 %v17796_v21 }
  0x53   :  { %447 = vmatpush1.bf16.msra.mxu0 %v17860_v38  ;;  %578 = vmatpush1.bf16.msra.mxu1 %v17802_v23 }
  0x54   :  { %687 = vmatprep.subr.bf16.mxu0 %v17740_v2  ;;  %835 = vmatprep.subr.bf16.mxu1 %v17808_v25 }
  0x56   :  { %14702 = vmatmul.mubr.msk.bf16.vlgmr.msra.gmra.mxu0 %vm149_vm0, %v14689_v39  ;;  %14716 = vmatmul.mubr.msk.bf16.vlgmr.msra.gmra.mxu1 %vm149_vm0, %v14703_v40  ;;  %v18069_v39 = vld [vmem:[#allocation4 + $0x110] ss:$8 sps:$4 sm:$0xff]  }
  0x57   :  { %688 = vmatpush1.bf16.msra.mxu0 %v17745_v4  ;;  %836 = vmatpush1.bf16.msra.mxu1 %v17818_v28  ;;  %v18071_v40 = vld [vmem:[#allocation4 + $0x50] ss:$8 sps:$4 sm:$0xff]  }
  0x58   :  { %689 = vmatprep.subr.bf16.mxu0 %v17752_v6  ;;  %837 = vmatprep.subr.bf16.mxu1 %v17822_v29 }
  0x59   :  { %715 = vmatprep.mubr.bf16.mxu0 %v17675_v0  ;;  %863 = vmatprep.mubr.bf16.mxu1 %v17675_v0 }
  0x5b   :  { %690 = vmatpush1.bf16.msra.mxu0 %v17757_v8  ;;  %838 = vmatpush1.bf16.msra.mxu1 %v17826_v30 }
  0x5c   :  { %691 = vmatprep.subr.bf16.mxu0 %v17762_v10  ;;  %839 = vmatprep.subr.bf16.mxu1 %v17828_v31 }
  0x5f   :  { %692 = vmatpush1.bf16.msra.mxu0 %v17766_v12  ;;  %840 = vmatpush1.bf16.msra.mxu1 %v17834_v32 }
  0x60   :  { %693 = vmatprep.subr.bf16.mxu0 %v17774_v14  ;;  %841 = vmatprep.subr.bf16.mxu1 %v17838_v33 }
  0x63   :  { %694 = vmatpush1.bf16.msra.mxu0 %v17780_v16  ;;  %842 = vmatpush1.bf16.msra.mxu1 %v17844_v34 }
  0x64   :  { %695 = vmatprep.subr.bf16.mxu0 %v17786_v18  ;;  %843 = vmatprep.subr.bf16.mxu1 %v17846_v35 }
  0x67   :  { %696 = vmatpush1.bf16.msra.mxu0 %v17792_v20  ;;  %844 = vmatpush1.bf16.msra.mxu1 %v17854_v36 }
  0x68   :  { %697 = vmatprep.subr.bf16.mxu0 %v17798_v22  ;;  %845 = vmatprep.subr.bf16.mxu1 %v17858_v37 }
  0x6b   :  { %698 = vmatpush1.bf16.msra.mxu0 %v17804_v24  ;;  %846 = vmatpush1.bf16.msra.mxu1 %v17860_v38 }
  0x6c   :  { %966 = vmatprep.subr.bf16.mxu0 %v17738_v1  ;;  %1086 = vmatprep.subr.bf16.mxu1 %v17740_v2 }
  0x6e   :  { %14730 = vmatmul.mubr.msk.bf16.vlgmr.msra.gmra.mxu0 %vm149_vm0, %v14717_v41  ;;  %14746 = vmatmul.mubr.msk.bf16.vlgmr.msra.gmra.mxu1 %vm149_vm0, %v14733_v42  ;;  %v17519_v41 = vld [vmem:[#allocation4] ss:$8 sps:$4 sm:$0xff]   ;;  %v18076_v42 = vld [vmem:[#allocation4 + $0x104] ss:$8 sps:$4 sm:$0xff]  }
  0x6f   :  { %967 = vmatpush1.bf16.msra.mxu0 %v17743_v3  ;;  %1087 = vmatpush1.bf16.msra.mxu1 %v17745_v4 }
  0x70   :  { %968 = vmatprep.subr.bf16.mxu0 %v17748_v5  ;;  %1088 = vmatprep.subr.bf16.mxu1 %v17752_v6 }
  0x71   :  { %994 = vmatprep.mubr.bf16.mxu0 %v17675_v0  ;;  %1114 = vmatprep.mubr.bf16.mxu1 %v17675_v0 }
  0x73   :  { %969 = vmatpush1.bf16.msra.mxu0 %v17754_v7  ;;  %1089 = vmatpush1.bf16.msra.mxu1 %v17757_v8 }
  0x74   :  { %970 = vmatprep.subr.bf16.mxu0 %v17760_v9  ;;  %1090 = vmatprep.subr.bf16.mxu1 %v17762_v10 }
  0x77   :  { %971 = vmatpush1.bf16.msra.mxu0 %v17764_v11  ;;  %1091 = vmatpush1.bf16.msra.mxu1 %v17766_v12 }
  0x78   :  { %972 = vmatprep.subr.bf16.mxu0 %v17770_v13  ;;  %1092 = vmatprep.subr.bf16.mxu1 %v17774_v14 }
  0x7b   :  { %973 = vmatpush1.bf16.msra.mxu0 %v17776_v15  ;;  %1093 = vmatpush1.bf16.msra.mxu1 %v17780_v16 }
  0x7c   :  { %974 = vmatprep.subr.bf16.mxu0 %v17782_v17  ;;  %1094 = vmatprep.subr.bf16.mxu1 %v17786_v18 }
  0x7f   :  { %975 = vmatpush1.bf16.msra.mxu0 %v17790_v19  ;;  %1095 = vmatpush1.bf16.msra.mxu1 %v17792_v20 }
  0x80   :  { %976 = vmatprep.subr.bf16.mxu0 %v17796_v21  ;;  %1096 = vmatprep.subr.bf16.mxu1 %v17798_v22 }
  0x83   :  { %977 = vmatpush1.bf16.msra.mxu0 %v17802_v23  ;;  %1097 = vmatpush1.bf16.msra.mxu1 %v17804_v24 }
  0x84   :  { %1234 = vmatprep.subr.bf16.mxu0 %v17808_v25  ;;  %1365 = vmatprep.subr.bf16.mxu1 %v17738_v1  ;;  %v17499_v1 = vld [vmem:[#allocation4 + $0xe0] ss:$8 sps:$4 sm:$0xff]  }
  0x86   :  { %14760 = vmatmul.mubr.msk.bf16.vlgmr.msra.gmra.mxu0 %vm149_vm0, %v14747_v43  ;;  %14774 = vmatmul.mubr.msk.bf16.vlgmr.msra.gmra.mxu1 %vm149_vm0, %v14761_v44  ;;  %v18078_v43 = vld [vmem:[#allocation4 + $0x44] ss:$8 sps:$4 sm:$0xff]   ;;  %v18080_v44 = vld [vmem:[#allocation4 + $0x100] ss:$8 sps:$4 sm:$0xff]  }
  0x87   :  { %1235 = vmatpush1.bf16.msra.mxu0 %v17818_v28  ;;  %1366 = vmatpush1.bf16.msra.mxu1 %v17743_v3  ;;  %v17501_v3 = vld [vmem:[#allocation4 + $0xd4] ss:$8 sps:$4 sm:$0xff]  }
  0x88   :  { %1236 = vmatprep.subr.bf16.mxu0 %v17822_v29  ;;  %1367 = vmatprep.subr.bf16.mxu1 %v17748_v5  ;;  %v17502_v5 = vld [vmem:[#allocation4 + $0x70] ss:$8 sps:$4 sm:$0xff]  }
  0x89   :  { %1262 = vmatprep.mubr.bf16.mxu0 %v17675_v0  ;;  %1393 = vmatprep.mubr.bf16.mxu1 %v17675_v0 }
  0x8b   :  { %1237 = vmatpush1.bf16.msra.mxu0 %v17826_v30  ;;  %1368 = vmatpush1.bf16.msra.mxu1 %v17754_v7  ;;  %v17504_v7 = vld [vmem:[#allocation4 + $0x64] ss:$8 sps:$4 sm:$0xff]  }
  0x8c   :  { %1238 = vmatprep.subr.bf16.mxu0 %v17828_v31  ;;  %1369 = vmatprep.subr.bf16.mxu1 %v17760_v9  ;;  %v14835_v9 = vld [vmem:[%s21345_s0 + $0x8] sm:$0x1] }
  0x8f   :  { %1239 = vmatpush1.bf16.msra.mxu0 %v17834_v32  ;;  %1370 = vmatpush1.bf16.msra.mxu1 %v17764_v11  ;;  %v18022_v11 = vld [vmem:[#allocation4 + $0xb0] ss:$8 sps:$4 sm:$0xff]  }
  0x90   :  { %1240 = vmatprep.subr.bf16.mxu0 %v17838_v33  ;;  %1371 = vmatprep.subr.bf16.mxu1 %v17770_v13  ;;  %v17506_v13 = vld [vmem:[#allocation4 + $0x60] ss:$8 sps:$4 sm:$0xff]  }
  0x93   :  { %1241 = vmatpush1.bf16.msra.mxu0 %v17844_v34  ;;  %1372 = vmatpush1.bf16.msra.mxu1 %v17776_v15  ;;  %v17508_v15 = vld [vmem:[#allocation4 + $0x54] ss:$8 sps:$4 sm:$0xff]  }
  0x94   :  { %1242 = vmatprep.subr.bf16.mxu0 %v17846_v35  ;;  %1373 = vmatprep.subr.bf16.mxu1 %v17782_v17  ;;  %v18031_v17 = vld [vmem:[#allocation4 + $0x94] ss:$8 sps:$4 sm:$0xff]  }
  0x97   :  { %1243 = vmatpush1.bf16.msra.mxu0 %v17854_v36  ;;  %1374 = vmatpush1.bf16.msra.mxu1 %v17790_v19  ;;  %v17510_v19 = vld [vmem:[#allocation4 + $0x44] ss:$8 sps:$4 sm:$0xff]  }
  0x98   :  { %1244 = vmatprep.subr.bf16.mxu0 %v17858_v37  ;;  %1375 = vmatprep.subr.bf16.mxu1 %v17796_v21  ;;  %v18039_v21 = vld [vmem:[#allocation4 + $0x84] ss:$8 sps:$4 sm:$0xff]  }
  0x9b   :  { %1245 = vmatpush1.bf16.msra.mxu0 %v17860_v38  ;;  %1376 = vmatpush1.bf16.msra.mxu1 %v17802_v23  ;;  %v17512_v23 = vld [vmem:[#allocation4 + $0x34] ss:$8 sps:$4 sm:$0xff]  }
  0x9c   :  { %1485 = vmatprep.subr.bf16.mxu0 %v17740_v2  ;;  %1633 = vmatprep.subr.bf16.mxu1 %v17808_v25  ;;  %v17500_v2 = vld [vmem:[#allocation4 + $0x74] ss:$8 sps:$4 sm:$0xff]  }
  0x9d   :  { %v18045_v25 = vld [vmem:[#allocation4 + $0x74] ss:$8 sps:$4 sm:$0xff]  }
  0x9e   :  { %14790 = vmatmul.mubr.msk.bf16.vlgmr.msra.gmra.mxu0 %vm149_vm0, %v14777_v45  ;;  %14804 = vmatmul.mubr.msk.bf16.vlgmr.msra.gmra.mxu1 %vm149_vm0, %v14791_v46  ;;  %v18082_v45 = vld [vmem:[#allocation4 + $0x40] ss:$8 sps:$4 sm:$0xff]   ;;  %v18090_v46 = vld [vmem:[#allocation4 + $0xf4] ss:$8 sps:$4 sm:$0xff]  }
  0x9f   :  { %1486 = vmatpush1.bf16.msra.mxu0 %v17745_v4  ;;  %1634 = vmatpush1.bf16.msra.mxu1 %v17818_v28  ;;  %v18014_v4 = vld [vmem:[#allocation4 + $0xb4] ss:$8 sps:$4 sm:$0xff]   ;;  %v17515_v28 = vld [vmem:[#allocation4 + $0x20] ss:$8 sps:$4 sm:$0xff]  }
  0xa0   :  { %1487 = vmatprep.subr.bf16.mxu0 %v17752_v6  ;;  %1635 = vmatprep.subr.bf16.mxu1 %v17822_v29  ;;  %v17503_v6 = vld [vmem:[#allocation4 + $0xd0] ss:$8 sps:$4 sm:$0xff]  }
  0xa1   :  { %1513 = vmatprep.mubr.bf16.mxu0 %v17675_v0  ;;  %1661 = vmatprep.mubr.bf16.mxu1 %v17675_v0  ;;  %v18050_v29 = vld [vmem:[#allocation4 + $0x70] ss:$8 sps:$4 sm:$0xff]  }
  0xa3   :  { %1488 = vmatpush1.bf16.msra.mxu0 %v17757_v8  ;;  %1636 = vmatpush1.bf16.msra.mxu1 %v17826_v30  ;;  %v17505_v8 = vld [vmem:[#allocation4 + $0xc4] ss:$8 sps:$4 sm:$0xff]   ;;  %v17516_v30 = vld [vmem:[#allocation4 + $0x14] ss:$8 sps:$4 sm:$0xff]  }
  0xa4   :  { %1489 = vmatprep.subr.bf16.mxu0 %v17762_v10  ;;  %1637 = vmatprep.subr.bf16.mxu1 %v17828_v31  ;;  %v14849_v10 = vld [vmem:[%s21345_s0 + $0x9] sm:$0x1]  ;;  %v18053_v31 = vld [vmem:[#allocation4 + $0x64] ss:$8 sps:$4 sm:$0xff]  }
  0xa7   :  { %1490 = vmatpush1.bf16.msra.mxu0 %v17766_v12  ;;  %1638 = vmatpush1.bf16.msra.mxu1 %v17834_v32  ;;  %v18024_v12 = vld [vmem:[#allocation4 + $0xa4] ss:$8 sps:$4 sm:$0xff]   ;;  %v18055_v32 = vld [vmem:[#allocation4 + $0x60] ss:$8 sps:$4 sm:$0xff]  }
  0xa8   :  { %1491 = vmatprep.subr.bf16.mxu0 %v17774_v14  ;;  %1639 = vmatprep.subr.bf16.mxu1 %v17838_v33  ;;  %v17507_v14 = vld [vmem:[#allocation4 + $0xc0] ss:$8 sps:$4 sm:$0xff]   ;;  %v18057_v33 = vld [vmem:[#allocation4 + $0x114] ss:$8 sps:$4 sm:$0xff]  }
  0xab   :  { %1492 = vmatpush1.bf16.msra.mxu0 %v17780_v16  ;;  %1640 = vmatpush1.bf16.msra.mxu1 %v17844_v34  ;;  %v18027_v16 = vld [vmem:[#allocation4 + $0xa0] ss:$8 sps:$4 sm:$0xff]   ;;  %v17517_v34 = vld [vmem:[#allocation4 + $0x10] ss:$8 sps:$4 sm:$0xff]  }
  0xac   :  { %1493 = vmatprep.subr.bf16.mxu0 %v17786_v18  ;;  %1641 = vmatprep.subr.bf16.mxu1 %v17846_v35  ;;  %v17509_v18 = vld [vmem:[#allocation4 + $0x50] ss:$8 sps:$4 sm:$0xff]   ;;  %v17518_v35 = vld [vmem:[#allocation4 + $0x4] ss:$8 sps:$4 sm:$0xff]  }
  0xaf   :  { %1494 = vmatpush1.bf16.msra.mxu0 %v17792_v20  ;;  %1642 = vmatpush1.bf16.msra.mxu1 %v17854_v36  ;;  %v18035_v20 = vld [vmem:[#allocation4 + $0x90] ss:$8 sps:$4 sm:$0xff]   ;;  %v18061_v36 = vld [vmem:[#allocation4 + $0x54] ss:$8 sps:$4 sm:$0xff]  }
  0xb0   :  { %1495 = vmatprep.subr.bf16.mxu0 %v17798_v22  ;;  %1643 = vmatprep.subr.bf16.mxu1 %v17858_v37  ;;  %v17511_v22 = vld [vmem:[#allocation4 + $0x40] ss:$8 sps:$4 sm:$0xff]   ;;  %v14865_v37 = vld [vmem:[%s21345_s0 + $0x9] sm:$0x1] }
  0xb3   :  { %1496 = vmatpush1.bf16.msra.mxu0 %v17804_v24  ;;  %1644 = vmatpush1.bf16.msra.mxu1 %v17860_v38  ;;  %v18043_v24 = vld [vmem:[#allocation4 + $0x80] ss:$8 sps:$4 sm:$0xff]   ;;  %v14879_v38 = vld [vmem:[%s21345_s0 + $0xa] sm:$0x1] }
  0xb4   :  { %1764 = vmatprep.subr.bf16.mxu0 %v17484_v49  ;;  %1884 = vmatprep.subr.bf16.mxu1 %v17485_v50  ;;  %v18096_v49 = vld [vmem:[#allocation4 + $0x30] ss:$8 sps:$4 sm:$0xff]   ;;  %v18104_v50 = vld [vmem:[#allocation4 + $0xe4] ss:$8 sps:$4 sm:$0xff]  }
  0xb6   :  { %14818 = vmatmul.mubr.msk.bf16.vlgmr.msra.gmra.mxu0 %vm149_vm0, %v14805_v47  ;;  %14834 = vmatmul.mubr.msk.bf16.vlgmr.msra.gmra.mxu1 %vm149_vm0, %v14821_v48  ;;  %v18092_v47 = vld [vmem:[#allocation4 + $0x34] ss:$8 sps:$4 sm:$0xff]   ;;  %v18094_v48 = vld [vmem:[#allocation4 + $0xf0] ss:$8 sps:$4 sm:$0xff]  }
  0xb7   :  { %1765 = vmatpush1.bf16.msra.mxu0 %v17486_v51  ;;  %1885 = vmatpush1.bf16.msra.mxu1 %v17487_v52  ;;  %v18106_v51 = vld [vmem:[#allocation4 + $0x24] ss:$8 sps:$4 sm:$0xff]   ;;  %v18108_v52 = vld [vmem:[#allocation4 + $0xe0] ss:$8 sps:$4 sm:$0xff]  }
  0xb8   :  { %1766 = vmatprep.subr.bf16.mxu0 %v17488_v53  ;;  %1886 = vmatprep.subr.bf16.mxu1 %v17489_v54  ;;  %v18110_v53 = vld [vmem:[#allocation4 + $0x20] ss:$8 sps:$4 sm:$0xff]   ;;  %v195_v54 = vlaneseq }
  0xb9   :  { %1792 = vmatprep.mubr.bf16.mxu0 %v17675_v0  ;;  %1912 = vmatprep.mubr.bf16.mxu1 %v17675_v0 }
  0xbb   :  { %1767 = vmatpush1.bf16.msra.mxu0 %v17490_v55  ;;  %1887 = vmatpush1.bf16.msra.mxu1 %v17491_v56  ;;  %v18116_v55 = vld [vmem:[#allocation4 + $0xd4] ss:$8 sps:$4 sm:$0xff]  }
  0xbc   :  { %1768 = vmatprep.subr.bf16.mxu0 %v17492_v57  ;;  %1888 = vmatprep.subr.bf16.mxu1 %v17493_v58  ;;  %v18118_v56 = vld [vmem:[#allocation4 + $0x14] ss:$8 sps:$4 sm:$0xff]   ;;  %v18120_v57 = vld [vmem:[#allocation4 + $0xd0] ss:$8 sps:$4 sm:$0xff]  }
  0xbd   :  { %v18122_v58 = vld [vmem:[#allocation4 + $0x10] ss:$8 sps:$4 sm:$0xff]  }
  0xbf   :  { %1769 = vmatpush1.bf16.msra.mxu0 %v17494_v59  ;;  %1889 = vmatpush1.bf16.msra.mxu1 %v17495_v60  ;;  %v196_v59 = vshrl.u32 %v195_v54, 7  ;;  %v18128_v60 = vld [vmem:[#allocation4 + $0xc4] ss:$8 sps:$4 sm:$0xff]  }
  0xc0   :  { %1770 = vmatprep.subr.bf16.mxu0 %v17496_v61  ;;  %1890 = vmatprep.subr.bf16.mxu1 %v17497_v62  ;;  %v18130_v61 = vld [vmem:[#allocation4 + $0x4] ss:$8 sps:$4 sm:$0xff]   ;;  %v18132_v62 = vld [vmem:[#allocation4 + $0xc0] ss:$8 sps:$4 sm:$0xff]  }
  0xc3   :  { %1771 = vmatpush1.bf16.msra.mxu0 %v17498_v63  ;;  %1891 = vmatpush1.bf16.msra.mxu1 %v17499_v1  ;;  %v18134_v63 = vld [vmem:[#allocation4] ss:$8 sps:$4 sm:$0xff]   ;;  %v18138_v1 = vsub.s32 0, %v196_v59 }
  0xc4   :  { %1772 = vmatprep.subr.bf16.mxu0 %v17500_v2  ;;  %1892 = vmatprep.subr.bf16.mxu1 %v17501_v3  ;;  %v74_v2 = vld [vmem:[%s21347_s2] sm:$0x3]  ;;  %v14893_v3 = vld [vmem:[%s21345_s0 + $0xb] sm:$0x1] }
  0xc5   :  { %21558 = vst [vmem:[#allocation11_spill] sm:$0xff] %v18138_v1 }
  0xc7   :  { %1773 = vmatpush1.bf16.msra.mxu0 %v17502_v5  ;;  %1893 = vmatpush1.bf16.msra.mxu1 %v17503_v6  ;;  %v14909_v5 = vld [vmem:[%s21345_s0 + $0xb] sm:$0x1]  ;;  %v18151_v6 = vsub.s32 1, %v196_v59 }
  0xc8   :  { %1774 = vmatprep.subr.bf16.mxu0 %v17504_v7  ;;  %1894 = vmatprep.subr.bf16.mxu1 %v17505_v8  ;;  %v198_v7 = vrot.slane %v74_v2, %v18138_v1 }
  0xc9   :  { %21559 = vst [vmem:[#allocation12_spill] sm:$0xff] %v18151_v6  ;;  %v202_v8 = vrot.slane %v74_v2, %v18151_v6 }
  0xcb   :  { %1775 = vmatpush1.bf16.msra.mxu0 %v17506_v13  ;;  %1895 = vmatpush1.bf16.msra.mxu1 %v17507_v14  ;;  %v17676_v13 = vmov 1966171168  }
  0xcc   :  { %2032 = vmatprep.subr.bf16.mxu0 %v17508_v15  ;;  %2163 = vmatprep.subr.bf16.mxu1 %v18014_v4  ;;  %v340_v14 = vunpack.c.l.s4 %v17676_v13 }
  0xce   :  { %14848 = vmatmul.mubr.msk.bf16.vlgmr.msra.gmra.mxu0 %vm149_vm0, %v14835_v9  ;;  %14862 = vmatmul.mubr.msk.bf16.vlgmr.msra.gmra.mxu1 %vm149_vm0, %v14849_v10 }
  0xcf   :  { %2033 = vmatpush1.bf16.msra.mxu0 %v17509_v18  ;;  %2164 = vmatpush1.bf16.msra.mxu1 %v18022_v11 }
  0xd0   :  { %2034 = vmatprep.subr.bf16.mxu0 %v17510_v19  ;;  %2165 = vmatprep.subr.bf16.mxu1 %v18024_v12 }
  0xd1   :  { %2060 = vmatprep.mubr.bf16.mxu0 %v17675_v0  ;;  %2191 = vmatprep.mubr.bf16.mxu1 %v17675_v0 }
  0xd3   :  { %2035 = vmatpush1.bf16.msra.mxu0 %v17511_v22  ;;  %2166 = vmatpush1.bf16.msra.mxu1 %v18027_v16 }
  0xd4   :  { %2036 = vmatprep.subr.bf16.mxu0 %v17512_v23  ;;  %2167 = vmatprep.subr.bf16.mxu1 %v18031_v17 }
  0xd7   :  { %2037 = vmatpush1.bf16.msra.mxu0 %v17513_v26  ;;  %2168 = vmatpush1.bf16.msra.mxu1 %v18035_v20  ;;  %v341_v26 = vunpack.c.0.s8 %v340_v14 }
  0xd8   :  { %2038 = vmatprep.subr.bf16.mxu0 %v17514_v27  ;;  %2169 = vmatprep.subr.bf16.mxu1 %v18039_v21 }
  0xdb   :  { %2039 = vmatpush1.bf16.msra.mxu0 %v17515_v28  ;;  %2170 = vmatpush1.bf16.msra.mxu1 %v18043_v24 }
  0xdc   :  { %2040 = vmatprep.subr.bf16.mxu0 %v17516_v30  ;;  %2171 = vmatprep.subr.bf16.mxu1 %v18045_v25 }
  0xdf   :  { %2041 = vmatpush1.bf16.msra.mxu0 %v17517_v34  ;;  %2172 = vmatpush1.bf16.msra.mxu1 %v18050_v29 }
  0xe0   :  { %2042 = vmatprep.subr.bf16.mxu0 %v17518_v35  ;;  %2173 = vmatprep.subr.bf16.mxu1 %v18053_v31 }
  0xe3   :  { %2043 = vmatpush1.bf16.msra.mxu0 %v17519_v41  ;;  %2174 = vmatpush1.bf16.msra.mxu1 %v18055_v32  ;;  %v18171_v41 = vsub.s32 %v341_v26, %v196_v59  ;;  %v14923_v59 = vld [vmem:[%s21345_s0 + $0xc] sm:$0x1] }
  0xe4   :  { %2283 = vmatprep.subr.bf16.mxu0 %v18057_v33  ;;  %2431 = vmatprep.subr.bf16.mxu1 %v18061_v36 }
  0xe6   :  { %14878 = vmatmul.mubr.msk.bf16.vlgmr.msra.gmra.mxu0 %vm149_vm0, %v14865_v37  ;;  %14892 = vmatmul.mubr.msk.bf16.vlgmr.msra.gmra.mxu1 %vm149_vm0, %v14879_v38 }
  0xe7   :  { %2284 = vmatpush1.bf16.msra.mxu0 %v18069_v39  ;;  %2432 = vmatpush1.bf16.msra.mxu1 %v18071_v40 }
  0xe8   :  { %2285 = vmatprep.subr.bf16.mxu0 %v18076_v42  ;;  %2433 = vmatprep.subr.bf16.mxu1 %v18078_v43 }
  0xe9   :  { %2311 = vmatprep.mubr.bf16.mxu0 %v17675_v0  ;;  %2459 = vmatprep.mubr.bf16.mxu1 %v17675_v0 }
  0xeb   :  { %2286 = vmatpush1.bf16.msra.mxu0 %v18080_v44  ;;  %2434 = vmatpush1.bf16.msra.mxu1 %v18082_v45 }
  0xec   :  { %2287 = vmatprep.subr.bf16.mxu0 %v18090_v46  ;;  %2435 = vmatprep.subr.bf16.mxu1 %v18092_v47 }
  0xef   :  { %2288 = vmatpush1.bf16.msra.mxu0 %v18094_v48  ;;  %2436 = vmatpush1.bf16.msra.mxu1 %v18096_v49 }
  0xf0   :  { %2289 = vmatprep.subr.bf16.mxu0 %v18104_v50  ;;  %2437 = vmatprep.subr.bf16.mxu1 %v18106_v51 }
  0xf3   :  { %2290 = vmatpush1.bf16.msra.mxu0 %v18108_v52  ;;  %2438 = vmatpush1.bf16.msra.mxu1 %v18110_v53 }
  0xf4   :  { %2291 = vmatprep.subr.bf16.mxu0 %v18116_v55  ;;  %2439 = vmatprep.subr.bf16.mxu1 %v18118_v56 }
  0xf7   :  { %2292 = vmatpush1.bf16.msra.mxu0 %v18120_v57  ;;  %2440 = vmatpush1.bf16.msra.mxu1 %v18122_v58 }
  0xf8   :  { %2293 = vmatprep.subr.bf16.mxu0 %v18128_v60  ;;  %2441 = vmatprep.subr.bf16.mxu1 %v18130_v61 }
  0xfb   :  { %2294 = vmatpush1.bf16.msra.mxu0 %v18132_v62  ;;  %2442 = vmatpush1.bf16.msra.mxu1 %v18134_v63 }
  0xfc   :  { %2562 = vmatprep.subr.bf16.mxu0 %v18014_v4  ;;  %2682 = vmatprep.subr.bf16.mxu1 %v18057_v33 }
  0xfe   :  { %v187_v9 = vpop.f32.mrf.mxu0  ;;  %v319_v10 = vpop.f32.mrf.mxu1  ;;  %14906 = vmatmul.mubr.msk.bf16.vlgmr.msra.gmra.mxu0 %vm149_vm0, %v14893_v3  ;;  %14922 = vmatmul.mubr.msk.bf16.vlgmr.msra.gmra.mxu1 %vm149_vm0, %v14909_v5 }
  0xff   :  { %v205_v15 = vadd.f32 %v198_v7, %v187_v9  ;;  %2563 = vmatpush1.bf16.msra.mxu0 %v18022_v11  ;;  %2683 = vmatpush1.bf16.msra.mxu1 %v18069_v39  ;;  %v14937_v7 = vld [vmem:[%s21345_s0 + $0xd] sm:$0x1] }
 0x100   :  { %v189_v18 = vpop.f32.mrf.mxu0  ;;  %v321_v19 = vpop.f32.mrf.mxu1  ;;  %2564 = vmatprep.subr.bf16.mxu0 %v18024_v12  ;;  %2684 = vmatprep.subr.bf16.mxu1 %v18076_v42 }
 0x101   :  { %v326_v22 = vadd.f32 %v319_v10, %v205_v15  ;;  %v206_v23 = vadd.f32 %v202_v8, %v189_v18  ;;  %2590 = vmatprep.mubr.bf16.mxu0 %v17675_v0  ;;  %2710 = vmatprep.mubr.bf16.mxu1 %v17675_v0 }
 0x102   :  { %v323_v27 = vpop.f32.mrf.mxu1  ;;  %v191_v28 = vpop.f32.mrf.mxu0 }
 0x103   :  { %v330_v30 = vmul.f32 0.01, %v326_v22  ;;  %v327_v34 = vadd.f32 %v321_v19, %v206_v23  ;;  %2565 = vmatpush1.bf16.msra.mxu0 %v18027_v16  ;;  %2685 = vmatpush1.bf16.msra.mxu1 %v18080_v44  ;;  %vm328_vm1 = vcmp.gt.f32.partialorder %v326_v22, 0.0 }
 0x104   :  { %v324_v35 = vpop.f32.mrf.mxu1  ;;  %2566 = vmatprep.subr.bf16.mxu0 %v18031_v17  ;;  %2686 = vmatprep.subr.bf16.mxu1 %v18090_v46  ;;  %v192_v37 = vpop.f32.mrf.mxu0 }
 0x105   :  { %vm329_vm2 = vcmp.gt.f32.partialorder %v327_v34, 0.0  ;;  %v331_v38 = vmul.f32 0.01, %v327_v34  ;;  %v332_v54 = vsel %vm328_vm1, %v326_v22, %v330_v30 }
 0x107   :  { %v333_v2 = vsel %vm329_vm2, %v327_v34, %v331_v38  ;;  %2567 = vmatpush1.bf16.msra.mxu0 %v18035_v20  ;;  %2687 = vmatpush1.bf16.msra.mxu1 %v18094_v48 }
 0x108   :  { %v14687_v3 = vpack.c.bf16 %v333_v2, %v332_v54  ;;  %2568 = vmatprep.subr.bf16.mxu0 %v18039_v21  ;;  %2688 = vmatprep.subr.bf16.mxu1 %v18104_v50 }
 0x10a   :  { %v345_v5 = vrot.slane %v14687_v3, %v18171_v41 }
 0x10b   :  { %2569 = vmatpush1.bf16.msra.mxu0 %v18043_v24  ;;  %2689 = vmatpush1.bf16.msra.mxu1 %v18108_v52 }
 0x10c   :  { %14688 = vst.sshfl [vmem:[#allocation2] sm:$0x5 pattern:$0x73625140] %v345_v5  ;;  %2570 = vmatprep.subr.bf16.mxu0 %v18045_v25  ;;  %2690 = vmatprep.subr.bf16.mxu1 %v18116_v55 }
 0x10f   :  { %2571 = vmatpush1.bf16.msra.mxu0 %v18050_v29  ;;  %2691 = vmatpush1.bf16.msra.mxu1 %v18120_v57 }
 0x110   :  { %2572 = vmatprep.subr.bf16.mxu0 %v18053_v31  ;;  %2692 = vmatprep.subr.bf16.mxu1 %v18128_v60 }
 0x113   :  { %2573 = vmatpush1.bf16.msra.mxu0 %v18055_v32  ;;  %2693 = vmatpush1.bf16.msra.mxu1 %v18132_v62 }
 0x114   :  { %2830 = vmatprep.subr.bf16.mxu0 %v18061_v36  ;;  %2961 = vmatprep.subr.bf16.mxu1 %v18014_v4 }
 0x116   :  { %v466_v8 = vpop.f32.mrf.mxu0  ;;  %v597_v9 = vpop.f32.mrf.mxu1  ;;  %14936 = vmatmul.mubr.msk.bf16.vlgmr.msra.gmra.mxu0 %vm149_vm0, %v14923_v59  ;;  %14950 = vmatmul.mubr.msk.bf16.vlgmr.msra.gmra.mxu1 %vm149_vm0, %v14937_v7  ;;  %v17521_v59 = vld [vmem:[#allocation4 + $0xb0] ss:$8 sps:$4 sm:$0xff]  }
 0x117   :  { %2831 = vmatpush1.bf16.msra.mxu0 %v18071_v40  ;;  %2962 = vmatpush1.bf16.msra.mxu1 %v18022_v11 }
 0x118   :  { %v468_v10 = vpop.f32.mrf.mxu0  ;;  %v599_v13 = vpop.f32.mrf.mxu1  ;;  %2832 = vmatprep.subr.bf16.mxu0 %v18078_v43  ;;  %2963 = vmatprep.subr.bf16.mxu1 %v18024_v12  ;;  %v355_v12 = vld [vmem:[%s21347_s2] sm:$0x3] }
 0x119   :  { %2858 = vmatprep.mubr.bf16.mxu0 %v17675_v0  ;;  %2989 = vmatprep.mubr.bf16.mxu1 %v17675_v0 }
 0x11a   :  { %v601_v4 = vpop.f32.mrf.mxu1  ;;  %v470_v14 = vpop.f32.mrf.mxu0 }
 0x11b   :  { %2833 = vmatpush1.bf16.msra.mxu0 %v18082_v45  ;;  %2964 = vmatpush1.bf16.msra.mxu1 %v18027_v16  ;;  %v477_v16 = vrot.slane %v355_v12, %v18138_v1 }
 0x11c   :  { %v602_v15 = vpop.f32.mrf.mxu1  ;;  %2834 = vmatprep.subr.bf16.mxu0 %v18092_v47  ;;  %2965 = vmatprep.subr.bf16.mxu1 %v18031_v17  ;;  %v471_v11 = vpop.f32.mrf.mxu0  ;;  %v481_v17 = vrot.slane %v355_v12, %v18151_v6  ;;  %v17524_v12 = vld [vmem:[#allocation4 + $0x94] ss:$8 sps:$4 sm:$0xff]  }
 0x11d   :  { %v17523_v11 = vld [vmem:[#allocation4 + $0xa0] ss:$8 sps:$4 sm:$0xff]  }
 0x11f   :  { %2835 = vmatpush1.bf16.msra.mxu0 %v18096_v49  ;;  %2966 = vmatpush1.bf16.msra.mxu1 %v18035_v20  ;;  %v484_v20 = vadd.f32 %v477_v16, %v466_v8 }
 0x120   :  { %2836 = vmatprep.subr.bf16.mxu0 %v18106_v51  ;;  %2967 = vmatprep.subr.bf16.mxu1 %v18039_v21  ;;  %v14953_v21 = vld [vmem:[%s21345_s0 + $0xd] sm:$0x1] }
 0x123   :  { %2837 = vmatpush1.bf16.msra.mxu0 %v18110_v53  ;;  %2968 = vmatpush1.bf16.msra.mxu1 %v18043_v24  ;;  %v14967_v24 = vld [vmem:[%s21345_s0 + $0xe] sm:$0x1] }
 0x124   :  { %2838 = vmatprep.subr.bf16.mxu0 %v18118_v56  ;;  %2969 = vmatprep.subr.bf16.mxu1 %v18045_v25  ;;  %v485_v25 = vadd.f32 %v481_v17, %v468_v10 }
 0x126   :  { %v605_v19 = vadd.f32 %v599_v13, %v485_v25  ;;  %v17526_v25 = vld [vmem:[#allocation4 + $0x84] ss:$8 sps:$4 sm:$0xff]  }
 0x127   :  { %2839 = vmatpush1.bf16.msra.mxu0 %v18122_v58  ;;  %2970 = vmatpush1.bf16.msra.mxu1 %v18050_v29  ;;  %v604_v29 = vadd.f32 %v597_v9, %v484_v20  ;;  %v17522_v9 = vld [vmem:[#allocation4 + $0xa4] ss:$8 sps:$4 sm:$0xff]  }
 0x128   :  { %2840 = vmatprep.subr.bf16.mxu0 %v18130_v61  ;;  %2971 = vmatprep.subr.bf16.mxu1 %v18053_v31 }
 0x12b   :  { %2841 = vmatpush1.bf16.msra.mxu0 %v18134_v63  ;;  %2972 = vmatpush1.bf16.msra.mxu1 %v18055_v32 }
 0x12c   :  { %3081 = vmatprep.subr.bf16.mxu0 %v18057_v33  ;;  %3229 = vmatprep.subr.bf16.mxu1 %v18061_v36 }
 0x12e   :  { %v717_v31 = vpop.f32.mrf.mxu0  ;;  %v865_v18 = vpop.f32.mrf.mxu1  ;;  %14966 = vmatmul.mubr.msk.bf16.vlgmr.msra.gmra.mxu0 %vm149_vm0, %v14953_v21  ;;  %14980 = vmatmul.mubr.msk.bf16.vlgmr.msra.gmra.mxu1 %vm149_vm0, %v14967_v24  ;;  %v17525_v21 = vld [vmem:[#allocation4 + $0x90] ss:$8 sps:$4 sm:$0xff]  }
 0x12f   :  { %v724_v22 = vadd.f32 %v717_v31, %v604_v29  ;;  %3082 = vmatpush1.bf16.msra.mxu0 %v18069_v39  ;;  %3230 = vmatpush1.bf16.msra.mxu1 %v18071_v40  ;;  %v17527_v29 = vld [vmem:[#allocation4 + $0x80] ss:$8 sps:$4 sm:$0xff]   ;;  %v17529_v31 = vld [vmem:[#allocation4 + $0x70] ss:$8 sps:$4 sm:$0xff]  }
 0x130   :  { %v719_v23 = vpop.f32.mrf.mxu0  ;;  %v867_v26 = vpop.f32.mrf.mxu1  ;;  %3083 = vmatprep.subr.bf16.mxu0 %v18076_v42  ;;  %3231 = vmatprep.subr.bf16.mxu1 %v18078_v43 }
 0x131   :  { %vm726_vm3 = vcmp.gt.f32.partialorder %v724_v22, 0.0  ;;  %v728_v32 = vmul.f32 0.01, %v724_v22  ;;  %v725_v36 = vadd.f32 %v719_v23, %v605_v19  ;;  %3109 = vmatprep.mubr.bf16.mxu0 %v17675_v0  ;;  %3257 = vmatprep.mubr.bf16.mxu1 %v17675_v0  ;;  %v18298_v19 = vld [vmem:[#allocation4 + $0xb0] ss:$8 sps:$4 sm:$0xff]  }
 0x132   :  { %v869_v27 = vpop.f32.mrf.mxu1  ;;  %v721_v28 = vpop.f32.mrf.mxu0 }
 0x133   :  { %vm727_vm4 = vcmp.gt.f32.partialorder %v725_v36, 0.0  ;;  %v729_v30 = vmul.f32 0.01, %v725_v36  ;;  %3084 = vmatpush1.bf16.msra.mxu0 %v18080_v44  ;;  %3232 = vmatpush1.bf16.msra.mxu1 %v18082_v45  ;;  %v730_v34 = vsel %vm726_vm3, %v724_v22, %v728_v32  ;;  %v754_v45 = vld [vmem:[%s21347_s2] sm:$0x3] }
 0x134   :  { %v870_v40 = vpop.f32.mrf.mxu1  ;;  %3085 = vmatprep.subr.bf16.mxu0 %v18090_v46  ;;  %3233 = vmatprep.subr.bf16.mxu1 %v18092_v47  ;;  %v722_v43 = vpop.f32.mrf.mxu0  ;;  %v876_v47 = vrot.slane %v754_v45, %v18138_v1  ;;  %v17534_v27 = vld [vmem:[#allocation4 + $0x44] ss:$8 sps:$4 sm:$0xff]   ;;  %v18313_v28 = vld [vmem:[#allocation4 + $0x94] ss:$8 sps:$4 sm:$0xff]  }
 0x135   :  { %v731_v35 = vsel %vm727_vm4, %v725_v36, %v729_v30  ;;  %v17535_v43 = vld [vmem:[#allocation4 + $0x40] ss:$8 sps:$4 sm:$0xff]  }
 0x136   :  { %v14731_v37 = vpack.c.bf16 %v731_v35, %v730_v34  ;;  %v18318_v34 = vld [vmem:[#allocation4 + $0x90] ss:$8 sps:$4 sm:$0xff]  }
 0x137   :  { %3086 = vmatpush1.bf16.msra.mxu0 %v18094_v48  ;;  %3234 = vmatpush1.bf16.msra.mxu1 %v18096_v49  ;;  %v14981_v49 = vld [vmem:[%s21345_s0 + $0xf] sm:$0x1] }
 0x138   :  { %v743_v38 = vrot.slane %v14731_v37, %v18171_v41  ;;  %3087 = vmatprep.subr.bf16.mxu0 %v18104_v50  ;;  %3235 = vmatprep.subr.bf16.mxu1 %v18106_v51  ;;  %v14997_v51 = vld [vmem:[%s21345_s0 + $0xf] sm:$0x1] }
 0x139   :  { %v17536_v37 = vld [vmem:[#allocation4 + $0x34] ss:$8 sps:$4 sm:$0xff]  }
 0x13a   :  { %14732 = vst.sshfl [vmem:[#allocation2 + $0x2] sm:$0x5 pattern:$0x73625140] %v743_v38  ;;  %v18321_v38 = vld [vmem:[#allocation4 + $0x84] ss:$8 sps:$4 sm:$0xff]  }
 0x13b   :  { %3088 = vmatpush1.bf16.msra.mxu0 %v18108_v52  ;;  %3236 = vmatpush1.bf16.msra.mxu1 %v18110_v53  ;;  %v880_v53 = vrot.slane %v754_v45, %v18151_v6 }
 0x13c   :  { %3089 = vmatprep.subr.bf16.mxu0 %v18116_v55  ;;  %3237 = vmatprep.subr.bf16.mxu1 %v18118_v56  ;;  %v17520_v56 = vld [vmem:[#allocation4 + $0xb4] ss:$8 sps:$4 sm:$0xff]  }
 0x13d   :  { %v884_v3 = vadd.f32 %v880_v53, %v867_v26  ;;  %v18308_v26 = vld [vmem:[#allocation4 + $0xa0] ss:$8 sps:$4 sm:$0xff]   ;;  %v18327_v53 = vld [vmem:[#allocation4 + $0x74] ss:$8 sps:$4 sm:$0xff]  }
 0x13f   :  { %3090 = vmatpush1.bf16.msra.mxu0 %v18120_v57  ;;  %3238 = vmatpush1.bf16.msra.mxu1 %v18122_v58  ;;  %v883_v58 = vadd.f32 %v876_v47, %v865_v18  ;;  %v17531_v18 = vld [vmem:[#allocation4 + $0x60] ss:$8 sps:$4 sm:$0xff]   ;;  %v17537_v47 = vld [vmem:[#allocation4 + $0x30] ss:$8 sps:$4 sm:$0xff]  }
 0x140   :  { %3091 = vmatprep.subr.bf16.mxu0 %v18128_v60  ;;  %3239 = vmatprep.subr.bf16.mxu1 %v18130_v61 }
 0x143   :  { %3092 = vmatpush1.bf16.msra.mxu0 %v18132_v62  ;;  %3240 = vmatpush1.bf16.msra.mxu1 %v18134_v63 }
 0x144   :  { %3360 = vmatprep.subr.bf16.mxu0 %v17520_v56  ;;  %3480 = vmatprep.subr.bf16.mxu1 %v18057_v33  ;;  %v1153_v56 = vld [vmem:[%s21347_s2] sm:$0x3] }
 0x146   :  { %v996_v54 = vpop.f32.mrf.mxu0  ;;  %v1116_v2 = vpop.f32.mrf.mxu1  ;;  %14994 = vmatmul.mubr.msk.bf16.vlgmr.msra.gmra.mxu0 %vm149_vm0, %v14981_v49  ;;  %15010 = vmatmul.mubr.msk.bf16.vlgmr.msra.gmra.mxu1 %vm149_vm0, %v14997_v51  ;;  %v18324_v49 = vld [vmem:[#allocation4 + $0x80] ss:$8 sps:$4 sm:$0xff]   ;;  %v17538_v51 = vld [vmem:[#allocation4 + $0x24] ss:$8 sps:$4 sm:$0xff]  }
 0x147   :  { %v1003_v5 = vadd.f32 %v996_v54, %v883_v58  ;;  %3361 = vmatpush1.bf16.msra.mxu0 %v17521_v59  ;;  %3481 = vmatpush1.bf16.msra.mxu1 %v18069_v39  ;;  %v17539_v58 = vld [vmem:[#allocation4 + $0x20] ss:$8 sps:$4 sm:$0xff]   ;;  %v18333_v54 = vld [vmem:[#allocation4 + $0x70] ss:$8 sps:$4 sm:$0xff]   ;;  %v1279_v59 = vrot.slane %v1153_v56, %v18151_v6 }
 0x148   :  { %v998_v7 = vpop.f32.mrf.mxu0  ;;  %v1118_v8 = vpop.f32.mrf.mxu1  ;;  %3362 = vmatprep.subr.bf16.mxu0 %v17522_v9  ;;  %3482 = vmatprep.subr.bf16.mxu1 %v18076_v42  ;;  %v18345_v9 = vld [vmem:[#allocation4 + $0x114] ss:$8 sps:$4 sm:$0xff]  }
 0x149   :  { %v1123_v33 = vadd.f32 %v1116_v2, %v1003_v5  ;;  %v1004_v10 = vadd.f32 %v998_v7, %v884_v3  ;;  %3388 = vmatprep.mubr.bf16.mxu0 %v17675_v0  ;;  %3508 = vmatprep.mubr.bf16.mxu1 %v17675_v0  ;;  %v17540_v2 = vld [vmem:[#allocation4 + $0x14] ss:$8 sps:$4 sm:$0xff]   ;;  %v18336_v3 = vld [vmem:[#allocation4 + $0x64] ss:$8 sps:$4 sm:$0xff]   ;;  %v1275_v5 = vrot.slane %v1153_v56, %v18138_v1  ;;  %v17541_v7 = vld [vmem:[#allocation4 + $0x10] ss:$8 sps:$4 sm:$0xff]  }
 0x14a   :  { %v1120_v13 = vpop.f32.mrf.mxu1  ;;  %v1000_v4 = vpop.f32.mrf.mxu0  ;;  %v18422_v56 = vld [vmem:[#allocation4 + $0xc4] ss:$8 sps:$4 sm:$0xff]  }
 0x14b   :  { %vm1125_vm5 = vcmp.gt.f32.partialorder %v1123_v33, 0.0  ;;  %v1127_v14 = vmul.f32 0.01, %v1123_v33  ;;  %v1124_v15 = vadd.f32 %v1118_v8, %v1004_v10  ;;  %3363 = vmatpush1.bf16.msra.mxu0 %v17523_v11  ;;  %3483 = vmatpush1.bf16.msra.mxu1 %v18080_v44  ;;  %v18341_v8 = vld [vmem:[#allocation4 + $0x60] ss:$8 sps:$4 sm:$0xff]  }
 0x14c   :  { %v1121_v39 = vpop.f32.mrf.mxu1  ;;  %3364 = vmatprep.subr.bf16.mxu0 %v17524_v12  ;;  %3484 = vmatprep.subr.bf16.mxu1 %v18090_v46  ;;  %v1001_v42 = vpop.f32.mrf.mxu0  ;;  %v17528_v46 = vld [vmem:[#allocation4 + $0x74] ss:$8 sps:$4 sm:$0xff]   ;;  %v15041_v13 = vld [vmem:[%s21345_s0 + $0x11] sm:$0x1]  ;;  %v18363_v11 = vld [vmem:[#allocation4 + $0x104] ss:$8 sps:$4 sm:$0xff]  }
 0x14d   :  { %vm1126_vm6 = vcmp.gt.f32.partialorder %v1124_v15, 0.0  ;;  %v1128_v16 = vmul.f32 0.01, %v1124_v15  ;;  %v1129_v17 = vsel %vm1125_vm5, %v1123_v33, %v1127_v14  ;;  %v18347_v33 = vld [vmem:[#allocation4 + $0x54] ss:$8 sps:$4 sm:$0xff]  }
 0x14e   :  { %v18357_v14 = vld [vmem:[#allocation4 + $0x110] ss:$8 sps:$4 sm:$0xff]   ;;  %v18365_v39 = vld [vmem:[#allocation4 + $0x44] ss:$8 sps:$4 sm:$0xff]  }
 0x14f   :  { %v1130_v20 = vsel %vm1126_vm6, %v1124_v15, %v1128_v16  ;;  %3365 = vmatpush1.bf16.msra.mxu0 %v17525_v21  ;;  %3485 = vmatpush1.bf16.msra.mxu1 %v18094_v48  ;;  %v17530_v48 = vld [vmem:[#allocation4 + $0x64] ss:$8 sps:$4 sm:$0xff]   ;;  %v18359_v15 = vld [vmem:[#allocation4 + $0x50] ss:$8 sps:$4 sm:$0xff]   ;;  %v18377_v21 = vld [vmem:[#allocation4 + $0x40] ss:$8 sps:$4 sm:$0xff]  }
 0x150   :  { %v14775_v24 = vpack.c.bf16 %v1130_v20, %v1129_v17  ;;  %3366 = vmatprep.subr.bf16.mxu0 %v17526_v25  ;;  %3486 = vmatprep.subr.bf16.mxu1 %v18104_v50  ;;  %v18289_v50 = vld [vmem:[#allocation4 + $0xb4] ss:$8 sps:$4 sm:$0xff]   ;;  %v18375_v20 = vld [vmem:[#allocation4 + $0x100] ss:$8 sps:$4 sm:$0xff]  }
 0x152   :  { %v1142_v44 = vrot.slane %v14775_v24, %v18171_v41 }
 0x153   :  { %3367 = vmatpush1.bf16.msra.mxu0 %v17527_v29  ;;  %3487 = vmatpush1.bf16.msra.mxu1 %v18108_v52  ;;  %v15011_v52 = vld [vmem:[%s21345_s0 + $0x10] sm:$0x1]  ;;  %v18385_v29 = vld [vmem:[#allocation4 + $0x34] ss:$8 sps:$4 sm:$0xff]  }
 0x154   :  { %14776 = vst.sshfl [vmem:[#allocation2 + $0x4] sm:$0x5 pattern:$0x73625140] %v1142_v44  ;;  %3368 = vmatprep.subr.bf16.mxu0 %v17528_v46  ;;  %3488 = vmatprep.subr.bf16.mxu1 %v18116_v55  ;;  %v15025_v55 = vld [vmem:[%s21345_s0 + $0x11] sm:$0x1] }
 0x155   :  { %v18383_v44 = vld [vmem:[#allocation4 + $0xf4] ss:$8 sps:$4 sm:$0xff]  }
 0x157   :  { %3369 = vmatpush1.bf16.msra.mxu0 %v17529_v31  ;;  %3489 = vmatpush1.bf16.msra.mxu1 %v18120_v57  ;;  %v17532_v57 = vld [vmem:[#allocation4 + $0x54] ss:$8 sps:$4 sm:$0xff]  }
 0x158   :  { %3370 = vmatprep.subr.bf16.mxu0 %v17530_v48  ;;  %3490 = vmatprep.subr.bf16.mxu1 %v18128_v60  ;;  %v18301_v60 = vld [vmem:[#allocation4 + $0xa4] ss:$8 sps:$4 sm:$0xff]  }
 0x15b   :  { %3371 = vmatpush1.bf16.msra.mxu0 %v17531_v18  ;;  %3491 = vmatpush1.bf16.msra.mxu1 %v18132_v62  ;;  %v17533_v62 = vld [vmem:[#allocation4 + $0x50] ss:$8 sps:$4 sm:$0xff]  }
 0x15c   :  { %3628 = vmatprep.subr.bf16.mxu0 %v17532_v57  ;;  %3759 = vmatprep.subr.bf16.mxu1 %v18289_v50  ;;  %v18389_v18 = vld [vmem:[#allocation4 + $0xf0] ss:$8 sps:$4 sm:$0xff]  }
 0x15d   :  { %v18393_v57 = vld [vmem:[#allocation4 + $0x30] ss:$8 sps:$4 sm:$0xff]  }
 0x15e   :  { %v1264_v22 = vpop.f32.mrf.mxu0  ;;  %v18303_v23 = vpop.f32.mrf.mxu1  ;;  %15024 = vmatmul.mubr.msk.bf16.vlgmr.msra.gmra.mxu0 %vm149_vm0, %v15011_v52  ;;  %15038 = vmatmul.mubr.msk.bf16.vlgmr.msra.gmra.mxu1 %vm149_vm0, %v15025_v55 }
 0x15f   :  { %3629 = vmatpush1.bf16.msra.mxu0 %v17533_v62  ;;  %3760 = vmatpush1.bf16.msra.mxu1 %v18298_v19  ;;  %v1282_v10 = vadd.f32 %v1275_v5, %v1264_v22  ;;  %v18399_v62 = vld [vmem:[#allocation4 + $0x24] ss:$8 sps:$4 sm:$0xff]   ;;  %v18431_v5 = vld [vmem:[#allocation4 + $0xc0] ss:$8 sps:$4 sm:$0xff]  }
 0x160   :  { %v1266_v32 = vpop.f32.mrf.mxu0  ;;  %v18310_v36 = vpop.f32.mrf.mxu1  ;;  %3630 = vmatprep.subr.bf16.mxu0 %v17534_v27  ;;  %3761 = vmatprep.subr.bf16.mxu1 %v18301_v60 }
 0x161   :  { %3656 = vmatprep.mubr.bf16.mxu0 %v17675_v0  ;;  %3787 = vmatprep.mubr.bf16.mxu1 %v17675_v0  ;;  %v1283_v4 = vadd.f32 %v1279_v59, %v1266_v32  ;;  %v18433_v59 = vld [vmem:[#allocation4] ss:$8 sps:$4 sm:$0xff]  }
 0x162   :  { %v1399_v30 = vpop.f32.mrf.mxu1  ;;  %v1268_v40 = vpop.f32.mrf.mxu0 }
 0x163   :  { %3631 = vmatpush1.bf16.msra.mxu0 %v17535_v43  ;;  %3762 = vmatpush1.bf16.msra.mxu1 %v18308_v26  ;;  %v1403_v16 = vadd.f32 %v18310_v36, %v1283_v4  ;;  %v18403_v40 = vld [vmem:[#allocation4 + $0xe0] ss:$8 sps:$4 sm:$0xff]  }
 0x164   :  { %v1400_v35 = vpop.f32.mrf.mxu1  ;;  %3632 = vmatprep.subr.bf16.mxu0 %v17536_v37  ;;  %3763 = vmatprep.subr.bf16.mxu1 %v18313_v28  ;;  %v1269_v45 = vpop.f32.mrf.mxu0  ;;  %v18405_v43 = vld [vmem:[#allocation4 + $0x20] ss:$8 sps:$4 sm:$0xff]   ;;  %v18410_v37 = vld [vmem:[#allocation4 + $0xd4] ss:$8 sps:$4 sm:$0xff]  }
 0x165   :  { %v18412_v45 = vld [vmem:[#allocation4 + $0x14] ss:$8 sps:$4 sm:$0xff]   ;;  %v15085_v4 = vld [vmem:[%s21345_s0 + $0x13] sm:$0x1] }
 0x167   :  { %3633 = vmatpush1.bf16.msra.mxu0 %v17537_v47  ;;  %3764 = vmatpush1.bf16.msra.mxu1 %v18318_v34  ;;  %v18416_v47 = vld [vmem:[#allocation4 + $0xd0] ss:$8 sps:$4 sm:$0xff]  }
 0x168   :  { %3634 = vmatprep.subr.bf16.mxu0 %v17538_v51  ;;  %3765 = vmatprep.subr.bf16.mxu1 %v18321_v38  ;;  %v18418_v51 = vld [vmem:[#allocation4 + $0x10] ss:$8 sps:$4 sm:$0xff]  }
 0x16b   :  { %3635 = vmatpush1.bf16.msra.mxu0 %v17539_v58  ;;  %3766 = vmatpush1.bf16.msra.mxu1 %v18324_v49  ;;  %v18424_v58 = vld [vmem:[#allocation4 + $0x4] ss:$8 sps:$4 sm:$0xff]  }
 0x16c   :  { %3636 = vmatprep.subr.bf16.mxu0 %v17540_v2  ;;  %3767 = vmatprep.subr.bf16.mxu1 %v18327_v53  ;;  %v1552_v2 = vld [vmem:[%s21347_s2] sm:$0x3] }
 0x16f   :  { %3637 = vmatpush1.bf16.msra.mxu0 %v17541_v7  ;;  %3768 = vmatpush1.bf16.msra.mxu1 %v18333_v54  ;;  %v1674_v7 = vrot.slane %v1552_v2, %v18138_v1 }
 0x170   :  { %3638 = vmatprep.subr.bf16.mxu0 %v18130_v61  ;;  %3769 = vmatprep.subr.bf16.mxu1 %v18336_v3  ;;  %v15055_v61 = vld [vmem:[%s21345_s0 + $0x12] sm:$0x1] }
 0x173   :  { %3639 = vmatpush1.bf16.msra.mxu0 %v18134_v63  ;;  %3770 = vmatpush1.bf16.msra.mxu1 %v18341_v8  ;;  %v1402_v63 = vadd.f32 %v18303_v23, %v1282_v10  ;;  %v18397_v23 = vld [vmem:[#allocation4 + $0xe4] ss:$8 sps:$4 sm:$0xff]   ;;  %v1678_v10 = vrot.slane %v1552_v2, %v18151_v6 }
 0x174   :  { %3879 = vmatprep.subr.bf16.mxu0 %v18345_v9  ;;  %4027 = vmatprep.subr.bf16.mxu1 %v18347_v33 }
 0x176   :  { %v1515_v12 = vpop.f32.mrf.mxu0  ;;  %v18368_v42 = vpop.f32.mrf.mxu1  ;;  %15054 = vmatmul.mubr.msk.bf16.vlgmr.msra.gmra.mxu0 %vm149_vm0, %v15041_v13  ;;  %15068 = vmatmul.mubr.msk.bf16.vlgmr.msra.gmra.mxu1 %vm149_vm0, %v15055_v61  ;;  %v15069_v13 = vld [vmem:[%s21345_s0 + $0x13] sm:$0x1] }
 0x177   :  { %v1522_v17 = vadd.f32 %v1515_v12, %v1402_v63  ;;  %3880 = vmatpush1.bf16.msra.mxu0 %v18357_v14  ;;  %4028 = vmatpush1.bf16.msra.mxu1 %v18359_v15  ;;  %v1681_v61 = vadd.f32 %v1674_v7, %v18368_v42  ;;  %v15099_v7 = vld [vmem:[%s21345_s0 + $0x14] sm:$0x1] }
 0x178   :  { %v1517_v24 = vpop.f32.mrf.mxu0  ;;  %v18379_v25 = vpop.f32.mrf.mxu1  ;;  %3881 = vmatprep.subr.bf16.mxu0 %v18363_v11  ;;  %4029 = vmatprep.subr.bf16.mxu1 %v18365_v39 }
 0x179   :  { %v1526_v46 = vmul.f32 0.01, %v1522_v17  ;;  %v1523_v31 = vadd.f32 %v1517_v24, %v1403_v16  ;;  %3907 = vmatprep.mubr.bf16.mxu0 %v17675_v0  ;;  %4055 = vmatprep.mubr.bf16.mxu1 %v17675_v0  ;;  %vm1524_vm7 = vcmp.gt.f32.partialorder %v1522_v17, 0.0  ;;  %v1682_v16 = vadd.f32 %v1678_v10, %v18379_v25  ;;  %v15113_v10 = vld [vmem:[%s21345_s0 + $0x15] sm:$0x1] }
 0x17a   :  { %v1667_v48 = vpop.f32.mrf.mxu1  ;;  %v1519_v52 = vpop.f32.mrf.mxu0 }
 0x17b   :  { %vm1525_vm8 = vcmp.gt.f32.partialorder %v1523_v31, 0.0  ;;  %v1527_v55 = vmul.f32 0.01, %v1523_v31  ;;  %3882 = vmatpush1.bf16.msra.mxu0 %v18375_v20  ;;  %4030 = vmatpush1.bf16.msra.mxu1 %v18377_v21  ;;  %v1528_v36 = vsel %vm1524_vm7, %v1522_v17, %v1526_v46 }
 0x17c   :  { %v1668_v22 = vpop.f32.mrf.mxu1  ;;  %3883 = vmatprep.subr.bf16.mxu0 %v18383_v44  ;;  %4031 = vmatprep.subr.bf16.mxu1 %v18385_v29  ;;  %v1520_v32 = vpop.f32.mrf.mxu0 }
 0x17d   :  { %v1529_v27 = vsel %vm1525_vm8, %v1523_v31, %v1527_v55 }
 0x17e   :  { %v14819_v30 = vpack.c.bf16 %v1529_v27, %v1528_v36 }
 0x17f   :  { %3884 = vmatpush1.bf16.msra.mxu0 %v18389_v18  ;;  %4032 = vmatpush1.bf16.msra.mxu1 %v18393_v57 }
 0x180   :  { %v1541_v35 = vrot.slane %v14819_v30, %v18171_v41  ;;  %3885 = vmatprep.subr.bf16.mxu0 %v18397_v23  ;;  %4033 = vmatprep.subr.bf16.mxu1 %v18399_v62 }
 0x182   :  { %14820 = vst.sshfl [vmem:[#allocation2 + $0x6] sm:$0x5 pattern:$0x73625140] %v1541_v35 }
 0x183   :  { %3886 = vmatpush1.bf16.msra.mxu0 %v18403_v40  ;;  %4034 = vmatpush1.bf16.msra.mxu1 %v18405_v43 }
 0x184   :  { %3887 = vmatprep.subr.bf16.mxu0 %v18410_v37  ;;  %4035 = vmatprep.subr.bf16.mxu1 %v18412_v45 }
 0x187   :  { %3888 = vmatpush1.bf16.msra.mxu0 %v18416_v47  ;;  %4036 = vmatpush1.bf16.msra.mxu1 %v18418_v51 }
 0x188   :  { %3889 = vmatprep.subr.bf16.mxu0 %v18422_v56  ;;  %4037 = vmatprep.subr.bf16.mxu1 %v18424_v58 }
 0x18b   :  { %3890 = vmatpush1.bf16.msra.mxu0 %v18431_v5  ;;  %4038 = vmatpush1.bf16.msra.mxu1 %v18433_v59 }
 0x18c   :  { %4158 = vmatprep.subr.bf16.mxu0 %v18289_v50  ;;  %4278 = vmatprep.subr.bf16.mxu1 %v18345_v9 }
 0x18e   :  { %v1794_v63 = vpop.f32.mrf.mxu0  ;;  %v1914_v12 = vpop.f32.mrf.mxu1  ;;  %15082 = vmatmul.mubr.msk.bf16.vlgmr.msra.gmra.mxu0 %vm149_vm0, %v15069_v13  ;;  %15098 = vmatmul.mubr.msk.bf16.vlgmr.msra.gmra.mxu1 %vm149_vm0, %v15085_v4 }
 0x18f   :  { %v1801_v17 = vadd.f32 %v1794_v63, %v1681_v61  ;;  %4159 = vmatpush1.bf16.msra.mxu0 %v18298_v19  ;;  %4279 = vmatpush1.bf16.msra.mxu1 %v18357_v14 }
 0x190   :  { %v1796_v24 = vpop.f32.mrf.mxu0  ;;  %v1916_v46 = vpop.f32.mrf.mxu1  ;;  %4160 = vmatprep.subr.bf16.mxu0 %v18301_v60  ;;  %4280 = vmatprep.subr.bf16.mxu1 %v18363_v11 }
 0x191   :  { %v1921_v42 = vadd.f32 %v1914_v12, %v1801_v17  ;;  %v1802_v31 = vadd.f32 %v1796_v24, %v1682_v16  ;;  %4186 = vmatprep.mubr.bf16.mxu0 %v17675_v0  ;;  %4306 = vmatprep.mubr.bf16.mxu1 %v17675_v0 }
 0x192   :  { %v1918_v48 = vpop.f32.mrf.mxu1  ;;  %v1798_v52 = vpop.f32.mrf.mxu0 }
 0x193   :  { %v1925_v25 = vmul.f32 0.01, %v1921_v42  ;;  %v1922_v55 = vadd.f32 %v1916_v46, %v1802_v31  ;;  %4161 = vmatpush1.bf16.msra.mxu0 %v18308_v26  ;;  %4281 = vmatpush1.bf16.msra.mxu1 %v18375_v20  ;;  %vm1923_vm9 = vcmp.gt.f32.partialorder %v1921_v42, 0.0  ;;  %v1951_v46 = vld [vmem:[%s21347_s2] sm:$0x3] }
 0x194   :  { %v1919_v22 = vpop.f32.mrf.mxu1  ;;  %4162 = vmatprep.subr.bf16.mxu0 %v18313_v28  ;;  %4282 = vmatprep.subr.bf16.mxu1 %v18383_v44  ;;  %v1799_v32 = vpop.f32.mrf.mxu0  ;;  %v2077_v31 = vrot.slane %v1951_v46, %v18151_v6 }
 0x195   :  { %vm1924_vm10 = vcmp.gt.f32.partialorder %v1922_v55, 0.0  ;;  %v1926_v36 = vmul.f32 0.01, %v1922_v55  ;;  %v1927_v27 = vsel %vm1923_vm9, %v1921_v42, %v1925_v25  ;;  %v2073_v42 = vrot.slane %v1951_v46, %v18138_v1  ;;  %v15129_v25 = vld [vmem:[%s21345_s0 + $0x15] sm:$0x1] }
 0x197   :  { %v1928_v30 = vsel %vm1924_vm10, %v1922_v55, %v1926_v36  ;;  %4163 = vmatpush1.bf16.msra.mxu0 %v18318_v34  ;;  %4283 = vmatpush1.bf16.msra.mxu1 %v18389_v18  ;;  %v15143_v55 = vld [vmem:[%s21345_s0 + $0x16] sm:$0x1] }
 0x198   :  { %v14863_v35 = vpack.c.bf16 %v1928_v30, %v1927_v27  ;;  %4164 = vmatprep.subr.bf16.mxu0 %v18321_v38  ;;  %4284 = vmatprep.subr.bf16.mxu1 %v18397_v23 }
 0x19a   :  { %v1940_v2 = vrot.slane %v14863_v35, %v18171_v41 }
 0x19b   :  { %4165 = vmatpush1.bf16.msra.mxu0 %v18324_v49  ;;  %4285 = vmatpush1.bf16.msra.mxu1 %v18403_v40 }
 0x19c   :  { %14864 = vst.sshfl [vmem:[#allocation2 + $0x8] sm:$0x5 pattern:$0x73625140] %v1940_v2  ;;  %4166 = vmatprep.subr.bf16.mxu0 %v18327_v53  ;;  %4286 = vmatprep.subr.bf16.mxu1 %v18410_v37 }
 0x19f   :  { %4167 = vmatpush1.bf16.msra.mxu0 %v18333_v54  ;;  %4287 = vmatpush1.bf16.msra.mxu1 %v18416_v47 }
 0x1a0   :  { %4168 = vmatprep.subr.bf16.mxu0 %v18336_v3  ;;  %4288 = vmatprep.subr.bf16.mxu1 %v18422_v56 }
 0x1a3   :  { %4169 = vmatpush1.bf16.msra.mxu0 %v18341_v8  ;;  %4289 = vmatpush1.bf16.msra.mxu1 %v18431_v5 }
 0x1a4   :  { %4426 = vmatprep.subr.bf16.mxu0 %v18347_v33  ;;  %4557 = vmatprep.subr.bf16.mxu1 %v18289_v50 }
 0x1a6   :  { %v2062_v13 = vpop.f32.mrf.mxu0  ;;  %v2193_v4 = vpop.f32.mrf.mxu1  ;;  %15112 = vmatmul.mubr.msk.bf16.vlgmr.msra.gmra.mxu0 %vm149_vm0, %v15099_v7  ;;  %15126 = vmatmul.mubr.msk.bf16.vlgmr.msra.gmra.mxu1 %vm149_vm0, %v15113_v10 }
 0x1a7   :  { %4427 = vmatpush1.bf16.msra.mxu0 %v18359_v15  ;;  %4558 = vmatpush1.bf16.msra.mxu1 %v18298_v19  ;;  %v2080_v48 = vadd.f32 %v2073_v42, %v2062_v13  ;;  %v2350_v42 = vld [vmem:[%s21347_s2] sm:$0x3] }
 0x1a8   :  { %v2064_v61 = vpop.f32.mrf.mxu0  ;;  %v2195_v63 = vpop.f32.mrf.mxu1  ;;  %4428 = vmatprep.subr.bf16.mxu0 %v18365_v39  ;;  %4559 = vmatprep.subr.bf16.mxu1 %v18301_v60 }
 0x1a9   :  { %4454 = vmatprep.mubr.bf16.mxu0 %v17675_v0  ;;  %4585 = vmatprep.mubr.bf16.mxu1 %v17675_v0  ;;  %v2081_v52 = vadd.f32 %v2077_v31, %v2064_v61  ;;  %v2200_v22 = vadd.f32 %v2193_v4, %v2080_v48  ;;  %v2472_v31 = vrot.slane %v2350_v42, %v18138_v1 }
 0x1aa   :  { %v2197_v12 = vpop.f32.mrf.mxu1  ;;  %v2066_v16 = vpop.f32.mrf.mxu0  ;;  %v2476_v48 = vrot.slane %v2350_v42, %v18151_v6  ;;  %v18673_v42 = vld [vmem:[#allocation4 + $0x44] ss:$8 sps:$4 sm:$0xff]  }
 0x1ab   :  { %4429 = vmatpush1.bf16.msra.mxu0 %v18377_v21  ;;  %4560 = vmatpush1.bf16.msra.mxu1 %v18308_v26  ;;  %v2201_v27 = vadd.f32 %v2195_v63, %v2081_v52  ;;  %v15157_v52 = vld [vmem:[%s21345_s0 + $0x17] sm:$0x1] }
 0x1ac   :  { %v2198_v17 = vpop.f32.mrf.mxu1  ;;  %4430 = vmatprep.subr.bf16.mxu0 %v18385_v29  ;;  %4561 = vmatprep.subr.bf16.mxu1 %v18313_v28  ;;  %v2067_v24 = vpop.f32.mrf.mxu0 }
 0x1af   :  { %4431 = vmatpush1.bf16.msra.mxu0 %v18393_v57  ;;  %4562 = vmatpush1.bf16.msra.mxu1 %v18318_v34 }
 0x1b0   :  { %4432 = vmatprep.subr.bf16.mxu0 %v18399_v62  ;;  %4563 = vmatprep.subr.bf16.mxu1 %v18321_v38 }
 0x1b3   :  { %4433 = vmatpush1.bf16.msra.mxu0 %v18405_v43  ;;  %4564 = vmatpush1.bf16.msra.mxu1 %v18324_v49 }
 0x1b4   :  { %4434 = vmatprep.subr.bf16.mxu0 %v18412_v45  ;;  %4565 = vmatprep.subr.bf16.mxu1 %v18327_v53 }
 0x1b7   :  { %4435 = vmatpush1.bf16.msra.mxu0 %v18418_v51  ;;  %4566 = vmatpush1.bf16.msra.mxu1 %v18333_v54 }
 0x1b8   :  { %4436 = vmatprep.subr.bf16.mxu0 %v18424_v58  ;;  %4567 = vmatprep.subr.bf16.mxu1 %v18336_v3 }
 0x1bb   :  { %4437 = vmatpush1.bf16.msra.mxu0 %v18433_v59  ;;  %4568 = vmatpush1.bf16.msra.mxu1 %v18341_v8 }
 0x1bc   :  { %4677 = vmatprep.subr.bf16.mxu0 %v18345_v9  ;;  %4825 = vmatprep.subr.bf16.mxu1 %v18347_v33 }
 0x1be   :  { %v2313_v32 = vpop.f32.mrf.mxu0  ;;  %v2461_v36 = vpop.f32.mrf.mxu1  ;;  %15142 = vmatmul.mubr.msk.bf16.vlgmr.msra.gmra.mxu0 %vm149_vm0, %v15129_v25  ;;  %15156 = vmatmul.mubr.msk.bf16.vlgmr.msra.gmra.mxu1 %vm149_vm0, %v15143_v55  ;;  %v15173_v25 = vld [vmem:[%s21345_s0 + $0x17] sm:$0x1] }
 0x1bf   :  { %v2320_v30 = vadd.f32 %v2313_v32, %v2200_v22  ;;  %4678 = vmatpush1.bf16.msra.mxu0 %v18357_v14  ;;  %4826 = vmatpush1.bf16.msra.mxu1 %v18359_v15  ;;  %v2479_v55 = vadd.f32 %v2472_v31, %v2461_v36 }
 0x1c0   :  { %v2315_v35 = vpop.f32.mrf.mxu0  ;;  %v2463_v2 = vpop.f32.mrf.mxu1  ;;  %4679 = vmatprep.subr.bf16.mxu0 %v18363_v11  ;;  %4827 = vmatprep.subr.bf16.mxu1 %v18365_v39 }
 0x1c1   :  { %v2324_v7 = vmul.f32 0.01, %v2320_v30  ;;  %v2321_v10 = vadd.f32 %v2315_v35, %v2201_v27  ;;  %4705 = vmatprep.mubr.bf16.mxu0 %v17675_v0  ;;  %4853 = vmatprep.mubr.bf16.mxu1 %v17675_v0  ;;  %vm2322_vm11 = vcmp.gt.f32.partialorder %v2320_v30, 0.0  ;;  %v2480_v27 = vadd.f32 %v2476_v48, %v2463_v2 }
 0x1c2   :  { %v2465_v13 = vpop.f32.mrf.mxu1  ;;  %v2317_v4 = vpop.f32.mrf.mxu0 }
 0x1c3   :  { %vm2323_vm12 = vcmp.gt.f32.partialorder %v2321_v10, 0.0  ;;  %v2325_v61 = vmul.f32 0.01, %v2321_v10  ;;  %4680 = vmatpush1.bf16.msra.mxu0 %v18375_v20  ;;  %4828 = vmatpush1.bf16.msra.mxu1 %v18377_v21  ;;  %v2326_v16 = vsel %vm2322_vm11, %v2320_v30, %v2324_v7 }
 0x1c4   :  { %v2466_v63 = vpop.f32.mrf.mxu1  ;;  %4681 = vmatprep.subr.bf16.mxu0 %v18383_v44  ;;  %4829 = vmatprep.subr.bf16.mxu1 %v18385_v29  ;;  %v2318_v12 = vpop.f32.mrf.mxu0 }
 0x1c5   :  { %v2327_v17 = vsel %vm2323_vm12, %v2321_v10, %v2325_v61  ;;  %v18649_v63 = vld [vmem:[#allocation4 + $0x60] ss:$8 sps:$4 sm:$0xff]  }
 0x1c6   :  { %v14907_v24 = vpack.c.bf16 %v2327_v17, %v2326_v16  ;;  %v15217_v16 = vld [vmem:[%s21345_s0 + $0x19] sm:$0x1] }
 0x1c7   :  { %4682 = vmatpush1.bf16.msra.mxu0 %v18389_v18  ;;  %4830 = vmatpush1.bf16.msra.mxu1 %v18393_v57 }
 0x1c8   :  { %v2339_v46 = vrot.slane %v14907_v24, %v18171_v41  ;;  %4683 = vmatprep.subr.bf16.mxu0 %v18397_v23  ;;  %4831 = vmatprep.subr.bf16.mxu1 %v18399_v62  ;;  %v18667_v24 = vld [vmem:[#allocation4 + $0x50] ss:$8 sps:$4 sm:$0xff]  }
 0x1ca   :  { %14908 = vst.sshfl [vmem:[#allocation2 + $0xa] sm:$0x5 pattern:$0x73625140] %v2339_v46  ;;  %v18671_v46 = vld [vmem:[#allocation4 + $0x104] ss:$8 sps:$4 sm:$0xff]  }
 0x1cb   :  { %4684 = vmatpush1.bf16.msra.mxu0 %v18403_v40  ;;  %4832 = vmatpush1.bf16.msra.mxu1 %v18405_v43 }
 0x1cc   :  { %4685 = vmatprep.subr.bf16.mxu0 %v18410_v37  ;;  %4833 = vmatprep.subr.bf16.mxu1 %v18412_v45 }
 0x1cf   :  { %4686 = vmatpush1.bf16.msra.mxu0 %v18416_v47  ;;  %4834 = vmatpush1.bf16.msra.mxu1 %v18418_v51 }
 0x1d0   :  { %4687 = vmatprep.subr.bf16.mxu0 %v18422_v56  ;;  %4835 = vmatprep.subr.bf16.mxu1 %v18424_v58 }
 0x1d3   :  { %4688 = vmatpush1.bf16.msra.mxu0 %v18431_v5  ;;  %4836 = vmatpush1.bf16.msra.mxu1 %v18433_v59 }
 0x1d4   :  { %4956 = vmatprep.subr.bf16.mxu0 %v18289_v50  ;;  %5076 = vmatprep.subr.bf16.mxu1 %v18345_v9 }
 0x1d6   :  { %v2592_v22 = vpop.f32.mrf.mxu0  ;;  %v2712_v32 = vpop.f32.mrf.mxu1  ;;  %15170 = vmatmul.mubr.msk.bf16.vlgmr.msra.gmra.mxu0 %vm149_vm0, %v15157_v52  ;;  %15186 = vmatmul.mubr.msk.bf16.vlgmr.msra.gmra.mxu1 %vm149_vm0, %v15173_v25 }
 0x1d7   :  { %v2599_v30 = vadd.f32 %v2592_v22, %v2479_v55  ;;  %4957 = vmatpush1.bf16.msra.mxu0 %v18298_v19  ;;  %5077 = vmatpush1.bf16.msra.mxu1 %v18357_v14  ;;  %v18681_v55 = vld [vmem:[#allocation4 + $0x100] ss:$8 sps:$4 sm:$0xff]  }
 0x1d8   :  { %v2594_v35 = vpop.f32.mrf.mxu0  ;;  %v2714_v7 = vpop.f32.mrf.mxu1  ;;  %4958 = vmatprep.subr.bf16.mxu0 %v18301_v60  ;;  %5078 = vmatprep.subr.bf16.mxu1 %v18363_v11  ;;  %v18683_v22 = vld [vmem:[#allocation4 + $0x40] ss:$8 sps:$4 sm:$0xff]  }
 0x1d9   :  { %v2719_v50 = vadd.f32 %v2712_v32, %v2599_v30  ;;  %v2600_v9 = vadd.f32 %v2594_v35, %v2480_v27  ;;  %4984 = vmatprep.mubr.bf16.mxu0 %v17675_v0  ;;  %5104 = vmatprep.mubr.bf16.mxu1 %v17675_v0  ;;  %v18689_v30 = vld [vmem:[#allocation4 + $0xf4] ss:$8 sps:$4 sm:$0xff]  }
 0x1da   :  { %v2716_v36 = vpop.f32.mrf.mxu1  ;;  %v2596_v10 = vpop.f32.mrf.mxu0  ;;  %v18691_v35 = vld [vmem:[#allocation4 + $0x34] ss:$8 sps:$4 sm:$0xff]  }
 0x1db   :  { %v2723_v2 = vmul.f32 0.01, %v2719_v50  ;;  %v2720_v13 = vadd.f32 %v2714_v7, %v2600_v9  ;;  %4959 = vmatpush1.bf16.msra.mxu0 %v18308_v26  ;;  %5079 = vmatpush1.bf16.msra.mxu1 %v18375_v20  ;;  %vm2721_vm13 = vcmp.gt.f32.partialorder %v2719_v50, 0.0  ;;  %v18695_v36 = vld [vmem:[#allocation4 + $0xf0] ss:$8 sps:$4 sm:$0xff]  }
 0x1dc   :  { %v2717_v19 = vpop.f32.mrf.mxu1  ;;  %4960 = vmatprep.subr.bf16.mxu0 %v18313_v28  ;;  %5080 = vmatprep.subr.bf16.mxu1 %v18383_v44  ;;  %v2597_v60 = vpop.f32.mrf.mxu0  ;;  %v18590_v28 = vld [vmem:[#allocation4 + $0xb4] ss:$8 sps:$4 sm:$0xff]  }
 0x1dd   :  { %vm2722_vm14 = vcmp.gt.f32.partialorder %v2720_v13, 0.0  ;;  %v2724_v14 = vmul.f32 0.01, %v2720_v13  ;;  %v2725_v11 = vsel %vm2721_vm13, %v2719_v50, %v2723_v2  ;;  %v18703_v60 = vld [vmem:[#allocation4 + $0xe4] ss:$8 sps:$4 sm:$0xff]  }
 0x1df   :  { %v2726_v4 = vsel %vm2722_vm14, %v2720_v13, %v2724_v14  ;;  %4961 = vmatpush1.bf16.msra.mxu0 %v18318_v34  ;;  %5081 = vmatpush1.bf16.msra.mxu1 %v18389_v18  ;;  %v15187_v34 = vld [vmem:[%s21345_s0 + $0x18] sm:$0x1]  ;;  %v18699_v13 = vld [vmem:[#allocation4 + $0x30] ss:$8 sps:$4 sm:$0xff]   ;;  %v18705_v14 = vld [vmem:[#allocation4 + $0x24] ss:$8 sps:$4 sm:$0xff]  }
 0x1e0   :  { %v14951_v61 = vpack.c.bf16 %v2726_v4, %v2725_v11  ;;  %4962 = vmatprep.subr.bf16.mxu0 %v18321_v38  ;;  %5082 = vmatprep.subr.bf16.mxu1 %v18397_v23  ;;  %v15201_v38 = vld [vmem:[%s21345_s0 + $0x19] sm:$0x1] }
 0x1e2   :  { %v2738_v26 = vrot.slane %v14951_v61, %v18171_v41 }
 0x1e3   :  { %4963 = vmatpush1.bf16.msra.mxu0 %v18324_v49  ;;  %5083 = vmatpush1.bf16.msra.mxu1 %v18403_v40  ;;  %v18600_v49 = vld [vmem:[#allocation4 + $0xb0] ss:$8 sps:$4 sm:$0xff]  }
 0x1e4   :  { %14952 = vst.sshfl [vmem:[#allocation2 + $0xc] sm:$0x5 pattern:$0x73625140] %v2738_v26  ;;  %4964 = vmatprep.subr.bf16.mxu0 %v18327_v53  ;;  %5084 = vmatprep.subr.bf16.mxu1 %v18410_v37  ;;  %v18604_v53 = vld [vmem:[#allocation4 + $0xa4] ss:$8 sps:$4 sm:$0xff]  }
 0x1e7   :  { %4965 = vmatpush1.bf16.msra.mxu0 %v18333_v54  ;;  %5085 = vmatpush1.bf16.msra.mxu1 %v18416_v47  ;;  %v18628_v47 = vld [vmem:[#allocation4 + $0x80] ss:$8 sps:$4 sm:$0xff]  }
 0x1e8   :  { %4966 = vmatprep.subr.bf16.mxu0 %v18336_v3  ;;  %5086 = vmatprep.subr.bf16.mxu1 %v18422_v56  ;;  %v18639_v56 = vld [vmem:[#allocation4 + $0x70] ss:$8 sps:$4 sm:$0xff]  }
 0x1eb   :  { %4967 = vmatpush1.bf16.msra.mxu0 %v18341_v8  ;;  %5087 = vmatpush1.bf16.msra.mxu1 %v18431_v5  ;;  %v18610_v8 = vld [vmem:[#allocation4 + $0xa0] ss:$8 sps:$4 sm:$0xff]  }
 0x1ec   :  { %5224 = vmatprep.subr.bf16.mxu0 %v18347_v33  ;;  %5355 = vmatprep.subr.bf16.mxu1 %v18590_v28  ;;  %v18614_v33 = vld [vmem:[#allocation4 + $0x94] ss:$8 sps:$4 sm:$0xff]  }
 0x1ee   :  { %v2860_v54 = vpop.f32.mrf.mxu0  ;;  %v2991_v3 = vpop.f32.mrf.mxu1  ;;  %15200 = vmatmul.mubr.msk.bf16.vlgmr.msra.gmra.mxu0 %vm149_vm0, %v15187_v34  ;;  %15214 = vmatmul.mubr.msk.bf16.vlgmr.msra.gmra.mxu1 %vm149_vm0, %v15201_v38  ;;  %v18709_v34 = vld [vmem:[#allocation4 + $0xe0] ss:$8 sps:$4 sm:$0xff]  }
 0x1ef   :  { %5225 = vmatpush1.bf16.msra.mxu0 %v18359_v15  ;;  %5356 = vmatpush1.bf16.msra.mxu1 %v18600_v49  ;;  %v18620_v15 = vld [vmem:[#allocation4 + $0x90] ss:$8 sps:$4 sm:$0xff]   ;;  %v18711_v38 = vld [vmem:[#allocation4 + $0x20] ss:$8 sps:$4 sm:$0xff]  }
 0x1f0   :  { %v2862_v20 = vpop.f32.mrf.mxu0  ;;  %v2993_v44 = vpop.f32.mrf.mxu1  ;;  %5226 = vmatprep.subr.bf16.mxu0 %v18365_v39  ;;  %5357 = vmatprep.subr.bf16.mxu1 %v18604_v53  ;;  %v18624_v39 = vld [vmem:[#allocation4 + $0x84] ss:$8 sps:$4 sm:$0xff]  }
 0x1f1   :  { %5252 = vmatprep.mubr.bf16.mxu0 %v17675_v0  ;;  %5383 = vmatprep.mubr.bf16.mxu1 %v17675_v0 }
 0x1f2   :  { %v2995_v18 = vpop.f32.mrf.mxu1  ;;  %v2864_v23 = vpop.f32.mrf.mxu0 }
 0x1f3   :  { %5227 = vmatpush1.bf16.msra.mxu0 %v18377_v21  ;;  %5358 = vmatpush1.bf16.msra.mxu1 %v18610_v8  ;;  %v18632_v21 = vld [vmem:[#allocation4 + $0x74] ss:$8 sps:$4 sm:$0xff]   ;;  %v18724_v18 = vld [vmem:[#allocation4 + $0x10] ss:$8 sps:$4 sm:$0xff]   ;;  %v18728_v23 = vld [vmem:[#allocation4 + $0xc4] ss:$8 sps:$4 sm:$0xff]  }
 0x1f4   :  { %v2996_v40 = vpop.f32.mrf.mxu1  ;;  %5228 = vmatprep.subr.bf16.mxu0 %v18385_v29  ;;  %5359 = vmatprep.subr.bf16.mxu1 %v18614_v33  ;;  %v2865_v37 = vpop.f32.mrf.mxu0  ;;  %v2749_v29 = vld [vmem:[%s21347_s2] sm:$0x3] }
 0x1f5   :  { %v2875_v5 = vrot.slane %v2749_v29, %v18151_v6  ;;  %v18730_v40 = vld [vmem:[#allocation4 + $0x4] ss:$8 sps:$4 sm:$0xff]   ;;  %v3148_v37 = vld [vmem:[%s21347_s2] sm:$0x3] }
 0x1f7   :  { %5229 = vmatpush1.bf16.msra.mxu0 %v18393_v57  ;;  %5360 = vmatpush1.bf16.msra.mxu1 %v18620_v15  ;;  %v18643_v57 = vld [vmem:[#allocation4 + $0x64] ss:$8 sps:$4 sm:$0xff]   ;;  %v2879_v17 = vadd.f32 %v2875_v5, %v2862_v20  ;;  %v18718_v20 = vld [vmem:[#allocation4 + $0x14] ss:$8 sps:$4 sm:$0xff]   ;;  %v3270_v5 = vrot.slane %v3148_v37, %v18138_v1 }
 0x1f8   :  { %5230 = vmatprep.subr.bf16.mxu0 %v18399_v62  ;;  %5361 = vmatprep.subr.bf16.mxu1 %v18624_v39  ;;  %v2871_v62 = vrot.slane %v2749_v29, %v18138_v1  ;;  %v18737_v29 = vld [vmem:[#allocation4 + $0xc0] ss:$8 sps:$4 sm:$0xff]  }
 0x1f9   :  { %v2999_v52 = vadd.f32 %v2993_v44, %v2879_v17  ;;  %v18722_v44 = vld [vmem:[#allocation4 + $0xd0] ss:$8 sps:$4 sm:$0xff]   ;;  %v15261_v17 = vld [vmem:[%s21345_s0 + $0x1b] sm:$0x1] }
 0x1fa   :  { %v2878_v12 = vadd.f32 %v2871_v62, %v2860_v54  ;;  %v18739_v62 = vld [vmem:[#allocation4] ss:$8 sps:$4 sm:$0xff]  }
 0x1fb   :  { %5231 = vmatpush1.bf16.msra.mxu0 %v18405_v43  ;;  %5362 = vmatpush1.bf16.msra.mxu1 %v18628_v47  ;;  %v18653_v43 = vld [vmem:[#allocation4 + $0x114] ss:$8 sps:$4 sm:$0xff]  }
 0x1fc   :  { %5232 = vmatprep.subr.bf16.mxu0 %v18412_v45  ;;  %5363 = vmatprep.subr.bf16.mxu1 %v18632_v21  ;;  %v18655_v45 = vld [vmem:[#allocation4 + $0x54] ss:$8 sps:$4 sm:$0xff]   ;;  %v2998_v31 = vadd.f32 %v2991_v3, %v2878_v12  ;;  %v3274_v12 = vrot.slane %v3148_v37, %v18151_v6 }
 0x1fd   :  { %v18716_v3 = vld [vmem:[#allocation4 + $0xd4] ss:$8 sps:$4 sm:$0xff]  }
 0x1ff   :  { %5233 = vmatpush1.bf16.msra.mxu0 %v18418_v51  ;;  %5364 = vmatpush1.bf16.msra.mxu1 %v18639_v56  ;;  %v15231_v51 = vld [vmem:[%s21345_s0 + $0x1a] sm:$0x1] }
 0x200   :  { %5234 = vmatprep.subr.bf16.mxu0 %v18424_v58  ;;  %5365 = vmatprep.subr.bf16.mxu1 %v18643_v57  ;;  %v18665_v58 = vld [vmem:[#allocation4 + $0x110] ss:$8 sps:$4 sm:$0xff]  }
 0x203   :  { %5235 = vmatpush1.bf16.msra.mxu0 %v18433_v59  ;;  %5366 = vmatpush1.bf16.msra.mxu1 %v18649_v63 }
 0x204   :  { %5475 = vmatprep.subr.bf16.mxu0 %v18653_v43  ;;  %5623 = vmatprep.subr.bf16.mxu1 %v18655_v45 }
 0x206   :  { %v3111_v59 = vpop.f32.mrf.mxu0  ;;  %v18675_v48 = vpop.f32.mrf.mxu1  ;;  %15230 = vmatmul.mubr.msk.bf16.vlgmr.msra.gmra.mxu0 %vm149_vm0, %v15217_v16  ;;  %15244 = vmatmul.mubr.msk.bf16.vlgmr.msra.gmra.mxu1 %vm149_vm0, %v15231_v51  ;;  %v15245_v16 = vld [vmem:[%s21345_s0 + $0x1b] sm:$0x1] }
 0x207   :  { %v3118_v25 = vadd.f32 %v3111_v59, %v2998_v31  ;;  %5476 = vmatpush1.bf16.msra.mxu0 %v18665_v58  ;;  %5624 = vmatpush1.bf16.msra.mxu1 %v18667_v24  ;;  %v3277_v51 = vadd.f32 %v3270_v5, %v18675_v48  ;;  %v15275_v5 = vld [vmem:[%s21345_s0 + $0x1c] sm:$0x1] }
 0x208   :  { %v3113_v32 = vpop.f32.mrf.mxu0  ;;  %v18685_v27 = vpop.f32.mrf.mxu1  ;;  %5477 = vmatprep.subr.bf16.mxu0 %v18671_v46  ;;  %5625 = vmatprep.subr.bf16.mxu1 %v18673_v42 }
 0x209   :  { %v3122_v7 = vmul.f32 0.01, %v3118_v25  ;;  %v3119_v50 = vadd.f32 %v3113_v32, %v2999_v52  ;;  %5503 = vmatprep.mubr.bf16.mxu0 %v17675_v0  ;;  %5651 = vmatprep.mubr.bf16.mxu1 %v17675_v0  ;;  %vm3120_vm15 = vcmp.gt.f32.partialorder %v3118_v25, 0.0  ;;  %v3278_v52 = vadd.f32 %v3274_v12, %v18685_v27  ;;  %v15289_v12 = vld [vmem:[%s21345_s0 + $0x1d] sm:$0x1] }
 0x20a   :  { %v3263_v9 = vpop.f32.mrf.mxu1  ;;  %v3115_v10 = vpop.f32.mrf.mxu0 }
 0x20b   :  { %vm3121_vm1 = vcmp.gt.f32.partialorder %v3119_v50, 0.0  ;;  %v3123_v2 = vmul.f32 0.01, %v3119_v50  ;;  %5478 = vmatpush1.bf16.msra.mxu0 %v18681_v55  ;;  %5626 = vmatpush1.bf16.msra.mxu1 %v18683_v22  ;;  %v3124_v4 = vsel %vm3120_vm15, %v3118_v25, %v3122_v7 }
 0x20c   :  { %v3264_v19 = vpop.f32.mrf.mxu1  ;;  %5479 = vmatprep.subr.bf16.mxu0 %v18689_v30  ;;  %5627 = vmatprep.subr.bf16.mxu1 %v18691_v35  ;;  %v3116_v11 = vpop.f32.mrf.mxu0 }
 0x20d   :  { %v3125_v61 = vsel %vm3121_vm1, %v3119_v50, %v3123_v2 }
 0x20e   :  { %v14995_v26 = vpack.c.bf16 %v3125_v61, %v3124_v4 }
 0x20f   :  { %5480 = vmatpush1.bf16.msra.mxu0 %v18695_v36  ;;  %5628 = vmatpush1.bf16.msra.mxu1 %v18699_v13 }
 0x210   :  { %v3137_v54 = vrot.slane %v14995_v26, %v18171_v41  ;;  %5481 = vmatprep.subr.bf16.mxu0 %v18703_v60  ;;  %5629 = vmatprep.subr.bf16.mxu1 %v18705_v14 }
 0x212   :  { %14996 = vst.sshfl [vmem:[#allocation2 + $0xe] sm:$0x5 pattern:$0x73625140] %v3137_v54 }
 0x213   :  { %5482 = vmatpush1.bf16.msra.mxu0 %v18709_v34  ;;  %5630 = vmatpush1.bf16.msra.mxu1 %v18711_v38 }
 0x214   :  { %5483 = vmatprep.subr.bf16.mxu0 %v18716_v3  ;;  %5631 = vmatprep.subr.bf16.mxu1 %v18718_v20 }
 0x217   :  { %5484 = vmatpush1.bf16.msra.mxu0 %v18722_v44  ;;  %5632 = vmatpush1.bf16.msra.mxu1 %v18724_v18 }
 0x218   :  { %5485 = vmatprep.subr.bf16.mxu0 %v18728_v23  ;;  %5633 = vmatprep.subr.bf16.mxu1 %v18730_v40 }
 0x21b   :  { %5486 = vmatpush1.bf16.msra.mxu0 %v18737_v29  ;;  %5634 = vmatpush1.bf16.msra.mxu1 %v18739_v62 }
 0x21c   :  { %5754 = vmatprep.subr.bf16.mxu0 %v18590_v28  ;;  %5874 = vmatprep.subr.bf16.mxu1 %v18653_v43 }
 0x21e   :  { %v3390_v31 = vpop.f32.mrf.mxu0  ;;  %v3510_v59 = vpop.f32.mrf.mxu1  ;;  %15258 = vmatmul.mubr.msk.bf16.vlgmr.msra.gmra.mxu0 %vm149_vm0, %v15245_v16  ;;  %15274 = vmatmul.mubr.msk.bf16.vlgmr.msra.gmra.mxu1 %vm149_vm0, %v15261_v17 }
 0x21f   :  { %v3397_v25 = vadd.f32 %v3390_v31, %v3277_v51  ;;  %5755 = vmatpush1.bf16.msra.mxu0 %v18600_v49  ;;  %5875 = vmatpush1.bf16.msra.mxu1 %v18665_v58 }
 0x220   :  { %v3392_v32 = vpop.f32.mrf.mxu0  ;;  %v3512_v7 = vpop.f32.mrf.mxu1  ;;  %5756 = vmatprep.subr.bf16.mxu0 %v18604_v53  ;;  %5876 = vmatprep.subr.bf16.mxu1 %v18671_v46 }
 0x221   :  { %v3517_v48 = vadd.f32 %v3510_v59, %v3397_v25  ;;  %v3398_v50 = vadd.f32 %v3392_v32, %v3278_v52  ;;  %5782 = vmatprep.mubr.bf16.mxu0 %v17675_v0  ;;  %5902 = vmatprep.mubr.bf16.mxu1 %v17675_v0 }
 0x222   :  { %v3514_v9 = vpop.f32.mrf.mxu1  ;;  %v3394_v10 = vpop.f32.mrf.mxu0 }
 0x223   :  { %v3521_v27 = vmul.f32 0.01, %v3517_v48  ;;  %v3518_v2 = vadd.f32 %v3512_v7, %v3398_v50  ;;  %5757 = vmatpush1.bf16.msra.mxu0 %v18610_v8  ;;  %5877 = vmatpush1.bf16.msra.mxu1 %v18681_v55  ;;  %vm3519_vm2 = vcmp.gt.f32.partialorder %v3517_v48, 0.0  ;;  %v18863_v50 = vld [vmem:[#allocation6 + $0x144] ss:$8 sps:$4 sm:$0xff]  }
 0x224   :  { %v3515_v19 = vpop.f32.mrf.mxu1  ;;  %5758 = vmatprep.subr.bf16.mxu0 %v18614_v33  ;;  %5878 = vmatprep.subr.bf16.mxu1 %v18689_v30  ;;  %v3395_v11 = vpop.f32.mrf.mxu0 }
 0x225   :  { %vm3520_vm3 = vcmp.gt.f32.partialorder %v3518_v2, 0.0  ;;  %v3522_v4 = vmul.f32 0.01, %v3518_v2  ;;  %v3523_v61 = vsel %vm3519_vm2, %v3517_v48, %v3521_v27  ;;  %v18859_v48 = vld [vmem:[#allocation6 + $0x150] ss:$8 sps:$4 sm:$0xff]  }
 0x226   :  { %v18876_v19 = vld [vmem:[#allocation6 + $0x130] ss:$8 sps:$4 sm:$0xff]   ;;  %v18887_v11 = vld [vmem:[#allocation6 + $0x120] ss:$8 sps:$4 sm:$0xff]  }
 0x227   :  { %v3524_v26 = vsel %vm3520_vm3, %v3518_v2, %v3522_v4  ;;  %5759 = vmatpush1.bf16.msra.mxu0 %v18620_v15  ;;  %5879 = vmatpush1.bf16.msra.mxu1 %v18695_v36  ;;  %v18895_v4 = vld [vmem:[#allocation6 + $0x274] ss:$8 sps:$4 sm:$0xff]  }
 0x228   :  { %v15039_v54 = vpack.c.bf16 %v3524_v26, %v3523_v61  ;;  %5760 = vmatprep.subr.bf16.mxu0 %v18624_v39  ;;  %5880 = vmatprep.subr.bf16.mxu1 %v18703_v60 }
 0x22a   :  { %v3536_v37 = vrot.slane %v15039_v54, %v18171_v41  ;;  %v18906_v54 = vld [vmem:[#allocation6 + $0x110] ss:$8 sps:$4 sm:$0xff]  }
 0x22b   :  { %5761 = vmatpush1.bf16.msra.mxu0 %v18628_v47  ;;  %5881 = vmatpush1.bf16.msra.mxu1 %v18709_v34 }
 0x22c   :  { %15040 = vst.sshfl [vmem:[#allocation2 + $0x10] sm:$0x5 pattern:$0x73625140] %v3536_v37  ;;  %5762 = vmatprep.subr.bf16.mxu0 %v18632_v21  ;;  %5882 = vmatprep.subr.bf16.mxu1 %v18716_v3  ;;  %v18908_v37 = vld [vmem:[#allocation6 + $0x270] ss:$8 sps:$4 sm:$0xff]  }
 0x22f   :  { %5763 = vmatpush1.bf16.msra.mxu0 %v18639_v56  ;;  %5883 = vmatpush1.bf16.msra.mxu1 %v18722_v44 }
 0x230   :  { %5764 = vmatprep.subr.bf16.mxu0 %v18643_v57  ;;  %5884 = vmatprep.subr.bf16.mxu1 %v18728_v23 }
 0x233   :  { %5765 = vmatpush1.bf16.msra.mxu0 %v18649_v63  ;;  %5885 = vmatpush1.bf16.msra.mxu1 %v18737_v29 }
 0x234   :  { %6022 = vmatprep.subr.bf16.mxu0 %v18655_v45  ;;  %6153 = vmatprep.subr.bf16.mxu1 %v18590_v28 }
 0x236   :  { %v3658_v16 = vpop.f32.mrf.mxu0  ;;  %v3789_v17 = vpop.f32.mrf.mxu1  ;;  %15288 = vmatmul.mubr.msk.bf16.vlgmr.msra.gmra.mxu0 %vm149_vm0, %v15275_v5  ;;  %15302 = vmatmul.mubr.msk.bf16.vlgmr.msra.gmra.mxu1 %vm149_vm0, %v15289_v12  ;;  %v18912_v5 = vld [vmem:[#allocation6 + $0x104] ss:$8 sps:$4 sm:$0xff]  }
 0x237   :  { %6023 = vmatpush1.bf16.msra.mxu0 %v18667_v24  ;;  %6154 = vmatpush1.bf16.msra.mxu1 %v18600_v49 }
 0x238   :  { %v3660_v51 = vpop.f32.mrf.mxu0  ;;  %v3791_v31 = vpop.f32.mrf.mxu1  ;;  %6024 = vmatprep.subr.bf16.mxu0 %v18673_v42  ;;  %6155 = vmatprep.subr.bf16.mxu1 %v18604_v53  ;;  %v3547_v53 = vld [vmem:[%s21347_s2] sm:$0x3]  ;;  %v15319_v42 = vld [vmem:[%s21345_s0 + $0x1e] sm:$0x1] }
 0x239   :  { %6050 = vmatprep.mubr.bf16.mxu0 %v17675_v0  ;;  %6181 = vmatprep.mubr.bf16.mxu1 %v17675_v0 }
 0x23a   :  { %v3793_v28 = vpop.f32.mrf.mxu1  ;;  %v3662_v45 = vpop.f32.mrf.mxu0 }
 0x23b   :  { %6025 = vmatpush1.bf16.msra.mxu0 %v18683_v22  ;;  %6156 = vmatpush1.bf16.msra.mxu1 %v18610_v8  ;;  %v3669_v8 = vrot.slane %v3547_v53, %v18138_v1  ;;  %v18924_v45 = vld [vmem:[#allocation6 + $0x100] ss:$8 sps:$4 sm:$0xff]  }
 0x23c   :  { %v3794_v59 = vpop.f32.mrf.mxu1  ;;  %6026 = vmatprep.subr.bf16.mxu0 %v18691_v35  ;;  %6157 = vmatprep.subr.bf16.mxu1 %v18614_v33  ;;  %v3663_v49 = vpop.f32.mrf.mxu0  ;;  %v3673_v33 = vrot.slane %v3547_v53, %v18151_v6  ;;  %v18839_v35 = vld [vmem:[#allocation6 + $0x164] ss:$8 sps:$4 sm:$0xff]  }
 0x23d   :  { %v18926_v59 = vld [vmem:[#allocation6 + $0x260] ss:$8 sps:$4 sm:$0xff]  }
 0x23e   :  { %v3677_v24 = vadd.f32 %v3673_v33, %v3660_v51  ;;  %v18932_v33 = vld [vmem:[#allocation6 + $0x254] ss:$8 sps:$4 sm:$0xff]  }
 0x23f   :  { %6027 = vmatpush1.bf16.msra.mxu0 %v18699_v13  ;;  %6158 = vmatpush1.bf16.msra.mxu1 %v18620_v15  ;;  %v18819_v15 = vld.sshfl [vmem:[#allocation2] sm:$0x11 pattern:$0x75316420] }
 0x240   :  { %6028 = vmatprep.subr.bf16.mxu0 %v18705_v14  ;;  %6159 = vmatprep.subr.bf16.mxu1 %v18624_v39  ;;  %v18823_v39 = vld [vmem:[#allocation6 + $0x174] ss:$8 sps:$4 sm:$0xff]  }
 0x243   :  { %6029 = vmatpush1.bf16.msra.mxu0 %v18711_v38  ;;  %6160 = vmatpush1.bf16.msra.mxu1 %v18628_v47  ;;  %v3676_v47 = vadd.f32 %v3669_v8, %v3658_v16  ;;  %v3797_v38 = vadd.f32 %v3791_v31, %v3677_v24  ;;  %v18915_v16 = vld [vmem:[#allocation6 + $0x264] ss:$8 sps:$4 sm:$0xff]   ;;  %v18930_v8 = vld [vmem:[#allocation6 + $0x1f4] ss:$8 sps:$4 sm:$0xff]  }
 0x244   :  { %6030 = vmatprep.subr.bf16.mxu0 %v18718_v20  ;;  %6161 = vmatprep.subr.bf16.mxu1 %v18632_v21  ;;  %v6383_v21 = vcombine.high %v18819_v15, %v18819_v15 }
 0x245   :  { %v3796_v22 = vadd.f32 %v3789_v17, %v3676_v47 }
 0x247   :  { %6031 = vmatpush1.bf16.msra.mxu0 %v18724_v18  ;;  %6162 = vmatpush1.bf16.msra.mxu1 %v18639_v56  ;;  %v15305_v56 = vld [vmem:[%s21345_s0 + $0x1d] sm:$0x1] }
 0x248   :  { %6032 = vmatprep.subr.bf16.mxu0 %v18730_v40  ;;  %6163 = vmatprep.subr.bf16.mxu1 %v18643_v57  ;;  %v18835_v57 = vld [vmem:[#allocation6 + $0x170] ss:$8 sps:$4 sm:$0xff]  }
 0x24b   :  { %6033 = vmatpush1.bf16.msra.mxu0 %v18739_v62  ;;  %6164 = vmatpush1.bf16.msra.mxu1 %v18649_v63  ;;  %v6397_v63 = vrot.slane %v6383_v21, %v18171_v41  ;;  %v18853_v62 = vld [vmem:[#allocation6 + $0x154] ss:$8 sps:$4 sm:$0xff]  }
 0x24c   :  { %6273 = vmatprep.subr.bf16.mxu0 %v18653_v43  ;;  %6560 = vmatprep.subr.bf16.mxu1 %v18823_v39  ;;  %v18848_v43 = vld [vmem:[#allocation6 + $0x160] ss:$8 sps:$4 sm:$0xff]  }
 0x24e   :  { %v3909_v13 = vpop.f32.mrf.mxu0  ;;  %v18841_v14 = vpop.f32.mrf.mxu1  ;;  %15318 = vmatmul.mubr.msk.bf16.vlgmr.msra.gmra.mxu0 %vm149_vm0, %v15305_v56  ;;  %15332 = vmatmul.mubr.msk.bf16.vlgmr.msra.gmra.mxu1 %vm149_vm0, %v15319_v42 }
 0x24f   :  { %v3916_v20 = vadd.f32 %v3909_v13, %v3796_v22  ;;  %6274 = vmatpush1.bf16.msra.mxu0 %v18665_v58  ;;  %6561 = vmatpush1.bf16.msra.mxu1 %v18835_v57  ;;  %v18937_v13 = vld [vmem:[#allocation6 + $0x1f0] ss:$8 sps:$4 sm:$0xff]  }
 0x250   :  { %6592 = vmatprep.mubr.bf16.mxu1 %v6397_v63  ;;  %v3911_v18 = vpop.f32.mrf.mxu0  ;;  %v18850_v40 = vpop.f32.mrf.mxu1  ;;  %6275 = vmatprep.subr.bf16.mxu0 %v18671_v46 }
 0x251   :  { %v3920_v52 = vmul.f32 0.01, %v3916_v20  ;;  %v3917_v25 = vadd.f32 %v3911_v18, %v3797_v38  ;;  %6562 = vmatprep.subr.bf16.mxu1 %v18839_v35  ;;  %6301 = vmatprep.mubr.bf16.mxu0 %v17675_v0  ;;  %vm3918_vm4 = vcmp.gt.f32.partialorder %v3916_v20, 0.0  ;;  %v18943_v38 = vld [vmem:[#allocation6 + $0x1e4] ss:$8 sps:$4 sm:$0xff]  }
 0x252   :  { %v4061_v58 = vpop.f32.mrf.mxu1  ;;  %v3913_v32 = vpop.f32.mrf.mxu0 }
 0x253   :  { %vm3919_vm5 = vcmp.gt.f32.partialorder %v3917_v25, 0.0  ;;  %v3921_v7 = vmul.f32 0.01, %v3917_v25  ;;  %6276 = vmatpush1.bf16.msra.mxu0 %v18681_v55  ;;  %6563 = vmatpush1.bf16.msra.mxu1 %v18848_v43  ;;  %v3922_v0 = vsel %vm3918_vm4, %v3916_v20, %v3920_v52  ;;  %v18867_v55 = vld [vmem:[#allocation6 + $0x140] ss:$8 sps:$4 sm:$0xff]  }
 0x254   :  { %v4062_v46 = vpop.f32.mrf.mxu1  ;;  %6277 = vmatprep.subr.bf16.mxu0 %v18689_v30  ;;  %6564 = vmatprep.subr.bf16.mxu1 %v18853_v62  ;;  %v3914_v9 = vpop.f32.mrf.mxu0  ;;  %v18872_v30 = vld [vmem:[#allocation6 + $0x134] ss:$8 sps:$4 sm:$0xff]   ;;  %v18945_v20 = vld [vmem:[#allocation6 + $0x244] ss:$8 sps:$4 sm:$0xff]   ;;  %v18949_v58 = vld [vmem:[#allocation6 + $0x1e0] ss:$8 sps:$4 sm:$0xff]  }
 0x255   :  { %v3923_v10 = vsel %vm3919_vm5, %v3917_v25, %v3921_v7  ;;  %v18951_v32 = vld [vmem:[#allocation6 + $0x240] ss:$8 sps:$4 sm:$0xff]   ;;  %v18955_v46 = vld [vmem:[#allocation6 + $0x1d4] ss:$8 sps:$4 sm:$0xff]  }
 0x256   :  { %v15083_v27 = vpack.c.bf16 %v3923_v10, %v3922_v0  ;;  %v18957_v9 = vld [vmem:[#allocation6 + $0x234] ss:$8 sps:$4 sm:$0xff]   ;;  %v18962_v10 = vld [vmem:[#allocation6 + $0x1d0] ss:$8 sps:$4 sm:$0xff]  }
 0x257   :  { %6278 = vmatpush1.bf16.msra.mxu0 %v18695_v36  ;;  %6565 = vmatpush1.bf16.msra.mxu1 %v18859_v48  ;;  %v18880_v36 = vld [vmem:[#allocation6 + $0x124] ss:$8 sps:$4 sm:$0xff]  }
 0x258   :  { %v3935_v2 = vrot.slane %v15083_v27, %v18171_v41  ;;  %6279 = vmatprep.subr.bf16.mxu0 %v18703_v60  ;;  %6566 = vmatprep.subr.bf16.mxu1 %v18863_v50  ;;  %v3946_v60 = vld [vmem:[%s21347_s2] sm:$0x3] }
 0x259   :  { %v4068_v61 = vrot.slane %v3946_v60, %v18138_v1  ;;  %v18964_v27 = vld [vmem:[#allocation6 + $0x230] ss:$8 sps:$4 sm:$0xff]  }
 0x25a   :  { %15084 = vst.sshfl [vmem:[#allocation2 + $0x12] sm:$0x5 pattern:$0x73625140] %v3935_v2  ;;  %v18968_v2 = vld [vmem:[#allocation6 + $0x1c4] ss:$8 sps:$4 sm:$0xff]  }
 0x25b   :  { %6280 = vmatpush1.bf16.msra.mxu0 %v18709_v34  ;;  %6567 = vmatpush1.bf16.msra.mxu1 %v18867_v55  ;;  %v18889_v34 = vld.sshfl [vmem:[#allocation2 + $0x2] sm:$0x11 pattern:$0x75316420]  ;;  %v4075_v12 = vadd.f32 %v4068_v61, %v18841_v14  ;;  %v18974_v61 = vld [vmem:[#allocation6 + $0x1c0] ss:$8 sps:$4 sm:$0xff]  }
 0x25c   :  { %6281 = vmatprep.subr.bf16.mxu0 %v18716_v3  ;;  %6568 = vmatprep.subr.bf16.mxu1 %v18872_v30  ;;  %v18893_v3 = vld [vmem:[#allocation6 + $0x114] ss:$8 sps:$4 sm:$0xff]   ;;  %v6656_v26 = vcombine.high %v18889_v34, %v18889_v34  ;;  %v18939_v14 = vld [vmem:[#allocation6 + $0x250] ss:$8 sps:$4 sm:$0xff]  }
 0x25e   :  { %v18919_v51 = vrot.slane %v6656_v26, %v18171_v41  ;;  %v18976_v26 = vld [vmem:[#allocation6 + $0x220] ss:$8 sps:$4 sm:$0xff]  }
 0x25f   :  { %6282 = vmatpush1.bf16.msra.mxu0 %v18722_v44  ;;  %6569 = vmatpush1.bf16.msra.mxu1 %v18876_v19  ;;  %v4072_v44 = vrot.slane %v3946_v60, %v18151_v6  ;;  %v18970_v60 = vld [vmem:[#allocation6 + $0x224] ss:$8 sps:$4 sm:$0xff]   ;;  %21561 = vst [vmem:[#allocation14_spill] sm:$0xff] %v18976_v26 }
 0x260   :  { %6283 = vmatprep.subr.bf16.mxu0 %v18728_v23  ;;  %6570 = vmatprep.subr.bf16.mxu1 %v18880_v36  ;;  %v15333_v23 = vld [vmem:[%s21345_s0 + $0x1f] sm:$0x1]  ;;  %21560 = vst [vmem:[#allocation13_spill] sm:$0xff] %v18970_v60 }
 0x261   :  { %v4076_v31 = vadd.f32 %v4072_v44, %v18850_v40  ;;  %v18980_v44 = vld [vmem:[#allocation6 + $0x1b4] ss:$8 sps:$4 sm:$0xff]  }
 0x263   :  { %6284 = vmatpush1.bf16.msra.mxu0 %v18737_v29  ;;  %6571 = vmatpush1.bf16.msra.mxu1 %v18887_v11 }
 0x264   :  { %6572 = vmatprep.subr.bf16.mxu1 %v18893_v3  ;;  %6833 = vmatprep.subr.bf16.mxu0 %v18895_v4 }
 0x266   :  { %v4188_v29 = vpop.f32.mrf.mxu0  ;;  %v4308_v17 = vpop.f32.mrf.mxu1  ;;  %15346 = vmatmul.mubr.msk.bf16.vlgmr.msra.gmra.mxu0 %vm149_vm0, %v15333_v23  ;;  %v18982_v23 = vld [vmem:[#allocation6 + $0x214] ss:$8 sps:$4 sm:$0xff]  }
 0x267   :  { %v4195_v28 = vadd.f32 %v4188_v29, %v4075_v12  ;;  %6573 = vmatpush1.bf16.msra.mxu1 %v18906_v54  ;;  %6834 = vmatpush1.bf16.msra.mxu0 %v18908_v37  ;;  %21562 = vst [vmem:[#allocation15_spill] sm:$0xff] %v18982_v23  ;;  %v18986_v12 = vld [vmem:[#allocation6 + $0x1b0] ss:$8 sps:$4 sm:$0xff]  }
 0x268   :  { %6865 = vmatprep.mubr.bf16.mxu0 %v18919_v51  ;;  %v4190_v49 = vpop.f32.mrf.mxu0  ;;  %v4310_v53 = vpop.f32.mrf.mxu1  ;;  %6574 = vmatprep.subr.bf16.mxu1 %v18912_v5  ;;  %v18988_v29 = vld [vmem:[#allocation6 + $0x210] ss:$8 sps:$4 sm:$0xff]  }
 0x269   :  { %v4315_v47 = vadd.f32 %v4308_v17, %v4195_v28  ;;  %v4196_v21 = vadd.f32 %v4190_v49, %v4076_v31  ;;  %6835 = vmatprep.subr.bf16.mxu0 %v18915_v16  ;;  %21563 = vst [vmem:[#allocation16_spill] sm:$0xff] %v18988_v29  ;;  %v18992_v17 = vld [vmem:[#allocation6 + $0x1a4] ss:$8 sps:$4 sm:$0xff]  }
 0x26a   :  { %v4312_v24 = vpop.f32.mrf.mxu1  ;;  %v4192_v56 = vpop.f32.mrf.mxu0  ;;  %v18994_v31 = vld [vmem:[#allocation6 + $0x204] ss:$8 sps:$4 sm:$0xff]  }
 0x26b   :  { %v4319_v42 = vmul.f32 0.01, %v4315_v47  ;;  %v4316_v22 = vadd.f32 %v4310_v53, %v4196_v21  ;;  %6575 = vmatpush1.bf16.msra.mxu1 %v18924_v45  ;;  %6836 = vmatpush1.bf16.msra.mxu0 %v18926_v59  ;;  %vm4317_vm0 = vcmp.gt.f32.partialorder %v4315_v47, 0.0  ;;  %21564 = vst [vmem:[#allocation17_spill] sm:$0xff] %v18994_v31  ;;  %v19000_v53 = vld [vmem:[#allocation6 + $0x1a0] ss:$8 sps:$4 sm:$0xff]  }
 0x26c   :  { %v4313_v63 = vpop.f32.mrf.mxu1  ;;  %6576 = vmatprep.subr.bf16.mxu1 %v18930_v8  ;;  %6837 = vmatprep.subr.bf16.mxu0 %v18932_v33  ;;  %v4193_v18 = vpop.f32.mrf.mxu0  ;;  %v19006_v56 = vld [vmem:[#allocation6 + $0x194] ss:$8 sps:$4 sm:$0xff]  }
 0x26d   :  { %vm4318_vm6 = vcmp.gt.f32.partialorder %v4316_v22, 0.0  ;;  %v4320_v40 = vmul.f32 0.01, %v4316_v22  ;;  %v4321_v52 = vsel %vm4317_vm0, %v4315_v47, %v4319_v42  ;;  %v19002_v47 = vld [vmem:[#allocation6 + $0x200] ss:$8 sps:$4 sm:$0xff]  }
 0x26e   :  { %21565 = vst [vmem:[#allocation18_spill] sm:$0xff] %v19002_v47  ;;  %v19008_v42 = vld [vmem:[#allocation6 + $0x2f4] ss:$8 sps:$4 sm:$0xff]   ;;  %v19012_v18 = vld [vmem:[#allocation6 + $0x190] ss:$8 sps:$4 sm:$0xff]  }
 0x26f   :  { %v4322_v25 = vsel %vm4318_vm6, %v4316_v22, %v4320_v40  ;;  %6577 = vmatpush2.bf16.msra.mxu1 %v18937_v13  ;;  %6838 = vmatpush1.bf16.msra.mxu0 %v18939_v14  ;;  %21566 = vst [vmem:[#allocation19_spill] sm:$0xff] %v19008_v42  ;;  %v19014_v40 = vld [vmem:[#allocation6 + $0x2f0] ss:$8 sps:$4 sm:$0xff]  }
 0x270   :  { %v15127_v7 = vpack.c.bf16 %v4322_v25, %v4321_v52  ;;  %6578 = vmatprep.subr.bf16.mxu1 %v18943_v38  ;;  %6839 = vmatprep.subr.bf16.mxu0 %v18945_v20  ;;  %21567 = vst [vmem:[#allocation20_spill] sm:$0xff] %v19014_v40  ;;  %v19018_v25 = vld [vmem:[#allocation6 + $0x184] ss:$8 sps:$4 sm:$0xff]  }
 0x271   :  { %21568 = vst [vmem:[#allocation21_spill] sm:$0xff] %v19018_v25 }
 0x272   :  { %v4334_v0 = vrot.slane %v15127_v7, %v18171_v41  ;;  %v19020_v7 = vld [vmem:[#allocation6 + $0x2e4] ss:$8 sps:$4 sm:$0xff]  }
 0x273   :  { %6579 = vmatpush2.bf16.msra.mxu1 %v18949_v58  ;;  %6840 = vmatpush1.bf16.msra.mxu0 %v18951_v32  ;;  %21569 = vst [vmem:[#allocation22_spill] sm:$0xff] %v19020_v7 }
 0x274   :  { %15128 = vst.sshfl [vmem:[#allocation2 + $0x14] sm:$0x5 pattern:$0x73625140] %v4334_v0  ;;  %6580 = vmatprep.subr.bf16.mxu1 %v18955_v46  ;;  %6841 = vmatprep.subr.bf16.mxu0 %v18957_v9 }
 0x277   :  { %6581 = vmatpush2.bf16.msra.mxu1 %v18962_v10  ;;  %6842 = vmatpush1.bf16.msra.mxu0 %v18964_v27 }
 0x278   :  { %6582 = vmatprep.subr.bf16.mxu1 %v18968_v2  ;;  %6843 = vmatprep.subr.bf16.mxu0 %v18970_v60 }
 0x27b   :  { %6583 = vmatpush2.bf16.msra.mxu1 %v18974_v61  ;;  %6844 = vmatpush1.bf16.msra.mxu0 %v18976_v26  ;;  %v19055_v26 = vld [vmem:[#allocation6 + $0x2c0] ss:$8 sps:$4 sm:$0xff]  }
 0x27c   :  { %6584 = vmatprep.subr.bf16.mxu1 %v18980_v44  ;;  %6845 = vmatprep.subr.bf16.mxu0 %v18982_v23  ;;  %v19050_v23 = vld [vmem:[#allocation6 + $0x64] ss:$8 sps:$4 sm:$0xff]   ;;  %21578 = vst [vmem:[#allocation31_spill] sm:$0xff] %v19055_v26 }
 0x27d   :  { %21577 = vst [vmem:[#allocation30_spill] sm:$0xff] %v19050_v23 }
 0x27e   :  { %v4456_v28 = vpop.f32.mrf.mxu0  ;;  %v18996_v49 = vpop.f32.mrf.mxu1 }
 0x27f   :  { %6585 = vmatpush2.bf16.msra.mxu1 %v18986_v12  ;;  %6846 = vmatpush1.bf16.msra.mxu0 %v18988_v29 }
 0x280   :  { %v4458_v21 = vpop.f32.mrf.mxu0  ;;  %v4589_v24 = vpop.f32.mrf.mxu1  ;;  %6586 = vmatprep.subr.bf16.mxu1 %v18992_v17  ;;  %6847 = vmatprep.subr.bf16.mxu0 %v18994_v31  ;;  %v6390_v31 = vrot.slane %v18819_v15, %v18171_v41  ;;  %v19057_v15 = vld [vmem:[#allocation6 + $0x60] ss:$8 sps:$4 sm:$0xff]  }
 0x281   :  { %21579 = vst [vmem:[#allocation32_spill] sm:$0xff] %v19057_v15 }
 0x282   :  { %v4591_v22 = vpop.f32.mrf.mxu1  ;;  %v4460_v63 = vpop.f32.mrf.mxu0 }
 0x283   :  { %6587 = vmatpush2.bf16.msra.mxu1 %v19000_v53  ;;  %6848 = vmatpush1.bf16.msra.mxu0 %v19002_v47  ;;  %v19024_v22 = vld [vmem:[#allocation6 + $0x180] ss:$8 sps:$4 sm:$0xff]   ;;  %v19041_v47 = vld [vmem:[#allocation6 + $0x70] ss:$8 sps:$4 sm:$0xff]  }
 0x284   :  { %v4592_v52 = vpop.f32.mrf.mxu1  ;;  %6588 = vmatprep.subr.bf16.mxu1 %v19006_v56  ;;  %6849 = vmatprep.subr.bf16.mxu0 %v19008_v42  ;;  %v4461_v0 = vpop.f32.mrf.mxu0  ;;  %21570 = vst [vmem:[#allocation23_spill] sm:$0xff] %v19024_v22  ;;  %v19026_v63 = vld [vmem:[#allocation6 + $0x2e0] ss:$8 sps:$4 sm:$0xff]   ;;  %v19032_v42 = vld [vmem:[#allocation6 + $0x74] ss:$8 sps:$4 sm:$0xff]   ;;  %21575 = vst [vmem:[#allocation28_spill] sm:$0xff] %v19041_v47 }
 0x285   :  { %21571 = vst [vmem:[#allocation24_spill] sm:$0xff] %v19026_v63  ;;  %v19030_v52 = vld [vmem:[#allocation6 + $0x2d4] ss:$8 sps:$4 sm:$0xff]   ;;  %21573 = vst [vmem:[#allocation26_spill] sm:$0xff] %v19032_v42  ;;  %v4345_v0 = vld [vmem:[%s21347_s2] sm:$0x3] }
 0x286   :  { %21572 = vst [vmem:[#allocation25_spill] sm:$0xff] %v19030_v52  ;;  %v4467_v29 = vrot.slane %v4345_v0, %v18138_v1 }
 0x287   :  { %6589 = vmatpush2.bf16.msra.mxu1 %v19012_v18  ;;  %6850 = vmatpush2.bf16.msra.mxu0 %v19014_v40  ;;  %v19039_v40 = vld [vmem:[#allocation6 + $0x2d0] ss:$8 sps:$4 sm:$0xff]  }
 0x288   :  { %6590 = vmatprep.subr.bf16.mxu1 %v19018_v25  ;;  %6851 = vmatprep.subr.bf16.mxu0 %v19020_v7  ;;  %21574 = vst [vmem:[#allocation27_spill] sm:$0xff] %v19039_v40  ;;  %v19047_v7 = vld [vmem:[#allocation6 + $0x2c4] ss:$8 sps:$4 sm:$0xff]  }
 0x289   :  { %21576 = vst [vmem:[#allocation29_spill] sm:$0xff] %v19047_v7  ;;  %v19107_v25 = vld.sshfl [vmem:[#allocation2 + $0x4] sm:$0x11 pattern:$0x75316420] }
 0x28b   :  { %6591 = vmatpush2.bf16.msra.mxu1 %v19024_v22  ;;  %6852 = vmatpush2.bf16.msra.mxu0 %v19026_v63  ;;  %v4471_v63 = vrot.slane %v4345_v0, %v18151_v6  ;;  %v4474_v22 = vadd.f32 %v4467_v29, %v4456_v28  ;;  %v19068_v0 = vld [vmem:[#allocation6 + $0x2b0] ss:$8 sps:$4 sm:$0xff]  }
 0x28c   :  { %6853 = vmatprep.subr.bf16.mxu0 %v19030_v52  ;;  %7122 = vmatprep.subr.bf16.mxu1 %v19032_v42  ;;  %v19061_v52 = vld [vmem:[#allocation6 + $0x2b4] ss:$8 sps:$4 sm:$0xff]   ;;  %21582 = vst [vmem:[#allocation35_spill] sm:$0xff] %v19068_v0 }
 0x28d   :  { %21580 = vst [vmem:[#allocation33_spill] sm:$0xff] %v19061_v52  ;;  %v19063_v42 = vld [vmem:[#allocation6 + $0x54] ss:$8 sps:$4 sm:$0xff]   ;;  %v4594_v29 = vadd.f32 %v18996_v49, %v4474_v22 }
 0x28e   :  { %6593 = vmatmul.mubr.bf16.vlgmr.msra.gmra.mxu1 %v6390_v31  ;;  %21581 = vst [vmem:[#allocation34_spill] sm:$0xff] %v19063_v42  ;;  %v4475_v31 = vadd.f32 %v4471_v63, %v4458_v21  ;;  %v19091_v49 = vld [vmem:[#allocation6 + $0x294] ss:$8 sps:$4 sm:$0xff]  }
 0x28f   :  { %6854 = vmatpush2.bf16.msra.mxu0 %v19039_v40  ;;  %7123 = vmatpush1.bf16.msra.mxu1 %v19041_v47  ;;  %v19070_v40 = vld [vmem:[#allocation6 + $0x50] ss:$8 sps:$4 sm:$0xff]   ;;  %21587 = vst [vmem:[#allocation40_spill] sm:$0xff] %v19091_v49  ;;  %v19093_v22 = vld [vmem:[#allocation6 + $0x34] ss:$8 sps:$4 sm:$0xff]  }
 0x290   :  { %7154 = vmatprep.mubr.bf16.mxu1 %v18919_v51  ;;  %6855 = vmatprep.subr.bf16.mxu0 %v19047_v7  ;;  %21583 = vst [vmem:[#allocation36_spill] sm:$0xff] %v19070_v40  ;;  %v19074_v51 = vld [vmem:[#allocation6 + $0x2a4] ss:$8 sps:$4 sm:$0xff]   ;;  %v4595_v63 = vadd.f32 %v4589_v24, %v4475_v31 }
 0x291   :  { %7124 = vmatprep.subr.bf16.mxu1 %v19050_v23  ;;  %21584 = vst [vmem:[#allocation37_spill] sm:$0xff] %v19074_v51  ;;  %v19076_v7 = vld [vmem:[#allocation6 + $0x44] ss:$8 sps:$4 sm:$0xff]  }
 0x292   :  { %21585 = vst [vmem:[#allocation38_spill] sm:$0xff] %v19076_v7  ;;  %v19103_v47 = vld [vmem:[#allocation6 + $0x284] ss:$8 sps:$4 sm:$0xff]  }
 0x293   :  { %6856 = vmatpush2.bf16.msra.mxu0 %v19055_v26  ;;  %7125 = vmatpush1.bf16.msra.mxu1 %v19057_v15  ;;  %v19083_v15 = vld [vmem:[#allocation6 + $0x2a0] ss:$8 sps:$4 sm:$0xff]   ;;  %21589 = vst [vmem:[#allocation42_spill] sm:$0xff] %v19103_v47 }
 0x294   :  { %6857 = vmatprep.subr.bf16.mxu0 %v19061_v52  ;;  %7126 = vmatprep.subr.bf16.mxu1 %v19063_v42  ;;  %21586 = vst [vmem:[#allocation39_spill] sm:$0xff] %v19083_v15  ;;  %v19085_v52 = vld [vmem:[#allocation6 + $0x40] ss:$8 sps:$4 sm:$0xff]  }
 0x296   :  { %v4707_v28 = vpop.f32.mrf.mxu0  ;;  %v19079_v21 = vpop.f32.mrf.mxu1 }
 0x297   :  { %v4714_v26 = vadd.f32 %v4707_v28, %v4594_v29  ;;  %6858 = vmatpush2.bf16.msra.mxu0 %v19068_v0  ;;  %7127 = vmatpush1.bf16.msra.mxu1 %v19070_v40  ;;  %v19095_v28 = vld [vmem:[#allocation6 + $0x290] ss:$8 sps:$4 sm:$0xff]  }
 0x298   :  { %v4709_v42 = vpop.f32.mrf.mxu0  ;;  %v19087_v23 = vpop.f32.mrf.mxu1  ;;  %6859 = vmatprep.subr.bf16.mxu0 %v19074_v51  ;;  %7128 = vmatprep.subr.bf16.mxu1 %v19076_v7  ;;  %21588 = vst [vmem:[#allocation41_spill] sm:$0xff] %v19095_v28  ;;  %v19099_v51 = vld [vmem:[#allocation6 + $0x30] ss:$8 sps:$4 sm:$0xff]  }
 0x299   :  { %v4718_v24 = vmul.f32 0.01, %v4714_v26  ;;  %v4715_v31 = vadd.f32 %v4709_v42, %v4595_v63  ;;  %vm4716_vm7 = vcmp.gt.f32.partialorder %v4714_v26, 0.0  ;;  %v19105_v42 = vld [vmem:[#allocation6 + $0x24] ss:$8 sps:$4 sm:$0xff]  }
 0x29a   :  { %v4859_v29 = vpop.f32.mrf.mxu1  ;;  %v4711_v0 = vpop.f32.mrf.mxu0 }
 0x29b   :  { %vm4717_vm8 = vcmp.gt.f32.partialorder %v4715_v31, 0.0  ;;  %v4719_v40 = vmul.f32 0.01, %v4715_v31  ;;  %6860 = vmatpush2.bf16.msra.mxu0 %v19083_v15  ;;  %7129 = vmatpush1.bf16.msra.mxu1 %v19085_v52  ;;  %v4720_v29 = vsel %vm4716_vm7, %v4714_v26, %v4718_v24  ;;  %v19111_v15 = vld [vmem:[#allocation6 + $0x280] ss:$8 sps:$4 sm:$0xff]   ;;  %v7217_v26 = vcombine.high %v19107_v25, %v19107_v25 }
 0x29c   :  { %v4860_v7 = vpop.f32.mrf.mxu1  ;;  %6861 = vmatprep.subr.bf16.mxu0 %v19091_v49  ;;  %7130 = vmatprep.subr.bf16.mxu1 %v19093_v22  ;;  %v4712_v63 = vpop.f32.mrf.mxu0  ;;  %21590 = vst [vmem:[#allocation43_spill] sm:$0xff] %v19111_v15  ;;  %v19128_v24 = vrot.slane %v18889_v34, %v18171_v41  ;;  %v19141_v34 = vld [vmem:[#allocation6] ss:$8 sps:$4 sm:$0xff]  }
 0x29d   :  { %v4721_v0 = vsel %vm4717_vm8, %v4715_v31, %v4719_v40  ;;  %v19113_v7 = vld [vmem:[#allocation6 + $0x20] ss:$8 sps:$4 sm:$0xff]   ;;  %v19118_v63 = vld [vmem:[#allocation6 + $0x14] ss:$8 sps:$4 sm:$0xff]   ;;  %v19124_v40 = vld [vmem:[#allocation6 + $0x10] ss:$8 sps:$4 sm:$0xff]   ;;  %v7231_v31 = vrot.slane %v7217_v26, %v18171_v41 }
 0x29e   :  { %v15171_v60 = vpack.c.bf16 %v4721_v0, %v4720_v29  ;;  %21592 = vst [vmem:[#allocation45_spill] sm:$0xff] %v19141_v34  ;;  %v19151_v26 = vld [vmem:[#allocation6 + $0xf0] ss:$8 sps:$4 sm:$0xff]  }
 0x29f   :  { %6862 = vmatpush2.bf16.msra.mxu0 %v19095_v28  ;;  %7131 = vmatpush1.bf16.msra.mxu1 %v19099_v51 }
 0x2a0   :  { %v4733_v49 = vrot.slane %v15171_v60, %v18171_v41  ;;  %6863 = vmatprep.subr.bf16.mxu0 %v19103_v47  ;;  %7132 = vmatprep.subr.bf16.mxu1 %v19105_v42  ;;  %v19132_v60 = vld [vmem:[#allocation6 + $0x4] ss:$8 sps:$4 sm:$0xff]  }
 0x2a1   :  { %21591 = vst [vmem:[#allocation44_spill] sm:$0xff] %v19132_v60 }
 0x2a2   :  { %15172 = vst.sshfl [vmem:[#allocation2 + $0x16] sm:$0x5 pattern:$0x73625140] %v4733_v49  ;;  %v4744_v49 = vld [vmem:[%s21347_s2] sm:$0x3] }
 0x2a3   :  { %6864 = vmatpush2.bf16.msra.mxu0 %v19111_v15  ;;  %7133 = vmatpush1.bf16.msra.mxu1 %v19113_v7  ;;  %v4866_v29 = vrot.slane %v4744_v49, %v18138_v1  ;;  %v4870_v0 = vrot.slane %v4744_v49, %v18151_v6 }
 0x2a4   :  { %7134 = vmatprep.subr.bf16.mxu1 %v19118_v63  ;;  %7394 = vmatprep.subr.bf16.mxu0 %v18823_v39  ;;  %v19144_v39 = vld [vmem:[#allocation6 + $0xf4] ss:$8 sps:$4 sm:$0xff]  }
 0x2a5   :  { %21593 = vst [vmem:[#allocation46_spill] sm:$0xff] %v19144_v39 }
 0x2a6   :  { %6866 = vmatmul.mubr.bf16.vlgmr.msra.gmra.mxu0 %v19128_v24 }
 0x2a7   :  { %7135 = vmatpush1.bf16.msra.mxu1 %v19124_v40  ;;  %7395 = vmatpush1.bf16.msra.mxu0 %v18835_v57  ;;  %v19155_v57 = vld [vmem:[#allocation6 + $0xe4] ss:$8 sps:$4 sm:$0xff]  }
 0x2a8   :  { %7426 = vmatprep.mubr.bf16.mxu0 %v7231_v31  ;;  %7136 = vmatprep.subr.bf16.mxu1 %v19132_v60  ;;  %v4873_v31 = vadd.f32 %v4866_v29, %v19079_v21 }
 0x2a9   :  { %7396 = vmatprep.subr.bf16.mxu0 %v18839_v35  ;;  %v4874_v35 = vadd.f32 %v4870_v0, %v19087_v23 }
 0x2ab   :  { %7137 = vmatpush1.bf16.msra.mxu1 %v19141_v34  ;;  %7397 = vmatpush1.bf16.msra.mxu0 %v18848_v43  ;;  %v19161_v43 = vld [vmem:[#allocation6 + $0xe0] ss:$8 sps:$4 sm:$0xff]  }
 0x2ac   :  { %7138 = vmatprep.subr.bf16.mxu1 %v19144_v39  ;;  %7398 = vmatprep.subr.bf16.mxu0 %v18853_v62  ;;  %v19165_v62 = vld [vmem:[#allocation6 + $0xd4] ss:$8 sps:$4 sm:$0xff]  }
 0x2ae   :  { %v4986_v15 = vpop.f32.mrf.mxu0  ;;  %v5106_v47 = vpop.f32.mrf.mxu1 }
 0x2af   :  { %v4993_v28 = vadd.f32 %v4986_v15, %v4873_v31  ;;  %7139 = vmatpush2.bf16.msra.mxu1 %v19151_v26  ;;  %7399 = vmatpush1.bf16.msra.mxu0 %v18859_v48  ;;  %v19169_v48 = vld [vmem:[#allocation6 + $0xd0] ss:$8 sps:$4 sm:$0xff]   ;;  %v19181_v31 = vld [vmem:[#allocation6 + $0xb4] ss:$8 sps:$4 sm:$0xff]  }
 0x2b0   :  { %v4988_v49 = vpop.f32.mrf.mxu0  ;;  %v5108_v34 = vpop.f32.mrf.mxu1  ;;  %7140 = vmatprep.subr.bf16.mxu1 %v19155_v57  ;;  %7400 = vmatprep.subr.bf16.mxu0 %v18863_v50  ;;  %v19173_v50 = vld [vmem:[#allocation6 + $0xc4] ss:$8 sps:$4 sm:$0xff]  }
 0x2b1   :  { %v5113_v21 = vadd.f32 %v5106_v47, %v4993_v28  ;;  %v4994_v29 = vadd.f32 %v4988_v49, %v4874_v35  ;;  %v19186_v35 = vld [vmem:[#allocation6 + $0xb0] ss:$8 sps:$4 sm:$0xff]  }
 0x2b2   :  { %v5110_v39 = vpop.f32.mrf.mxu1  ;;  %v4990_v60 = vpop.f32.mrf.mxu0  ;;  %v19202_v49 = vld [vmem:[#allocation6 + $0x90] ss:$8 sps:$4 sm:$0xff]  }
 0x2b3   :  { %v5117_v23 = vmul.f32 0.01, %v5113_v21  ;;  %v5114_v15 = vadd.f32 %v5108_v34, %v4994_v29  ;;  %7141 = vmatpush2.bf16.msra.mxu1 %v19161_v43  ;;  %7401 = vmatpush1.bf16.msra.mxu0 %v18867_v55  ;;  %vm5115_vm9 = vcmp.gt.f32.partialorder %v5113_v21, 0.0  ;;  %v19177_v55 = vld [vmem:[#allocation6 + $0xc0] ss:$8 sps:$4 sm:$0xff]  }
 0x2b4   :  { %v5111_v0 = vpop.f32.mrf.mxu1  ;;  %7142 = vmatprep.subr.bf16.mxu1 %v19165_v62  ;;  %7402 = vmatprep.subr.bf16.mxu0 %v18872_v30  ;;  %v4991_v47 = vpop.f32.mrf.mxu0  ;;  %v19212_v29 = vld.sshfl [vmem:[#allocation2 + $0x6] sm:$0x11 pattern:$0x75316420] }
 0x2b5   :  { %vm5116_vm10 = vcmp.gt.f32.partialorder %v5114_v15, 0.0  ;;  %v5118_v28 = vmul.f32 0.01, %v5114_v15  ;;  %v5119_v60 = vsel %vm5115_vm9, %v5113_v21, %v5117_v23 }
 0x2b7   :  { %v5120_v39 = vsel %vm5116_vm10, %v5114_v15, %v5118_v28  ;;  %7143 = vmatpush2.bf16.msra.mxu1 %v19169_v48  ;;  %7403 = vmatpush1.bf16.msra.mxu0 %v18876_v19  ;;  %v19190_v19 = vld [vmem:[#allocation6 + $0xa4] ss:$8 sps:$4 sm:$0xff]  }
 0x2b8   :  { %v15215_v34 = vpack.c.bf16 %v5120_v39, %v5119_v60  ;;  %7144 = vmatprep.subr.bf16.mxu1 %v19173_v50  ;;  %7404 = vmatprep.subr.bf16.mxu0 %v18880_v36  ;;  %v19194_v36 = vld [vmem:[#allocation6 + $0xa0] ss:$8 sps:$4 sm:$0xff]   ;;  %v21599_v39 = vld [vmem:[#allocation26_spill] sm:$0xff] }
 0x2b9   :  { %v21598_v60 = vld [vmem:[#allocation15_spill] sm:$0xff] }
 0x2ba   :  { %v5132_v30 = vrot.slane %v15215_v34, %v18171_v41 }
 0x2bb   :  { %7145 = vmatpush2.bf16.msra.mxu1 %v19177_v55  ;;  %7405 = vmatpush1.bf16.msra.mxu0 %v18887_v11  ;;  %v19198_v11 = vld [vmem:[#allocation6 + $0x94] ss:$8 sps:$4 sm:$0xff]  }
 0x2bc   :  { %15216 = vst.sshfl [vmem:[#allocation2 + $0x18] sm:$0x5 pattern:$0x73625140] %v5132_v30  ;;  %7146 = vmatprep.subr.bf16.mxu1 %v19181_v31  ;;  %7406 = vmatprep.subr.bf16.mxu0 %v18893_v3  ;;  %v19206_v3 = vld [vmem:[#allocation6 + $0x84] ss:$8 sps:$4 sm:$0xff]  }
 0x2bf   :  { %7147 = vmatpush2.bf16.msra.mxu1 %v19186_v35  ;;  %7407 = vmatpush1.bf16.msra.mxu0 %v18906_v54 }
 0x2c0   :  { %7148 = vmatprep.subr.bf16.mxu1 %v19190_v19  ;;  %7408 = vmatprep.subr.bf16.mxu0 %v18912_v5  ;;  %v19210_v5 = vld [vmem:[#allocation6 + $0x80] ss:$8 sps:$4 sm:$0xff]  }
 0x2c3   :  { %7149 = vmatpush2.bf16.msra.mxu1 %v19194_v36  ;;  %7409 = vmatpush1.bf16.msra.mxu0 %v18924_v45 }
 0x2c4   :  { %7150 = vmatprep.subr.bf16.mxu1 %v19198_v11  ;;  %7410 = vmatprep.subr.bf16.mxu0 %v18930_v8  ;;  %v7478_v8 = vcombine.high %v19212_v29, %v19212_v29 }
 0x2c6   :  { %v5254_v54 = vpop.f32.mrf.mxu0  ;;  %v5385_v21 = vpop.f32.mrf.mxu1  ;;  %v7492_v28 = vrot.slane %v7478_v8, %v18171_v41  ;;  %v21602_v8 = vld [vmem:[#allocation17_spill] sm:$0xff] }
 0x2c7   :  { %7151 = vmatpush2.bf16.msra.mxu1 %v19202_v49  ;;  %7411 = vmatpush2.bf16.msra.mxu0 %v18937_v13 }
 0x2c8   :  { %v5256_v23 = vpop.f32.mrf.mxu0  ;;  %v5387_v45 = vpop.f32.mrf.mxu1  ;;  %7152 = vmatprep.subr.bf16.mxu1 %v19206_v3  ;;  %7412 = vmatprep.subr.bf16.mxu0 %v18943_v38  ;;  %v5143_v38 = vld [vmem:[%s21347_s2] sm:$0x3] }
 0x2ca   :  { %v5389_v15 = vpop.f32.mrf.mxu1  ;;  %v5258_v0 = vpop.f32.mrf.mxu0 }
 0x2cb   :  { %7153 = vmatpush2.bf16.msra.mxu1 %v19210_v5  ;;  %7413 = vmatpush2.bf16.msra.mxu0 %v18949_v58  ;;  %v21603_v0 = vld [vmem:[#allocation30_spill] sm:$0xff] }
 0x2cc   :  { %v5390_v13 = vpop.f32.mrf.mxu1  ;;  %7414 = vmatprep.subr.bf16.mxu0 %v18955_v46  ;;  %7655 = vmatprep.subr.bf16.mxu1 %v18895_v4  ;;  %v5259_v47 = vpop.f32.mrf.mxu0  ;;  %v5265_v4 = vrot.slane %v5143_v38, %v18138_v1 }
 0x2cd   :  { %v21605_v13 = vld [vmem:[#allocation32_spill] sm:$0xff]  ;;  %v21606_v47 = vld [vmem:[#allocation19_spill] sm:$0xff] }
 0x2ce   :  { %7155 = vmatmul.mubr.bf16.vlgmr.msra.gmra.mxu1 %v19128_v24  ;;  %v21597_v24 = vld [vmem:[#allocation14_spill] sm:$0xff] }
 0x2cf   :  { %7415 = vmatpush2.bf16.msra.mxu0 %v18962_v10  ;;  %7656 = vmatpush1.bf16.msra.mxu1 %v18908_v37  ;;  %v5269_v37 = vrot.slane %v5143_v38, %v18151_v6  ;;  %v21607_v38 = vld [vmem:[#allocation34_spill] sm:$0xff] }
 0x2d0   :  { %7687 = vmatprep.mubr.bf16.mxu1 %v7492_v28  ;;  %7416 = vmatprep.subr.bf16.mxu0 %v18968_v2 }
 0x2d1   :  { %7657 = vmatprep.subr.bf16.mxu1 %v18915_v16  ;;  %v5272_v16 = vadd.f32 %v5265_v4, %v5254_v54  ;;  %v5273_v58 = vadd.f32 %v5269_v37, %v5256_v23  ;;  %v21600_v23 = vld [vmem:[#allocation16_spill] sm:$0xff]  ;;  %v5542_v4 = vld [vmem:[%s21347_s2] sm:$0x3] }
 0x2d2   :  { %v21608_v37 = vld [vmem:[#allocation20_spill] sm:$0xff] }
 0x2d3   :  { %7417 = vmatpush2.bf16.msra.mxu0 %v18974_v61  ;;  %7658 = vmatpush1.bf16.msra.mxu1 %v18926_v59  ;;  %v5392_v59 = vadd.f32 %v5385_v21, %v5272_v16  ;;  %v5393_v10 = vadd.f32 %v5387_v45, %v5273_v58  ;;  %v21594_v61 = vld [vmem:[#allocation21_spill] sm:$0xff]  ;;  %v21601_v45 = vld [vmem:[#allocation28_spill] sm:$0xff]  ;;  %v21610_v16 = vld [vmem:[#allocation22_spill] sm:$0xff] }
 0x2d4   :  { %7418 = vmatprep.subr.bf16.mxu0 %v18980_v44  ;;  %7659 = vmatprep.subr.bf16.mxu1 %v18932_v33  ;;  %v21595_v44 = vld [vmem:[#allocation13_spill] sm:$0xff]  ;;  %v21611_v58 = vld [vmem:[#allocation38_spill] sm:$0xff] }
 0x2d7   :  { %7419 = vmatpush2.bf16.msra.mxu0 %v18986_v12  ;;  %7660 = vmatpush1.bf16.msra.mxu1 %v18939_v14 }
 0x2d8   :  { %7420 = vmatprep.subr.bf16.mxu0 %v18992_v17  ;;  %7661 = vmatprep.subr.bf16.mxu1 %v18945_v20 }
 0x2db   :  { %7421 = vmatpush2.bf16.msra.mxu0 %v19000_v53  ;;  %7662 = vmatpush1.bf16.msra.mxu1 %v18951_v32 }
 0x2dc   :  { %7422 = vmatprep.subr.bf16.mxu0 %v19006_v56  ;;  %7663 = vmatprep.subr.bf16.mxu1 %v18957_v9  ;;  %v21596_v56 = vld [vmem:[#allocation23_spill] sm:$0xff] }
 0x2de   :  { %v5505_v33 = vpop.f32.mrf.mxu0  ;;  %v5653_v46 = vpop.f32.mrf.mxu1 }
 0x2df   :  { %v5512_v2 = vadd.f32 %v5505_v33, %v5392_v59  ;;  %7423 = vmatpush2.bf16.msra.mxu0 %v19012_v18  ;;  %7664 = vmatpush1.bf16.msra.mxu1 %v18964_v27  ;;  %v7224_v27 = vrot.slane %v19107_v25, %v18171_v41  ;;  %v21604_v25 = vld [vmem:[#allocation18_spill] sm:$0xff]  ;;  %v5664_v59 = vrot.slane %v5542_v4, %v18138_v1 }
 0x2e0   :  { %v5507_v14 = vpop.f32.mrf.mxu0  ;;  %v5655_v20 = vpop.f32.mrf.mxu1  ;;  %7424 = vmatprep.subr.bf16.mxu0 %v21594_v61  ;;  %7665 = vmatprep.subr.bf16.mxu1 %v21595_v44  ;;  %v5668_v33 = vrot.slane %v5542_v4, %v18151_v6  ;;  %v21627_v4 = vld [vmem:[#allocation43_spill] sm:$0xff] }
 0x2e1   :  { %v5516_v32 = vmul.f32 0.01, %v5512_v2  ;;  %v5513_v12 = vadd.f32 %v5507_v14, %v5393_v10  ;;  %vm5514_vm11 = vcmp.gt.f32.partialorder %v5512_v2, 0.0  ;;  %v21612_v10 = vld [vmem:[#allocation24_spill] sm:$0xff]  ;;  %v5671_v14 = vadd.f32 %v5664_v59, %v5653_v46 }
 0x2e2   :  { %v5657_v17 = vpop.f32.mrf.mxu1  ;;  %v5509_v9 = vpop.f32.mrf.mxu0 }
 0x2e3   :  { %vm5515_vm12 = vcmp.gt.f32.partialorder %v5513_v12, 0.0  ;;  %v5517_v53 = vmul.f32 0.01, %v5513_v12  ;;  %7425 = vmatpush2.bf16.msra.mxu0 %v21596_v56  ;;  %7666 = vmatpush1.bf16.msra.mxu1 %v21597_v24  ;;  %v5518_v30 = vsel %vm5514_vm11, %v5512_v2, %v5516_v32  ;;  %v21613_v2 = vld [vmem:[#allocation25_spill] sm:$0xff]  ;;  %v5672_v32 = vadd.f32 %v5668_v33, %v5655_v20  ;;  %v21614_v17 = vld [vmem:[#allocation27_spill] sm:$0xff] }
 0x2e4   :  { %v5658_v18 = vpop.f32.mrf.mxu1  ;;  %7667 = vmatprep.subr.bf16.mxu1 %v21598_v60  ;;  %7945 = vmatprep.subr.bf16.mxu0 %v21599_v39  ;;  %v5510_v34 = vpop.f32.mrf.mxu0  ;;  %v21615_v56 = vld [vmem:[#allocation29_spill] sm:$0xff]  ;;  %v21616_v60 = vld [vmem:[#allocation31_spill] sm:$0xff] }
 0x2e5   :  { %v5519_v54 = vsel %vm5515_vm12, %v5513_v12, %v5517_v53  ;;  %v21617_v39 = vld [vmem:[#allocation33_spill] sm:$0xff] }
 0x2e6   :  { %v15259_v21 = vpack.c.bf16 %v5519_v54, %v5518_v30  ;;  %7427 = vmatmul.mubr.bf16.vlgmr.msra.gmra.mxu0 %v7224_v27  ;;  %v21618_v54 = vld [vmem:[#allocation35_spill] sm:$0xff] }
 0x2e7   :  { %7668 = vmatpush1.bf16.msra.mxu1 %v21600_v23  ;;  %7946 = vmatpush1.bf16.msra.mxu0 %v21601_v45  ;;  %v21619_v23 = vld [vmem:[#allocation37_spill] sm:$0xff]  ;;  %v21620_v45 = vld [vmem:[#allocation44_spill] sm:$0xff] }
 0x2e8   :  { %v5531_v15 = vrot.slane %v15259_v21, %v18171_v41  ;;  %7977 = vmatprep.mubr.bf16.mxu0 %v7492_v28  ;;  %7669 = vmatprep.subr.bf16.mxu1 %v21602_v8  ;;  %v21609_v28 = vld [vmem:[#allocation36_spill] sm:$0xff]  ;;  %v21622_v8 = vld [vmem:[#allocation45_spill] sm:$0xff] }
 0x2e9   :  { %7947 = vmatprep.subr.bf16.mxu0 %v21603_v0  ;;  %v21624_v0 = vld [vmem:[#allocation46_spill] sm:$0xff] }
 0x2ea   :  { %15260 = vst.sshfl [vmem:[#allocation2 + $0x1a] sm:$0x5 pattern:$0x73625140] %v5531_v15  ;;  %v21621_v15 = vld [vmem:[#allocation39_spill] sm:$0xff] }
 0x2eb   :  { %7670 = vmatpush1.bf16.msra.mxu1 %v21604_v25  ;;  %7948 = vmatpush1.bf16.msra.mxu0 %v21605_v13  ;;  %v21625_v25 = vld [vmem:[#allocation41_spill] sm:$0xff]  ;;  %v21626_v13 = vld [vmem:[#allocation42_spill] sm:$0xff] }
 0x2ec   :  { %7671 = vmatprep.subr.bf16.mxu1 %v21606_v47  ;;  %7949 = vmatprep.subr.bf16.mxu0 %v21607_v38  ;;  %v19300_v47 = vld [vmem:[#allocation6 + $0x174] ss:$8 sps:$4 sm:$0xff]  }
 0x2ef   :  { %7672 = vmatpush2.bf16.msra.mxu1 %v21608_v37  ;;  %7950 = vmatpush1.bf16.msra.mxu0 %v21609_v28  ;;  %v19306_v37 = vld [vmem:[#allocation6 + $0x170] ss:$8 sps:$4 sm:$0xff]   ;;  %v19312_v28 = vld [vmem:[#allocation6 + $0x164] ss:$8 sps:$4 sm:$0xff]  }
 0x2f0   :  { %7673 = vmatprep.subr.bf16.mxu1 %v21610_v16  ;;  %7951 = vmatprep.subr.bf16.mxu0 %v21611_v58 }
 0x2f3   :  { %7674 = vmatpush2.bf16.msra.mxu1 %v21612_v10  ;;  %7952 = vmatpush1.bf16.msra.mxu0 %v19085_v52 }
 0x2f4   :  { %7675 = vmatprep.subr.bf16.mxu1 %v21613_v2  ;;  %7953 = vmatprep.subr.bf16.mxu0 %v19093_v22 }
 0x2f6   :  { %v5784_v61 = vpop.f32.mrf.mxu0  ;;  %v5904_v44 = vpop.f32.mrf.mxu1 }
 0x2f7   :  { %v5791_v12 = vadd.f32 %v5784_v61, %v5671_v14  ;;  %7676 = vmatpush2.bf16.msra.mxu1 %v21614_v17  ;;  %7954 = vmatpush1.bf16.msra.mxu0 %v19099_v51  ;;  %v19329_v14 = vld [vmem:[#allocation6 + $0x144] ss:$8 sps:$4 sm:$0xff]   ;;  %v19333_v61 = vld [vmem:[#allocation6 + $0x140] ss:$8 sps:$4 sm:$0xff]   ;;  %v19362_v17 = vld [vmem:[#allocation6 + $0x274] ss:$8 sps:$4 sm:$0xff]  }
 0x2f8   :  { %v5786_v9 = vpop.f32.mrf.mxu0  ;;  %v5906_v53 = vpop.f32.mrf.mxu1  ;;  %7677 = vmatprep.subr.bf16.mxu1 %v21615_v56  ;;  %7955 = vmatprep.subr.bf16.mxu0 %v19105_v42 }
 0x2f9   :  { %v5911_v52 = vadd.f32 %v5904_v44, %v5791_v12  ;;  %v5792_v24 = vadd.f32 %v5786_v9, %v5672_v32  ;;  %v19344_v44 = vld [vmem:[#allocation6 + $0x130] ss:$8 sps:$4 sm:$0xff]   ;;  %v19354_v12 = vld [vmem:[#allocation6 + $0x120] ss:$8 sps:$4 sm:$0xff]  }
 0x2fa   :  { %v5908_v18 = vpop.f32.mrf.mxu1  ;;  %v5788_v27 = vpop.f32.mrf.mxu0 }
 0x2fb   :  { %v5915_v22 = vmul.f32 0.01, %v5911_v52  ;;  %v5912_v46 = vadd.f32 %v5906_v53, %v5792_v24  ;;  %7678 = vmatpush2.bf16.msra.mxu1 %v21616_v60  ;;  %7956 = vmatpush1.bf16.msra.mxu0 %v19113_v7  ;;  %vm5913_vm13 = vcmp.gt.f32.partialorder %v5911_v52, 0.0  ;;  %v19376_v18 = vld [vmem:[#allocation6 + $0x264] ss:$8 sps:$4 sm:$0xff]  }
 0x2fc   :  { %v5909_v20 = vpop.f32.mrf.mxu1  ;;  %7679 = vmatprep.subr.bf16.mxu1 %v21617_v39  ;;  %7957 = vmatprep.subr.bf16.mxu0 %v19118_v63  ;;  %v5789_v51 = vpop.f32.mrf.mxu0  ;;  %v21623_v63 = vld [vmem:[#allocation40_spill] sm:$0xff] }
 0x2fd   :  { %vm5914_vm14 = vcmp.gt.f32.partialorder %v5912_v46, 0.0  ;;  %v5916_v34 = vmul.f32 0.01, %v5912_v46  ;;  %v5917_v42 = vsel %vm5913_vm13, %v5911_v52, %v5915_v22  ;;  %v19370_v52 = vld [vmem:[#allocation6 + $0x270] ss:$8 sps:$4 sm:$0xff]  }
 0x2fe   :  { %v19383_v60 = vld [vmem:[#allocation6 + $0x100] ss:$8 sps:$4 sm:$0xff]   ;;  %v19389_v51 = vld [vmem:[#allocation6 + $0x1f4] ss:$8 sps:$4 sm:$0xff]  }
 0x2ff   :  { %v5918_v30 = vsel %vm5914_vm14, %v5912_v46, %v5916_v34  ;;  %7680 = vmatpush2.bf16.msra.mxu1 %v21618_v54  ;;  %7958 = vmatpush1.bf16.msra.mxu0 %v19124_v40  ;;  %v19296_v40 = vld.sshfl [vmem:[#allocation2 + $0x8] sm:$0x11 pattern:$0x75316420]  ;;  %v19385_v20 = vld [vmem:[#allocation6 + $0x260] ss:$8 sps:$4 sm:$0xff]  }
 0x300   :  { %v15303_v21 = vpack.c.bf16 %v5918_v30, %v5917_v42  ;;  %7681 = vmatprep.subr.bf16.mxu1 %v21619_v23  ;;  %7959 = vmatprep.subr.bf16.mxu0 %v21620_v45  ;;  %v8040_v38 = vcombine.high %v19296_v40, %v19296_v40  ;;  %v19391_v34 = vld [vmem:[#allocation6 + $0x254] ss:$8 sps:$4 sm:$0xff]   ;;  %v19394_v54 = vld [vmem:[#allocation6 + $0x1f0] ss:$8 sps:$4 sm:$0xff]  }
 0x301   :  { %v19398_v45 = vld [vmem:[#allocation6 + $0x250] ss:$8 sps:$4 sm:$0xff]  }
 0x302   :  { %v5930_v7 = vrot.slane %v15303_v21, %v18171_v41  ;;  %v8054_v58 = vrot.slane %v8040_v38, %v18171_v41  ;;  %v19410_v38 = vld [vmem:[#allocation6 + $0x240] ss:$8 sps:$4 sm:$0xff]  }
 0x303   :  { %7682 = vmatpush2.bf16.msra.mxu1 %v21621_v15  ;;  %7960 = vmatpush1.bf16.msra.mxu0 %v21622_v8  ;;  %v19404_v15 = vld [vmem:[#allocation6 + $0x244] ss:$8 sps:$4 sm:$0xff]  }
 0x304   :  { %15304 = vst.sshfl [vmem:[#allocation2 + $0x1c] sm:$0x5 pattern:$0x73625140] %v5930_v7  ;;  %7683 = vmatprep.subr.bf16.mxu1 %v21623_v63  ;;  %7961 = vmatprep.subr.bf16.mxu0 %v21624_v0  ;;  %v19402_v7 = vld [vmem:[#allocation6 + $0x1e4] ss:$8 sps:$4 sm:$0xff]  }
 0x307   :  { %7684 = vmatpush2.bf16.msra.mxu1 %v21625_v25  ;;  %7962 = vmatpush2.bf16.msra.mxu0 %v19151_v26  ;;  %v7485_v26 = vrot.slane %v19212_v29, %v18171_v41 }
 0x308   :  { %7685 = vmatprep.subr.bf16.mxu1 %v21626_v13  ;;  %7963 = vmatprep.subr.bf16.mxu0 %v19155_v57  ;;  %v19408_v13 = vld [vmem:[#allocation6 + $0x1e0] ss:$8 sps:$4 sm:$0xff]  }
 0x30b   :  { %7686 = vmatpush2.bf16.msra.mxu1 %v21627_v4  ;;  %7964 = vmatpush2.bf16.msra.mxu0 %v19161_v43  ;;  %v19317_v43 = vld [vmem:[#allocation6 + $0x160] ss:$8 sps:$4 sm:$0xff]  }
 0x30c   :  { %7965 = vmatprep.subr.bf16.mxu0 %v19165_v62  ;;  %8217 = vmatprep.subr.bf16.mxu1 %v19300_v47  ;;  %v19320_v62 = vld [vmem:[#allocation6 + $0x154] ss:$8 sps:$4 sm:$0xff]  }
 0x30e   :  { %v6052_v57 = vpop.f32.mrf.mxu0  ;;  %v6183_v16 = vpop.f32.mrf.mxu1  ;;  %7688 = vmatmul.mubr.bf16.vlgmr.msra.gmra.mxu1 %v7485_v26 }
 0x30f   :  { %7966 = vmatpush2.bf16.msra.mxu0 %v19169_v48  ;;  %8218 = vmatpush1.bf16.msra.mxu1 %v19306_v37  ;;  %v19325_v48 = vld [vmem:[#allocation6 + $0x150] ss:$8 sps:$4 sm:$0xff]  }
 0x310   :  { %8249 = vmatprep.mubr.bf16.mxu1 %v8054_v58  ;;  %v6054_v59 = vpop.f32.mrf.mxu0  ;;  %v6185_v29 = vpop.f32.mrf.mxu1  ;;  %7967 = vmatprep.subr.bf16.mxu0 %v19173_v50  ;;  %v19423_v58 = vld [vmem:[#allocation6 + $0x230] ss:$8 sps:$4 sm:$0xff]  }
 0x311   :  { %8219 = vmatprep.subr.bf16.mxu1 %v19312_v28 }
 0x312   :  { %v6187_v33 = vpop.f32.mrf.mxu1  ;;  %v6056_v10 = vpop.f32.mrf.mxu0 }
 0x313   :  { %7968 = vmatpush2.bf16.msra.mxu0 %v19177_v55  ;;  %8220 = vmatpush1.bf16.msra.mxu1 %v19317_v43  ;;  %v19337_v55 = vld [vmem:[#allocation6 + $0x134] ss:$8 sps:$4 sm:$0xff]   ;;  %v19433_v33 = vld [vmem:[#allocation6 + $0x1c0] ss:$8 sps:$4 sm:$0xff]  }
 0x314   :  { %v6188_v2 = vpop.f32.mrf.mxu1  ;;  %7969 = vmatprep.subr.bf16.mxu0 %v19181_v31  ;;  %8221 = vmatprep.subr.bf16.mxu1 %v19320_v62  ;;  %v6057_v50 = vpop.f32.mrf.mxu0  ;;  %v5941_v31 = vld [vmem:[%s21347_s2] sm:$0x3]  ;;  %v19435_v10 = vld [vmem:[#allocation6 + $0x220] ss:$8 sps:$4 sm:$0xff]  }
 0x315   :  { %v6067_v32 = vrot.slane %v5941_v31, %v18151_v6  ;;  %v19439_v2 = vld [vmem:[#allocation6 + $0x1b4] ss:$8 sps:$4 sm:$0xff]  }
 0x316   :  { %v19441_v50 = vld [vmem:[#allocation6 + $0x214] ss:$8 sps:$4 sm:$0xff]  }
 0x317   :  { %7970 = vmatpush2.bf16.msra.mxu0 %v19186_v35  ;;  %8222 = vmatpush1.bf16.msra.mxu1 %v19325_v48  ;;  %v19348_v35 = vld [vmem:[#allocation6 + $0x124] ss:$8 sps:$4 sm:$0xff]   ;;  %v6071_v56 = vadd.f32 %v6067_v32, %v6054_v59 }
 0x318   :  { %7971 = vmatprep.subr.bf16.mxu0 %v19190_v19  ;;  %8223 = vmatprep.subr.bf16.mxu1 %v19329_v14  ;;  %v6063_v19 = vrot.slane %v5941_v31, %v18138_v1  ;;  %v19427_v59 = vld [vmem:[#allocation6 + $0x1c4] ss:$8 sps:$4 sm:$0xff]   ;;  %v19445_v31 = vld [vmem:[#allocation6 + $0x1b0] ss:$8 sps:$4 sm:$0xff]  }
 0x319   :  { %v19451_v32 = vld [vmem:[#allocation6 + $0x1a4] ss:$8 sps:$4 sm:$0xff]  }
 0x31a   :  { %v6070_v9 = vadd.f32 %v6063_v19, %v6052_v57  ;;  %v19417_v57 = vld [vmem:[#allocation6 + $0x234] ss:$8 sps:$4 sm:$0xff]   ;;  %v19447_v19 = vld [vmem:[#allocation6 + $0x210] ss:$8 sps:$4 sm:$0xff]  }
 0x31b   :  { %7972 = vmatpush2.bf16.msra.mxu0 %v19194_v36  ;;  %8224 = vmatpush1.bf16.msra.mxu1 %v19333_v61  ;;  %v19356_v36 = vld.sshfl [vmem:[#allocation2 + $0xa] sm:$0x11 pattern:$0x75316420]  ;;  %21628 = vst [vmem:[#allocation21_spill] sm:$0xff] %v19447_v19 }
 0x31c   :  { %7973 = vmatprep.subr.bf16.mxu0 %v19198_v11  ;;  %8225 = vmatprep.subr.bf16.mxu1 %v19337_v55  ;;  %v19360_v11 = vld [vmem:[#allocation6 + $0x114] ss:$8 sps:$4 sm:$0xff]   ;;  %v8301_v53 = vcombine.high %v19356_v36, %v19356_v36  ;;  %v6190_v24 = vadd.f32 %v6183_v16, %v6070_v9  ;;  %v19421_v16 = vld [vmem:[#allocation6 + $0x1d0] ss:$8 sps:$4 sm:$0xff]   ;;  %v19453_v9 = vld [vmem:[#allocation6 + $0x204] ss:$8 sps:$4 sm:$0xff]  }
 0x31d   :  { %21629 = vst [vmem:[#allocation13_spill] sm:$0xff] %v19453_v9 }
 0x31e   :  { %v19379_v22 = vrot.slane %v8301_v53, %v18171_v41  ;;  %v19457_v53 = vld [vmem:[#allocation6 + $0x1a0] ss:$8 sps:$4 sm:$0xff]  }
 0x31f   :  { %7974 = vmatpush2.bf16.msra.mxu0 %v19202_v49  ;;  %8226 = vmatpush1.bf16.msra.mxu1 %v19344_v44  ;;  %v19368_v49 = vld [vmem:[#allocation6 + $0x110] ss:$8 sps:$4 sm:$0xff]  }
 0x320   :  { %7975 = vmatprep.subr.bf16.mxu0 %v19206_v3  ;;  %8227 = vmatprep.subr.bf16.mxu1 %v19348_v35  ;;  %v19374_v3 = vld [vmem:[#allocation6 + $0x104] ss:$8 sps:$4 sm:$0xff]  }
 0x323   :  { %7976 = vmatpush2.bf16.msra.mxu0 %v19210_v5  ;;  %8228 = vmatpush1.bf16.msra.mxu1 %v19354_v12  ;;  %v6191_v5 = vadd.f32 %v6185_v29, %v6071_v56  ;;  %v19429_v29 = vld [vmem:[#allocation6 + $0x224] ss:$8 sps:$4 sm:$0xff]   ;;  %v19459_v56 = vld [vmem:[#allocation6 + $0x200] ss:$8 sps:$4 sm:$0xff]  }
 0x324   :  { %8229 = vmatprep.subr.bf16.mxu1 %v19360_v11  ;;  %8478 = vmatprep.subr.bf16.mxu0 %v19362_v17  ;;  %21630 = vst [vmem:[#allocation23_spill] sm:$0xff] %v19459_v56 }
 0x326   :  { %v6303_v27 = vpop.f32.mrf.mxu0  ;;  %7978 = vmatmul.mubr.bf16.vlgmr.msra.gmra.mxu0 %v7485_v26  ;;  %v19415_v26 = vld [vmem:[#allocation6 + $0x1d4] ss:$8 sps:$4 sm:$0xff]  }
 0x327   :  { %v6310_v46 = vadd.f32 %v6303_v27, %v6190_v24  ;;  %8230 = vmatpush1.bf16.msra.mxu1 %v19368_v49  ;;  %8479 = vmatpush1.bf16.msra.mxu0 %v19370_v52  ;;  %v19463_v24 = vld [vmem:[#allocation6 + $0x194] ss:$8 sps:$4 sm:$0xff]  }
 0x328   :  { %8510 = vmatprep.mubr.bf16.mxu0 %v19379_v22  ;;  %v6305_v39 = vpop.f32.mrf.mxu0  ;;  %8231 = vmatprep.subr.bf16.mxu1 %v19374_v3  ;;  %v19465_v27 = vld [vmem:[#allocation6 + $0x2f4] ss:$8 sps:$4 sm:$0xff]  }
 0x329   :  { %v6314_v42 = vmul.f32 0.01, %v6310_v46  ;;  %v6311_v30 = vadd.f32 %v6305_v39, %v6191_v5  ;;  %8480 = vmatprep.subr.bf16.mxu0 %v19376_v18  ;;  %vm6312_vm15 = vcmp.gt.f32.partialorder %v6310_v46, 0.0  ;;  %21631 = vst [vmem:[#allocation14_spill] sm:$0xff] %v19465_v27  ;;  %v19469_v5 = vld [vmem:[#allocation6 + $0x190] ss:$8 sps:$4 sm:$0xff]  }
 0x32a   :  { %v6307_v21 = vpop.f32.mrf.mxu0  ;;  %v19475_v39 = vld [vmem:[#allocation6 + $0x184] ss:$8 sps:$4 sm:$0xff]  }
 0x32b   :  { %vm6313_vm1 = vcmp.gt.f32.partialorder %v6311_v30, 0.0  ;;  %v6315_v23 = vmul.f32 0.01, %v6311_v30  ;;  %8232 = vmatpush1.bf16.msra.mxu1 %v19383_v60  ;;  %8481 = vmatpush1.bf16.msra.mxu0 %v19385_v20  ;;  %v6316_v63 = vsel %vm6312_vm15, %v6310_v46, %v6314_v42  ;;  %v19471_v46 = vld [vmem:[#allocation6 + $0x2f0] ss:$8 sps:$4 sm:$0xff]  }
 0x32c   :  { %8233 = vmatprep.subr.bf16.mxu1 %v19389_v51  ;;  %8482 = vmatprep.subr.bf16.mxu0 %v19391_v34  ;;  %v6308_v8 = vpop.f32.mrf.mxu0  ;;  %21632 = vst [vmem:[#allocation15_spill] sm:$0xff] %v19471_v46  ;;  %v19477_v42 = vld [vmem:[#allocation6 + $0x2e4] ss:$8 sps:$4 sm:$0xff]   ;;  %v19483_v21 = vld [vmem:[#allocation6 + $0x2e0] ss:$8 sps:$4 sm:$0xff]  }
 0x32d   :  { %v6317_v0 = vsel %vm6313_vm1, %v6311_v30, %v6315_v23  ;;  %21633 = vst [vmem:[#allocation26_spill] sm:$0xff] %v19477_v42  ;;  %v19481_v30 = vld [vmem:[#allocation6 + $0x180] ss:$8 sps:$4 sm:$0xff]   ;;  %21634 = vst [vmem:[#allocation16_spill] sm:$0xff] %v19483_v21  ;;  %v19487_v23 = vld [vmem:[#allocation6 + $0x2d4] ss:$8 sps:$4 sm:$0xff]  }
 0x32e   :  { %v15347_v25 = vpack.c.bf16 %v6317_v0, %v6316_v63  ;;  %21635 = vst [vmem:[#allocation28_spill] sm:$0xff] %v19487_v23  ;;  %v19489_v8 = vld [vmem:[#allocation6 + $0x74] ss:$8 sps:$4 sm:$0xff]   ;;  %v19493_v63 = vld [vmem:[#allocation6 + $0x2d0] ss:$8 sps:$4 sm:$0xff]  }
 0x32f   :  { %8234 = vmatpush2.bf16.msra.mxu1 %v19394_v54  ;;  %8483 = vmatpush1.bf16.msra.mxu0 %v19398_v45  ;;  %21636 = vst [vmem:[#allocation17_spill] sm:$0xff] %v19493_v63  ;;  %v19495_v0 = vld [vmem:[#allocation6 + $0x70] ss:$8 sps:$4 sm:$0xff]  }
 0x330   :  { %v6329_v4 = vrot.slane %v15347_v25, %v18171_v41  ;;  %8235 = vmatprep.subr.bf16.mxu1 %v19402_v7  ;;  %8484 = vmatprep.subr.bf16.mxu0 %v19404_v15  ;;  %21637 = vst [vmem:[#allocation30_spill] sm:$0xff] %v19495_v0  ;;  %v8047_v25 = vrot.slane %v19296_v40, %v18171_v41 }
 0x332   :  { %15348 = vst.sshfl [vmem:[#allocation2 + $0x1e] sm:$0x5 pattern:$0x73625140] %v6329_v4  ;;  %v19501_v4 = vld [vmem:[#allocation6 + $0x2c4] ss:$8 sps:$4 sm:$0xff]  }
 0x333   :  { %8236 = vmatpush2.bf16.msra.mxu1 %v19408_v13  ;;  %8485 = vmatpush1.bf16.msra.mxu0 %v19410_v38  ;;  %21638 = vst [vmem:[#allocation18_spill] sm:$0xff] %v19501_v4 }
 0x334   :  { %8237 = vmatprep.subr.bf16.mxu1 %v19415_v26  ;;  %8486 = vmatprep.subr.bf16.mxu0 %v19417_v57 }
 0x337   :  { %8238 = vmatpush2.bf16.msra.mxu1 %v19421_v16  ;;  %8487 = vmatpush1.bf16.msra.mxu0 %v19423_v58 }
 0x338   :  { %8239 = vmatprep.subr.bf16.mxu1 %v19427_v59  ;;  %8488 = vmatprep.subr.bf16.mxu0 %v19429_v29 }
 0x33b   :  { %8240 = vmatpush2.bf16.msra.mxu1 %v19433_v33  ;;  %8489 = vmatpush1.bf16.msra.mxu0 %v19435_v10 }
 0x33c   :  { %8241 = vmatprep.subr.bf16.mxu1 %v19439_v2  ;;  %8490 = vmatprep.subr.bf16.mxu0 %v19441_v50 }
 0x33f   :  { %8242 = vmatpush2.bf16.msra.mxu1 %v19445_v31  ;;  %8491 = vmatpush1.bf16.msra.mxu0 %v19447_v19 }
 0x340   :  { %8243 = vmatprep.subr.bf16.mxu1 %v19451_v32  ;;  %8492 = vmatprep.subr.bf16.mxu0 %v19453_v9  ;;  %v19522_v9 = vld [vmem:[#allocation6 + $0x50] ss:$8 sps:$4 sm:$0xff]  }
 0x341   :  { %21645 = vst [vmem:[#allocation38_spill] sm:$0xff] %v19522_v9 }
 0x343   :  { %8244 = vmatpush2.bf16.msra.mxu1 %v19457_v53  ;;  %8493 = vmatpush1.bf16.msra.mxu0 %v19459_v56  ;;  %v19515_v56 = vld [vmem:[#allocation6 + $0x54] ss:$8 sps:$4 sm:$0xff]  }
 0x344   :  { %8245 = vmatprep.subr.bf16.mxu1 %v19463_v24  ;;  %8494 = vmatprep.subr.bf16.mxu0 %v19465_v27  ;;  %v19509_v27 = vld [vmem:[#allocation6 + $0x60] ss:$8 sps:$4 sm:$0xff]   ;;  %21643 = vst [vmem:[#allocation36_spill] sm:$0xff] %v19515_v56 }
 0x345   :  { %21641 = vst [vmem:[#allocation34_spill] sm:$0xff] %v19509_v27 }
 0x347   :  { %8246 = vmatpush2.bf16.msra.mxu1 %v19469_v5  ;;  %8495 = vmatpush2.bf16.msra.mxu0 %v19471_v46 }
 0x348   :  { %8247 = vmatprep.subr.bf16.mxu1 %v19475_v39  ;;  %8496 = vmatprep.subr.bf16.mxu0 %v19477_v42  ;;  %v19503_v42 = vld [vmem:[#allocation6 + $0x64] ss:$8 sps:$4 sm:$0xff]  }
 0x349   :  { %21639 = vst [vmem:[#allocation32_spill] sm:$0xff] %v19503_v42 }
 0x34b   :  { %8248 = vmatpush2.bf16.msra.mxu1 %v19481_v30  ;;  %8497 = vmatpush2.bf16.msra.mxu0 %v19483_v21  ;;  %v19507_v21 = vld [vmem:[#allocation6 + $0x2c0] ss:$8 sps:$4 sm:$0xff]  }
 0x34c   :  { %8498 = vmatprep.subr.bf16.mxu0 %v19487_v23  ;;  %8768 = vmatprep.subr.bf16.mxu1 %v19489_v8  ;;  %21640 = vst [vmem:[#allocation19_spill] sm:$0xff] %v19507_v21  ;;  %v19513_v23 = vld [vmem:[#allocation6 + $0x2b4] ss:$8 sps:$4 sm:$0xff]  }
 0x34d   :  { %21642 = vst [vmem:[#allocation20_spill] sm:$0xff] %v19513_v23 }
 0x34e   :  { %v6594_v46 = vpop.f32.mrf.mxu1  ;;  %8250 = vmatmul.mubr.bf16.vlgmr.msra.gmra.mxu1 %v8047_v25 }
 0x34f   :  { %8499 = vmatpush2.bf16.msra.mxu0 %v19493_v63  ;;  %8769 = vmatpush1.bf16.msra.mxu1 %v19495_v0  ;;  %v19520_v63 = vld [vmem:[#allocation6 + $0x2b0] ss:$8 sps:$4 sm:$0xff]  }
 0x350   :  { %8800 = vmatprep.mubr.bf16.mxu1 %v19379_v22  ;;  %v6596_v40 = vpop.f32.mrf.mxu1  ;;  %8500 = vmatprep.subr.bf16.mxu0 %v19501_v4  ;;  %21644 = vst [vmem:[#allocation22_spill] sm:$0xff] %v19520_v63  ;;  %v19526_v22 = vld [vmem:[#allocation6 + $0x2a4] ss:$8 sps:$4 sm:$0xff]  }
 0x351   :  { %8770 = vmatprep.subr.bf16.mxu1 %v19503_v42  ;;  %21646 = vst [vmem:[#allocation24_spill] sm:$0xff] %v19526_v22  ;;  %v19528_v4 = vld [vmem:[#allocation6 + $0x44] ss:$8 sps:$4 sm:$0xff]  }
 0x352   :  { %v6598_v25 = vpop.f32.mrf.mxu1  ;;  %21647 = vst [vmem:[#allocation25_spill] sm:$0xff] %v19528_v4 }
 0x353   :  { %8501 = vmatpush2.bf16.msra.mxu0 %v19507_v21  ;;  %8771 = vmatpush1.bf16.msra.mxu1 %v19509_v27  ;;  %v19532_v25 = vld [vmem:[#allocation6 + $0x2a0] ss:$8 sps:$4 sm:$0xff]   ;;  %v19557_v27 = vld.sshfl [vmem:[#allocation2 + $0xc] sm:$0x11 pattern:$0x75316420] }
 0x354   :  { %v6599_v0 = vpop.f32.mrf.mxu1  ;;  %8502 = vmatprep.subr.bf16.mxu0 %v19513_v23  ;;  %8772 = vmatprep.subr.bf16.mxu1 %v19515_v56  ;;  %21648 = vst [vmem:[#allocation27_spill] sm:$0xff] %v19532_v25  ;;  %v19534_v21 = vld [vmem:[#allocation6 + $0x40] ss:$8 sps:$4 sm:$0xff]   ;;  %v19540_v23 = vld [vmem:[#allocation6 + $0x34] ss:$8 sps:$4 sm:$0xff]   ;;  %v8863_v42 = vcombine.high %v19557_v27, %v19557_v27 }
 0x355   :  { %21649 = vst [vmem:[#allocation29_spill] sm:$0xff] %v19534_v21  ;;  %v19538_v0 = vld [vmem:[#allocation6 + $0x294] ss:$8 sps:$4 sm:$0xff]   ;;  %21651 = vst [vmem:[#allocation33_spill] sm:$0xff] %v19540_v23  ;;  %v19544_v56 = vld [vmem:[#allocation6 + $0x290] ss:$8 sps:$4 sm:$0xff]  }
 0x356   :  { %21650 = vst [vmem:[#allocation31_spill] sm:$0xff] %v19538_v0  ;;  %21652 = vst [vmem:[#allocation35_spill] sm:$0xff] %v19544_v56 }
 0x357   :  { %8503 = vmatpush2.bf16.msra.mxu0 %v19520_v63  ;;  %8773 = vmatpush1.bf16.msra.mxu1 %v19522_v9  ;;  %v19546_v63 = vld [vmem:[#allocation6 + $0x30] ss:$8 sps:$4 sm:$0xff]   ;;  %v19550_v9 = vld [vmem:[#allocation6 + $0x284] ss:$8 sps:$4 sm:$0xff]  }
 0x358   :  { %8504 = vmatprep.subr.bf16.mxu0 %v19526_v22  ;;  %8774 = vmatprep.subr.bf16.mxu1 %v19528_v4  ;;  %21653 = vst [vmem:[#allocation37_spill] sm:$0xff] %v19546_v63  ;;  %21654 = vst [vmem:[#allocation44_spill] sm:$0xff] %v19550_v9  ;;  %v19552_v22 = vld [vmem:[#allocation6 + $0x24] ss:$8 sps:$4 sm:$0xff]   ;;  %v6340_v4 = vld [vmem:[%s21349_s4] sm:$0x3] }
 0x359   :  { %21655 = vst [vmem:[#allocation39_spill] sm:$0xff] %v19552_v22  ;;  %v6609_v19 = vrot.slane %v6340_v4, %v18151_v6 }
 0x35b   :  { %8505 = vmatpush2.bf16.msra.mxu0 %v19532_v25  ;;  %8775 = vmatpush1.bf16.msra.mxu1 %v19534_v21  ;;  %v19561_v25 = vld [vmem:[#allocation6 + $0x280] ss:$8 sps:$4 sm:$0xff]  }
 0x35c   :  { %8506 = vmatprep.subr.bf16.mxu0 %v19538_v0  ;;  %8776 = vmatprep.subr.bf16.mxu1 %v19540_v23  ;;  %21656 = vst [vmem:[#allocation45_spill] sm:$0xff] %v19561_v25  ;;  %v19563_v21 = vld [vmem:[#allocation6 + $0x20] ss:$8 sps:$4 sm:$0xff]   ;;  %v19567_v0 = vld [vmem:[#allocation6 + $0x14] ss:$8 sps:$4 sm:$0xff]   ;;  %v6605_v23 = vrot.slane %v6340_v4, %v18138_v1  ;;  %v8877_v4 = vrot.slane %v8863_v42, %v18171_v41 }
 0x35d   :  { %21657 = vst [vmem:[#allocation40_spill] sm:$0xff] %v19567_v0  ;;  %v19583_v1 = vld [vmem:[#allocation6 + $0x4] ss:$8 sps:$4 sm:$0xff]  }
 0x35f   :  { %8507 = vmatpush2.bf16.msra.mxu0 %v19544_v56  ;;  %8777 = vmatpush1.bf16.msra.mxu1 %v19546_v63  ;;  %v19575_v56 = vld [vmem:[#allocation6 + $0x10] ss:$8 sps:$4 sm:$0xff]  }
 0x360   :  { %8508 = vmatprep.subr.bf16.mxu0 %v19550_v9  ;;  %8778 = vmatprep.subr.bf16.mxu1 %v19552_v22  ;;  %v19579_v9 = vrot.slane %v19356_v36, %v18171_v41  ;;  %v6612_v22 = vadd.f32 %v6605_v23, %v6594_v46  ;;  %v19589_v36 = vld [vmem:[#allocation6] ss:$8 sps:$4 sm:$0xff]  }
 0x363   :  { %8509 = vmatpush2.bf16.msra.mxu0 %v19561_v25  ;;  %8779 = vmatpush1.bf16.msra.mxu1 %v19563_v21  ;;  %v6613_v25 = vadd.f32 %v6609_v19, %v6596_v40  ;;  %v19601_v40 = vld [vmem:[#allocation6 + $0xe4] ss:$8 sps:$4 sm:$0xff]  }
 0x364   :  { %8780 = vmatprep.subr.bf16.mxu1 %v19567_v0  ;;  %9040 = vmatprep.subr.bf16.mxu0 %v19300_v47  ;;  %v19592_v47 = vld [vmem:[#allocation6 + $0xf4] ss:$8 sps:$4 sm:$0xff]  }
 0x366   :  { %v6867_v63 = vpop.f32.mrf.mxu0  ;;  %8511 = vmatmul.mubr.bf16.vlgmr.msra.gmra.mxu0 %v19579_v9 }
 0x367   :  { %v6874_v6 = vadd.f32 %v6867_v63, %v6612_v22  ;;  %8781 = vmatpush1.bf16.msra.mxu1 %v19575_v56  ;;  %9041 = vmatpush1.bf16.msra.mxu0 %v19306_v37  ;;  %v19597_v37 = vld [vmem:[#allocation6 + $0xf0] ss:$8 sps:$4 sm:$0xff]  }
 0x368   :  { %9072 = vmatprep.mubr.bf16.mxu0 %v8877_v4  ;;  %v6869_v0 = vpop.f32.mrf.mxu0  ;;  %8782 = vmatprep.subr.bf16.mxu1 %v19583_v1  ;;  %v19610_v4 = vld [vmem:[#allocation6 + $0xd4] ss:$8 sps:$4 sm:$0xff]  }
 0x369   :  { %v6878_v46 = vmul.f32 0.01, %v6874_v6  ;;  %v6875_v23 = vadd.f32 %v6869_v0, %v6613_v25  ;;  %9042 = vmatprep.subr.bf16.mxu0 %v19312_v28  ;;  %vm6876_vm2 = vcmp.gt.f32.partialorder %v6874_v6, 0.0  ;;  %v19605_v0 = vld [vmem:[#allocation6 + $0xe0] ss:$8 sps:$4 sm:$0xff]  }
 0x36a   :  { %v6871_v42 = vpop.f32.mrf.mxu0 }
 0x36b   :  { %vm6877_vm3 = vcmp.gt.f32.partialorder %v6875_v23, 0.0  ;;  %v6879_v19 = vmul.f32 0.01, %v6875_v23  ;;  %8783 = vmatpush1.bf16.msra.mxu1 %v19589_v36  ;;  %9043 = vmatpush1.bf16.msra.mxu0 %v19317_v43  ;;  %v6880_v22 = vsel %vm6876_vm2, %v6874_v6, %v6878_v46  ;;  %v19614_v6 = vld [vmem:[#allocation6 + $0xd0] ss:$8 sps:$4 sm:$0xff]   ;;  %v21680_v46 = vld [vmem:[#allocation40_spill] sm:$0xff] }
 0x36c   :  { %v6872_v63 = vpop.f32.mrf.mxu0  ;;  %8784 = vmatprep.subr.bf16.mxu1 %v19592_v47  ;;  %9044 = vmatprep.subr.bf16.mxu0 %v19320_v62  ;;  %v19618_v62 = vld [vmem:[#allocation6 + $0xc4] ss:$8 sps:$4 sm:$0xff]  }
 0x36d   :  { %v6881_v25 = vsel %vm6877_vm3, %v6875_v23, %v6879_v19  ;;  %v21681_v23 = vld [vmem:[#allocation22_spill] sm:$0xff]  ;;  %v21682_v42 = vld [vmem:[#allocation24_spill] sm:$0xff]  ;;  %v21683_v19 = vld [vmem:[#allocation27_spill] sm:$0xff] }
 0x36e   :  { %v15415_v28 = vpack.c.bf16 %v6881_v25, %v6880_v22  ;;  %v21684_v63 = vld [vmem:[#allocation31_spill] sm:$0xff] }
 0x36f   :  { %8785 = vmatpush2.bf16.msra.mxu1 %v19597_v37  ;;  %9045 = vmatpush1.bf16.msra.mxu0 %v19325_v48  ;;  %v19622_v48 = vld [vmem:[#allocation6 + $0xc0] ss:$8 sps:$4 sm:$0xff]  }
 0x370   :  { %v6893_v43 = vrot.slane %v15415_v28, %v18171_v41  ;;  %8786 = vmatprep.subr.bf16.mxu1 %v19601_v40  ;;  %9046 = vmatprep.subr.bf16.mxu0 %v19329_v14  ;;  %v19626_v14 = vld [vmem:[#allocation6 + $0xb4] ss:$8 sps:$4 sm:$0xff]   ;;  %v21685_v22 = vld [vmem:[#allocation11_spill] sm:$0xff] }
 0x371   :  { %v21686_v28 = vld [vmem:[#allocation35_spill] sm:$0xff] }
 0x372   :  { %15416 = vst.sshfl [vmem:[#allocation3] sm:$0x5 pattern:$0x73625140] %v6893_v43  ;;  %v21688_v43 = vld [vmem:[#allocation12_spill] sm:$0xff] }
 0x373   :  { %8787 = vmatpush2.bf16.msra.mxu1 %v19605_v0  ;;  %9047 = vmatpush1.bf16.msra.mxu0 %v19333_v61  ;;  %v19630_v61 = vld [vmem:[#allocation6 + $0xb0] ss:$8 sps:$4 sm:$0xff]  }
 0x374   :  { %8788 = vmatprep.subr.bf16.mxu1 %v19610_v4  ;;  %9048 = vmatprep.subr.bf16.mxu0 %v19337_v55  ;;  %v19634_v55 = vld [vmem:[#allocation6 + $0xa4] ss:$8 sps:$4 sm:$0xff]  }
 0x377   :  { %8789 = vmatpush2.bf16.msra.mxu1 %v19614_v6  ;;  %9049 = vmatpush1.bf16.msra.mxu0 %v19344_v44  ;;  %v19638_v44 = vld [vmem:[#allocation6 + $0xa0] ss:$8 sps:$4 sm:$0xff]  }
 0x378   :  { %8790 = vmatprep.subr.bf16.mxu1 %v19618_v62  ;;  %9050 = vmatprep.subr.bf16.mxu0 %v19348_v35  ;;  %v19642_v35 = vld [vmem:[#allocation6 + $0x94] ss:$8 sps:$4 sm:$0xff]  }
 0x37b   :  { %8791 = vmatpush2.bf16.msra.mxu1 %v19622_v48  ;;  %9051 = vmatpush1.bf16.msra.mxu0 %v19354_v12  ;;  %v19646_v12 = vld [vmem:[#allocation6 + $0x90] ss:$8 sps:$4 sm:$0xff]  }
 0x37c   :  { %8792 = vmatprep.subr.bf16.mxu1 %v19626_v14  ;;  %9052 = vmatprep.subr.bf16.mxu0 %v19360_v11  ;;  %v19650_v11 = vld [vmem:[#allocation6 + $0x84] ss:$8 sps:$4 sm:$0xff]  }
 0x37f   :  { %8793 = vmatpush2.bf16.msra.mxu1 %v19630_v61  ;;  %9053 = vmatpush1.bf16.msra.mxu0 %v19368_v49  ;;  %v19654_v49 = vld [vmem:[#allocation6 + $0x80] ss:$8 sps:$4 sm:$0xff]  }
 0x380   :  { %8794 = vmatprep.subr.bf16.mxu1 %v19634_v55  ;;  %9054 = vmatprep.subr.bf16.mxu0 %v19374_v3  ;;  %v19656_v3 = vld.sshfl [vmem:[#allocation2 + $0xe] sm:$0x11 pattern:$0x75316420] }
 0x383   :  { %8795 = vmatpush2.bf16.msra.mxu1 %v19638_v44  ;;  %9055 = vmatpush1.bf16.msra.mxu0 %v19383_v60  ;;  %v9124_v60 = vcombine.high %v19656_v3, %v19656_v3 }
 0x384   :  { %8796 = vmatprep.subr.bf16.mxu1 %v19642_v35  ;;  %9056 = vmatprep.subr.bf16.mxu0 %v19389_v51 }
 0x387   :  { %8797 = vmatpush2.bf16.msra.mxu1 %v19646_v12  ;;  %9057 = vmatpush2.bf16.msra.mxu0 %v19394_v54  ;;  %v9138_v54 = vrot.slane %v9124_v60, %v18171_v41 }
 0x388   :  { %8798 = vmatprep.subr.bf16.mxu1 %v19650_v11  ;;  %9058 = vmatprep.subr.bf16.mxu0 %v19402_v7 }
 0x38b   :  { %8799 = vmatpush2.bf16.msra.mxu1 %v19654_v49  ;;  %9059 = vmatpush2.bf16.msra.mxu0 %v19408_v13 }
 0x38c   :  { %9060 = vmatprep.subr.bf16.mxu0 %v19415_v26  ;;  %9301 = vmatprep.subr.bf16.mxu1 %v19362_v17 }
 0x38e   :  { %v19666_v51 = vpop.f32.mrf.mxu1  ;;  %8801 = vmatmul.mubr.bf16.vlgmr.msra.gmra.mxu1 %v19579_v9  ;;  %v21672_v9 = vld [vmem:[#allocation28_spill] sm:$0xff] }
 0x38f   :  { %9061 = vmatpush2.bf16.msra.mxu0 %v19421_v16  ;;  %9302 = vmatpush1.bf16.msra.mxu1 %v19370_v52  ;;  %v8870_v52 = vrot.slane %v19557_v27, %v18171_v41  ;;  %v21663_v16 = vld [vmem:[#allocation34_spill] sm:$0xff]  ;;  %v21675_v27 = vld [vmem:[#allocation37_spill] sm:$0xff] }
 0x390   :  { %9333 = vmatprep.mubr.bf16.mxu1 %v9138_v54  ;;  %v19672_v7 = vpop.f32.mrf.mxu1  ;;  %9062 = vmatprep.subr.bf16.mxu0 %v19427_v59  ;;  %v21664_v59 = vld [vmem:[#allocation14_spill] sm:$0xff] }
 0x391   :  { %9303 = vmatprep.subr.bf16.mxu1 %v19376_v18 }
 0x392   :  { %v7160_v13 = vpop.f32.mrf.mxu1 }
 0x393   :  { %9063 = vmatpush2.bf16.msra.mxu0 %v19433_v33  ;;  %9304 = vmatpush1.bf16.msra.mxu1 %v19385_v20  ;;  %v21658_v20 = vld [vmem:[#allocation21_spill] sm:$0xff]  ;;  %v21666_v33 = vld [vmem:[#allocation15_spill] sm:$0xff] }
 0x394   :  { %v7161_v17 = vpop.f32.mrf.mxu1  ;;  %9064 = vmatprep.subr.bf16.mxu0 %v19439_v2  ;;  %9305 = vmatprep.subr.bf16.mxu1 %v19391_v34  ;;  %v21659_v34 = vld [vmem:[#allocation30_spill] sm:$0xff]  ;;  %v21689_v13 = vld [vmem:[#allocation45_spill] sm:$0xff] }
 0x395   :  { %v21668_v2 = vld [vmem:[#allocation26_spill] sm:$0xff]  ;;  %v19752_v17 = vrot.slane %v19656_v3, %v18171_v41  ;;  %v19763_v3 = vld [vmem:[#allocation6 + $0x160] ss:$8 sps:$4 sm:$0xff]  }
 0x397   :  { %9065 = vmatpush2.bf16.msra.mxu0 %v19445_v31  ;;  %9306 = vmatpush1.bf16.msra.mxu1 %v19398_v45  ;;  %v21670_v31 = vld [vmem:[#allocation16_spill] sm:$0xff] }
 0x398   :  { %9066 = vmatprep.subr.bf16.mxu0 %v19451_v32  ;;  %9307 = vmatprep.subr.bf16.mxu1 %v19404_v15  ;;  %v21660_v15 = vld [vmem:[#allocation13_spill] sm:$0xff] }
 0x399   :  { %v21671_v32 = vld [vmem:[#allocation29_spill] sm:$0xff] }
 0x39b   :  { %9067 = vmatpush2.bf16.msra.mxu0 %v19457_v53  ;;  %9308 = vmatpush1.bf16.msra.mxu1 %v19410_v38  ;;  %v21661_v38 = vld [vmem:[#allocation32_spill] sm:$0xff]  ;;  %v21673_v53 = vld [vmem:[#allocation33_spill] sm:$0xff] }
 0x39c   :  { %9068 = vmatprep.subr.bf16.mxu0 %v19463_v24  ;;  %9309 = vmatprep.subr.bf16.mxu1 %v19417_v57  ;;  %v21662_v57 = vld [vmem:[#allocation23_spill] sm:$0xff]  ;;  %v21674_v24 = vld [vmem:[#allocation17_spill] sm:$0xff] }
 0x39f   :  { %9069 = vmatpush2.bf16.msra.mxu0 %v19469_v5  ;;  %9310 = vmatpush1.bf16.msra.mxu1 %v19423_v58  ;;  %v21676_v5 = vld [vmem:[#allocation18_spill] sm:$0xff] }
 0x3a0   :  { %9070 = vmatprep.subr.bf16.mxu0 %v19475_v39  ;;  %9311 = vmatprep.subr.bf16.mxu1 %v19429_v29  ;;  %v21665_v29 = vld [vmem:[#allocation36_spill] sm:$0xff]  ;;  %v21677_v39 = vld [vmem:[#allocation39_spill] sm:$0xff] }
 0x3a3   :  { %9071 = vmatpush2.bf16.msra.mxu0 %v19481_v30  ;;  %9312 = vmatpush1.bf16.msra.mxu1 %v19435_v10  ;;  %v21667_v10 = vld [vmem:[#allocation38_spill] sm:$0xff]  ;;  %v21678_v30 = vld [vmem:[#allocation19_spill] sm:$0xff] }
 0x3a4   :  { %9313 = vmatprep.subr.bf16.mxu1 %v19441_v50  ;;  %9591 = vmatprep.subr.bf16.mxu0 %v19489_v8  ;;  %v21669_v50 = vld [vmem:[#allocation25_spill] sm:$0xff]  ;;  %v21679_v8 = vld [vmem:[#allocation20_spill] sm:$0xff] }
 0x3a6   :  { %v7428_v18 = vpop.f32.mrf.mxu0  ;;  %9073 = vmatmul.mubr.bf16.vlgmr.msra.gmra.mxu0 %v8870_v52 }
 0x3a7   :  { %9314 = vmatpush1.bf16.msra.mxu1 %v21658_v20  ;;  %9592 = vmatpush1.bf16.msra.mxu0 %v21659_v34  ;;  %v19757_v20 = vld [vmem:[#allocation6 + $0x164] ss:$8 sps:$4 sm:$0xff]  }
 0x3a8   :  { %9623 = vmatprep.mubr.bf16.mxu0 %v9138_v54  ;;  %v7430_v45 = vpop.f32.mrf.mxu0  ;;  %9315 = vmatprep.subr.bf16.mxu1 %v21660_v15 }
 0x3a9   :  { %9593 = vmatprep.subr.bf16.mxu0 %v21661_v38 }
 0x3aa   :  { %v7432_v26 = vpop.f32.mrf.mxu0 }
 0x3ab   :  { %9316 = vmatpush1.bf16.msra.mxu1 %v21662_v57  ;;  %9594 = vmatpush1.bf16.msra.mxu0 %v21663_v16 }
 0x3ac   :  { %v7433_v58 = vpop.f32.mrf.mxu0  ;;  %9317 = vmatprep.subr.bf16.mxu1 %v21664_v59  ;;  %9595 = vmatprep.subr.bf16.mxu0 %v21665_v29  ;;  %v19779_v29 = vld [vmem:[#allocation6 + $0x140] ss:$8 sps:$4 sm:$0xff]  }
 0x3af   :  { %9318 = vmatpush2.bf16.msra.mxu1 %v21666_v33  ;;  %9596 = vmatpush1.bf16.msra.mxu0 %v21667_v10  ;;  %v19788_v33 = vld [vmem:[#allocation6 + $0x130] ss:$8 sps:$4 sm:$0xff]   ;;  %v19798_v10 = vld.sshfl [vmem:[#allocation2 + $0x12] sm:$0x11 pattern:$0x75316420] }
 0x3b0   :  { %9319 = vmatprep.subr.bf16.mxu1 %v21668_v2  ;;  %9597 = vmatprep.subr.bf16.mxu0 %v21669_v50  ;;  %v19804_v2 = vld [vmem:[#allocation6 + $0x274] ss:$8 sps:$4 sm:$0xff]   ;;  %v19812_v50 = vld [vmem:[#allocation6 + $0x270] ss:$8 sps:$4 sm:$0xff]  }
 0x3b3   :  { %9320 = vmatpush2.bf16.msra.mxu1 %v21670_v31  ;;  %9598 = vmatpush1.bf16.msra.mxu0 %v21671_v32  ;;  %v19818_v31 = vld [vmem:[#allocation6 + $0x264] ss:$8 sps:$4 sm:$0xff]  }
 0x3b4   :  { %9321 = vmatprep.subr.bf16.mxu1 %v21672_v9  ;;  %9599 = vmatprep.subr.bf16.mxu0 %v21673_v53  ;;  %v19828_v9 = vld [vmem:[#allocation6 + $0x100] ss:$8 sps:$4 sm:$0xff]  }
 0x3b5   :  { %v19830_v53 = vld [vmem:[#allocation6 + $0x260] ss:$8 sps:$4 sm:$0xff]  }
 0x3b7   :  { %9322 = vmatpush2.bf16.msra.mxu1 %v21674_v24  ;;  %9600 = vmatpush1.bf16.msra.mxu0 %v21675_v27  ;;  %v19836_v27 = vld [vmem:[#allocation6 + $0x1f4] ss:$8 sps:$4 sm:$0xff]  }
 0x3b8   :  { %9323 = vmatprep.subr.bf16.mxu1 %v21676_v5  ;;  %9601 = vmatprep.subr.bf16.mxu0 %v21677_v39  ;;  %v19838_v5 = vld [vmem:[#allocation6 + $0x254] ss:$8 sps:$4 sm:$0xff]  }
 0x3bb   :  { %9324 = vmatpush2.bf16.msra.mxu1 %v21678_v30  ;;  %9602 = vmatpush1.bf16.msra.mxu0 %v19563_v21  ;;  %v6903_v21 = vld [vmem:[%s21349_s4] sm:$0x3] }
 0x3bc   :  { %9325 = vmatprep.subr.bf16.mxu1 %v21679_v8  ;;  %9603 = vmatprep.subr.bf16.mxu0 %v21680_v46  ;;  %v7167_v25 = vrot.slane %v6903_v21, %v21685_v22  ;;  %v7171_v60 = vrot.slane %v6903_v21, %v21688_v43  ;;  %v19843_v30 = vld [vmem:[#allocation6 + $0x1f0] ss:$8 sps:$4 sm:$0xff]   ;;  %v19857_v21 = vld [vmem:[#allocation6 + $0x240] ss:$8 sps:$4 sm:$0xff]  }
 0x3bd   :  { %v19845_v8 = vld [vmem:[#allocation6 + $0x250] ss:$8 sps:$4 sm:$0xff]  }
 0x3bf   :  { %9326 = vmatpush2.bf16.msra.mxu1 %v21681_v23  ;;  %9604 = vmatpush1.bf16.msra.mxu0 %v19575_v56  ;;  %v19736_v56 = vld.sshfl [vmem:[#allocation2 + $0x10] sm:$0x11 pattern:$0x75316420]  ;;  %v19849_v23 = vld [vmem:[#allocation6 + $0x1e4] ss:$8 sps:$4 sm:$0xff]  }
 0x3c0   :  { %9327 = vmatprep.subr.bf16.mxu1 %v21682_v42  ;;  %9605 = vmatprep.subr.bf16.mxu0 %v19583_v1  ;;  %v21687_v1 = vld [vmem:[#allocation44_spill] sm:$0xff]  ;;  %v9686_v54 = vcombine.high %v19736_v56, %v19736_v56 }
 0x3c1   :  { %v19851_v42 = vld [vmem:[#allocation6 + $0x244] ss:$8 sps:$4 sm:$0xff]  }
 0x3c3   :  { %9328 = vmatpush2.bf16.msra.mxu1 %v21683_v19  ;;  %9606 = vmatpush1.bf16.msra.mxu0 %v19589_v36  ;;  %v19740_v36 = vld [vmem:[#allocation6 + $0x174] ss:$8 sps:$4 sm:$0xff]   ;;  %v19855_v19 = vld [vmem:[#allocation6 + $0x1e0] ss:$8 sps:$4 sm:$0xff]  }
 0x3c4   :  { %9329 = vmatprep.subr.bf16.mxu1 %v21684_v63  ;;  %9607 = vmatprep.subr.bf16.mxu0 %v19592_v47  ;;  %v7174_v47 = vadd.f32 %v7167_v25, %v19666_v51  ;;  %v19861_v63 = vld [vmem:[#allocation6 + $0x1d4] ss:$8 sps:$4 sm:$0xff]  }
 0x3c5   :  { %v19863_v25 = vld [vmem:[#allocation6 + $0x234] ss:$8 sps:$4 sm:$0xff]  }
 0x3c6   :  { %v7435_v52 = vadd.f32 %v7428_v18, %v7174_v47  ;;  %v19879_v47 = vld [vmem:[#allocation6 + $0x1c0] ss:$8 sps:$4 sm:$0xff]  }
 0x3c7   :  { %9330 = vmatpush2.bf16.msra.mxu1 %v21686_v28  ;;  %9608 = vmatpush2.bf16.msra.mxu0 %v19597_v37  ;;  %v19748_v37 = vld [vmem:[#allocation6 + $0x170] ss:$8 sps:$4 sm:$0xff]  }
 0x3c8   :  { %9331 = vmatprep.subr.bf16.mxu1 %v21687_v1  ;;  %9609 = vmatprep.subr.bf16.mxu0 %v19601_v40  ;;  %v7175_v40 = vadd.f32 %v7171_v60, %v19672_v7  ;;  %v19766_v7 = vld [vmem:[#allocation6 + $0x154] ss:$8 sps:$4 sm:$0xff]   ;;  %v19867_v28 = vld [vmem:[#allocation6 + $0x1d0] ss:$8 sps:$4 sm:$0xff]   ;;  %v19873_v60 = vld [vmem:[#allocation6 + $0x1c4] ss:$8 sps:$4 sm:$0xff]  }
 0x3c9   :  { %v19869_v1 = vld [vmem:[#allocation6 + $0x230] ss:$8 sps:$4 sm:$0xff]  }
 0x3ca   :  { %v7436_v34 = vadd.f32 %v7430_v45, %v7175_v40  ;;  %v19887_v40 = vld [vmem:[#allocation6 + $0x214] ss:$8 sps:$4 sm:$0xff]  }
 0x3cb   :  { %9332 = vmatpush2.bf16.msra.mxu1 %v21689_v13  ;;  %9610 = vmatpush2.bf16.msra.mxu0 %v19605_v0  ;;  %v9700_v0 = vrot.slane %v9686_v54, %v18171_v41  ;;  %v19875_v54 = vld [vmem:[#allocation6 + $0x224] ss:$8 sps:$4 sm:$0xff]   ;;  %v19881_v13 = vld [vmem:[#allocation6 + $0x220] ss:$8 sps:$4 sm:$0xff]   ;;  %21690 = vst [vmem:[#allocation46_spill] sm:$0xff] %v19887_v40 }
 0x3cc   :  { %9611 = vmatprep.subr.bf16.mxu0 %v19610_v4  ;;  %9863 = vmatprep.subr.bf16.mxu1 %v19740_v36 }
 0x3ce   :  { %v7689_v51 = vpop.f32.mrf.mxu1  ;;  %9334 = vmatmul.mubr.bf16.vlgmr.msra.gmra.mxu1 %v19752_v17 }
 0x3cf   :  { %v7696_v15 = vadd.f32 %v7689_v51, %v7435_v52  ;;  %9612 = vmatpush2.bf16.msra.mxu0 %v19614_v6  ;;  %9864 = vmatpush1.bf16.msra.mxu1 %v19748_v37  ;;  %v19771_v6 = vld [vmem:[#allocation6 + $0x150] ss:$8 sps:$4 sm:$0xff]  }
 0x3d0   :  { %9895 = vmatprep.mubr.bf16.mxu1 %v9700_v0  ;;  %v7691_v4 = vpop.f32.mrf.mxu1  ;;  %9613 = vmatprep.subr.bf16.mxu0 %v19618_v62  ;;  %v19775_v62 = vld [vmem:[#allocation6 + $0x144] ss:$8 sps:$4 sm:$0xff]   ;;  %v19891_v52 = vld [vmem:[#allocation6 + $0x1b0] ss:$8 sps:$4 sm:$0xff]  }
 0x3d1   :  { %v7700_v18 = vmul.f32 0.01, %v7696_v15  ;;  %v7697_v38 = vadd.f32 %v7691_v4, %v7436_v34  ;;  %9865 = vmatprep.subr.bf16.mxu1 %v19757_v20  ;;  %vm7698_vm4 = vcmp.gt.f32.partialorder %v7696_v15, 0.0  ;;  %v19893_v51 = vld [vmem:[#allocation6 + $0x210] ss:$8 sps:$4 sm:$0xff]  }
 0x3d2   :  { %v7693_v26 = vpop.f32.mrf.mxu1  ;;  %21691 = vst [vmem:[#allocation41_spill] sm:$0xff] %v19893_v51  ;;  %v19897_v0 = vld [vmem:[#allocation6 + $0x1a4] ss:$8 sps:$4 sm:$0xff]   ;;  %v19905_v4 = vld [vmem:[#allocation6 + $0x200] ss:$8 sps:$4 sm:$0xff]  }
 0x3d3   :  { %vm7699_vm5 = vcmp.gt.f32.partialorder %v7697_v38, 0.0  ;;  %v7701_v45 = vmul.f32 0.01, %v7697_v38  ;;  %9614 = vmatpush2.bf16.msra.mxu0 %v19622_v48  ;;  %9866 = vmatpush1.bf16.msra.mxu1 %v19763_v3  ;;  %v7702_v16 = vsel %vm7698_vm4, %v7696_v15, %v7700_v18  ;;  %v19899_v34 = vld [vmem:[#allocation6 + $0x204] ss:$8 sps:$4 sm:$0xff]   ;;  %21693 = vst [vmem:[#allocation43_spill] sm:$0xff] %v19905_v4 }
 0x3d4   :  { %v7694_v57 = vpop.f32.mrf.mxu1  ;;  %9615 = vmatprep.subr.bf16.mxu0 %v19626_v14  ;;  %9867 = vmatprep.subr.bf16.mxu1 %v19766_v7  ;;  %v19784_v14 = vld [vmem:[#allocation6 + $0x134] ss:$8 sps:$4 sm:$0xff]   ;;  %21692 = vst [vmem:[#allocation42_spill] sm:$0xff] %v19899_v34  ;;  %v19903_v15 = vld [vmem:[#allocation6 + $0x1a0] ss:$8 sps:$4 sm:$0xff]  }
 0x3d5   :  { %v7703_v58 = vsel %vm7699_vm5, %v7697_v38, %v7701_v45  ;;  %v19909_v18 = vld [vmem:[#allocation6 + $0x194] ss:$8 sps:$4 sm:$0xff]   ;;  %v19915_v26 = vld [vmem:[#allocation6 + $0x190] ss:$8 sps:$4 sm:$0xff]   ;;  %v19921_v57 = vld [vmem:[#allocation6 + $0x184] ss:$8 sps:$4 sm:$0xff]  }
 0x3d6   :  { %v15516_v59 = vpack.c.bf16 %v7703_v58, %v7702_v16  ;;  %v19911_v38 = vld [vmem:[#allocation6 + $0x2f4] ss:$8 sps:$4 sm:$0xff]   ;;  %v19917_v45 = vld [vmem:[#allocation6 + $0x2f0] ss:$8 sps:$4 sm:$0xff]   ;;  %v19923_v16 = vld [vmem:[#allocation6 + $0x2e4] ss:$8 sps:$4 sm:$0xff]  }
 0x3d7   :  { %9616 = vmatpush2.bf16.msra.mxu0 %v19630_v61  ;;  %9868 = vmatpush1.bf16.msra.mxu1 %v19771_v6  ;;  %v19792_v61 = vld [vmem:[#allocation6 + $0x124] ss:$8 sps:$4 sm:$0xff]   ;;  %21694 = vst [vmem:[#allocation21_spill] sm:$0xff] %v19911_v38  ;;  %21695 = vst [vmem:[#allocation30_spill] sm:$0xff] %v19917_v45  ;;  %v19927_v58 = vld [vmem:[#allocation6 + $0x180] ss:$8 sps:$4 sm:$0xff]  }
 0x3d8   :  { %v7715_v48 = vrot.slane %v15516_v59, %v18171_v41  ;;  %9617 = vmatprep.subr.bf16.mxu0 %v19634_v55  ;;  %9869 = vmatprep.subr.bf16.mxu1 %v19775_v62  ;;  %v19796_v55 = vld [vmem:[#allocation6 + $0x120] ss:$8 sps:$4 sm:$0xff]   ;;  %21696 = vst [vmem:[#allocation13_spill] sm:$0xff] %v19923_v16 }
 0x3d9   :  { %v19929_v59 = vld [vmem:[#allocation6 + $0x2e0] ss:$8 sps:$4 sm:$0xff]  }
 0x3da   :  { %15517 = vst.sshfl [vmem:[#allocation3 + $0x2] sm:$0x5 pattern:$0x73625140] %v7715_v48  ;;  %21697 = vst [vmem:[#allocation32_spill] sm:$0xff] %v19929_v59 }
 0x3db   :  { %9618 = vmatpush2.bf16.msra.mxu0 %v19638_v44  ;;  %9870 = vmatpush1.bf16.msra.mxu1 %v19779_v29  ;;  %v19802_v44 = vld [vmem:[#allocation6 + $0x114] ss:$8 sps:$4 sm:$0xff]  }
 0x3dc   :  { %9619 = vmatprep.subr.bf16.mxu0 %v19642_v35  ;;  %9871 = vmatprep.subr.bf16.mxu1 %v19784_v14  ;;  %v9947_v35 = vcombine.high %v19798_v10, %v19798_v10  ;;  %v19933_v48 = vld [vmem:[#allocation6 + $0x2d4] ss:$8 sps:$4 sm:$0xff]  }
 0x3dd   :  { %21698 = vst [vmem:[#allocation23_spill] sm:$0xff] %v19933_v48 }
 0x3df   :  { %9620 = vmatpush2.bf16.msra.mxu0 %v19646_v12  ;;  %9872 = vmatpush1.bf16.msra.mxu1 %v19788_v33  ;;  %v19810_v12 = vld [vmem:[#allocation6 + $0x110] ss:$8 sps:$4 sm:$0xff]  }
 0x3e0   :  { %9621 = vmatprep.subr.bf16.mxu0 %v19650_v11  ;;  %9873 = vmatprep.subr.bf16.mxu1 %v19792_v61  ;;  %v19816_v11 = vld [vmem:[#allocation6 + $0x104] ss:$8 sps:$4 sm:$0xff]  }
 0x3e3   :  { %9622 = vmatpush2.bf16.msra.mxu0 %v19654_v49  ;;  %9874 = vmatpush1.bf16.msra.mxu1 %v19796_v55  ;;  %v19824_v49 = vrot.slane %v9947_v35, %v18171_v41  ;;  %v19935_v35 = vld [vmem:[#allocation6 + $0x74] ss:$8 sps:$4 sm:$0xff]  }
 0x3e4   :  { %9875 = vmatprep.subr.bf16.mxu1 %v19802_v44  ;;  %10124 = vmatprep.subr.bf16.mxu0 %v19804_v2  ;;  %21699 = vst [vmem:[#allocation34_spill] sm:$0xff] %v19935_v35 }
 0x3e6   :  { %v19820_v32 = vpop.f32.mrf.mxu0  ;;  %9624 = vmatmul.mubr.bf16.vlgmr.msra.gmra.mxu0 %v19752_v17  ;;  %v19885_v17 = vld [vmem:[#allocation6 + $0x1b4] ss:$8 sps:$4 sm:$0xff]  }
 0x3e7   :  { %9876 = vmatpush1.bf16.msra.mxu1 %v19810_v12  ;;  %10125 = vmatpush1.bf16.msra.mxu0 %v19812_v50 }
 0x3e8   :  { %10156 = vmatprep.mubr.bf16.mxu0 %v19824_v49  ;;  %v19833_v24 = vpop.f32.mrf.mxu0  ;;  %9877 = vmatprep.subr.bf16.mxu1 %v19816_v11 }
 0x3e9   :  { %10126 = vmatprep.subr.bf16.mxu0 %v19818_v31 }
 0x3ea   :  { %v7983_v39 = vpop.f32.mrf.mxu0 }
 0x3eb   :  { %9878 = vmatpush1.bf16.msra.mxu1 %v19828_v9  ;;  %10127 = vmatpush1.bf16.msra.mxu0 %v19830_v53  ;;  %v19939_v39 = vld [vmem:[#allocation6 + $0x2d0] ss:$8 sps:$4 sm:$0xff]  }
 0x3ec   :  { %v7984_v46 = vpop.f32.mrf.mxu0  ;;  %9879 = vmatprep.subr.bf16.mxu1 %v19836_v27  ;;  %10128 = vmatprep.subr.bf16.mxu0 %v19838_v5  ;;  %21700 = vst [vmem:[#allocation14_spill] sm:$0xff] %v19939_v39 }
 0x3ed   :  { %v19941_v46 = vld [vmem:[#allocation6 + $0x70] ss:$8 sps:$4 sm:$0xff]  }
 0x3ee   :  { %21701 = vst [vmem:[#allocation36_spill] sm:$0xff] %v19941_v46 }
 0x3ef   :  { %9880 = vmatpush2.bf16.msra.mxu1 %v19843_v30  ;;  %10129 = vmatpush1.bf16.msra.mxu0 %v19845_v8 }
 0x3f0   :  { %9881 = vmatprep.subr.bf16.mxu1 %v19849_v23  ;;  %10130 = vmatprep.subr.bf16.mxu0 %v19851_v42 }
 0x3f3   :  { %9882 = vmatpush2.bf16.msra.mxu1 %v19855_v19  ;;  %10131 = vmatpush1.bf16.msra.mxu0 %v19857_v21 }
 0x3f4   :  { %9883 = vmatprep.subr.bf16.mxu1 %v19861_v63  ;;  %10132 = vmatprep.subr.bf16.mxu0 %v19863_v25 }
 0x3f7   :  { %9884 = vmatpush2.bf16.msra.mxu1 %v19867_v28  ;;  %10133 = vmatpush1.bf16.msra.mxu0 %v19869_v1 }
 0x3f8   :  { %9885 = vmatprep.subr.bf16.mxu1 %v19873_v60  ;;  %10134 = vmatprep.subr.bf16.mxu0 %v19875_v54 }
 0x3fb   :  { %9886 = vmatpush2.bf16.msra.mxu1 %v19879_v47  ;;  %10135 = vmatpush1.bf16.msra.mxu0 %v19881_v13 }
 0x3fc   :  { %9887 = vmatprep.subr.bf16.mxu1 %v19885_v17  ;;  %10136 = vmatprep.subr.bf16.mxu0 %v19887_v40 }
 0x3ff   :  { %9888 = vmatpush2.bf16.msra.mxu1 %v19891_v52  ;;  %10137 = vmatpush1.bf16.msra.mxu0 %v19893_v51  ;;  %v19961_v51 = vld [vmem:[#allocation6 + $0x54] ss:$8 sps:$4 sm:$0xff]  }
 0x400   :  { %9889 = vmatprep.subr.bf16.mxu1 %v19897_v0  ;;  %10138 = vmatprep.subr.bf16.mxu0 %v19899_v34  ;;  %v19955_v34 = vld [vmem:[#allocation6 + $0x60] ss:$8 sps:$4 sm:$0xff]   ;;  %21707 = vst [vmem:[#allocation29_spill] sm:$0xff] %v19961_v51 }
 0x401   :  { %21705 = vst [vmem:[#allocation25_spill] sm:$0xff] %v19955_v34 }
 0x403   :  { %9890 = vmatpush2.bf16.msra.mxu1 %v19903_v15  ;;  %10139 = vmatpush1.bf16.msra.mxu0 %v19905_v4 }
 0x404   :  { %9891 = vmatprep.subr.bf16.mxu1 %v19909_v18  ;;  %10140 = vmatprep.subr.bf16.mxu0 %v19911_v38  ;;  %v19949_v38 = vld [vmem:[#allocation6 + $0x64] ss:$8 sps:$4 sm:$0xff]  }
 0x405   :  { %21703 = vst [vmem:[#allocation38_spill] sm:$0xff] %v19949_v38 }
 0x407   :  { %9892 = vmatpush2.bf16.msra.mxu1 %v19915_v26  ;;  %10141 = vmatpush2.bf16.msra.mxu0 %v19917_v45  ;;  %v9693_v45 = vrot.slane %v19736_v56, %v18171_v41 }
 0x408   :  { %9893 = vmatprep.subr.bf16.mxu1 %v19921_v57  ;;  %10142 = vmatprep.subr.bf16.mxu0 %v19923_v16  ;;  %v19947_v16 = vld [vmem:[#allocation6 + $0x2c4] ss:$8 sps:$4 sm:$0xff]  }
 0x409   :  { %21702 = vst [vmem:[#allocation15_spill] sm:$0xff] %v19947_v16 }
 0x40b   :  { %9894 = vmatpush2.bf16.msra.mxu1 %v19927_v58  ;;  %10143 = vmatpush2.bf16.msra.mxu0 %v19929_v59  ;;  %v19953_v59 = vld [vmem:[#allocation6 + $0x2c0] ss:$8 sps:$4 sm:$0xff]  }
 0x40c   :  { %10144 = vmatprep.subr.bf16.mxu0 %v19933_v48  ;;  %10414 = vmatprep.subr.bf16.mxu1 %v19935_v35  ;;  %21704 = vst [vmem:[#allocation26_spill] sm:$0xff] %v19953_v59  ;;  %v19959_v48 = vld [vmem:[#allocation6 + $0x2b4] ss:$8 sps:$4 sm:$0xff]  }
 0x40d   :  { %21706 = vst [vmem:[#allocation16_spill] sm:$0xff] %v19959_v48 }
 0x40e   :  { %v8251_v4 = vpop.f32.mrf.mxu1  ;;  %9896 = vmatmul.mubr.bf16.vlgmr.msra.gmra.mxu1 %v9693_v45 }
 0x40f   :  { %10145 = vmatpush2.bf16.msra.mxu0 %v19939_v39  ;;  %10415 = vmatpush1.bf16.msra.mxu1 %v19941_v46  ;;  %v19966_v39 = vld [vmem:[#allocation6 + $0x2b0] ss:$8 sps:$4 sm:$0xff]  }
 0x410   :  { %10446 = vmatprep.mubr.bf16.mxu1 %v19824_v49  ;;  %v8253_v56 = vpop.f32.mrf.mxu1  ;;  %10146 = vmatprep.subr.bf16.mxu0 %v19947_v16  ;;  %21708 = vst [vmem:[#allocation28_spill] sm:$0xff] %v19966_v39  ;;  %v19968_v46 = vld [vmem:[#allocation6 + $0x50] ss:$8 sps:$4 sm:$0xff]   ;;  %v19972_v49 = vld [vmem:[#allocation6 + $0x2a4] ss:$8 sps:$4 sm:$0xff]  }
 0x411   :  { %10416 = vmatprep.subr.bf16.mxu1 %v19949_v38  ;;  %21709 = vst [vmem:[#allocation33_spill] sm:$0xff] %v19968_v46  ;;  %21710 = vst [vmem:[#allocation17_spill] sm:$0xff] %v19972_v49  ;;  %v19974_v16 = vld [vmem:[#allocation6 + $0x44] ss:$8 sps:$4 sm:$0xff]   ;;  %v20010_v38 = vld [vmem:[#allocation6 + $0x20] ss:$8 sps:$4 sm:$0xff]  }
 0x412   :  { %v8255_v45 = vpop.f32.mrf.mxu1  ;;  %21711 = vst [vmem:[#allocation37_spill] sm:$0xff] %v19974_v16  ;;  %21720 = vst [vmem:[#allocation31_spill] sm:$0xff] %v20010_v38 }
 0x413   :  { %10147 = vmatpush2.bf16.msra.mxu0 %v19953_v59  ;;  %10417 = vmatpush1.bf16.msra.mxu1 %v19955_v34  ;;  %v19978_v45 = vld [vmem:[#allocation6 + $0x2a0] ss:$8 sps:$4 sm:$0xff]   ;;  %v20003_v34 = vld.sshfl [vmem:[#allocation2 + $0x14] sm:$0x11 pattern:$0x75316420] }
 0x414   :  { %v8256_v35 = vpop.f32.mrf.mxu1  ;;  %10148 = vmatprep.subr.bf16.mxu0 %v19959_v48  ;;  %10418 = vmatprep.subr.bf16.mxu1 %v19961_v51  ;;  %21712 = vst [vmem:[#allocation18_spill] sm:$0xff] %v19978_v45  ;;  %v19980_v59 = vld [vmem:[#allocation6 + $0x40] ss:$8 sps:$4 sm:$0xff]   ;;  %v19986_v48 = vld [vmem:[#allocation6 + $0x34] ss:$8 sps:$4 sm:$0xff]   ;;  %v10509_v40 = vcombine.high %v20003_v34, %v20003_v34 }
 0x415   :  { %21713 = vst [vmem:[#allocation39_spill] sm:$0xff] %v19980_v59  ;;  %v19984_v35 = vld [vmem:[#allocation6 + $0x294] ss:$8 sps:$4 sm:$0xff]   ;;  %21715 = vst [vmem:[#allocation20_spill] sm:$0xff] %v19986_v48  ;;  %v19990_v51 = vld [vmem:[#allocation6 + $0x290] ss:$8 sps:$4 sm:$0xff]  }
 0x416   :  { %21714 = vst [vmem:[#allocation19_spill] sm:$0xff] %v19984_v35  ;;  %21716 = vst [vmem:[#allocation40_spill] sm:$0xff] %v19990_v51 }
 0x417   :  { %10149 = vmatpush2.bf16.msra.mxu0 %v19966_v39  ;;  %10419 = vmatpush1.bf16.msra.mxu1 %v19968_v46  ;;  %v19992_v39 = vld [vmem:[#allocation6 + $0x30] ss:$8 sps:$4 sm:$0xff]  }
 0x418   :  { %10150 = vmatprep.subr.bf16.mxu0 %v19972_v49  ;;  %10420 = vmatprep.subr.bf16.mxu1 %v19974_v16  ;;  %v7726_v46 = vld [vmem:[%s21349_s4] sm:$0x3]  ;;  %v19999_v49 = vld [vmem:[#allocation6 + $0x284] ss:$8 sps:$4 sm:$0xff]  }
 0x419   :  { %21717 = vst [vmem:[#allocation22_spill] sm:$0xff] %v19999_v49  ;;  %v20001_v16 = vld [vmem:[#allocation6 + $0x24] ss:$8 sps:$4 sm:$0xff]  }
 0x41a   :  { %21718 = vst [vmem:[#allocation24_spill] sm:$0xff] %v20001_v16 }
 0x41b   :  { %10151 = vmatpush2.bf16.msra.mxu0 %v19978_v45  ;;  %10421 = vmatpush1.bf16.msra.mxu1 %v19980_v59  ;;  %v7990_v45 = vrot.slane %v7726_v46, %v21685_v22  ;;  %v20008_v59 = vld [vmem:[#allocation6 + $0x280] ss:$8 sps:$4 sm:$0xff]  }
 0x41c   :  { %10152 = vmatprep.subr.bf16.mxu0 %v19984_v35  ;;  %10422 = vmatprep.subr.bf16.mxu1 %v19986_v48  ;;  %21719 = vst [vmem:[#allocation27_spill] sm:$0xff] %v20008_v59  ;;  %v20014_v35 = vld [vmem:[#allocation6 + $0x14] ss:$8 sps:$4 sm:$0xff]   ;;  %v7994_v48 = vrot.slane %v7726_v46, %v21688_v43  ;;  %v20030_v46 = vld [vmem:[#allocation6 + $0x4] ss:$8 sps:$4 sm:$0xff]  }
 0x41d   :  { %21721 = vst [vmem:[#allocation35_spill] sm:$0xff] %v20014_v35  ;;  %v7997_v22 = vadd.f32 %v7990_v45, %v19820_v32  ;;  %v10523_v45 = vrot.slane %v10509_v40, %v18171_v41 }
 0x41e   :  { %v7998_v43 = vadd.f32 %v7994_v48, %v19833_v24 }
 0x41f   :  { %10153 = vmatpush2.bf16.msra.mxu0 %v19990_v51  ;;  %10423 = vmatpush1.bf16.msra.mxu1 %v19992_v39  ;;  %v20022_v51 = vld [vmem:[#allocation6 + $0x10] ss:$8 sps:$4 sm:$0xff]  }
 0x420   :  { %10154 = vmatprep.subr.bf16.mxu0 %v19999_v49  ;;  %10424 = vmatprep.subr.bf16.mxu1 %v20001_v16  ;;  %v20026_v49 = vrot.slane %v19798_v10, %v18171_v41  ;;  %v8258_v16 = vadd.f32 %v8251_v4, %v7997_v22  ;;  %v20037_v10 = vld [vmem:[#allocation6] ss:$8 sps:$4 sm:$0xff]  }
 0x423   :  { %10155 = vmatpush2.bf16.msra.mxu0 %v20008_v59  ;;  %10425 = vmatpush1.bf16.msra.mxu1 %v20010_v38  ;;  %v8259_v59 = vadd.f32 %v8253_v56, %v7998_v43  ;;  %v20053_v56 = vld [vmem:[#allocation6 + $0xe0] ss:$8 sps:$4 sm:$0xff]  }
 0x424   :  { %10426 = vmatprep.subr.bf16.mxu1 %v20014_v35  ;;  %10686 = vmatprep.subr.bf16.mxu0 %v19740_v36  ;;  %v20040_v35 = vld [vmem:[#allocation6 + $0xf4] ss:$8 sps:$4 sm:$0xff]  }
 0x426   :  { %v8512_v32 = vpop.f32.mrf.mxu0  ;;  %10157 = vmatmul.mubr.bf16.vlgmr.msra.gmra.mxu0 %v20026_v49 }
 0x427   :  { %v8519_v38 = vadd.f32 %v8512_v32, %v8258_v16  ;;  %10427 = vmatpush1.bf16.msra.mxu1 %v20022_v51  ;;  %10687 = vmatpush1.bf16.msra.mxu0 %v19748_v37  ;;  %v20045_v37 = vld [vmem:[#allocation6 + $0xf0] ss:$8 sps:$4 sm:$0xff]   ;;  %v20049_v16 = vld [vmem:[#allocation6 + $0xe4] ss:$8 sps:$4 sm:$0xff]   ;;  %v20058_v32 = vld [vmem:[#allocation6 + $0xd4] ss:$8 sps:$4 sm:$0xff]  }
 0x428   :  { %10718 = vmatprep.mubr.bf16.mxu0 %v10523_v45  ;;  %v8514_v36 = vpop.f32.mrf.mxu0  ;;  %10428 = vmatprep.subr.bf16.mxu1 %v20030_v46  ;;  %v21742_v45 = vld [vmem:[#allocation24_spill] sm:$0xff] }
 0x429   :  { %v8523_v22 = vmul.f32 0.01, %v8519_v38  ;;  %v8520_v24 = vadd.f32 %v8514_v36, %v8259_v59  ;;  %10688 = vmatprep.subr.bf16.mxu0 %v19757_v20  ;;  %vm8521_vm0 = vcmp.gt.f32.partialorder %v8519_v38, 0.0  ;;  %v21743_v36 = vld [vmem:[#allocation26_spill] sm:$0xff] }
 0x42a   :  { %v8516_v40 = vpop.f32.mrf.mxu0 }
 0x42b   :  { %vm8522_vm6 = vcmp.gt.f32.partialorder %v8520_v24, 0.0  ;;  %v8524_v43 = vmul.f32 0.01, %v8520_v24  ;;  %10429 = vmatpush1.bf16.msra.mxu1 %v20037_v10  ;;  %10689 = vmatpush1.bf16.msra.mxu0 %v19763_v3  ;;  %v8525_v59 = vsel %vm8521_vm0, %v8519_v38, %v8523_v22  ;;  %v20074_v38 = vld [vmem:[#allocation6 + $0xb4] ss:$8 sps:$4 sm:$0xff]   ;;  %v21744_v22 = vld [vmem:[#allocation31_spill] sm:$0xff] }
 0x42c   :  { %v8517_v4 = vpop.f32.mrf.mxu0  ;;  %10430 = vmatprep.subr.bf16.mxu1 %v20040_v35  ;;  %10690 = vmatprep.subr.bf16.mxu0 %v19766_v7  ;;  %v20062_v7 = vld [vmem:[#allocation6 + $0xd0] ss:$8 sps:$4 sm:$0xff]   ;;  %v21746_v40 = vld [vmem:[#allocation35_spill] sm:$0xff] }
 0x42d   :  { %v8526_v48 = vsel %vm8522_vm6, %v8520_v24, %v8524_v43  ;;  %v21745_v24 = vld [vmem:[#allocation16_spill] sm:$0xff]  ;;  %v21748_v4 = vld [vmem:[#allocation17_spill] sm:$0xff] }
 0x42e   :  { %v15617_v20 = vpack.c.bf16 %v8526_v48, %v8525_v59  ;;  %v21747_v43 = vld [vmem:[#allocation28_spill] sm:$0xff]  ;;  %v8549_v59 = vld [vmem:[%s21349_s4] sm:$0x3]  ;;  %v21750_v48 = vld [vmem:[#allocation19_spill] sm:$0xff] }
 0x42f   :  { %10431 = vmatpush2.bf16.msra.mxu1 %v20045_v37  ;;  %10691 = vmatpush1.bf16.msra.mxu0 %v19771_v6  ;;  %v20066_v6 = vld [vmem:[#allocation6 + $0xc4] ss:$8 sps:$4 sm:$0xff]  }
 0x430   :  { %v8538_v3 = vrot.slane %v15617_v20, %v18171_v41  ;;  %10432 = vmatprep.subr.bf16.mxu1 %v20049_v16  ;;  %10692 = vmatprep.subr.bf16.mxu0 %v19775_v62  ;;  %v20070_v62 = vld [vmem:[#allocation6 + $0xc0] ss:$8 sps:$4 sm:$0xff]  }
 0x431   :  { %v21751_v20 = vld [vmem:[#allocation11_spill] sm:$0xff] }
 0x432   :  { %15618 = vst.sshfl [vmem:[#allocation3 + $0x4] sm:$0x5 pattern:$0x73625140] %v8538_v3  ;;  %v8813_v3 = vrot.slane %v8549_v59, %v21751_v20 }
 0x433   :  { %10433 = vmatpush2.bf16.msra.mxu1 %v20053_v56  ;;  %10693 = vmatpush1.bf16.msra.mxu0 %v19779_v29  ;;  %v20078_v29 = vld [vmem:[#allocation6 + $0xb0] ss:$8 sps:$4 sm:$0xff]  }
 0x434   :  { %10434 = vmatprep.subr.bf16.mxu1 %v20058_v32  ;;  %10694 = vmatprep.subr.bf16.mxu0 %v19784_v14  ;;  %v20082_v14 = vld [vmem:[#allocation6 + $0xa4] ss:$8 sps:$4 sm:$0xff]  }
 0x437   :  { %10435 = vmatpush2.bf16.msra.mxu1 %v20062_v7  ;;  %10695 = vmatpush1.bf16.msra.mxu0 %v19788_v33  ;;  %v20086_v33 = vld [vmem:[#allocation6 + $0xa0] ss:$8 sps:$4 sm:$0xff]  }
 0x438   :  { %10436 = vmatprep.subr.bf16.mxu1 %v20066_v6  ;;  %10696 = vmatprep.subr.bf16.mxu0 %v19792_v61  ;;  %v20090_v61 = vld [vmem:[#allocation6 + $0x94] ss:$8 sps:$4 sm:$0xff]  }
 0x43b   :  { %10437 = vmatpush2.bf16.msra.mxu1 %v20070_v62  ;;  %10697 = vmatpush1.bf16.msra.mxu0 %v19796_v55  ;;  %v20094_v55 = vld [vmem:[#allocation6 + $0x90] ss:$8 sps:$4 sm:$0xff]  }
 0x43c   :  { %10438 = vmatprep.subr.bf16.mxu1 %v20074_v38  ;;  %10698 = vmatprep.subr.bf16.mxu0 %v19802_v44  ;;  %v20098_v44 = vld [vmem:[#allocation6 + $0x84] ss:$8 sps:$4 sm:$0xff]  }
 0x43f   :  { %10439 = vmatpush2.bf16.msra.mxu1 %v20078_v29  ;;  %10699 = vmatpush1.bf16.msra.mxu0 %v19810_v12  ;;  %v20102_v12 = vld [vmem:[#allocation6 + $0x80] ss:$8 sps:$4 sm:$0xff]  }
 0x440   :  { %10440 = vmatprep.subr.bf16.mxu1 %v20082_v14  ;;  %10700 = vmatprep.subr.bf16.mxu0 %v19816_v11  ;;  %v20104_v11 = vld.sshfl [vmem:[#allocation2 + $0x16] sm:$0x11 pattern:$0x75316420] }
 0x443   :  { %10441 = vmatpush2.bf16.msra.mxu1 %v20086_v33  ;;  %10701 = vmatpush1.bf16.msra.mxu0 %v19828_v9  ;;  %v10770_v9 = vcombine.high %v20104_v11, %v20104_v11 }
 0x444   :  { %10442 = vmatprep.subr.bf16.mxu1 %v20090_v61  ;;  %10702 = vmatprep.subr.bf16.mxu0 %v19836_v27 }
 0x447   :  { %10443 = vmatpush2.bf16.msra.mxu1 %v20094_v55  ;;  %10703 = vmatpush2.bf16.msra.mxu0 %v19843_v30  ;;  %v10784_v30 = vrot.slane %v10770_v9, %v18171_v41  ;;  %v21752_v9 = vld [vmem:[#allocation40_spill] sm:$0xff] }
 0x448   :  { %10444 = vmatprep.subr.bf16.mxu1 %v20098_v44  ;;  %10704 = vmatprep.subr.bf16.mxu0 %v19849_v23 }
 0x44b   :  { %10445 = vmatpush2.bf16.msra.mxu1 %v20102_v12  ;;  %10705 = vmatpush2.bf16.msra.mxu0 %v19855_v19 }
 0x44c   :  { %10706 = vmatprep.subr.bf16.mxu0 %v19861_v63  ;;  %10947 = vmatprep.subr.bf16.mxu1 %v19804_v2  ;;  %v21726_v63 = vld [vmem:[#allocation42_spill] sm:$0xff] }
 0x44e   :  { %v20114_v27 = vpop.f32.mrf.mxu1  ;;  %10447 = vmatmul.mubr.bf16.vlgmr.msra.gmra.mxu1 %v20026_v49  ;;  %v21741_v49 = vld [vmem:[#allocation15_spill] sm:$0xff] }
 0x44f   :  { %10707 = vmatpush2.bf16.msra.mxu0 %v19867_v28  ;;  %10948 = vmatpush1.bf16.msra.mxu1 %v19812_v50  ;;  %v10516_v50 = vrot.slane %v20003_v34, %v18171_v41  ;;  %v21735_v34 = vld [vmem:[#allocation37_spill] sm:$0xff] }
 0x450   :  { %10979 = vmatprep.mubr.bf16.mxu1 %v10784_v30  ;;  %v20120_v23 = vpop.f32.mrf.mxu1  ;;  %10708 = vmatprep.subr.bf16.mxu0 %v19873_v60  ;;  %v21729_v60 = vld [vmem:[#allocation25_spill] sm:$0xff] }
 0x451   :  { %10949 = vmatprep.subr.bf16.mxu1 %v19818_v31  ;;  %v21722_v31 = vld [vmem:[#allocation46_spill] sm:$0xff] }
 0x452   :  { %v8806_v19 = vpop.f32.mrf.mxu1 }
 0x453   :  { %10709 = vmatpush2.bf16.msra.mxu0 %v19879_v47  ;;  %10950 = vmatpush1.bf16.msra.mxu1 %v19830_v53  ;;  %v21723_v53 = vld [vmem:[#allocation34_spill] sm:$0xff]  ;;  %v21730_v47 = vld [vmem:[#allocation21_spill] sm:$0xff] }
 0x454   :  { %v8807_v2 = vpop.f32.mrf.mxu1  ;;  %10710 = vmatprep.subr.bf16.mxu0 %v19885_v17  ;;  %10951 = vmatprep.subr.bf16.mxu1 %v19838_v5  ;;  %v21732_v17 = vld [vmem:[#allocation30_spill] sm:$0xff] }
 0x457   :  { %10711 = vmatpush2.bf16.msra.mxu0 %v19891_v52  ;;  %10952 = vmatpush1.bf16.msra.mxu1 %v19845_v8  ;;  %v21724_v8 = vld [vmem:[#allocation41_spill] sm:$0xff] }
 0x458   :  { %10712 = vmatprep.subr.bf16.mxu0 %v19897_v0  ;;  %10953 = vmatprep.subr.bf16.mxu1 %v19851_v42  ;;  %v21725_v42 = vld [vmem:[#allocation36_spill] sm:$0xff]  ;;  %v21733_v52 = vld [vmem:[#allocation33_spill] sm:$0xff] }
 0x459   :  { %v21734_v0 = vld [vmem:[#allocation13_spill] sm:$0xff] }
 0x45b   :  { %10713 = vmatpush2.bf16.msra.mxu0 %v19903_v15  ;;  %10954 = vmatpush1.bf16.msra.mxu1 %v19857_v21  ;;  %v21736_v15 = vld [vmem:[#allocation32_spill] sm:$0xff] }
 0x45c   :  { %10714 = vmatprep.subr.bf16.mxu0 %v19909_v18  ;;  %10955 = vmatprep.subr.bf16.mxu1 %v19863_v25  ;;  %v21727_v25 = vld [vmem:[#allocation38_spill] sm:$0xff]  ;;  %v21737_v18 = vld [vmem:[#allocation39_spill] sm:$0xff] }
 0x45f   :  { %10715 = vmatpush2.bf16.msra.mxu0 %v19915_v26  ;;  %10956 = vmatpush1.bf16.msra.mxu1 %v19869_v1  ;;  %v21728_v1 = vld [vmem:[#allocation43_spill] sm:$0xff] }
 0x460   :  { %10716 = vmatprep.subr.bf16.mxu0 %v19921_v57  ;;  %10957 = vmatprep.subr.bf16.mxu1 %v19875_v54  ;;  %v21738_v26 = vld [vmem:[#allocation23_spill] sm:$0xff]  ;;  %v21739_v57 = vld [vmem:[#allocation20_spill] sm:$0xff] }
 0x463   :  { %10717 = vmatpush2.bf16.msra.mxu0 %v19927_v58  ;;  %10958 = vmatpush1.bf16.msra.mxu1 %v19881_v13  ;;  %v21731_v13 = vld [vmem:[#allocation29_spill] sm:$0xff]  ;;  %v21740_v58 = vld [vmem:[#allocation14_spill] sm:$0xff] }
 0x464   :  { %10959 = vmatprep.subr.bf16.mxu1 %v21722_v31  ;;  %11237 = vmatprep.subr.bf16.mxu0 %v21723_v53  ;;  %v20200_v31 = vrot.slane %v20104_v11, %v18171_v41  ;;  %v20211_v11 = vld [vmem:[#allocation6 + $0x160] ss:$8 sps:$4 sm:$0xff]  }
 0x466   :  { %v9074_v5 = vpop.f32.mrf.mxu0  ;;  %10719 = vmatmul.mubr.bf16.vlgmr.msra.gmra.mxu0 %v10516_v50  ;;  %v21755_v50 = vld [vmem:[#allocation27_spill] sm:$0xff] }
 0x467   :  { %10960 = vmatpush1.bf16.msra.mxu1 %v21724_v8  ;;  %11238 = vmatpush1.bf16.msra.mxu0 %v21725_v42  ;;  %v20205_v8 = vld [vmem:[#allocation6 + $0x164] ss:$8 sps:$4 sm:$0xff]  }
 0x468   :  { %11269 = vmatprep.mubr.bf16.mxu0 %v10784_v30  ;;  %v9076_v21 = vpop.f32.mrf.mxu0  ;;  %10961 = vmatprep.subr.bf16.mxu1 %v21726_v63  ;;  %v21754_v30 = vld [vmem:[#allocation12_spill] sm:$0xff] }
 0x469   :  { %11239 = vmatprep.subr.bf16.mxu0 %v21727_v25  ;;  %v8817_v19 = vrot.slane %v8549_v59, %v21754_v30  ;;  %v20305_v59 = vld [vmem:[#allocation6 + $0x240] ss:$8 sps:$4 sm:$0xff]  }
 0x46a   :  { %v9078_v28 = vpop.f32.mrf.mxu0 }
 0x46b   :  { %10962 = vmatpush1.bf16.msra.mxu1 %v21728_v1  ;;  %11240 = vmatpush1.bf16.msra.mxu0 %v21729_v60 }
 0x46c   :  { %v9079_v54 = vpop.f32.mrf.mxu0  ;;  %10963 = vmatprep.subr.bf16.mxu1 %v21730_v47  ;;  %11241 = vmatprep.subr.bf16.mxu0 %v21731_v13  ;;  %v20227_v13 = vld [vmem:[#allocation6 + $0x140] ss:$8 sps:$4 sm:$0xff]  }
 0x46f   :  { %10964 = vmatpush2.bf16.msra.mxu1 %v21732_v17  ;;  %11242 = vmatpush1.bf16.msra.mxu0 %v21733_v52  ;;  %v20236_v17 = vld [vmem:[#allocation6 + $0x130] ss:$8 sps:$4 sm:$0xff]   ;;  %v20246_v52 = vld.sshfl [vmem:[#allocation2 + $0x1a] sm:$0x11 pattern:$0x75316420] }
 0x470   :  { %10965 = vmatprep.subr.bf16.mxu1 %v21734_v0  ;;  %11243 = vmatprep.subr.bf16.mxu0 %v21735_v34  ;;  %v20252_v0 = vld [vmem:[#allocation6 + $0x274] ss:$8 sps:$4 sm:$0xff]   ;;  %v20260_v34 = vld [vmem:[#allocation6 + $0x270] ss:$8 sps:$4 sm:$0xff]  }
 0x473   :  { %10966 = vmatpush2.bf16.msra.mxu1 %v21736_v15  ;;  %11244 = vmatpush1.bf16.msra.mxu0 %v21737_v18  ;;  %v20266_v15 = vld [vmem:[#allocation6 + $0x264] ss:$8 sps:$4 sm:$0xff]  }
 0x474   :  { %10967 = vmatprep.subr.bf16.mxu1 %v21738_v26  ;;  %11245 = vmatprep.subr.bf16.mxu0 %v21739_v57  ;;  %v20276_v26 = vld [vmem:[#allocation6 + $0x100] ss:$8 sps:$4 sm:$0xff]  }
 0x475   :  { %v20278_v57 = vld [vmem:[#allocation6 + $0x260] ss:$8 sps:$4 sm:$0xff]  }
 0x477   :  { %10968 = vmatpush2.bf16.msra.mxu1 %v21740_v58  ;;  %11246 = vmatpush1.bf16.msra.mxu0 %v19992_v39  ;;  %v21749_v39 = vld [vmem:[#allocation18_spill] sm:$0xff] }
 0x478   :  { %10969 = vmatprep.subr.bf16.mxu1 %v21741_v49  ;;  %11247 = vmatprep.subr.bf16.mxu0 %v21742_v45  ;;  %v20284_v49 = vld [vmem:[#allocation6 + $0x1f4] ss:$8 sps:$4 sm:$0xff]  }
 0x479   :  { %v20286_v45 = vld [vmem:[#allocation6 + $0x254] ss:$8 sps:$4 sm:$0xff]  }
 0x47b   :  { %10970 = vmatpush2.bf16.msra.mxu1 %v21743_v36  ;;  %11248 = vmatpush1.bf16.msra.mxu0 %v21744_v22  ;;  %v20291_v22 = vld [vmem:[#allocation6 + $0x1f0] ss:$8 sps:$4 sm:$0xff]  }
 0x47c   :  { %10971 = vmatprep.subr.bf16.mxu1 %v21745_v24  ;;  %11249 = vmatprep.subr.bf16.mxu0 %v21746_v40  ;;  %v20293_v24 = vld [vmem:[#allocation6 + $0x250] ss:$8 sps:$4 sm:$0xff]  }
 0x47f   :  { %10972 = vmatpush2.bf16.msra.mxu1 %v21747_v43  ;;  %11250 = vmatpush1.bf16.msra.mxu0 %v20022_v51  ;;  %v20184_v51 = vld.sshfl [vmem:[#allocation2 + $0x18] sm:$0x11 pattern:$0x75316420]  ;;  %v20297_v43 = vld [vmem:[#allocation6 + $0x1e4] ss:$8 sps:$4 sm:$0xff]  }
 0x480   :  { %10973 = vmatprep.subr.bf16.mxu1 %v21748_v4  ;;  %11251 = vmatprep.subr.bf16.mxu0 %v20030_v46  ;;  %v21753_v46 = vld [vmem:[#allocation22_spill] sm:$0xff]  ;;  %v11332_v2 = vcombine.high %v20184_v51, %v20184_v51  ;;  %v20299_v4 = vld [vmem:[#allocation6 + $0x244] ss:$8 sps:$4 sm:$0xff]  }
 0x483   :  { %10974 = vmatpush2.bf16.msra.mxu1 %v21749_v39  ;;  %11252 = vmatpush1.bf16.msra.mxu0 %v20037_v10  ;;  %v20188_v10 = vld [vmem:[#allocation6 + $0x174] ss:$8 sps:$4 sm:$0xff]   ;;  %v20303_v39 = vld [vmem:[#allocation6 + $0x1e0] ss:$8 sps:$4 sm:$0xff]  }
 0x484   :  { %10975 = vmatprep.subr.bf16.mxu1 %v21750_v48  ;;  %11253 = vmatprep.subr.bf16.mxu0 %v20040_v35  ;;  %v8820_v35 = vadd.f32 %v8813_v3, %v20114_v27  ;;  %v20309_v48 = vld [vmem:[#allocation6 + $0x1d4] ss:$8 sps:$4 sm:$0xff]  }
 0x485   :  { %v20311_v3 = vld [vmem:[#allocation6 + $0x234] ss:$8 sps:$4 sm:$0xff]  }
 0x486   :  { %v9081_v53 = vadd.f32 %v9074_v5, %v8820_v35  ;;  %v20327_v35 = vld [vmem:[#allocation6 + $0x1c0] ss:$8 sps:$4 sm:$0xff]  }
 0x487   :  { %10976 = vmatpush2.bf16.msra.mxu1 %v21752_v9  ;;  %11254 = vmatpush2.bf16.msra.mxu0 %v20045_v37  ;;  %v20196_v37 = vld [vmem:[#allocation6 + $0x170] ss:$8 sps:$4 sm:$0xff]  }
 0x488   :  { %10977 = vmatprep.subr.bf16.mxu1 %v21753_v46  ;;  %11255 = vmatprep.subr.bf16.mxu0 %v20049_v16  ;;  %v8821_v16 = vadd.f32 %v8817_v19, %v20120_v23  ;;  %v20214_v23 = vld [vmem:[#allocation6 + $0x154] ss:$8 sps:$4 sm:$0xff]   ;;  %v20315_v9 = vld [vmem:[#allocation6 + $0x1d0] ss:$8 sps:$4 sm:$0xff]   ;;  %v20321_v19 = vld [vmem:[#allocation6 + $0x1c4] ss:$8 sps:$4 sm:$0xff]  }
 0x489   :  { %v20317_v46 = vld [vmem:[#allocation6 + $0x230] ss:$8 sps:$4 sm:$0xff]  }
 0x48a   :  { %v9082_v42 = vadd.f32 %v9076_v21, %v8821_v16  ;;  %v20335_v16 = vld [vmem:[#allocation6 + $0x214] ss:$8 sps:$4 sm:$0xff]  }
 0x48b   :  { %10978 = vmatpush2.bf16.msra.mxu1 %v21755_v50  ;;  %11256 = vmatpush2.bf16.msra.mxu0 %v20053_v56  ;;  %v11346_v56 = vrot.slane %v11332_v2, %v18171_v41  ;;  %v20323_v2 = vld [vmem:[#allocation6 + $0x224] ss:$8 sps:$4 sm:$0xff]   ;;  %v20329_v50 = vld [vmem:[#allocation6 + $0x220] ss:$8 sps:$4 sm:$0xff]   ;;  %21757 = vst [vmem:[#allocation45_spill] sm:$0xff] %v20335_v16 }
 0x48c   :  { %11257 = vmatprep.subr.bf16.mxu0 %v20058_v32  ;;  %11509 = vmatprep.subr.bf16.mxu1 %v20188_v10  ;;  %21756 = vst [vmem:[#allocation44_spill] sm:$0xff] %v20329_v50 }
 0x48e   :  { %v9335_v27 = vpop.f32.mrf.mxu1  ;;  %10980 = vmatmul.mubr.bf16.vlgmr.msra.gmra.mxu1 %v20200_v31 }
 0x48f   :  { %v9342_v63 = vadd.f32 %v9335_v27, %v9081_v53  ;;  %11258 = vmatpush2.bf16.msra.mxu0 %v20062_v7  ;;  %11510 = vmatpush1.bf16.msra.mxu1 %v20196_v37  ;;  %v20219_v7 = vld [vmem:[#allocation6 + $0x150] ss:$8 sps:$4 sm:$0xff]  }
 0x490   :  { %11541 = vmatprep.mubr.bf16.mxu1 %v11346_v56  ;;  %v9337_v32 = vpop.f32.mrf.mxu1  ;;  %11259 = vmatprep.subr.bf16.mxu0 %v20066_v6  ;;  %v20223_v6 = vld [vmem:[#allocation6 + $0x144] ss:$8 sps:$4 sm:$0xff]   ;;  %v20339_v53 = vld [vmem:[#allocation6 + $0x1b0] ss:$8 sps:$4 sm:$0xff]  }
 0x491   :  { %v9346_v5 = vmul.f32 0.01, %v9342_v63  ;;  %v9343_v25 = vadd.f32 %v9337_v32, %v9082_v42  ;;  %11511 = vmatprep.subr.bf16.mxu1 %v20205_v8  ;;  %vm9344_vm7 = vcmp.gt.f32.partialorder %v9342_v63, 0.0  ;;  %v20341_v27 = vld [vmem:[#allocation6 + $0x210] ss:$8 sps:$4 sm:$0xff]  }
 0x492   :  { %v9339_v28 = vpop.f32.mrf.mxu1  ;;  %21758 = vst [vmem:[#allocation46_spill] sm:$0xff] %v20341_v27  ;;  %v20345_v56 = vld [vmem:[#allocation6 + $0x1a4] ss:$8 sps:$4 sm:$0xff]   ;;  %v20353_v32 = vld [vmem:[#allocation6 + $0x200] ss:$8 sps:$4 sm:$0xff]  }
 0x493   :  { %vm9345_vm8 = vcmp.gt.f32.partialorder %v9343_v25, 0.0  ;;  %v9347_v21 = vmul.f32 0.01, %v9343_v25  ;;  %11260 = vmatpush2.bf16.msra.mxu0 %v20070_v62  ;;  %11512 = vmatpush1.bf16.msra.mxu1 %v20211_v11  ;;  %v9348_v60 = vsel %vm9344_vm7, %v9342_v63, %v9346_v5  ;;  %v20347_v42 = vld [vmem:[#allocation6 + $0x204] ss:$8 sps:$4 sm:$0xff]   ;;  %21760 = vst [vmem:[#allocation41_spill] sm:$0xff] %v20353_v32 }
 0x494   :  { %v9340_v1 = vpop.f32.mrf.mxu1  ;;  %11261 = vmatprep.subr.bf16.mxu0 %v20074_v38  ;;  %11513 = vmatprep.subr.bf16.mxu1 %v20214_v23  ;;  %v20232_v38 = vld [vmem:[#allocation6 + $0x134] ss:$8 sps:$4 sm:$0xff]   ;;  %21759 = vst [vmem:[#allocation34_spill] sm:$0xff] %v20347_v42  ;;  %v20351_v63 = vld [vmem:[#allocation6 + $0x1a0] ss:$8 sps:$4 sm:$0xff]  }
 0x495   :  { %v9349_v54 = vsel %vm9345_vm8, %v9343_v25, %v9347_v21  ;;  %v20357_v5 = vld [vmem:[#allocation6 + $0x194] ss:$8 sps:$4 sm:$0xff]   ;;  %v20363_v28 = vld [vmem:[#allocation6 + $0x190] ss:$8 sps:$4 sm:$0xff]   ;;  %v20369_v1 = vld [vmem:[#allocation6 + $0x184] ss:$8 sps:$4 sm:$0xff]  }
 0x496   :  { %v15718_v47 = vpack.c.bf16 %v9349_v54, %v9348_v60  ;;  %v20359_v25 = vld [vmem:[#allocation6 + $0x2f4] ss:$8 sps:$4 sm:$0xff]   ;;  %v20365_v21 = vld [vmem:[#allocation6 + $0x2f0] ss:$8 sps:$4 sm:$0xff]   ;;  %v20371_v60 = vld [vmem:[#allocation6 + $0x2e4] ss:$8 sps:$4 sm:$0xff]  }
 0x497   :  { %11262 = vmatpush2.bf16.msra.mxu0 %v20078_v29  ;;  %11514 = vmatpush1.bf16.msra.mxu1 %v20219_v7  ;;  %v20240_v29 = vld [vmem:[#allocation6 + $0x124] ss:$8 sps:$4 sm:$0xff]   ;;  %21761 = vst [vmem:[#allocation36_spill] sm:$0xff] %v20359_v25  ;;  %21762 = vst [vmem:[#allocation42_spill] sm:$0xff] %v20365_v21  ;;  %v20375_v54 = vld [vmem:[#allocation6 + $0x180] ss:$8 sps:$4 sm:$0xff]  }
 0x498   :  { %v9361_v62 = vrot.slane %v15718_v47, %v18171_v41  ;;  %11263 = vmatprep.subr.bf16.mxu0 %v20082_v14  ;;  %11515 = vmatprep.subr.bf16.mxu1 %v20223_v6  ;;  %v20244_v14 = vld [vmem:[#allocation6 + $0x120] ss:$8 sps:$4 sm:$0xff]   ;;  %21763 = vst [vmem:[#allocation38_spill] sm:$0xff] %v20371_v60 }
 0x499   :  { %v20377_v47 = vld [vmem:[#allocation6 + $0x2e0] ss:$8 sps:$4 sm:$0xff]  }
 0x49a   :  { %15719 = vst.sshfl [vmem:[#allocation3 + $0x6] sm:$0x5 pattern:$0x73625140] %v9361_v62  ;;  %21764 = vst [vmem:[#allocation43_spill] sm:$0xff] %v20377_v47 }
 0x49b   :  { %11264 = vmatpush2.bf16.msra.mxu0 %v20086_v33  ;;  %11516 = vmatpush1.bf16.msra.mxu1 %v20227_v13  ;;  %v20250_v33 = vld [vmem:[#allocation6 + $0x114] ss:$8 sps:$4 sm:$0xff]  }
 0x49c   :  { %11265 = vmatprep.subr.bf16.mxu0 %v20090_v61  ;;  %11517 = vmatprep.subr.bf16.mxu1 %v20232_v38  ;;  %v11593_v61 = vcombine.high %v20246_v52, %v20246_v52  ;;  %v20381_v62 = vld [vmem:[#allocation6 + $0x2d4] ss:$8 sps:$4 sm:$0xff]  }
 0x49d   :  { %21765 = vst [vmem:[#allocation25_spill] sm:$0xff] %v20381_v62 }
 0x49f   :  { %11266 = vmatpush2.bf16.msra.mxu0 %v20094_v55  ;;  %11518 = vmatpush1.bf16.msra.mxu1 %v20236_v17  ;;  %v20258_v55 = vld [vmem:[#allocation6 + $0x110] ss:$8 sps:$4 sm:$0xff]  }
 0x4a0   :  { %11267 = vmatprep.subr.bf16.mxu0 %v20098_v44  ;;  %11519 = vmatprep.subr.bf16.mxu1 %v20240_v29  ;;  %v20264_v44 = vld [vmem:[#allocation6 + $0x104] ss:$8 sps:$4 sm:$0xff]  }
 0x4a3   :  { %11268 = vmatpush2.bf16.msra.mxu0 %v20102_v12  ;;  %11520 = vmatpush1.bf16.msra.mxu1 %v20244_v14  ;;  %v20272_v12 = vrot.slane %v11593_v61, %v18171_v41  ;;  %v17215_v61 = vld [vmem:[#allocation6 + $0x74] ss:$8 sps:$4 sm:$0xff]  }
 0x4a4   :  { %11521 = vmatprep.subr.bf16.mxu1 %v20250_v33  ;;  %11770 = vmatprep.subr.bf16.mxu0 %v20252_v0 }
 0x4a6   :  { %v20268_v18 = vpop.f32.mrf.mxu0  ;;  %11270 = vmatmul.mubr.bf16.vlgmr.msra.gmra.mxu0 %v20200_v31  ;;  %v20333_v31 = vld [vmem:[#allocation6 + $0x1b4] ss:$8 sps:$4 sm:$0xff]  }
 0x4a7   :  { %11522 = vmatpush1.bf16.msra.mxu1 %v20258_v55  ;;  %11771 = vmatpush1.bf16.msra.mxu0 %v20260_v34 }
 0x4a8   :  { %11802 = vmatprep.mubr.bf16.mxu0 %v20272_v12  ;;  %v20281_v58 = vpop.f32.mrf.mxu0  ;;  %11523 = vmatprep.subr.bf16.mxu1 %v20264_v44 }
 0x4a9   :  { %11772 = vmatprep.subr.bf16.mxu0 %v20266_v15 }
 0x4aa   :  { %v9629_v36 = vpop.f32.mrf.mxu0 }
 0x4ab   :  { %11524 = vmatpush1.bf16.msra.mxu1 %v20276_v26  ;;  %11773 = vmatpush1.bf16.msra.mxu0 %v20278_v57  ;;  %v20385_v36 = vld [vmem:[#allocation6 + $0x2d0] ss:$8 sps:$4 sm:$0xff]  }
 0x4ac   :  { %v9630_v40 = vpop.f32.mrf.mxu0  ;;  %11525 = vmatprep.subr.bf16.mxu1 %v20284_v49  ;;  %11774 = vmatprep.subr.bf16.mxu0 %v20286_v45  ;;  %21766 = vst [vmem:[#allocation21_spill] sm:$0xff] %v20385_v36 }
 0x4ad   :  { %v17213_v40 = vld [vmem:[#allocation6 + $0x70] ss:$8 sps:$4 sm:$0xff]  }
 0x4af   :  { %11526 = vmatpush2.bf16.msra.mxu1 %v20291_v22  ;;  %11775 = vmatpush1.bf16.msra.mxu0 %v20293_v24 }
 0x4b0   :  { %11527 = vmatprep.subr.bf16.mxu1 %v20297_v43  ;;  %11776 = vmatprep.subr.bf16.mxu0 %v20299_v4 }
 0x4b3   :  { %11528 = vmatpush2.bf16.msra.mxu1 %v20303_v39  ;;  %11777 = vmatpush1.bf16.msra.mxu0 %v20305_v59 }
 0x4b4   :  { %11529 = vmatprep.subr.bf16.mxu1 %v20309_v48  ;;  %11778 = vmatprep.subr.bf16.mxu0 %v20311_v3 }
 0x4b7   :  { %11530 = vmatpush2.bf16.msra.mxu1 %v20315_v9  ;;  %11779 = vmatpush1.bf16.msra.mxu0 %v20317_v46 }
 0x4b8   :  { %11531 = vmatprep.subr.bf16.mxu1 %v20321_v19  ;;  %11780 = vmatprep.subr.bf16.mxu0 %v20323_v2 }
 0x4bb   :  { %11532 = vmatpush2.bf16.msra.mxu1 %v20327_v35  ;;  %11781 = vmatpush1.bf16.msra.mxu0 %v20329_v50 }
 0x4bc   :  { %11533 = vmatprep.subr.bf16.mxu1 %v20333_v31  ;;  %11782 = vmatprep.subr.bf16.mxu0 %v20335_v16  ;;  %v20403_v16 = vld [vmem:[#allocation6 + $0x2a4] ss:$8 sps:$4 sm:$0xff]  }
 0x4bd   :  { %21771 = vst [vmem:[#allocation37_spill] sm:$0xff] %v20403_v16 }
 0x4bf   :  { %11534 = vmatpush2.bf16.msra.mxu1 %v20339_v53  ;;  %11783 = vmatpush1.bf16.msra.mxu0 %v20341_v27 }
 0x4c0   :  { %11535 = vmatprep.subr.bf16.mxu1 %v20345_v56  ;;  %11784 = vmatprep.subr.bf16.mxu0 %v20347_v42  ;;  %v20393_v42 = vld [vmem:[#allocation6 + $0x2c0] ss:$8 sps:$4 sm:$0xff]  }
 0x4c1   :  { %21768 = vst [vmem:[#allocation30_spill] sm:$0xff] %v20393_v42 }
 0x4c3   :  { %11536 = vmatpush2.bf16.msra.mxu1 %v20351_v63  ;;  %11785 = vmatpush1.bf16.msra.mxu0 %v20353_v32  ;;  %v17221_v32 = vld [vmem:[#allocation6 + $0x64] ss:$8 sps:$4 sm:$0xff]  }
 0x4c4   :  { %11537 = vmatprep.subr.bf16.mxu1 %v20357_v5  ;;  %11786 = vmatprep.subr.bf16.mxu0 %v20359_v25  ;;  %v20390_v25 = vld [vmem:[#allocation6 + $0x2c4] ss:$8 sps:$4 sm:$0xff]  }
 0x4c5   :  { %21767 = vst [vmem:[#allocation29_spill] sm:$0xff] %v20390_v25 }
 0x4c7   :  { %11538 = vmatpush2.bf16.msra.mxu1 %v20363_v28  ;;  %11787 = vmatpush2.bf16.msra.mxu0 %v20365_v21  ;;  %v11339_v21 = vrot.slane %v20184_v51, %v18171_v41  ;;  %v20397_v51 = vld [vmem:[#allocation6 + $0x2b4] ss:$8 sps:$4 sm:$0xff]  }
 0x4c8   :  { %11539 = vmatprep.subr.bf16.mxu1 %v20369_v1  ;;  %11788 = vmatprep.subr.bf16.mxu0 %v20371_v60  ;;  %21769 = vst [vmem:[#allocation33_spill] sm:$0xff] %v20397_v51 }
 0x4cb   :  { %11540 = vmatpush2.bf16.msra.mxu1 %v20375_v54  ;;  %11789 = vmatpush2.bf16.msra.mxu0 %v20377_v47  ;;  %v17219_v47 = vld [vmem:[#allocation6 + $0x60] ss:$8 sps:$4 sm:$0xff]  }
 0x4cc   :  { %11790 = vmatprep.subr.bf16.mxu0 %v20381_v62  ;;  %12060 = vmatprep.subr.bf16.mxu1 %v17215_v61  ;;  %v17227_v62 = vld [vmem:[#allocation6 + $0x54] ss:$8 sps:$4 sm:$0xff]  }
 0x4ce   :  { %v9897_v60 = vpop.f32.mrf.mxu1  ;;  %11542 = vmatmul.mubr.bf16.vlgmr.msra.gmra.mxu1 %v11339_v21  ;;  %v20400_v21 = vld [vmem:[#allocation6 + $0x2b0] ss:$8 sps:$4 sm:$0xff]  }
 0x4cf   :  { %11791 = vmatpush2.bf16.msra.mxu0 %v20385_v36  ;;  %12061 = vmatpush1.bf16.msra.mxu1 %v17213_v40  ;;  %21770 = vst [vmem:[#allocation13_spill] sm:$0xff] %v20400_v21  ;;  %v17225_v36 = vld [vmem:[#allocation6 + $0x50] ss:$8 sps:$4 sm:$0xff]  }
 0x4d0   :  { %12092 = vmatprep.mubr.bf16.mxu1 %v20272_v12  ;;  %v9899_v27 = vpop.f32.mrf.mxu1  ;;  %11792 = vmatprep.subr.bf16.mxu0 %v20390_v25  ;;  %v17233_v12 = vld [vmem:[#allocation6 + $0x44] ss:$8 sps:$4 sm:$0xff]   ;;  %v20406_v25 = vld [vmem:[#allocation6 + $0x2a0] ss:$8 sps:$4 sm:$0xff]  }
 0x4d1   :  { %12062 = vmatprep.subr.bf16.mxu1 %v17221_v32  ;;  %21772 = vst [vmem:[#allocation32_spill] sm:$0xff] %v20406_v25  ;;  %v17231_v32 = vld [vmem:[#allocation6 + $0x40] ss:$8 sps:$4 sm:$0xff]  }
 0x4d2   :  { %v9901_v61 = vpop.f32.mrf.mxu1 }
 0x4d3   :  { %11793 = vmatpush2.bf16.msra.mxu0 %v20393_v42  ;;  %12063 = vmatpush1.bf16.msra.mxu1 %v17219_v47  ;;  %v20409_v47 = vld [vmem:[#allocation6 + $0x294] ss:$8 sps:$4 sm:$0xff]  }
 0x4d4   :  { %v9902_v40 = vpop.f32.mrf.mxu1  ;;  %11794 = vmatprep.subr.bf16.mxu0 %v20397_v51  ;;  %12064 = vmatprep.subr.bf16.mxu1 %v17227_v62  ;;  %21773 = vst [vmem:[#allocation39_spill] sm:$0xff] %v20409_v47  ;;  %v17239_v61 = vld [vmem:[#allocation6 + $0x34] ss:$8 sps:$4 sm:$0xff]   ;;  %v17237_v62 = vld [vmem:[#allocation6 + $0x30] ss:$8 sps:$4 sm:$0xff]  }
 0x4d5   :  { %v20412_v40 = vld [vmem:[#allocation6 + $0x290] ss:$8 sps:$4 sm:$0xff]   ;;  %v17248_v42 = vld [vmem:[#allocation6 + $0x14] ss:$8 sps:$4 sm:$0xff]  }
 0x4d6   :  { %21774 = vst [vmem:[#allocation23_spill] sm:$0xff] %v20412_v40 }
 0x4d7   :  { %11795 = vmatpush2.bf16.msra.mxu0 %v20400_v21  ;;  %12065 = vmatpush1.bf16.msra.mxu1 %v17225_v36  ;;  %v9372_v21 = vld [vmem:[%s21349_s4] sm:$0x3]  ;;  %v20418_v36 = vld [vmem:[#allocation6 + $0x284] ss:$8 sps:$4 sm:$0xff]  }
 0x4d8   :  { %11796 = vmatprep.subr.bf16.mxu0 %v20403_v16  ;;  %12066 = vmatprep.subr.bf16.mxu1 %v17233_v12  ;;  %21775 = vst [vmem:[#allocation20_spill] sm:$0xff] %v20418_v36  ;;  %v17245_v16 = vld [vmem:[#allocation6 + $0x24] ss:$8 sps:$4 sm:$0xff]   ;;  %v9636_v51 = vrot.slane %v9372_v21, %v21751_v20  ;;  %v17246_v20 = vld [vmem:[#allocation6 + $0x10] ss:$8 sps:$4 sm:$0xff]  }
 0x4d9   :  { %v20420_v12 = vld.sshfl [vmem:[#allocation2 + $0x1c] sm:$0x11 pattern:$0x75316420] }
 0x4da   :  { %v9643_v50 = vadd.f32 %v9636_v51, %v20268_v18 }
 0x4db   :  { %11797 = vmatpush2.bf16.msra.mxu0 %v20406_v25  ;;  %12067 = vmatpush1.bf16.msra.mxu1 %v17231_v32  ;;  %v20424_v32 = vld [vmem:[#allocation6 + $0x280] ss:$8 sps:$4 sm:$0xff]  }
 0x4dc   :  { %11798 = vmatprep.subr.bf16.mxu0 %v20409_v47  ;;  %12068 = vmatprep.subr.bf16.mxu1 %v17239_v61  ;;  %21776 = vst [vmem:[#allocation14_spill] sm:$0xff] %v20424_v32  ;;  %v17243_v25 = vld [vmem:[#allocation6 + $0x20] ss:$8 sps:$4 sm:$0xff]   ;;  %v9640_v47 = vrot.slane %v9372_v21, %v21754_v30  ;;  %v12155_v61 = vcombine.high %v20420_v12, %v20420_v12 }
 0x4dd   :  { %v9904_v21 = vadd.f32 %v9897_v60, %v9643_v50 }
 0x4de   :  { %v12169_v18 = vrot.slane %v12155_v61, %v18171_v41  ;;  %v17260_v61 = vld [vmem:[#allocation6 + $0xd4] ss:$8 sps:$4 sm:$0xff]  }
 0x4df   :  { %11799 = vmatpush2.bf16.msra.mxu0 %v20412_v40  ;;  %12069 = vmatpush1.bf16.msra.mxu1 %v17237_v62  ;;  %v20434_v62 = vrot.slane %v20246_v52, %v18171_v41 }
 0x4e0   :  { %11800 = vmatprep.subr.bf16.mxu0 %v20418_v36  ;;  %12070 = vmatprep.subr.bf16.mxu1 %v17245_v16  ;;  %v17251_v16 = vld [vmem:[#allocation6 + $0x4] ss:$8 sps:$4 sm:$0xff]   ;;  %v9644_v36 = vadd.f32 %v9640_v47, %v20281_v58 }
 0x4e2   :  { %v9905_v51 = vadd.f32 %v9899_v27, %v9644_v36 }
 0x4e3   :  { %11801 = vmatpush2.bf16.msra.mxu0 %v20424_v32  ;;  %12071 = vmatpush1.bf16.msra.mxu1 %v17243_v25  ;;  %v17249_v25 = vld [vmem:[#allocation6] ss:$8 sps:$4 sm:$0xff]  }
 0x4e4   :  { %12072 = vmatprep.subr.bf16.mxu1 %v17248_v42  ;;  %12332 = vmatprep.subr.bf16.mxu0 %v20188_v10  ;;  %v17254_v42 = vld [vmem:[#allocation6 + $0xf4] ss:$8 sps:$4 sm:$0xff]  }
 0x4e6   :  { %v10158_v30 = vpop.f32.mrf.mxu0  ;;  %11803 = vmatmul.mubr.bf16.vlgmr.msra.gmra.mxu0 %v20434_v62 }
 0x4e7   :  { %v10165_v32 = vadd.f32 %v10158_v30, %v9904_v21  ;;  %12073 = vmatpush1.bf16.msra.mxu1 %v17246_v20  ;;  %12333 = vmatpush1.bf16.msra.mxu0 %v20196_v37  ;;  %v17252_v30 = vld [vmem:[#allocation6 + $0xf0] ss:$8 sps:$4 sm:$0xff]   ;;  %v17257_v37 = vld [vmem:[#allocation6 + $0xe4] ss:$8 sps:$4 sm:$0xff]  }
 0x4e8   :  { %12364 = vmatprep.mubr.bf16.mxu0 %v12169_v18  ;;  %v10160_v52 = vpop.f32.mrf.mxu0  ;;  %12074 = vmatprep.subr.bf16.mxu1 %v17251_v16  ;;  %v20539_v16 = vld [vmem:[#allocation8 + $0x130] ss:$8 sps:$4 sm:$0xff]   ;;  %v20543_v18 = vld [vmem:[#allocation8 + $0x124] ss:$8 sps:$4 sm:$0xff]  }
 0x4e9   :  { %v10169_v10 = vmul.f32 0.01, %v10165_v32  ;;  %v10166_v40 = vadd.f32 %v10160_v52, %v9905_v51  ;;  %12334 = vmatprep.subr.bf16.mxu0 %v20205_v8  ;;  %vm10167_vm9 = vcmp.gt.f32.partialorder %v10165_v32, 0.0  ;;  %v17255_v8 = vld [vmem:[#allocation6 + $0xe0] ss:$8 sps:$4 sm:$0xff]   ;;  %21791 = vst [vmem:[#allocation35_spill] sm:$0xff] %v20539_v16 }
 0x4ea   :  { %v10162_v58 = vpop.f32.mrf.mxu0  ;;  %v21792_v21 = vld [vmem:[#allocation25_spill] sm:$0xff]  ;;  %21793 = vst [vmem:[#allocation28_spill] sm:$0xff] %v20543_v18 }
 0x4eb   :  { %vm10168_vm10 = vcmp.gt.f32.partialorder %v10166_v40, 0.0  ;;  %v10170_v50 = vmul.f32 0.01, %v10166_v40  ;;  %12075 = vmatpush1.bf16.msra.mxu1 %v17249_v25  ;;  %12335 = vmatpush1.bf16.msra.mxu0 %v20211_v11  ;;  %v10171_v27 = vsel %vm10167_vm9, %v10165_v32, %v10169_v10  ;;  %v17258_v11 = vld [vmem:[#allocation6 + $0xd0] ss:$8 sps:$4 sm:$0xff]  }
 0x4ec   :  { %v10163_v20 = vpop.f32.mrf.mxu0  ;;  %12076 = vmatprep.subr.bf16.mxu1 %v17254_v42  ;;  %12336 = vmatprep.subr.bf16.mxu0 %v20214_v23  ;;  %v17263_v23 = vld [vmem:[#allocation6 + $0xc4] ss:$8 sps:$4 sm:$0xff]   ;;  %v21794_v51 = vld [vmem:[#allocation21_spill] sm:$0xff]  ;;  %v20547_v25 = vld [vmem:[#allocation8 + $0x120] ss:$8 sps:$4 sm:$0xff]  }
 0x4ed   :  { %v10172_v60 = vsel %vm10168_vm10, %v10166_v40, %v10170_v50  ;;  %v17266_v40 = vld [vmem:[#allocation6 + $0xb4] ss:$8 sps:$4 sm:$0xff]   ;;  %v20458_v32 = vld.sshfl [vmem:[#allocation2 + $0x1e] sm:$0x11 pattern:$0x75316420] }
 0x4ee   :  { %v15819_v47 = vpack.c.bf16 %v10172_v60, %v10171_v27  ;;  %v21795_v52 = vld [vmem:[#allocation29_spill] sm:$0xff]  ;;  %v21796_v10 = vld [vmem:[#allocation30_spill] sm:$0xff] }
 0x4ef   :  { %12077 = vmatpush2.bf16.msra.mxu1 %v17252_v30  ;;  %12337 = vmatpush1.bf16.msra.mxu0 %v20219_v7  ;;  %v17261_v7 = vld [vmem:[#allocation6 + $0xc0] ss:$8 sps:$4 sm:$0xff]   ;;  %v20551_v42 = vld [vmem:[#allocation8 + $0x114] ss:$8 sps:$4 sm:$0xff]   ;;  %v20555_v58 = vld [vmem:[#allocation8 + $0x110] ss:$8 sps:$4 sm:$0xff]  }
 0x4f0   :  { %v10184_v36 = vrot.slane %v15819_v47, %v18171_v41  ;;  %12078 = vmatprep.subr.bf16.mxu1 %v17257_v37  ;;  %12338 = vmatprep.subr.bf16.mxu0 %v20223_v6  ;;  %v17264_v6 = vld [vmem:[#allocation6 + $0xb0] ss:$8 sps:$4 sm:$0xff]   ;;  %v20559_v30 = vld [vmem:[#allocation8 + $0x104] ss:$8 sps:$4 sm:$0xff]   ;;  %v20563_v37 = vld [vmem:[#allocation8 + $0x100] ss:$8 sps:$4 sm:$0xff]  }
 0x4f1   :  { %v21797_v50 = vld [vmem:[#allocation33_spill] sm:$0xff]  ;;  %v21800_v47 = vld [vmem:[#allocation32_spill] sm:$0xff] }
 0x4f2   :  { %15820 = vst.sshfl [vmem:[#allocation3 + $0x8] sm:$0x5 pattern:$0x73625140] %v10184_v36  ;;  %v21798_v20 = vld [vmem:[#allocation13_spill] sm:$0xff] }
 0x4f3   :  { %12079 = vmatpush2.bf16.msra.mxu1 %v17255_v8  ;;  %12339 = vmatpush1.bf16.msra.mxu0 %v20227_v13  ;;  %v17269_v13 = vld [vmem:[#allocation6 + $0xa4] ss:$8 sps:$4 sm:$0xff]   ;;  %v21799_v27 = vld [vmem:[#allocation37_spill] sm:$0xff] }
 0x4f4   :  { %12080 = vmatprep.subr.bf16.mxu1 %v17260_v61  ;;  %12340 = vmatprep.subr.bf16.mxu0 %v20232_v38  ;;  %v17267_v38 = vld [vmem:[#allocation6 + $0xa0] ss:$8 sps:$4 sm:$0xff]   ;;  %v20567_v60 = vld [vmem:[#allocation8 + $0x1f4] ss:$8 sps:$4 sm:$0xff]   ;;  %v20571_v8 = vld [vmem:[#allocation8 + $0x1f0] ss:$8 sps:$4 sm:$0xff]  }
 0x4f5   :  { %v10195_v36 = vld [vmem:[%s21349_s4] sm:$0x3]  ;;  %v21801_v61 = vld [vmem:[#allocation39_spill] sm:$0xff] }
 0x4f7   :  { %12081 = vmatpush2.bf16.msra.mxu1 %v17258_v11  ;;  %12341 = vmatpush1.bf16.msra.mxu0 %v20236_v17  ;;  %v17272_v17 = vld [vmem:[#allocation6 + $0x94] ss:$8 sps:$4 sm:$0xff]   ;;  %v20578_v11 = vld [vmem:[#allocation8 + $0x1e4] ss:$8 sps:$4 sm:$0xff]  }
 0x4f8   :  { %12082 = vmatprep.subr.bf16.mxu1 %v17263_v23  ;;  %12342 = vmatprep.subr.bf16.mxu0 %v20240_v29  ;;  %v17270_v29 = vld [vmem:[#allocation6 + $0x90] ss:$8 sps:$4 sm:$0xff]   ;;  %v21802_v23 = vld [vmem:[#allocation11_spill] sm:$0xff] }
 0x4fb   :  { %12083 = vmatpush2.bf16.msra.mxu1 %v17261_v7  ;;  %12343 = vmatpush1.bf16.msra.mxu0 %v20244_v14  ;;  %v17275_v14 = vld [vmem:[#allocation6 + $0x84] ss:$8 sps:$4 sm:$0xff]   ;;  %v10459_v7 = vrot.slane %v10195_v36, %v21802_v23 }
 0x4fc   :  { %12084 = vmatprep.subr.bf16.mxu1 %v17266_v40  ;;  %12344 = vmatprep.subr.bf16.mxu0 %v20250_v33  ;;  %v17273_v33 = vld [vmem:[#allocation6 + $0x80] ss:$8 sps:$4 sm:$0xff]  }
 0x4fd   :  { %v21803_v40 = vld [vmem:[#allocation23_spill] sm:$0xff] }
 0x4ff   :  { %12085 = vmatpush2.bf16.msra.mxu1 %v17264_v6  ;;  %12345 = vmatpush1.bf16.msra.mxu0 %v20258_v55  ;;  %v12416_v55 = vcombine.high %v20458_v32, %v20458_v32  ;;  %v20583_v6 = vld [vmem:[#allocation8 + $0x1e0] ss:$8 sps:$4 sm:$0xff]  }
 0x500   :  { %12086 = vmatprep.subr.bf16.mxu1 %v17269_v13  ;;  %12346 = vmatprep.subr.bf16.mxu0 %v20264_v44  ;;  %v20585_v13 = vld.sshfl [vmem:[#allocation3 + $0x2] sm:$0x11 pattern:$0x75316420] }
 0x503   :  { %12087 = vmatpush2.bf16.msra.mxu1 %v17267_v38  ;;  %12347 = vmatpush1.bf16.msra.mxu0 %v20276_v26  ;;  %v12430_v26 = vrot.slane %v12416_v55, %v18171_v41  ;;  %v21804_v38 = vld [vmem:[#allocation20_spill] sm:$0xff]  ;;  %v12981_v55 = vcombine.high %v20585_v13, %v20585_v13 }
 0x504   :  { %12088 = vmatprep.subr.bf16.mxu1 %v17272_v17  ;;  %12348 = vmatprep.subr.bf16.mxu0 %v20284_v49  ;;  %v20589_v17 = vld [vmem:[#allocation8 + $0x1d4] ss:$8 sps:$4 sm:$0xff]  }
 0x507   :  { %12089 = vmatpush2.bf16.msra.mxu1 %v17270_v29  ;;  %12349 = vmatpush2.bf16.msra.mxu0 %v20291_v22  ;;  %v20591_v29 = vld [vmem:[#allocation8 + $0x274] ss:$8 sps:$4 sm:$0xff]  }
 0x508   :  { %12090 = vmatprep.subr.bf16.mxu1 %v17275_v14  ;;  %12350 = vmatprep.subr.bf16.mxu0 %v20297_v43  ;;  %v12162_v43 = vrot.slane %v20420_v12, %v18171_v41  ;;  %v20535_v12 = vld [vmem:[#allocation8 + $0x134] ss:$8 sps:$4 sm:$0xff]   ;;  %v21805_v14 = vld [vmem:[#allocation12_spill] sm:$0xff] }
 0x509   :  { %21789 = vst [vmem:[#allocation16_spill] sm:$0xff] %v20535_v12 }
 0x50b   :  { %12091 = vmatpush2.bf16.msra.mxu1 %v17273_v33  ;;  %12351 = vmatpush2.bf16.msra.mxu0 %v20303_v39  ;;  %v20506_v39 = vld [vmem:[#allocation8 + $0x164] ss:$8 sps:$4 sm:$0xff]   ;;  %v10463_v33 = vrot.slane %v10195_v36, %v21805_v14  ;;  %v20644_v36 = vld [vmem:[#allocation8 + $0x1a0] ss:$8 sps:$4 sm:$0xff]  }
 0x50c   :  { %12352 = vmatprep.subr.bf16.mxu0 %v20309_v48  ;;  %12593 = vmatprep.subr.bf16.mxu1 %v20252_v0  ;;  %21808 = vst [vmem:[#allocation18_spill] sm:$0xff] %v20644_v36 }
 0x50e   :  { %v20466_v44 = vpop.f32.mrf.mxu1  ;;  %12093 = vmatmul.mubr.bf16.vlgmr.msra.gmra.mxu1 %v20434_v62  ;;  %v21790_v62 = vld [vmem:[#allocation43_spill] sm:$0xff] }
 0x50f   :  { %12353 = vmatpush2.bf16.msra.mxu0 %v20315_v9  ;;  %12594 = vmatpush1.bf16.msra.mxu1 %v20260_v34  ;;  %v20490_v34 = vld.sshfl [vmem:[#allocation3] sm:$0x11 pattern:$0x75316420]  ;;  %v20513_v9 = vld [vmem:[#allocation8 + $0x160] ss:$8 sps:$4 sm:$0xff]  }
 0x510   :  { %12625 = vmatprep.mubr.bf16.mxu1 %v12430_v26  ;;  %v20472_v49 = vpop.f32.mrf.mxu1  ;;  %12354 = vmatprep.subr.bf16.mxu0 %v20321_v19  ;;  %v21780_v19 = vld [vmem:[#allocation34_spill] sm:$0xff]  ;;  %v10466_v26 = vadd.f32 %v10459_v7, %v20466_v44 }
 0x511   :  { %12595 = vmatprep.subr.bf16.mxu1 %v20266_v15  ;;  %v20494_v15 = vld [vmem:[#allocation8 + $0x174] ss:$8 sps:$4 sm:$0xff]  }
 0x512   :  { %v10452_v22 = vpop.f32.mrf.mxu1 }
 0x513   :  { %12355 = vmatpush2.bf16.msra.mxu0 %v20327_v35  ;;  %12596 = vmatpush1.bf16.msra.mxu1 %v20278_v57  ;;  %v12708_v57 = vcombine.high %v20490_v34, %v20490_v34  ;;  %v21806_v22 = vld [vmem:[#allocation14_spill] sm:$0xff] }
 0x514   :  { %v10453_v0 = vpop.f32.mrf.mxu1  ;;  %12356 = vmatprep.subr.bf16.mxu0 %v20333_v31  ;;  %12597 = vmatprep.subr.bf16.mxu1 %v20286_v45  ;;  %v21777_v45 = vld [vmem:[#allocation44_spill] sm:$0xff]  ;;  %v21782_v31 = vld [vmem:[#allocation41_spill] sm:$0xff] }
 0x515   :  { %v12722_v48 = vrot.slane %v12708_v57, %v18171_v41  ;;  %v20599_v0 = vld [vmem:[#allocation8 + $0x1d0] ss:$8 sps:$4 sm:$0xff]  }
 0x516   :  { %v20601_v57 = vld [vmem:[#allocation8 + $0x270] ss:$8 sps:$4 sm:$0xff]  }
 0x517   :  { %12357 = vmatpush2.bf16.msra.mxu0 %v20339_v53  ;;  %12598 = vmatpush1.bf16.msra.mxu1 %v20293_v24  ;;  %v20500_v24 = vld [vmem:[#allocation8 + $0x170] ss:$8 sps:$4 sm:$0xff]  }
 0x518   :  { %12358 = vmatprep.subr.bf16.mxu0 %v20345_v56  ;;  %12599 = vmatprep.subr.bf16.mxu1 %v20299_v4  ;;  %v21778_v4 = vld [vmem:[#allocation45_spill] sm:$0xff] }
 0x519   :  { %v20523_v53 = vld [vmem:[#allocation8 + $0x150] ss:$8 sps:$4 sm:$0xff]  }
 0x51a   :  { %21783 = vst [vmem:[#allocation24_spill] sm:$0xff] %v20523_v53 }
 0x51b   :  { %12359 = vmatpush2.bf16.msra.mxu0 %v20351_v63  ;;  %12600 = vmatpush1.bf16.msra.mxu1 %v20305_v59  ;;  %v21784_v63 = vld [vmem:[#allocation36_spill] sm:$0xff] }
 0x51c   :  { %12360 = vmatprep.subr.bf16.mxu0 %v20357_v5  ;;  %12601 = vmatprep.subr.bf16.mxu1 %v20311_v3  ;;  %v21779_v3 = vld [vmem:[#allocation46_spill] sm:$0xff]  ;;  %v20527_v5 = vld [vmem:[#allocation8 + $0x144] ss:$8 sps:$4 sm:$0xff]  }
 0x51d   :  { %21785 = vst [vmem:[#allocation26_spill] sm:$0xff] %v20527_v5 }
 0x51f   :  { %12361 = vmatpush2.bf16.msra.mxu0 %v20363_v28  ;;  %12602 = vmatpush1.bf16.msra.mxu1 %v20317_v46  ;;  %v21786_v28 = vld [vmem:[#allocation42_spill] sm:$0xff] }
 0x520   :  { %12362 = vmatprep.subr.bf16.mxu0 %v20369_v1  ;;  %12603 = vmatprep.subr.bf16.mxu1 %v20323_v2  ;;  %v20518_v2 = vld [vmem:[#allocation8 + $0x154] ss:$8 sps:$4 sm:$0xff]   ;;  %v20531_v1 = vld [vmem:[#allocation8 + $0x140] ss:$8 sps:$4 sm:$0xff]  }
 0x521   :  { %21781 = vst [vmem:[#allocation15_spill] sm:$0xff] %v20518_v2  ;;  %21787 = vst [vmem:[#allocation31_spill] sm:$0xff] %v20531_v1 }
 0x523   :  { %12363 = vmatpush2.bf16.msra.mxu0 %v20375_v54  ;;  %12604 = vmatpush1.bf16.msra.mxu1 %v21777_v45  ;;  %v21788_v54 = vld [vmem:[#allocation38_spill] sm:$0xff]  ;;  %v12423_v45 = vrot.slane %v20458_v32, %v18171_v41 }
 0x524   :  { %12605 = vmatprep.subr.bf16.mxu1 %v21778_v4  ;;  %12885 = vmatprep.subr.bf16.mxu0 %v20494_v15  ;;  %v10467_v4 = vadd.f32 %v10463_v33, %v20472_v49  ;;  %v20657_v33 = vld [vmem:[#allocation8 + $0x190] ss:$8 sps:$4 sm:$0xff]  }
 0x525   :  { %21810 = vst [vmem:[#allocation40_spill] sm:$0xff] %v20657_v33 }
 0x526   :  { %v20508_v59 = vpop.f32.mrf.mxu0  ;;  %12365 = vmatmul.mubr.bf16.vlgmr.msra.gmra.mxu0 %v12162_v43  ;;  %v20607_v43 = vld [vmem:[#allocation8 + $0x1c4] ss:$8 sps:$4 sm:$0xff]  }
 0x527   :  { %12606 = vmatpush1.bf16.msra.mxu1 %v21779_v3  ;;  %12886 = vmatpush1.bf16.msra.mxu0 %v20500_v24  ;;  %v10727_v44 = vadd.f32 %v20508_v59, %v10466_v26  ;;  %v20625_v59 = vld [vmem:[#allocation8 + $0x1b4] ss:$8 sps:$4 sm:$0xff]   ;;  %v20663_v26 = vld [vmem:[#allocation8 + $0x184] ss:$8 sps:$4 sm:$0xff]  }
 0x528   :  { %12917 = vmatprep.mubr.bf16.mxu0 %v12722_v48  ;;  %v20515_v46 = vpop.f32.mrf.mxu0  ;;  %12607 = vmatprep.subr.bf16.mxu1 %v21780_v19  ;;  %v20611_v48 = vld [vmem:[#allocation8 + $0x264] ss:$8 sps:$4 sm:$0xff]   ;;  %v20614_v19 = vrot.slane %v12981_v55, %v18171_v41  ;;  %v20659_v55 = vld [vmem:[#allocation8 + $0x230] ss:$8 sps:$4 sm:$0xff]   ;;  %21811 = vst [vmem:[#allocation22_spill] sm:$0xff] %v20663_v26 }
 0x529   :  { %12887 = vmatprep.subr.bf16.mxu0 %v20506_v39 }
 0x52a   :  { %v10724_v35 = vpop.f32.mrf.mxu0 }
 0x52b   :  { %12608 = vmatpush1.bf16.msra.mxu1 %v21782_v31  ;;  %12888 = vmatpush1.bf16.msra.mxu0 %v20513_v9  ;;  %v10728_v35 = vadd.f32 %v20515_v46, %v10467_v4  ;;  %v20619_v31 = vld [vmem:[#allocation8 + $0x1c0] ss:$8 sps:$4 sm:$0xff]  }
 0x52c   :  { %v10725_v56 = vpop.f32.mrf.mxu0  ;;  %12609 = vmatprep.subr.bf16.mxu1 %v21784_v63  ;;  %12889 = vmatprep.subr.bf16.mxu0 %v20518_v2  ;;  %v20627_v63 = vld [vmem:[#allocation8 + $0x254] ss:$8 sps:$4 sm:$0xff]   ;;  %v20671_v4 = vld [vmem:[#allocation8 + $0x220] ss:$8 sps:$4 sm:$0xff]  }
 0x52d   :  { %v20621_v56 = vld [vmem:[#allocation8 + $0x260] ss:$8 sps:$4 sm:$0xff]  }
 0x52f   :  { %12610 = vmatpush2.bf16.msra.mxu1 %v21786_v28  ;;  %12890 = vmatpush1.bf16.msra.mxu0 %v20523_v53 }
 0x530   :  { %12611 = vmatprep.subr.bf16.mxu1 %v21788_v54  ;;  %12891 = vmatprep.subr.bf16.mxu0 %v20527_v5 }
 0x533   :  { %12612 = vmatpush2.bf16.msra.mxu1 %v21790_v62  ;;  %12892 = vmatpush1.bf16.msra.mxu0 %v20531_v1  ;;  %v20630_v62 = vld [vmem:[#allocation8 + $0x1b0] ss:$8 sps:$4 sm:$0xff]  }
 0x534   :  { %12613 = vmatprep.subr.bf16.mxu1 %v21792_v21  ;;  %12893 = vmatprep.subr.bf16.mxu0 %v20535_v12 }
 0x537   :  { %12614 = vmatpush2.bf16.msra.mxu1 %v21794_v51  ;;  %12894 = vmatpush1.bf16.msra.mxu0 %v20539_v16  ;;  %v20634_v51 = vld [vmem:[#allocation8 + $0x250] ss:$8 sps:$4 sm:$0xff]  }
 0x538   :  { %12615 = vmatprep.subr.bf16.mxu1 %v21795_v52  ;;  %12895 = vmatprep.subr.bf16.mxu0 %v20543_v18 }
 0x53b   :  { %12616 = vmatpush2.bf16.msra.mxu1 %v21796_v10  ;;  %12896 = vmatpush1.bf16.msra.mxu0 %v20547_v25  ;;  %v20638_v10 = vld [vmem:[#allocation8 + $0x1a4] ss:$8 sps:$4 sm:$0xff]  }
 0x53c   :  { %12617 = vmatprep.subr.bf16.mxu1 %v21797_v50  ;;  %12897 = vmatprep.subr.bf16.mxu0 %v20551_v42  ;;  %21807 = vst [vmem:[#allocation17_spill] sm:$0xff] %v20638_v10  ;;  %v20640_v50 = vld [vmem:[#allocation8 + $0x244] ss:$8 sps:$4 sm:$0xff]  }
 0x53f   :  { %12618 = vmatpush2.bf16.msra.mxu1 %v21798_v20  ;;  %12898 = vmatpush1.bf16.msra.mxu0 %v20555_v58 }
 0x540   :  { %12619 = vmatprep.subr.bf16.mxu1 %v21799_v27  ;;  %12899 = vmatprep.subr.bf16.mxu0 %v20559_v30 }
 0x543   :  { %12620 = vmatpush2.bf16.msra.mxu1 %v21800_v47  ;;  %12900 = vmatpush1.bf16.msra.mxu0 %v20563_v37 }
 0x544   :  { %12621 = vmatprep.subr.bf16.mxu1 %v21801_v61  ;;  %12901 = vmatprep.subr.bf16.mxu0 %v20567_v60  ;;  %v20646_v61 = vld [vmem:[#allocation8 + $0x240] ss:$8 sps:$4 sm:$0xff]  }
 0x547   :  { %12622 = vmatpush2.bf16.msra.mxu1 %v21803_v40  ;;  %12902 = vmatpush2.bf16.msra.mxu0 %v20571_v8  ;;  %v20651_v40 = vld [vmem:[#allocation8 + $0x194] ss:$8 sps:$4 sm:$0xff]  }
 0x548   :  { %12623 = vmatprep.subr.bf16.mxu1 %v21804_v38  ;;  %12903 = vmatprep.subr.bf16.mxu0 %v20578_v11  ;;  %21809 = vst [vmem:[#allocation19_spill] sm:$0xff] %v20651_v40  ;;  %v20653_v38 = vld [vmem:[#allocation8 + $0x234] ss:$8 sps:$4 sm:$0xff]  }
 0x54b   :  { %12624 = vmatpush2.bf16.msra.mxu1 %v21806_v22  ;;  %12904 = vmatpush2.bf16.msra.mxu0 %v20583_v6  ;;  %v20665_v22 = vld [vmem:[#allocation8 + $0x224] ss:$8 sps:$4 sm:$0xff]  }
 0x54c   :  { %12905 = vmatprep.subr.bf16.mxu0 %v20589_v17  ;;  %13158 = vmatprep.subr.bf16.mxu1 %v20591_v29 }
 0x54e   :  { %v10981_v3 = vpop.f32.mrf.mxu1  ;;  %12626 = vmatmul.mubr.bf16.vlgmr.msra.gmra.mxu1 %v12423_v45  ;;  %v20669_v45 = vld [vmem:[#allocation8 + $0x180] ss:$8 sps:$4 sm:$0xff]  }
 0x54f   :  { %v10988_v32 = vadd.f32 %v10981_v3, %v10727_v44  ;;  %12906 = vmatpush2.bf16.msra.mxu0 %v20599_v0  ;;  %13159 = vmatpush1.bf16.msra.mxu1 %v20601_v57  ;;  %21812 = vst [vmem:[#allocation27_spill] sm:$0xff] %v20669_v45  ;;  %v20675_v44 = vld [vmem:[#allocation8 + $0x214] ss:$8 sps:$4 sm:$0xff]   ;;  %v20679_v3 = vld [vmem:[#allocation8 + $0x210] ss:$8 sps:$4 sm:$0xff]  }
 0x550   :  { %13190 = vmatprep.mubr.bf16.mxu1 %v20614_v19  ;;  %v10983_v49 = vpop.f32.mrf.mxu1  ;;  %12907 = vmatprep.subr.bf16.mxu0 %v20607_v43  ;;  %21813 = vst [vmem:[#allocation44_spill] sm:$0xff] %v20675_v44  ;;  %21814 = vst [vmem:[#allocation45_spill] sm:$0xff] %v20679_v3 }
 0x551   :  { %v10992_v28 = vmul.f32 0.01, %v10988_v32  ;;  %v10989_v46 = vadd.f32 %v10983_v49, %v10728_v35  ;;  %13160 = vmatprep.subr.bf16.mxu1 %v20611_v48  ;;  %vm10990_vm11 = vcmp.gt.f32.partialorder %v10988_v32, 0.0  ;;  %v12715_v35 = vrot.slane %v20490_v34, %v18171_v41  ;;  %v20697_v34 = vld [vmem:[#allocation8 + $0x2f0] ss:$8 sps:$4 sm:$0xff]  }
 0x552   :  { %v10985_v54 = vpop.f32.mrf.mxu1  ;;  %21818 = vst [vmem:[#allocation36_spill] sm:$0xff] %v20697_v34 }
 0x553   :  { %vm10991_vm12 = vcmp.gt.f32.partialorder %v10989_v46, 0.0  ;;  %v10993_v21 = vmul.f32 0.01, %v10989_v46  ;;  %12908 = vmatpush2.bf16.msra.mxu0 %v20619_v31  ;;  %13161 = vmatpush1.bf16.msra.mxu1 %v20621_v56  ;;  %v10994_v20 = vsel %vm10990_vm11, %v10988_v32, %v10992_v28  ;;  %v20684_v32 = vld [vmem:[#allocation8 + $0x204] ss:$8 sps:$4 sm:$0xff]  }
 0x554   :  { %v10986_v52 = vpop.f32.mrf.mxu1  ;;  %12909 = vmatprep.subr.bf16.mxu0 %v20625_v59  ;;  %13162 = vmatprep.subr.bf16.mxu1 %v20627_v63  ;;  %21815 = vst [vmem:[#allocation46_spill] sm:$0xff] %v20684_v32  ;;  %v20689_v28 = vld [vmem:[#allocation8 + $0x200] ss:$8 sps:$4 sm:$0xff]   ;;  %v20694_v54 = vld [vmem:[#allocation8 + $0x2f4] ss:$8 sps:$4 sm:$0xff]  }
 0x555   :  { %v10995_v27 = vsel %vm10991_vm12, %v10989_v46, %v10993_v21  ;;  %21816 = vst [vmem:[#allocation34_spill] sm:$0xff] %v20689_v28  ;;  %21817 = vst [vmem:[#allocation41_spill] sm:$0xff] %v20694_v54 }
 0x556   :  { %v15920_v47 = vpack.c.bf16 %v10995_v27, %v10994_v20  ;;  %v20700_v20 = vld [vmem:[#allocation8 + $0x2e4] ss:$8 sps:$4 sm:$0xff]   ;;  %v20703_v27 = vld [vmem:[#allocation8 + $0x2e0] ss:$8 sps:$4 sm:$0xff]  }
 0x557   :  { %12910 = vmatpush2.bf16.msra.mxu0 %v20630_v62  ;;  %13163 = vmatpush1.bf16.msra.mxu1 %v20634_v51  ;;  %21819 = vst [vmem:[#allocation42_spill] sm:$0xff] %v20700_v20  ;;  %21820 = vst [vmem:[#allocation38_spill] sm:$0xff] %v20703_v27 }
 0x558   :  { %v11007_v7 = vrot.slane %v15920_v47, %v18171_v41  ;;  %12911 = vmatprep.subr.bf16.mxu0 %v20638_v10  ;;  %13164 = vmatprep.subr.bf16.mxu1 %v20640_v50  ;;  %v20706_v47 = vld [vmem:[#allocation8 + $0x2d4] ss:$8 sps:$4 sm:$0xff]  }
 0x559   :  { %21821 = vst [vmem:[#allocation43_spill] sm:$0xff] %v20706_v47 }
 0x55a   :  { %15921 = vst.sshfl [vmem:[#allocation3 + $0xa] sm:$0x5 pattern:$0x73625140] %v11007_v7  ;;  %v20709_v7 = vld [vmem:[#allocation8 + $0x2d0] ss:$8 sps:$4 sm:$0xff]  }
 0x55b   :  { %12912 = vmatpush2.bf16.msra.mxu0 %v20644_v36  ;;  %13165 = vmatpush1.bf16.msra.mxu1 %v20646_v61  ;;  %21822 = vst [vmem:[#allocation25_spill] sm:$0xff] %v20709_v7 }
 0x55c   :  { %12913 = vmatprep.subr.bf16.mxu0 %v20651_v40  ;;  %13166 = vmatprep.subr.bf16.mxu1 %v20653_v38 }
 0x55f   :  { %12914 = vmatpush2.bf16.msra.mxu0 %v20657_v33  ;;  %13167 = vmatpush1.bf16.msra.mxu1 %v20659_v55 }
 0x560   :  { %12915 = vmatprep.subr.bf16.mxu0 %v20663_v26  ;;  %13168 = vmatprep.subr.bf16.mxu1 %v20665_v22 }
 0x563   :  { %12916 = vmatpush2.bf16.msra.mxu0 %v20669_v45  ;;  %13169 = vmatpush1.bf16.msra.mxu1 %v20671_v4 }
 0x564   :  { %13170 = vmatprep.subr.bf16.mxu1 %v20675_v44 }
 0x566   :  { %v20686_v49 = vpop.f32.mrf.mxu0  ;;  %12918 = vmatmul.mubr.bf16.vlgmr.msra.gmra.mxu0 %v12715_v35  ;;  %v20712_v35 = vld [vmem:[#allocation8 + $0x2c4] ss:$8 sps:$4 sm:$0xff]  }
 0x567   :  { %13171 = vmatpush1.bf16.msra.mxu1 %v20679_v3  ;;  %21823 = vst [vmem:[#allocation21_spill] sm:$0xff] %v20712_v35 }
 0x568   :  { %v20691_v46 = vpop.f32.mrf.mxu0  ;;  %13172 = vmatprep.subr.bf16.mxu1 %v20684_v32 }
 0x56a   :  { %v11275_v21 = vpop.f32.mrf.mxu0 }
 0x56b   :  { %13173 = vmatpush1.bf16.msra.mxu1 %v20689_v28  ;;  %v20715_v21 = vld [vmem:[#allocation8 + $0x2c0] ss:$8 sps:$4 sm:$0xff]  }
 0x56c   :  { %v11276_v52 = vpop.f32.mrf.mxu0  ;;  %13174 = vmatprep.subr.bf16.mxu1 %v20694_v54  ;;  %21824 = vst [vmem:[#allocation29_spill] sm:$0xff] %v20715_v21 }
 0x56d   :  { %v20718_v52 = vld [vmem:[#allocation8 + $0x2b4] ss:$8 sps:$4 sm:$0xff]  }
 0x56e   :  { %21825 = vst [vmem:[#allocation30_spill] sm:$0xff] %v20718_v52 }
 0x56f   :  { %13175 = vmatpush2.bf16.msra.mxu1 %v20697_v34  ;;  %v20738_v34 = vld.sshfl [vmem:[#allocation3 + $0x4] sm:$0x11 pattern:$0x75316420] }
 0x570   :  { %13176 = vmatprep.subr.bf16.mxu1 %v20700_v20  ;;  %v20721_v20 = vld [vmem:[#allocation8 + $0x2b0] ss:$8 sps:$4 sm:$0xff]  }
 0x571   :  { %21826 = vst [vmem:[#allocation33_spill] sm:$0xff] %v20721_v20 }
 0x573   :  { %13177 = vmatpush2.bf16.msra.mxu1 %v20703_v27  ;;  %v20724_v27 = vld [vmem:[#allocation8 + $0x2a4] ss:$8 sps:$4 sm:$0xff]  }
 0x574   :  { %13178 = vmatprep.subr.bf16.mxu1 %v20706_v47  ;;  %21827 = vst [vmem:[#allocation13_spill] sm:$0xff] %v20724_v27  ;;  %v20727_v47 = vld [vmem:[#allocation8 + $0x2a0] ss:$8 sps:$4 sm:$0xff]  }
 0x575   :  { %21828 = vst [vmem:[#allocation37_spill] sm:$0xff] %v20727_v47 }
 0x577   :  { %13179 = vmatpush2.bf16.msra.mxu1 %v20709_v7  ;;  %v20730_v7 = vld [vmem:[#allocation8 + $0x294] ss:$8 sps:$4 sm:$0xff]  }
 0x578   :  { %13180 = vmatprep.subr.bf16.mxu1 %v20712_v35  ;;  %21829 = vst [vmem:[#allocation32_spill] sm:$0xff] %v20730_v7  ;;  %v20733_v35 = vld [vmem:[#allocation8 + $0x290] ss:$8 sps:$4 sm:$0xff]  }
 0x579   :  { %21830 = vst [vmem:[#allocation39_spill] sm:$0xff] %v20733_v35 }
 0x57b   :  { %13181 = vmatpush2.bf16.msra.mxu1 %v20715_v21  ;;  %v20736_v21 = vld [vmem:[#allocation8 + $0x284] ss:$8 sps:$4 sm:$0xff]  }
 0x57c   :  { %13182 = vmatprep.subr.bf16.mxu1 %v20718_v52  ;;  %21831 = vst [vmem:[#allocation11_spill] sm:$0xff] %v20736_v21  ;;  %v20741_v52 = vld [vmem:[#allocation8 + $0x280] ss:$8 sps:$4 sm:$0xff]  }
 0x57d   :  { %21832 = vst [vmem:[#allocation23_spill] sm:$0xff] %v20741_v52 }
 0x57f   :  { %13183 = vmatpush2.bf16.msra.mxu1 %v20721_v20 }
 0x580   :  { %13184 = vmatprep.subr.bf16.mxu1 %v20724_v27  ;;  %v13628_v27 = vcombine.high %v20738_v34, %v20738_v34 }
 0x583   :  { %13185 = vmatpush2.bf16.msra.mxu1 %v20727_v47  ;;  %v20749_v47 = vrot.slane %v20585_v13, %v18171_v41  ;;  %v11018_v13 = vld [vmem:[%s21349_s4] sm:$0x3] }
 0x584   :  { %13186 = vmatprep.subr.bf16.mxu1 %v20730_v7  ;;  %v13642_v7 = vrot.slane %v13628_v27, %v18171_v41  ;;  %v11282_v27 = vrot.slane %v11018_v13, %v21802_v23 }
 0x587   :  { %13187 = vmatpush2.bf16.msra.mxu1 %v20733_v35 }
 0x588   :  { %13188 = vmatprep.subr.bf16.mxu1 %v20736_v21 }
 0x58b   :  { %13189 = vmatpush2.bf16.msra.mxu1 %v20741_v52 }
 0x58c   :  { %13645 = vmatprep.subr.bf16.mxu1 %v20494_v15 }
 0x58e   :  { %v11543_v20 = vpop.f32.mrf.mxu1  ;;  %13191 = vmatmul.mubr.bf16.vlgmr.msra.gmra.mxu1 %v20749_v47 }
 0x58f   :  { %13646 = vmatpush1.bf16.msra.mxu1 %v20500_v24  ;;  %13677 = vmatprep.mubr.bf16.mxu1 %v13642_v7  ;;  %v11286_v7 = vrot.slane %v11018_v13, %v21805_v14 }
 0x590   :  { %v11545_v21 = vpop.f32.mrf.mxu1  ;;  %13647 = vmatprep.subr.bf16.mxu1 %v20506_v39 }
 0x592   :  { %v11547_v35 = vpop.f32.mrf.mxu1 }
 0x593   :  { %13648 = vmatpush1.bf16.msra.mxu1 %v20513_v9  ;;  %v11289_v35 = vadd.f32 %v11282_v27, %v20686_v49 }
 0x594   :  { %v11548_v52 = vpop.f32.mrf.mxu1  ;;  %13649 = vmatprep.subr.bf16.mxu1 %v20518_v2 }
 0x595   :  { %v11290_v52 = vadd.f32 %v11286_v7, %v20691_v46 }
 0x597   :  { %13650 = vmatpush1.bf16.msra.mxu1 %v20523_v53  ;;  %v11551_v53 = vadd.f32 %v11545_v21, %v11290_v52  ;;  %v17375_v21 = vld [vmem:[%s21352_s7 + $0x30] sm:$0xff]   ;;  %v17380_v52 = vld [vmem:[%s21352_s7 + $0x58] sm:$0xff]  }
 0x598   :  { %13651 = vmatprep.subr.bf16.mxu1 %v20527_v5 }
 0x59b   :  { %13652 = vmatpush1.bf16.msra.mxu1 %v20531_v1  ;;  %v11550_v1 = vadd.f32 %v11543_v20, %v11289_v35  ;;  %v17376_v35 = vld [vmem:[%s21352_s7 + $0x68] sm:$0xff]  }
 0x59c   :  { %13653 = vmatprep.subr.bf16.mxu1 %v20535_v12 }
 0x59f   :  { %13654 = vmatpush1.bf16.msra.mxu1 %v20539_v16 }
 0x5a0   :  { %13655 = vmatprep.subr.bf16.mxu1 %v20543_v18 }
 0x5a3   :  { %13656 = vmatpush1.bf16.msra.mxu1 %v20547_v25 }
 0x5a4   :  { %13657 = vmatprep.subr.bf16.mxu1 %v20551_v42 }
 0x5a6   :  { %v11804_v5 = vpop.f32.mrf.mxu0 }
 0x5a7   :  { %v11811_v12 = vadd.f32 %v11804_v5, %v11550_v1  ;;  %13658 = vmatpush1.bf16.msra.mxu1 %v20555_v58  ;;  %v17372_v5 = vld [vmem:[%s21352_s7 + $0x78] sm:$0xff]  }
 0x5a8   :  { %v11806_v2 = vpop.f32.mrf.mxu0  ;;  %13659 = vmatprep.subr.bf16.mxu1 %v20559_v30  ;;  %v17373_v1 = vld [vmem:[%s21352_s7 + $0x38] sm:$0xff]   ;;  %16389 = vmatprep.subr.bf16.mxu0 %v17372_v5  ;;  %v13635_v5 = vrot.slane %v20738_v34, %v18171_v41  ;;  %v17387_v34 = vld [vmem:[%s21352_s7] sm:$0xff]  }
 0x5a9   :  { %v11815_v18 = vmul.f32 0.01, %v11811_v12  ;;  %v11812_v16 = vadd.f32 %v11806_v2, %v11551_v53  ;;  %vm11813_vm13 = vcmp.gt.f32.partialorder %v11811_v12, 0.0  ;;  %v17374_v2 = vld [vmem:[%s21352_s7 + $0x70] sm:$0xff]   ;;  %16390 = vmatpush3.bf16.msra.mxu0 %v17373_v1 }
 0x5aa   :  { %v11808_v13 = vpop.f32.mrf.mxu0  ;;  %16391 = vmatprep.subr.bf16.mxu0 %v17374_v2 }
 0x5ab   :  { %vm11814_vm14 = vcmp.gt.f32.partialorder %v11812_v16, 0.0  ;;  %v11816_v49 = vmul.f32 0.01, %v11812_v16  ;;  %13660 = vmatpush1.bf16.msra.mxu1 %v20563_v37  ;;  %v11817_v53 = vsel %vm11813_vm13, %v11811_v12, %v11815_v18  ;;  %v17377_v12 = vld [vmem:[%s21352_s7 + $0x28] sm:$0xff]   ;;  %v17379_v18 = vld [vmem:[%s21352_s7 + $0x20] sm:$0xff]   ;;  %v17381_v13 = vld [vmem:[%s21352_s7 + $0x18] sm:$0xff]  }
 0x5ac   :  { %v11809_v27 = vpop.f32.mrf.mxu0  ;;  %13661 = vmatprep.subr.bf16.mxu1 %v20567_v60 }
 0x5ad   :  { %v11818_v46 = vsel %vm11814_vm14, %v11812_v16, %v11816_v49  ;;  %16392 = vmatpush3.bf16.msra.mxu0 %v17375_v21  ;;  %v17378_v16 = vld [vmem:[%s21352_s7 + $0x60] sm:$0xff]   ;;  %v17382_v49 = vld [vmem:[%s21352_s7 + $0x50] sm:$0xff]  }
 0x5ae   :  { %v16021_v20 = vpack.c.bf16 %v11818_v46, %v11817_v53  ;;  %16393 = vmatprep.subr.bf16.mxu0 %v17376_v35  ;;  %v17383_v27 = vld [vmem:[%s21352_s7 + $0x10] sm:$0xff]   ;;  %v17384_v53 = vld [vmem:[%s21352_s7 + $0x48] sm:$0xff]  }
 0x5af   :  { %13662 = vmatpush2.bf16.msra.mxu1 %v20571_v8  ;;  %v17385_v46 = vld [vmem:[%s21352_s7 + $0x8] sm:$0xff]  }
 0x5b0   :  { %v11830_v7 = vrot.slane %v16021_v20, %v18171_v41  ;;  %13663 = vmatprep.subr.bf16.mxu1 %v20578_v11  ;;  %v20843_v35 = vld [vmem:[#allocation8 + $0x74] ss:$8 sps:$4 sm:$0xff]  }
 0x5b1   :  { %16394 = vmatpush3.bf16.msra.mxu0 %v17377_v12  ;;  %21833 = vst [vmem:[#allocation20_spill] sm:$0xff] %v20843_v35 }
 0x5b2   :  { %16022 = vst.sshfl [vmem:[#allocation3 + $0xc] sm:$0x5 pattern:$0x73625140] %v11830_v7  ;;  %16395 = vmatprep.subr.bf16.mxu0 %v17378_v16  ;;  %v17386_v7 = vld [vmem:[%s21352_s7 + $0x40] sm:$0xff]  }
 0x5b3   :  { %13664 = vmatpush2.bf16.msra.mxu1 %v20583_v6 }
 0x5b4   :  { %13665 = vmatprep.subr.bf16.mxu1 %v20589_v17 }
 0x5b5   :  { %16396 = vmatpush3.bf16.msra.mxu0 %v17379_v18 }
 0x5b6   :  { %16397 = vmatprep.subr.bf16.mxu0 %v17380_v52 }
 0x5b7   :  { %13666 = vmatpush2.bf16.msra.mxu1 %v20599_v0 }
 0x5b8   :  { %13667 = vmatprep.subr.bf16.mxu1 %v20607_v43 }
 0x5b9   :  { %16398 = vmatpush3.bf16.msra.mxu0 %v17381_v13  ;;  %v11841_v13 = vld [vmem:[%s21349_s4] sm:$0x3] }
 0x5ba   :  { %16399 = vmatprep.subr.bf16.mxu0 %v17382_v49  ;;  %v12105_v49 = vrot.slane %v11841_v13, %v21802_v23 }
 0x5bb   :  { %13668 = vmatpush2.bf16.msra.mxu1 %v20619_v31 }
 0x5bc   :  { %13669 = vmatprep.subr.bf16.mxu1 %v20625_v59 }
 0x5bd   :  { %16400 = vmatpush3.bf16.msra.mxu0 %v17383_v27  ;;  %v12109_v27 = vrot.slane %v11841_v13, %v21805_v14 }
 0x5be   :  { %16401 = vmatprep.subr.bf16.mxu0 %v17384_v53 }
 0x5bf   :  { %13670 = vmatpush2.bf16.msra.mxu1 %v20630_v62 }
 0x5c0   :  { %13671 = vmatprep.subr.bf16.mxu1 %v20638_v10 }
 0x5c1   :  { %16402 = vmatpush3.bf16.msra.mxu0 %v17385_v46 }
 0x5c2   :  { %16403 = vmatprep.subr.bf16.mxu0 %v17386_v7 }
 0x5c3   :  { %13672 = vmatpush2.bf16.msra.mxu1 %v20644_v36 }
 0x5c4   :  { %13673 = vmatprep.subr.bf16.mxu1 %v20651_v40 }
 0x5c5   :  { %16404 = vmatpush3.bf16.msra.mxu0 %v17387_v34 }
 0x5c6   :  { %13576 = vmatprep.subr.bf16.mxu0 %v20843_v35 }
 0x5c7   :  { %13674 = vmatpush2.bf16.msra.mxu1 %v20657_v33 }
 0x5c8   :  { %13675 = vmatprep.subr.bf16.mxu1 %v20663_v26 }
 0x5cb   :  { %13676 = vmatpush2.bf16.msra.mxu1 %v20669_v45 }
 0x5ce   :  { %v12094_v1 = vpop.f32.mrf.mxu1  ;;  %13678 = vmatmul.mubr.bf16.vlgmr.msra.gmra.mxu1 %v13635_v5 }
 0x5cf   :  { %v12112_v5 = vadd.f32 %v12105_v49, %v12094_v1 }
 0x5d0   :  { %v12096_v2 = vpop.f32.mrf.mxu1 }
 0x5d1   :  { %v12113_v53 = vadd.f32 %v12109_v27, %v12096_v2 }
 0x5d2   :  { %v12098_v20 = vpop.f32.mrf.mxu1 }
 0x5d4   :  { %v12099_v21 = vpop.f32.mrf.mxu1 }
 0x5e6   :  { %v12366_v12 = vpop.f32.mrf.mxu0 }
 0x5e7   :  { %v12373_v46 = vadd.f32 %v12366_v12, %v12112_v5 }
 0x5e8   :  { %v12368_v16 = vpop.f32.mrf.mxu0 }
 0x5e9   :  { %v12374_v21 = vadd.f32 %v12368_v16, %v12113_v53  ;;  %v12665_v16 = vld [vmem:[%s21351_s6] sm:$0x3] }
 0x5ea   :  { %v12370_v18 = vpop.f32.mrf.mxu0  ;;  %v20856_v49 = vrot.slane %v12665_v16, %v21802_v23  ;;  %v20859_v27 = vrot.slane %v12665_v16, %v21805_v14  ;;  %v20890_v16 = vld [vmem:[#allocation8 + $0x24] ss:$8 sps:$4 sm:$0xff]  }
 0x5ec   :  { %v12371_v52 = vpop.f32.mrf.mxu0 }
 0x60e   :  { %v12627_v20 = vpop.f32.mrf.mxu1 }
 0x60f   :  { %v12634_v7 = vadd.f32 %v12627_v20, %v12373_v46 }
 0x610   :  { %v12629_v34 = vpop.f32.mrf.mxu1 }
 0x611   :  { %v12638_v35 = vmul.f32 0.01, %v12634_v7  ;;  %v12635_v45 = vadd.f32 %v12629_v34, %v12374_v21  ;;  %vm12636_vm15 = vcmp.gt.f32.partialorder %v12634_v7, 0.0  ;;  %v20865_v34 = vld [vmem:[#allocation8 + $0x64] ss:$8 sps:$4 sm:$0xff]  }
 0x612   :  { %v12631_v18 = vpop.f32.mrf.mxu1 }
 0x613   :  { %vm12637_vm1 = vcmp.gt.f32.partialorder %v12635_v45, 0.0  ;;  %v12639_v52 = vmul.f32 0.01, %v12635_v45  ;;  %v12640_v33 = vsel %vm12636_vm15, %v12634_v7, %v12638_v35  ;;  %v20863_v7 = vld [vmem:[#allocation8 + $0x70] ss:$8 sps:$4 sm:$0xff]  }
 0x614   :  { %v12632_v26 = vpop.f32.mrf.mxu1  ;;  %v20869_v18 = vld [vmem:[#allocation8 + $0x60] ss:$8 sps:$4 sm:$0xff]  }
 0x615   :  { %v12641_v40 = vsel %vm12637_vm1, %v12635_v45, %v12639_v52  ;;  %v20872_v52 = vld [vmem:[#allocation8 + $0x54] ss:$8 sps:$4 sm:$0xff]  }
 0x616   :  { %v16122_v36 = vpack.c.bf16 %v12641_v40, %v12640_v33 }
 0x618   :  { %v12653_v10 = vrot.slane %v16122_v36, %v18171_v41 }
 0x61a   :  { %16123 = vst.sshfl [vmem:[#allocation3 + $0xe] sm:$0x5 pattern:$0x73625140] %v12653_v10 }
 0x626   :  { %v12919_v1 = vpop.f32.mrf.mxu0 }
 0x627   :  { %v12937_v26 = vadd.f32 %v20856_v49, %v12919_v1  ;;  %v20875_v1 = vld [vmem:[#allocation8 + $0x50] ss:$8 sps:$4 sm:$0xff]  }
 0x628   :  { %v12921_v2 = vpop.f32.mrf.mxu0 }
 0x629   :  { %v12938_v36 = vadd.f32 %v20859_v27, %v12921_v2  ;;  %v20878_v2 = vld [vmem:[#allocation8 + $0x44] ss:$8 sps:$4 sm:$0xff]  }
 0x62a   :  { %v12923_v12 = vpop.f32.mrf.mxu0 }
 0x62b   :  { %v20881_v12 = vld [vmem:[#allocation8 + $0x40] ss:$8 sps:$4 sm:$0xff]  }
 0x62c   :  { %v12924_v13 = vpop.f32.mrf.mxu0 }
 0x62d   :  { %v20887_v13 = vld [vmem:[#allocation8 + $0x30] ss:$8 sps:$4 sm:$0xff]  }
 0x64e   :  { %v13192_v40 = vpop.f32.mrf.mxu1 }
 0x64f   :  { %v13199_v10 = vadd.f32 %v13192_v40, %v12937_v26  ;;  %v20893_v26 = vld [vmem:[#allocation8 + $0x20] ss:$8 sps:$4 sm:$0xff]   ;;  %v20896_v40 = vld [vmem:[#allocation8 + $0x14] ss:$8 sps:$4 sm:$0xff]  }
 0x650   :  { %v13194_v33 = vpop.f32.mrf.mxu1 }
 0x651   :  { %vm13201_vm2 = vcmp.gt.f32.partialorder %v13199_v10, 0.0  ;;  %v13203_v45 = vmul.f32 0.01, %v13199_v10  ;;  %v13200_v35 = vadd.f32 %v13194_v33, %v12938_v36  ;;  %v20899_v36 = vld [vmem:[#allocation8 + $0x10] ss:$8 sps:$4 sm:$0xff]  }
 0x652   :  { %v13196_v5 = vpop.f32.mrf.mxu1  ;;  %v20905_v33 = vld [vmem:[#allocation8] ss:$8 sps:$4 sm:$0xff]  }
 0x653   :  { %vm13202_vm3 = vcmp.gt.f32.partialorder %v13200_v35, 0.0  ;;  %v13204_v53 = vmul.f32 0.01, %v13200_v35  ;;  %v13205_v46 = vsel %vm13201_vm2, %v13199_v10, %v13203_v45  ;;  %v20902_v10 = vld [vmem:[#allocation8 + $0x4] ss:$8 sps:$4 sm:$0xff]   ;;  %21834 = vst [vmem:[#allocation12_spill] sm:$0xff] %v20905_v33 }
 0x654   :  { %v13197_v20 = vpop.f32.mrf.mxu1  ;;  %v13207_v14 = vpack.c.bf16 %v13205_v46, %v13205_v46  ;;  %v20908_v45 = vld [vmem:[#allocation8 + $0xf4] ss:$8 sps:$4 sm:$0xff]   ;;  %v20914_v5 = vld [vmem:[#allocation8 + $0xe4] ss:$8 sps:$4 sm:$0xff]  }
 0x655   :  { %v13206_v23 = vsel %vm13202_vm3, %v13200_v35, %v13204_v53  ;;  %21835 = vst [vmem:[#allocation14_spill] sm:$0xff] %v20908_v45  ;;  %v20911_v35 = vld [vmem:[#allocation8 + $0xf0] ss:$8 sps:$4 sm:$0xff]   ;;  %21837 = vst [vmem:[#allocation48_spill] sm:$0xff] %v20914_v5  ;;  %v20917_v53 = vld [vmem:[#allocation8 + $0xe0] ss:$8 sps:$4 sm:$0xff]  }
 0x656   :  { %v13208_v21 = vpack.c.bf16 %v13206_v23, %v13206_v23  ;;  %21836 = vst [vmem:[#allocation47_spill] sm:$0xff] %v20911_v35  ;;  %21838 = vst [vmem:[#allocation49_spill] sm:$0xff] %v20917_v53  ;;  %v20920_v46 = vld [vmem:[#allocation8 + $0xd4] ss:$8 sps:$4 sm:$0xff]   ;;  %v20923_v20 = vld [vmem:[#allocation8 + $0xd0] ss:$8 sps:$4 sm:$0xff]  }
 0x657   :  { %21839 = vst [vmem:[#allocation50_spill] sm:$0xff] %v20920_v46  ;;  %21840 = vst [vmem:[#allocation51_spill] sm:$0xff] %v20923_v20  ;;  %v20926_v23 = vld [vmem:[#allocation8 + $0xc4] ss:$8 sps:$4 sm:$0xff]  }
 0x658   :  { %13369 = vmatprep.mubr.bf16.mxu0 %v13208_v21  ;;  %21841 = vst [vmem:[#allocation52_spill] sm:$0xff] %v20926_v23  ;;  %v20929_v21 = vld [vmem:[#allocation8 + $0xc0] ss:$8 sps:$4 sm:$0xff]  }
 0x659   :  { %13370 = vmatmul.mubr.bf16.vlgmr.msra.gmra.mxu0 %v13207_v14  ;;  %21842 = vst [vmem:[#allocation53_spill] sm:$0xff] %v20929_v21  ;;  %v20932_v14 = vld [vmem:[#allocation8 + $0xb4] ss:$8 sps:$4 sm:$0xff]  }
 0x65a   :  { %13577 = vmatpush1.bf16.msra.mxu0 %v20863_v7  ;;  %13608 = vmatprep.mubr.bf16.mxu0 %v20614_v19  ;;  %v20884_v19 = vld [vmem:[#allocation8 + $0x34] ss:$8 sps:$4 sm:$0xff]   ;;  %21843 = vst [vmem:[#allocation54_spill] sm:$0xff] %v20932_v14 }
 0x65b   :  { %13578 = vmatprep.subr.bf16.mxu0 %v20865_v34 }
 0x65e   :  { %13579 = vmatpush1.bf16.msra.mxu0 %v20869_v18 }
 0x65f   :  { %13580 = vmatprep.subr.bf16.mxu0 %v20872_v52 }
 0x662   :  { %13581 = vmatpush1.bf16.msra.mxu0 %v20875_v1 }
 0x663   :  { %13582 = vmatprep.subr.bf16.mxu0 %v20878_v2 }
 0x666   :  { %13583 = vmatpush1.bf16.msra.mxu0 %v20881_v12 }
 0x667   :  { %13584 = vmatprep.subr.bf16.mxu0 %v20884_v19 }
 0x66a   :  { %13585 = vmatpush1.bf16.msra.mxu0 %v20887_v13 }
 0x66b   :  { %13586 = vmatprep.subr.bf16.mxu0 %v20890_v16 }
 0x66e   :  { %13587 = vmatpush1.bf16.msra.mxu0 %v20893_v26 }
 0x66f   :  { %13588 = vmatprep.subr.bf16.mxu0 %v20896_v40 }
 0x672   :  { %13589 = vmatpush1.bf16.msra.mxu0 %v20899_v36 }
 0x673   :  { %13590 = vmatprep.subr.bf16.mxu0 %v20902_v10 }
 0x676   :  { %13591 = vmatpush1.bf16.msra.mxu0 %v20905_v33  ;;  %v20957_v33 = vld [vmem:[#allocation8 + $0x80] ss:$8 sps:$4 sm:$0xff]  }
 0x677   :  { %13592 = vmatprep.subr.bf16.mxu0 %v20908_v45  ;;  %v16240_v45 = vld.sshfl [vmem:[#allocation3 + $0x6] sm:$0x11 pattern:$0x75316420] }
 0x67a   :  { %13593 = vmatpush2.bf16.msra.mxu0 %v20911_v35  ;;  %v20949_v35 = vld [vmem:[#allocation8 + $0x90] ss:$8 sps:$4 sm:$0xff]  }
 0x67b   :  { %13594 = vmatprep.subr.bf16.mxu0 %v20914_v5  ;;  %v20935_v5 = vld [vmem:[#allocation8 + $0xb0] ss:$8 sps:$4 sm:$0xff]  }
 0x67c   :  { %21844 = vst [vmem:[#allocation55_spill] sm:$0xff] %v20935_v5 }
 0x67e   :  { %13595 = vmatpush2.bf16.msra.mxu0 %v20917_v53  ;;  %v20938_v53 = vld [vmem:[#allocation8 + $0xa4] ss:$8 sps:$4 sm:$0xff]  }
 0x67f   :  { %13596 = vmatprep.subr.bf16.mxu0 %v20920_v46  ;;  %21845 = vst [vmem:[#allocation56_spill] sm:$0xff] %v20938_v53  ;;  %v20941_v46 = vld [vmem:[#allocation8 + $0xa0] ss:$8 sps:$4 sm:$0xff]  }
 0x680   :  { %21846 = vst [vmem:[#allocation57_spill] sm:$0xff] %v20941_v46 }
 0x682   :  { %13597 = vmatpush2.bf16.msra.mxu0 %v20923_v20  ;;  %v20944_v20 = vld [vmem:[#allocation8 + $0x94] ss:$8 sps:$4 sm:$0xff]  }
 0x683   :  { %13598 = vmatprep.subr.bf16.mxu0 %v20926_v23  ;;  %21847 = vst [vmem:[#allocation58_spill] sm:$0xff] %v20944_v20 }
 0x686   :  { %13599 = vmatpush2.bf16.msra.mxu0 %v20929_v21  ;;  %v20952_v21 = vld [vmem:[#allocation8 + $0x84] ss:$8 sps:$4 sm:$0xff]  }
 0x687   :  { %13600 = vmatprep.subr.bf16.mxu0 %v20932_v14 }
 0x68a   :  { %13601 = vmatpush2.bf16.msra.mxu0 %v20935_v5 }
 0x68b   :  { %13602 = vmatprep.subr.bf16.mxu0 %v20938_v53 }
 0x68e   :  { %13603 = vmatpush2.bf16.msra.mxu0 %v20941_v46  ;;  %v20947_v23 = vpop.f32.mrf.mxu1  ;;  %v13697_v46 = vcombine.high %v16240_v45, %v16240_v45 }
 0x68f   :  { %13604 = vmatprep.subr.bf16.mxu0 %v20944_v20 }
 0x690   :  { %v20954_v14 = vpop.f32.mrf.mxu1  ;;  %v20963_v20 = vrot.slane %v13697_v46, %v18171_v41  ;;  %v21853_v46 = vld [vmem:[#allocation21_spill] sm:$0xff] }
 0x692   :  { %13605 = vmatpush2.bf16.msra.mxu0 %v20949_v35  ;;  %v13683_v5 = vpop.f32.mrf.mxu1 }
 0x693   :  { %13606 = vmatprep.subr.bf16.mxu0 %v20952_v21  ;;  %v21851_v5 = vld [vmem:[#allocation43_spill] sm:$0xff] }
 0x694   :  { %v13684_v53 = vpop.f32.mrf.mxu1 }
 0x695   :  { %v21852_v53 = vld [vmem:[#allocation25_spill] sm:$0xff] }
 0x696   :  { %13607 = vmatpush2.bf16.msra.mxu0 %v20957_v33 }
 0x697   :  { %13714 = vmatprep.subr.bf16.mxu0 %v20591_v29  ;;  %v21848_v29 = vld [vmem:[#allocation36_spill] sm:$0xff] }
 0x699   :  { %13609 = vmatmul.mubr.bf16.vlgmr.msra.gmra.mxu0 %v20749_v47  ;;  %v21850_v47 = vld [vmem:[#allocation38_spill] sm:$0xff] }
 0x69a   :  { %13715 = vmatpush1.bf16.msra.mxu0 %v20601_v57  ;;  %13746 = vmatprep.mubr.bf16.mxu0 %v20963_v20  ;;  %v21849_v57 = vld [vmem:[#allocation42_spill] sm:$0xff] }
 0x69b   :  { %13716 = vmatprep.subr.bf16.mxu0 %v20611_v48 }
 0x69e   :  { %13717 = vmatpush1.bf16.msra.mxu0 %v20621_v56 }
 0x69f   :  { %13718 = vmatprep.subr.bf16.mxu0 %v20627_v63 }
 0x6a2   :  { %13719 = vmatpush1.bf16.msra.mxu0 %v20634_v51 }
 0x6a3   :  { %13720 = vmatprep.subr.bf16.mxu0 %v20640_v50 }
 0x6a6   :  { %13721 = vmatpush1.bf16.msra.mxu0 %v20646_v61 }
 0x6a7   :  { %13722 = vmatprep.subr.bf16.mxu0 %v20653_v38 }
 0x6aa   :  { %13723 = vmatpush1.bf16.msra.mxu0 %v20659_v55 }
 0x6ab   :  { %13724 = vmatprep.subr.bf16.mxu0 %v20665_v22 }
 0x6ae   :  { %13725 = vmatpush1.bf16.msra.mxu0 %v20671_v4 }
 0x6af   :  { %13726 = vmatprep.subr.bf16.mxu0 %v20675_v44  ;;  %v21854_v44 = vld [vmem:[#allocation29_spill] sm:$0xff] }
 0x6b2   :  { %13727 = vmatpush1.bf16.msra.mxu0 %v20679_v3  ;;  %v21855_v3 = vld [vmem:[#allocation30_spill] sm:$0xff] }
 0x6b3   :  { %13728 = vmatprep.subr.bf16.mxu0 %v20684_v32  ;;  %v21856_v32 = vld [vmem:[#allocation33_spill] sm:$0xff] }
 0x6b6   :  { %13729 = vmatpush1.bf16.msra.mxu0 %v20689_v28  ;;  %v21857_v28 = vld [vmem:[#allocation13_spill] sm:$0xff] }
 0x6b7   :  { %13730 = vmatprep.subr.bf16.mxu0 %v20694_v54  ;;  %v21858_v54 = vld [vmem:[#allocation37_spill] sm:$0xff] }
 0x6ba   :  { %13731 = vmatpush2.bf16.msra.mxu0 %v21848_v29  ;;  %v21859_v29 = vld [vmem:[#allocation32_spill] sm:$0xff] }
 0x6bb   :  { %13732 = vmatprep.subr.bf16.mxu0 %v21849_v57  ;;  %v20995_v57 = vld.sshfl [vmem:[#allocation3 + $0x8] sm:$0x11 pattern:$0x75316420] }
 0x6be   :  { %13733 = vmatpush2.bf16.msra.mxu0 %v21850_v47  ;;  %v21860_v47 = vld [vmem:[#allocation39_spill] sm:$0xff] }
 0x6bf   :  { %13734 = vmatprep.subr.bf16.mxu0 %v21851_v5  ;;  %v21861_v5 = vld [vmem:[#allocation11_spill] sm:$0xff] }
 0x6c2   :  { %13735 = vmatpush2.bf16.msra.mxu0 %v21852_v53 }
 0x6c3   :  { %13736 = vmatprep.subr.bf16.mxu0 %v21853_v46  ;;  %v13987_v46 = vcombine.high %v20995_v57, %v20995_v57 }
 0x6c6   :  { %13737 = vmatpush2.bf16.msra.mxu0 %v21854_v44  ;;  %v21862_v44 = vld [vmem:[#allocation23_spill] sm:$0xff] }
 0x6c7   :  { %13738 = vmatprep.subr.bf16.mxu0 %v21855_v3  ;;  %v21003_v3 = vrot.slane %v16240_v45, %v18171_v41  ;;  %v17436_v45 = vld [vmem:[%s21352_s7 + $0xf8] sm:$0xff]  }
 0x6c8   :  { %16411 = vmatprep.subr.bf16.mxu1 %v17436_v45  ;;  %v17441_v45 = vld [vmem:[%s21352_s7 + $0xa8] sm:$0xff]  }
 0x6ca   :  { %13739 = vmatpush2.bf16.msra.mxu0 %v21856_v32 }
 0x6cb   :  { %13740 = vmatprep.subr.bf16.mxu0 %v21857_v28 }
 0x6ce   :  { %13741 = vmatpush2.bf16.msra.mxu0 %v21858_v54  ;;  %v14001_v54 = vrot.slane %v13987_v46, %v18171_v41  ;;  %v17438_v46 = vld [vmem:[%s21352_s7 + $0xf0] sm:$0xff]  }
 0x6cf   :  { %13742 = vmatprep.subr.bf16.mxu0 %v21859_v29 }
 0x6d2   :  { %13743 = vmatpush2.bf16.msra.mxu0 %v21860_v47 }
 0x6d3   :  { %13744 = vmatprep.subr.bf16.mxu0 %v21861_v5  ;;  %v21863_v5 = vld [vmem:[#allocation15_spill] sm:$0xff] }
 0x6d6   :  { %13745 = vmatpush2.bf16.msra.mxu0 %v21862_v44 }
 0x6d7   :  { %14004 = vmatprep.subr.bf16.mxu0 %v20494_v15  ;;  %v17437_v15 = vld [vmem:[%s21352_s7 + $0xb8] sm:$0xff]  }
 0x6d8   :  { %16412 = vmatpush3.bf16.msra.mxu1 %v17437_v15  ;;  %v17442_v15 = vld [vmem:[%s21352_s7 + $0xe0] sm:$0xff]  }
 0x6d9   :  { %13747 = vmatmul.mubr.bf16.vlgmr.msra.gmra.mxu0 %v21003_v3  ;;  %16413 = vmatprep.subr.bf16.mxu1 %v17438_v46  ;;  %v17443_v46 = vld [vmem:[%s21352_s7 + $0xa0] sm:$0xff]  }
 0x6da   :  { %14005 = vmatpush1.bf16.msra.mxu0 %v20500_v24  ;;  %14036 = vmatprep.mubr.bf16.mxu0 %v14001_v54  ;;  %v21864_v24 = vld [vmem:[#allocation24_spill] sm:$0xff]  ;;  %v17440_v54 = vld [vmem:[%s21352_s7 + $0xe8] sm:$0xff]  }
 0x6db   :  { %14006 = vmatprep.subr.bf16.mxu0 %v20506_v39  ;;  %v17439_v39 = vld [vmem:[%s21352_s7 + $0xb0] sm:$0xff]  }
 0x6dc   :  { %16414 = vmatpush3.bf16.msra.mxu1 %v17439_v39  ;;  %v17444_v39 = vld [vmem:[%s21352_s7 + $0xd8] sm:$0xff]  }
 0x6dd   :  { %16415 = vmatprep.subr.bf16.mxu1 %v17440_v54  ;;  %v17445_v54 = vld [vmem:[%s21352_s7 + $0x98] sm:$0xff]  }
 0x6de   :  { %14007 = vmatpush1.bf16.msra.mxu0 %v20513_v9  ;;  %v21865_v9 = vld [vmem:[#allocation26_spill] sm:$0xff] }
 0x6df   :  { %14008 = vmatprep.subr.bf16.mxu0 %v21863_v5  ;;  %v21866_v5 = vld [vmem:[#allocation31_spill] sm:$0xff] }
 0x6e0   :  { %16416 = vmatpush3.bf16.msra.mxu1 %v17441_v45  ;;  %v17446_v45 = vld [vmem:[%s21352_s7 + $0xd0] sm:$0xff]  }
 0x6e1   :  { %16417 = vmatprep.subr.bf16.mxu1 %v17442_v15  ;;  %v21876_v15 = vld [vmem:[#allocation20_spill] sm:$0xff] }
 0x6e2   :  { %14009 = vmatpush1.bf16.msra.mxu0 %v21864_v24  ;;  %v21867_v24 = vld [vmem:[#allocation16_spill] sm:$0xff] }
 0x6e3   :  { %14010 = vmatprep.subr.bf16.mxu0 %v21865_v9  ;;  %v21868_v9 = vld [vmem:[#allocation35_spill] sm:$0xff] }
 0x6e4   :  { %16418 = vmatpush3.bf16.msra.mxu1 %v17443_v46 }
 0x6e5   :  { %16419 = vmatprep.subr.bf16.mxu1 %v17444_v39 }
 0x6e6   :  { %14011 = vmatpush1.bf16.msra.mxu0 %v21866_v5  ;;  %v21869_v5 = vld [vmem:[#allocation28_spill] sm:$0xff] }
 0x6e7   :  { %14012 = vmatprep.subr.bf16.mxu0 %v21867_v24  ;;  %v17447_v24 = vld [vmem:[%s21352_s7 + $0x90] sm:$0xff]  }
 0x6e8   :  { %16420 = vmatpush3.bf16.msra.mxu1 %v17445_v54 }
 0x6e9   :  { %16421 = vmatprep.subr.bf16.mxu1 %v17446_v45 }
 0x6ea   :  { %14013 = vmatpush1.bf16.msra.mxu0 %v21868_v9 }
 0x6eb   :  { %14014 = vmatprep.subr.bf16.mxu0 %v21869_v5 }
 0x6ec   :  { %16422 = vmatpush3.bf16.msra.mxu1 %v17447_v24 }
 0x6ee   :  { %14015 = vmatpush1.bf16.msra.mxu0 %v20547_v25  ;;  %v21870_v25 = vld [vmem:[#allocation17_spill] sm:$0xff] }
 0x6ef   :  { %14016 = vmatprep.subr.bf16.mxu0 %v20551_v42  ;;  %v21871_v42 = vld [vmem:[#allocation18_spill] sm:$0xff] }
 0x6f2   :  { %14017 = vmatpush1.bf16.msra.mxu0 %v20555_v58  ;;  %v21872_v58 = vld [vmem:[#allocation19_spill] sm:$0xff] }
 0x6f3   :  { %14018 = vmatprep.subr.bf16.mxu0 %v20559_v30  ;;  %v21873_v30 = vld [vmem:[#allocation40_spill] sm:$0xff] }
 0x6f6   :  { %14019 = vmatpush1.bf16.msra.mxu0 %v20563_v37  ;;  %v21874_v37 = vld [vmem:[#allocation22_spill] sm:$0xff] }
 0x6f7   :  { %14020 = vmatprep.subr.bf16.mxu0 %v20567_v60  ;;  %v21875_v60 = vld [vmem:[#allocation27_spill] sm:$0xff] }
 0x6fa   :  { %14021 = vmatpush2.bf16.msra.mxu0 %v20571_v8  ;;  %v13994_v8 = vrot.slane %v20995_v57, %v18171_v41  ;;  %v17451_v57 = vld [vmem:[%s21352_s7 + $0x80] sm:$0xff]  }
 0x6fb   :  { %14022 = vmatprep.subr.bf16.mxu0 %v20578_v11 }
 0x6fe   :  { %14023 = vmatpush2.bf16.msra.mxu0 %v20583_v6  ;;  %v17448_v6 = vld [vmem:[%s21352_s7 + $0xc8] sm:$0xff]  }
 0x6ff   :  { %14024 = vmatprep.subr.bf16.mxu0 %v20589_v17  ;;  %16423 = vmatprep.subr.bf16.mxu1 %v17448_v6 }
 0x702   :  { %14025 = vmatpush2.bf16.msra.mxu0 %v20599_v0  ;;  %v17449_v0 = vld [vmem:[%s21352_s7 + $0x88] sm:$0xff]  }
 0x703   :  { %14026 = vmatprep.subr.bf16.mxu0 %v20607_v43  ;;  %16424 = vmatpush3.bf16.msra.mxu1 %v17449_v0 }
 0x706   :  { %14027 = vmatpush2.bf16.msra.mxu0 %v20619_v31 }
 0x707   :  { %14028 = vmatprep.subr.bf16.mxu0 %v20625_v59  ;;  %v17450_v59 = vld [vmem:[%s21352_s7 + $0xc0] sm:$0xff]  }
 0x708   :  { %16425 = vmatprep.subr.bf16.mxu1 %v17450_v59 }
 0x709   :  { %16426 = vmatpush3.bf16.msra.mxu1 %v17451_v57  ;;  %v21881_v57 = vld [vmem:[#allocation49_spill] sm:$0xff] }
 0x70a   :  { %14029 = vmatpush2.bf16.msra.mxu0 %v20630_v62  ;;  %13935 = vmatprep.subr.bf16.mxu1 %v21876_v15 }
 0x70b   :  { %14030 = vmatprep.subr.bf16.mxu0 %v21870_v25 }
 0x70e   :  { %14031 = vmatpush2.bf16.msra.mxu0 %v21871_v42 }
 0x70f   :  { %14032 = vmatprep.subr.bf16.mxu0 %v21872_v58 }
 0x712   :  { %14033 = vmatpush2.bf16.msra.mxu0 %v21873_v30 }
 0x713   :  { %14034 = vmatprep.subr.bf16.mxu0 %v21874_v37 }
 0x716   :  { %14035 = vmatpush2.bf16.msra.mxu0 %v21875_v60 }
 0x719   :  { %14037 = vmatmul.mubr.bf16.vlgmr.msra.gmra.mxu0 %v13994_v8  ;;  %v16405_v11 = vpop.f32.mrf.mxu0 }
 0x71b   :  { %v16406_v17 = vpop.f32.mrf.mxu0 }
 0x71c   :  { %v21083_v43 = vadd.f32 %v16406_v17, %v16405_v11 }
 0x71d   :  { %v16408_v31 = vpop.f32.mrf.mxu0 }
 0x71f   :  { %v16409_v62 = vpop.f32.mrf.mxu0 }
 0x720   :  { %v21880_v62 = vld [vmem:[#allocation48_spill] sm:$0xff] }
 0x759   :  { %v13610_v9 = vpop.f32.mrf.mxu0 }
 0x75a   :  { %v13617_v54 = vadd.f32 %v13610_v9, %v20856_v49  ;;  %v21882_v9 = vld [vmem:[#allocation50_spill] sm:$0xff] }
 0x75b   :  { %v13612_v46 = vpop.f32.mrf.mxu0 }
 0x75c   :  { %v13618_v45 = vadd.f32 %v13612_v46, %v20859_v27  ;;  %v13686_v24 = vadd.f32 %v20947_v23, %v13617_v54  ;;  %v21878_v23 = vld [vmem:[#allocation14_spill] sm:$0xff]  ;;  %v21883_v46 = vld [vmem:[#allocation51_spill] sm:$0xff] }
 0x75d   :  { %v13614_v5 = vpop.f32.mrf.mxu0  ;;  %v21886_v54 = vld [vmem:[#allocation54_spill] sm:$0xff] }
 0x75e   :  { %v13687_v58 = vadd.f32 %v20954_v14, %v13618_v45  ;;  %v21879_v14 = vld [vmem:[#allocation47_spill] sm:$0xff]  ;;  %v21884_v5 = vld [vmem:[#allocation52_spill] sm:$0xff] }
 0x75f   :  { %v13615_v39 = vpop.f32.mrf.mxu0  ;;  %v21887_v45 = vld [vmem:[#allocation55_spill] sm:$0xff] }
 0x760   :  { %v21885_v39 = vld [vmem:[#allocation53_spill] sm:$0xff] }
 0x799   :  { %v13748_v25 = vpop.f32.mrf.mxu0 }
 0x79a   :  { %v13755_v42 = vadd.f32 %v13748_v25, %v13686_v24  ;;  %v21888_v24 = vld [vmem:[#allocation56_spill] sm:$0xff]  ;;  %v21889_v25 = vld [vmem:[#allocation57_spill] sm:$0xff] }
 0x79b   :  { %v13750_v30 = vpop.f32.mrf.mxu0 }
 0x79c   :  { %vm13757_vm4 = vcmp.gt.f32.partialorder %v13755_v42, 0.0  ;;  %v13759_v37 = vmul.f32 0.01, %v13755_v42  ;;  %v13756_v60 = vadd.f32 %v13750_v30, %v13687_v58  ;;  %v21890_v58 = vld [vmem:[#allocation58_spill] sm:$0xff] }
 0x79d   :  { %v13752_v8 = vpop.f32.mrf.mxu0 }
 0x79e   :  { %vm13758_vm5 = vcmp.gt.f32.partialorder %v13756_v60, 0.0  ;;  %v13760_v11 = vmul.f32 0.01, %v13756_v60  ;;  %v13761_v6 = vsel %vm13757_vm4, %v13755_v42, %v13759_v37 }
 0x79f   :  { %v13753_v17 = vpop.f32.mrf.mxu0  ;;  %v13763_v59 = vpack.c.bf16 %v13761_v6, %v13761_v6  ;;  %v16290_v37 = vld.sshfl [vmem:[#allocation3 + $0xa] sm:$0x11 pattern:$0x75316420]  ;;  %v21132_v6 = vld [vmem:[#allocation8 + $0x274] ss:$8 sps:$4 sm:$0xff]  }
 0x7a0   :  { %v13762_v0 = vsel %vm13758_vm5, %v13756_v60, %v13760_v11  ;;  %v14056_v11 = vcombine.high %v16290_v37, %v16290_v37 }
 0x7a1   :  { %v13764_v31 = vpack.c.bf16 %v13762_v0, %v13762_v0  ;;  %v21139_v0 = vld [vmem:[#allocation8 + $0x270] ss:$8 sps:$4 sm:$0xff]  }
 0x7a2   :  { %v21136_v17 = vrot.slane %v14056_v11, %v18171_v41  ;;  %v21178_v11 = vrot.slane %v16290_v37, %v18171_v41  ;;  %v17453_v37 = vld [vmem:[%s21352_s7 + $0x138] sm:$0xff]  }
 0x7a3   :  { %13926 = vmatprep.mubr.bf16.mxu1 %v13764_v31  ;;  %v21902_v31 = vld [vmem:[#allocation30_spill] sm:$0xff] }
 0x7a4   :  { %13927 = vmatmul.mubr.bf16.vlgmr.msra.gmra.mxu1 %v13763_v59  ;;  %v21903_v59 = vld [vmem:[#allocation37_spill] sm:$0xff] }
 0x7a5   :  { %13936 = vmatpush1.bf16.msra.mxu1 %v20863_v7  ;;  %13967 = vmatprep.mubr.bf16.mxu1 %v20963_v20  ;;  %v21877_v20 = vld [vmem:[#allocation12_spill] sm:$0xff] }
 0x7a6   :  { %13937 = vmatprep.subr.bf16.mxu1 %v20865_v34 }
 0x7a9   :  { %13938 = vmatpush1.bf16.msra.mxu1 %v20869_v18 }
 0x7aa   :  { %13939 = vmatprep.subr.bf16.mxu1 %v20872_v52 }
 0x7ad   :  { %13940 = vmatpush1.bf16.msra.mxu1 %v20875_v1 }
 0x7ae   :  { %13941 = vmatprep.subr.bf16.mxu1 %v20878_v2 }
 0x7b1   :  { %13942 = vmatpush1.bf16.msra.mxu1 %v20881_v12 }
 0x7b2   :  { %13943 = vmatprep.subr.bf16.mxu1 %v20884_v19 }
 0x7b5   :  { %13944 = vmatpush1.bf16.msra.mxu1 %v20887_v13 }
 0x7b6   :  { %13945 = vmatprep.subr.bf16.mxu1 %v20890_v16 }
 0x7b9   :  { %13946 = vmatpush1.bf16.msra.mxu1 %v20893_v26 }
 0x7ba   :  { %13947 = vmatprep.subr.bf16.mxu1 %v20896_v40 }
 0x7bd   :  { %13948 = vmatpush1.bf16.msra.mxu1 %v20899_v36 }
 0x7be   :  { %13949 = vmatprep.subr.bf16.mxu1 %v20902_v10 }
 0x7c1   :  { %13950 = vmatpush1.bf16.msra.mxu1 %v21877_v20 }
 0x7c2   :  { %13951 = vmatprep.subr.bf16.mxu1 %v21878_v23 }
 0x7c5   :  { %13952 = vmatpush2.bf16.msra.mxu1 %v21879_v14 }
 0x7c6   :  { %13953 = vmatprep.subr.bf16.mxu1 %v21880_v62 }
 0x7c9   :  { %13954 = vmatpush2.bf16.msra.mxu1 %v21881_v57 }
 0x7ca   :  { %13955 = vmatprep.subr.bf16.mxu1 %v21882_v9 }
 0x7cd   :  { %13956 = vmatpush2.bf16.msra.mxu1 %v21883_v46 }
 0x7ce   :  { %13957 = vmatprep.subr.bf16.mxu1 %v21884_v5 }
 0x7d1   :  { %13958 = vmatpush2.bf16.msra.mxu1 %v21885_v39 }
 0x7d2   :  { %13959 = vmatprep.subr.bf16.mxu1 %v21886_v54 }
 0x7d5   :  { %13960 = vmatpush2.bf16.msra.mxu1 %v21887_v45 }
 0x7d6   :  { %13961 = vmatprep.subr.bf16.mxu1 %v21888_v24 }
 0x7d9   :  { %13962 = vmatpush2.bf16.msra.mxu1 %v21889_v25  ;;  %v21124_v42 = vpop.f32.mrf.mxu0 }
 0x7da   :  { %13963 = vmatprep.subr.bf16.mxu1 %v21890_v58 }
 0x7db   :  { %v21127_v30 = vpop.f32.mrf.mxu0 }
 0x7dd   :  { %13964 = vmatpush2.bf16.msra.mxu1 %v20949_v35  ;;  %v14042_v60 = vpop.f32.mrf.mxu0 }
 0x7de   :  { %13965 = vmatprep.subr.bf16.mxu1 %v20952_v21  ;;  %v21170_v60 = vld.sshfl [vmem:[#allocation3 + $0xc] sm:$0x11 pattern:$0x75316420] }
 0x7df   :  { %v14043_v8 = vpop.f32.mrf.mxu0 }
 0x7e0   :  { %v21904_v8 = vld [vmem:[#allocation11_spill] sm:$0xff] }
 0x7e1   :  { %13966 = vmatpush2.bf16.msra.mxu1 %v20957_v33 }
 0x7e2   :  { %14073 = vmatprep.subr.bf16.mxu1 %v21132_v6 }
 0x7e4   :  { %13968 = vmatmul.mubr.bf16.vlgmr.msra.gmra.mxu1 %v21003_v3  ;;  %v21891_v3 = vld [vmem:[#allocation44_spill] sm:$0xff] }
 0x7e5   :  { %14074 = vmatpush1.bf16.msra.mxu1 %v21139_v0  ;;  %14105 = vmatprep.mubr.bf16.mxu1 %v21136_v17 }
 0x7e6   :  { %14075 = vmatprep.subr.bf16.mxu1 %v20611_v48  ;;  %v21892_v48 = vld [vmem:[#allocation45_spill] sm:$0xff] }
 0x7e9   :  { %14076 = vmatpush1.bf16.msra.mxu1 %v20621_v56  ;;  %v21893_v56 = vld [vmem:[#allocation46_spill] sm:$0xff] }
 0x7ea   :  { %14077 = vmatprep.subr.bf16.mxu1 %v20627_v63  ;;  %v21894_v63 = vld [vmem:[#allocation34_spill] sm:$0xff] }
 0x7ed   :  { %14078 = vmatpush1.bf16.msra.mxu1 %v20634_v51  ;;  %v21895_v51 = vld [vmem:[#allocation41_spill] sm:$0xff] }
 0x7ee   :  { %14079 = vmatprep.subr.bf16.mxu1 %v20640_v50  ;;  %v21896_v50 = vld [vmem:[#allocation36_spill] sm:$0xff] }
 0x7f1   :  { %14080 = vmatpush1.bf16.msra.mxu1 %v20646_v61  ;;  %v21897_v61 = vld [vmem:[#allocation42_spill] sm:$0xff] }
 0x7f2   :  { %14081 = vmatprep.subr.bf16.mxu1 %v20653_v38  ;;  %v21898_v38 = vld [vmem:[#allocation38_spill] sm:$0xff] }
 0x7f5   :  { %14082 = vmatpush1.bf16.msra.mxu1 %v20659_v55  ;;  %v21899_v55 = vld [vmem:[#allocation43_spill] sm:$0xff] }
 0x7f6   :  { %14083 = vmatprep.subr.bf16.mxu1 %v20665_v22  ;;  %v21900_v22 = vld [vmem:[#allocation21_spill] sm:$0xff] }
 0x7f9   :  { %14084 = vmatpush1.bf16.msra.mxu1 %v20671_v4  ;;  %v21901_v4 = vld [vmem:[#allocation29_spill] sm:$0xff] }
 0x7fa   :  { %14085 = vmatprep.subr.bf16.mxu1 %v21891_v3  ;;  %v17547_v3 = vld [vmem:[#allocation8 + $0x160] ss:$8 sps:$4 sm:$0xff]  }
 0x7fd   :  { %14086 = vmatpush1.bf16.msra.mxu1 %v21892_v48  ;;  %v17548_v48 = vld [vmem:[#allocation8 + $0x154] ss:$8 sps:$4 sm:$0xff]  }
 0x7fe   :  { %14087 = vmatprep.subr.bf16.mxu1 %v21893_v56  ;;  %v17454_v56 = vld [vmem:[%s21352_s7 + $0x170] sm:$0xff]  }
 0x801   :  { %14088 = vmatpush1.bf16.msra.mxu1 %v21894_v63  ;;  %v17549_v63 = vld [vmem:[#allocation8 + $0x150] ss:$8 sps:$4 sm:$0xff]  }
 0x802   :  { %14089 = vmatprep.subr.bf16.mxu1 %v21895_v51  ;;  %v17455_v51 = vld [vmem:[%s21352_s7 + $0x130] sm:$0xff]  }
 0x805   :  { %14090 = vmatpush2.bf16.msra.mxu1 %v21896_v50  ;;  %v17550_v50 = vld [vmem:[#allocation8 + $0x144] ss:$8 sps:$4 sm:$0xff]  }
 0x806   :  { %14091 = vmatprep.subr.bf16.mxu1 %v21897_v61  ;;  %v17456_v61 = vld [vmem:[%s21352_s7 + $0x168] sm:$0xff]  }
 0x809   :  { %14092 = vmatpush2.bf16.msra.mxu1 %v21898_v38  ;;  %v17551_v38 = vld [vmem:[#allocation8 + $0x140] ss:$8 sps:$4 sm:$0xff]  }
 0x80a   :  { %14093 = vmatprep.subr.bf16.mxu1 %v21899_v55  ;;  %v17457_v55 = vld [vmem:[%s21352_s7 + $0x128] sm:$0xff]  }
 0x80d   :  { %14094 = vmatpush2.bf16.msra.mxu1 %v21852_v53  ;;  %v14346_v53 = vcombine.high %v21170_v60, %v21170_v60 }
 0x80e   :  { %14095 = vmatprep.subr.bf16.mxu1 %v21900_v22  ;;  %v17552_v22 = vld [vmem:[#allocation8 + $0x134] ss:$8 sps:$4 sm:$0xff]  }
 0x811   :  { %14096 = vmatpush2.bf16.msra.mxu1 %v21901_v4  ;;  %v17458_v4 = vld [vmem:[%s21352_s7 + $0x160] sm:$0xff]  }
 0x812   :  { %14097 = vmatprep.subr.bf16.mxu1 %v21902_v31  ;;  %v17553_v31 = vld [vmem:[#allocation8 + $0x130] ss:$8 sps:$4 sm:$0xff]  }
 0x815   :  { %14098 = vmatpush2.bf16.msra.mxu1 %v21856_v32  ;;  %v17544_v32 = vld [vmem:[#allocation8 + $0x174] ss:$8 sps:$4 sm:$0xff]  }
 0x816   :  { %14099 = vmatprep.subr.bf16.mxu1 %v21857_v28  ;;  %v14360_v28 = vrot.slane %v14346_v53, %v18171_v41  ;;  %v17460_v53 = vld [vmem:[%s21352_s7 + $0x158] sm:$0xff]  }
 0x819   :  { %14100 = vmatpush2.bf16.msra.mxu1 %v21903_v59  ;;  %v17459_v59 = vld [vmem:[%s21352_s7 + $0x120] sm:$0xff]  }
 0x81a   :  { %14101 = vmatprep.subr.bf16.mxu1 %v21859_v29  ;;  %v17545_v29 = vld [vmem:[#allocation8 + $0x170] ss:$8 sps:$4 sm:$0xff]  }
 0x81d   :  { %14102 = vmatpush2.bf16.msra.mxu1 %v21860_v47  ;;  %v17546_v47 = vld [vmem:[#allocation8 + $0x164] ss:$8 sps:$4 sm:$0xff]  }
 0x81e   :  { %14103 = vmatprep.subr.bf16.mxu1 %v21904_v8  ;;  %v17554_v8 = vld [vmem:[#allocation8 + $0x124] ss:$8 sps:$4 sm:$0xff]  }
 0x821   :  { %14104 = vmatpush2.bf16.msra.mxu1 %v21862_v44  ;;  %v17452_v44 = vld [vmem:[%s21352_s7 + $0x178] sm:$0xff]  }
 0x822   :  { %14363 = vmatprep.subr.bf16.mxu1 %v17544_v32  ;;  %16433 = vmatprep.subr.bf16.mxu0 %v17452_v44  ;;  %v17555_v32 = vld [vmem:[#allocation8 + $0x120] ss:$8 sps:$4 sm:$0xff]   ;;  %v17558_v44 = vld [vmem:[#allocation8 + $0x104] ss:$8 sps:$4 sm:$0xff]  }
 0x823   :  { %16434 = vmatpush3.bf16.msra.mxu0 %v17453_v37  ;;  %v17559_v37 = vld [vmem:[#allocation8 + $0x100] ss:$8 sps:$4 sm:$0xff]  }
 0x824   :  { %14106 = vmatmul.mubr.bf16.vlgmr.msra.gmra.mxu1 %v21178_v11  ;;  %16435 = vmatprep.subr.bf16.mxu0 %v17454_v56  ;;  %v17560_v56 = vld [vmem:[#allocation8 + $0x1f4] ss:$8 sps:$4 sm:$0xff]  }
 0x825   :  { %14364 = vmatpush1.bf16.msra.mxu1 %v17545_v29  ;;  %14395 = vmatprep.mubr.bf16.mxu1 %v14360_v28  ;;  %v17461_v28 = vld [vmem:[%s21352_s7 + $0x118] sm:$0xff]   ;;  %v17556_v29 = vld [vmem:[#allocation8 + $0x114] ss:$8 sps:$4 sm:$0xff]  }
 0x826   :  { %14365 = vmatprep.subr.bf16.mxu1 %v17546_v47  ;;  %v17462_v47 = vld [vmem:[%s21352_s7 + $0x150] sm:$0xff]  }
 0x827   :  { %16436 = vmatpush3.bf16.msra.mxu0 %v17455_v51  ;;  %v17562_v51 = vld [vmem:[#allocation8 + $0x1e4] ss:$8 sps:$4 sm:$0xff]  }
 0x828   :  { %16437 = vmatprep.subr.bf16.mxu0 %v17456_v61  ;;  %v17564_v61 = vld [vmem:[#allocation8 + $0x1d4] ss:$8 sps:$4 sm:$0xff]  }
 0x829   :  { %14366 = vmatpush1.bf16.msra.mxu1 %v17547_v3  ;;  %v17557_v3 = vld [vmem:[#allocation8 + $0x110] ss:$8 sps:$4 sm:$0xff]  }
 0x82a   :  { %14367 = vmatprep.subr.bf16.mxu1 %v17548_v48  ;;  %v17463_v48 = vld [vmem:[%s21352_s7 + $0x110] sm:$0xff]  }
 0x82b   :  { %16438 = vmatpush3.bf16.msra.mxu0 %v17457_v55  ;;  %v17566_v55 = vld [vmem:[#allocation8 + $0x1c4] ss:$8 sps:$4 sm:$0xff]  }
 0x82c   :  { %16439 = vmatprep.subr.bf16.mxu0 %v17458_v4  ;;  %v17568_v4 = vld [vmem:[#allocation8 + $0x1b4] ss:$8 sps:$4 sm:$0xff]  }
 0x82d   :  { %14368 = vmatpush1.bf16.msra.mxu1 %v17549_v63  ;;  %v17561_v63 = vld [vmem:[#allocation8 + $0x1f0] ss:$8 sps:$4 sm:$0xff]  }
 0x82e   :  { %14369 = vmatprep.subr.bf16.mxu1 %v17550_v50  ;;  %v17563_v50 = vld [vmem:[#allocation8 + $0x1e0] ss:$8 sps:$4 sm:$0xff]  }
 0x82f   :  { %16440 = vmatpush3.bf16.msra.mxu0 %v17459_v59  ;;  %v17570_v59 = vld [vmem:[#allocation8 + $0x1a4] ss:$8 sps:$4 sm:$0xff]  }
 0x830   :  { %16441 = vmatprep.subr.bf16.mxu0 %v17460_v53  ;;  %v17572_v53 = vld [vmem:[#allocation8 + $0x194] ss:$8 sps:$4 sm:$0xff]  }
 0x831   :  { %14370 = vmatpush1.bf16.msra.mxu1 %v17551_v38  ;;  %v17565_v38 = vld [vmem:[#allocation8 + $0x1d0] ss:$8 sps:$4 sm:$0xff]  }
 0x832   :  { %14371 = vmatprep.subr.bf16.mxu1 %v17552_v22  ;;  %v17567_v22 = vld [vmem:[#allocation8 + $0x1c0] ss:$8 sps:$4 sm:$0xff]  }
 0x833   :  { %16442 = vmatpush3.bf16.msra.mxu0 %v17461_v28  ;;  %v17574_v28 = vld [vmem:[#allocation8 + $0x184] ss:$8 sps:$4 sm:$0xff]  }
 0x834   :  { %16443 = vmatprep.subr.bf16.mxu0 %v17462_v47  ;;  %v14353_v47 = vrot.slane %v21170_v60, %v18171_v41 }
 0x835   :  { %14372 = vmatpush1.bf16.msra.mxu1 %v17553_v31  ;;  %v17569_v31 = vld [vmem:[#allocation8 + $0x1b0] ss:$8 sps:$4 sm:$0xff]  }
 0x836   :  { %14373 = vmatprep.subr.bf16.mxu1 %v17554_v8  ;;  %v17571_v8 = vld [vmem:[#allocation8 + $0x1a0] ss:$8 sps:$4 sm:$0xff]  }
 0x837   :  { %16444 = vmatpush3.bf16.msra.mxu0 %v17463_v48 }
 0x839   :  { %14374 = vmatpush1.bf16.msra.mxu1 %v17555_v32  ;;  %v17573_v32 = vld [vmem:[#allocation8 + $0x190] ss:$8 sps:$4 sm:$0xff]  }
 0x83a   :  { %14375 = vmatprep.subr.bf16.mxu1 %v17556_v29  ;;  %v17575_v29 = vld [vmem:[#allocation8 + $0x180] ss:$8 sps:$4 sm:$0xff]  }
 0x83d   :  { %14376 = vmatpush1.bf16.msra.mxu1 %v17557_v3  ;;  %v16206_v3 = vld [vmem:[%s21353_s8] ss:$0 sm:$0xff] }
 0x83e   :  { %14377 = vmatprep.subr.bf16.mxu1 %v17558_v44  ;;  %v17464_v44 = vld [vmem:[%s21352_s7 + $0x148] sm:$0xff]  }
 0x83f   :  { %16445 = vmatprep.subr.bf16.mxu0 %v17464_v44 }
 0x841   :  { %14378 = vmatpush1.bf16.msra.mxu1 %v17559_v37  ;;  %v17465_v37 = vld [vmem:[%s21352_s7 + $0x108] sm:$0xff]  }
 0x842   :  { %14379 = vmatprep.subr.bf16.mxu1 %v17560_v56  ;;  %16446 = vmatpush3.bf16.msra.mxu0 %v17465_v37 }
 0x845   :  { %14380 = vmatpush2.bf16.msra.mxu1 %v17561_v63  ;;  %v13383_v63 = vadd.f32 %v21083_v43, %v16206_v3 }
 0x846   :  { %14381 = vmatprep.subr.bf16.mxu1 %v17562_v51 }
 0x849   :  { %14382 = vmatpush2.bf16.msra.mxu1 %v17563_v50  ;;  %v17466_v50 = vld [vmem:[%s21352_s7 + $0x140] sm:$0xff]  }
 0x84a   :  { %14383 = vmatprep.subr.bf16.mxu1 %v17564_v61  ;;  %16447 = vmatprep.subr.bf16.mxu0 %v17466_v50 }
 0x84d   :  { %14384 = vmatpush2.bf16.msra.mxu1 %v17565_v38  ;;  %v17467_v38 = vld [vmem:[%s21352_s7 + $0x100] sm:$0xff]  }
 0x84e   :  { %14385 = vmatprep.subr.bf16.mxu1 %v17566_v55  ;;  %16448 = vmatpush3.bf16.msra.mxu0 %v17467_v38  ;;  %v17468_v38 = vld [vmem:[%s21352_s7 + $0x1f8] sm:$0xff]  }
 0x84f   :  { %14294 = vmatprep.subr.bf16.mxu0 %v21876_v15 }
 0x851   :  { %14386 = vmatpush2.bf16.msra.mxu1 %v17567_v22 }
 0x852   :  { %14387 = vmatprep.subr.bf16.mxu1 %v17568_v4 }
 0x855   :  { %14388 = vmatpush2.bf16.msra.mxu1 %v17569_v31 }
 0x856   :  { %14389 = vmatprep.subr.bf16.mxu1 %v17570_v59 }
 0x859   :  { %14390 = vmatpush2.bf16.msra.mxu1 %v17571_v8 }
 0x85a   :  { %14391 = vmatprep.subr.bf16.mxu1 %v17572_v53 }
 0x85d   :  { %14392 = vmatpush2.bf16.msra.mxu1 %v17573_v32 }
 0x85e   :  { %14393 = vmatprep.subr.bf16.mxu1 %v17574_v28 }
 0x861   :  { %14394 = vmatpush2.bf16.msra.mxu1 %v17575_v29 }
 0x862   :  { %16455 = vmatprep.subr.bf16.mxu1 %v17468_v38 }
 0x864   :  { %14396 = vmatmul.mubr.bf16.vlgmr.msra.gmra.mxu1 %v14353_v47  ;;  %v16427_v48 = vpop.f32.mrf.mxu1 }
 0x866   :  { %v16428_v56 = vpop.f32.mrf.mxu1 }
 0x867   :  { %v16429_v51 = vadd.f32 %v16428_v56, %v16427_v48 }
 0x868   :  { %v16430_v60 = vpop.f32.mrf.mxu1 }
 0x869   :  { %v21233_v61 = vadd.f32 %v16429_v51, %v13383_v63 }
 0x86a   :  { %v16431_v55 = vpop.f32.mrf.mxu1 }
 0x86b   :  { %v17469_v55 = vld [vmem:[%s21352_s7 + $0x1b8] sm:$0xff]  }
 0x86c   :  { %16456 = vmatpush3.bf16.msra.mxu1 %v17469_v55 }
 0x8a4   :  { %v13969_v22 = vpop.f32.mrf.mxu1 }
 0x8a5   :  { %v13976_v59 = vadd.f32 %v13969_v22, %v20856_v49  ;;  %v17470_v22 = vld [vmem:[%s21352_s7 + $0x1f0] sm:$0xff]  }
 0x8a6   :  { %v13971_v43 = vpop.f32.mrf.mxu1  ;;  %16457 = vmatprep.subr.bf16.mxu1 %v17470_v22 }
 0x8a7   :  { %v13977_v8 = vadd.f32 %v13971_v43, %v20859_v27  ;;  %v14045_v53 = vadd.f32 %v21124_v42, %v13976_v59  ;;  %v17599_v42 = vld [vmem:[#allocation8 + $0x2b0] ss:$8 sps:$4 sm:$0xff]   ;;  %v17471_v43 = vld [vmem:[%s21352_s7 + $0x1b0] sm:$0xff]  }
 0x8a8   :  { %v13973_v4 = vpop.f32.mrf.mxu1  ;;  %16458 = vmatpush3.bf16.msra.mxu1 %v17471_v43  ;;  %v17475_v59 = vld [vmem:[%s21352_s7 + $0x1a0] sm:$0xff]  }
 0x8a9   :  { %v14046_v29 = vadd.f32 %v21127_v30, %v13977_v8  ;;  %v17601_v30 = vld [vmem:[#allocation8 + $0x2a0] ss:$8 sps:$4 sm:$0xff]   ;;  %v17473_v4 = vld [vmem:[%s21352_s7 + $0x1a8] sm:$0xff]  }
 0x8aa   :  { %v13974_v31 = vpop.f32.mrf.mxu1  ;;  %v17476_v8 = vld [vmem:[%s21352_s7 + $0x1d8] sm:$0xff]  }
 0x8ab   :  { %v17474_v31 = vld [vmem:[%s21352_s7 + $0x1e0] sm:$0xff]  }
 0x8e4   :  { %v14107_v32 = vpop.f32.mrf.mxu1 }
 0x8e5   :  { %v14114_v28 = vadd.f32 %v14107_v32, %v14045_v53  ;;  %v17477_v53 = vld [vmem:[%s21352_s7 + $0x198] sm:$0xff]   ;;  %v17478_v32 = vld [vmem:[%s21352_s7 + $0x1d0] sm:$0xff]  }
 0x8e6   :  { %v14109_v47 = vpop.f32.mrf.mxu1 }
 0x8e7   :  { %vm14116_vm0 = vcmp.gt.f32.partialorder %v14114_v28, 0.0  ;;  %v14118_v3 = vmul.f32 0.01, %v14114_v28  ;;  %v14115_v48 = vadd.f32 %v14109_v47, %v14046_v29  ;;  %v17480_v47 = vld [vmem:[%s21352_s7 + $0x1c8] sm:$0xff]  }
 0x8e8   :  { %v14111_v44 = vpop.f32.mrf.mxu1 }
 0x8e9   :  { %vm14117_vm6 = vcmp.gt.f32.partialorder %v14115_v48, 0.0  ;;  %v14119_v15 = vmul.f32 0.01, %v14115_v48  ;;  %v14120_v37 = vsel %vm14116_vm0, %v14114_v28, %v14118_v3  ;;  %v17479_v28 = vld [vmem:[%s21352_s7 + $0x190] sm:$0xff]  }
 0x8ea   :  { %v14112_v56 = vpop.f32.mrf.mxu1  ;;  %v14122_v60 = vpack.c.bf16 %v14120_v37, %v14120_v37 }
 0x8eb   :  { %v14121_v63 = vsel %vm14117_vm6, %v14115_v48, %v14119_v15  ;;  %v17481_v48 = vld [vmem:[%s21352_s7 + $0x188] sm:$0xff]   ;;  %v17482_v56 = vld [vmem:[%s21352_s7 + $0x1c0] sm:$0xff]  }
 0x8ec   :  { %v14123_v51 = vpack.c.bf16 %v14121_v63, %v14121_v63 }
 0x8ee   :  { %14285 = vmatprep.mubr.bf16.mxu0 %v14123_v51  ;;  %v17483_v51 = vld [vmem:[%s21352_s7 + $0x180] sm:$0xff]  }
 0x8ef   :  { %14286 = vmatmul.mubr.bf16.vlgmr.msra.gmra.mxu0 %v14122_v60 }
 0x8f0   :  { %14295 = vmatpush1.bf16.msra.mxu0 %v20863_v7  ;;  %14326 = vmatprep.mubr.bf16.mxu0 %v21136_v17  ;;  %v17603_v17 = vld [vmem:[#allocation8 + $0x290] ss:$8 sps:$4 sm:$0xff]  }
 0x8f1   :  { %14296 = vmatprep.subr.bf16.mxu0 %v20865_v34 }
 0x8f4   :  { %14297 = vmatpush1.bf16.msra.mxu0 %v20869_v18  ;;  %v21276_v18 = vld.sshfl [vmem:[#allocation3 + $0xe] sm:$0x11 pattern:$0x75316420] }
 0x8f5   :  { %14298 = vmatprep.subr.bf16.mxu0 %v20872_v52  ;;  %v14422_v50 = vrot.slane %v21276_v18, %v18171_v41 }
 0x8f8   :  { %14299 = vmatpush1.bf16.msra.mxu0 %v20875_v1 }
 0x8f9   :  { %14300 = vmatprep.subr.bf16.mxu0 %v20878_v2  ;;  %v14415_v2 = vcombine.high %v21276_v18, %v21276_v18 }
 0x8fc   :  { %14301 = vmatpush1.bf16.msra.mxu0 %v20881_v12  ;;  %v14429_v12 = vrot.slane %v14415_v2, %v18171_v41  ;;  %v17472_v41 = vld [vmem:[%s21352_s7 + $0x1e8] sm:$0xff]  }
 0x8fd   :  { %14302 = vmatprep.subr.bf16.mxu0 %v20884_v19  ;;  %v17576_v19 = vld [vmem:[#allocation8 + $0x264] ss:$8 sps:$4 sm:$0xff]   ;;  %16459 = vmatprep.subr.bf16.mxu1 %v17472_v41 }
 0x8fe   :  { %16460 = vmatpush3.bf16.msra.mxu1 %v17473_v4 }
 0x8ff   :  { %16461 = vmatprep.subr.bf16.mxu1 %v17474_v31 }
 0x900   :  { %14303 = vmatpush1.bf16.msra.mxu0 %v20887_v13  ;;  %v17577_v13 = vld [vmem:[#allocation8 + $0x260] ss:$8 sps:$4 sm:$0xff]  }
 0x901   :  { %14304 = vmatprep.subr.bf16.mxu0 %v20890_v16  ;;  %v17578_v16 = vld [vmem:[#allocation8 + $0x254] ss:$8 sps:$4 sm:$0xff]  }
 0x902   :  { %16462 = vmatpush3.bf16.msra.mxu1 %v17475_v59 }
 0x903   :  { %16463 = vmatprep.subr.bf16.mxu1 %v17476_v8 }
 0x904   :  { %14305 = vmatpush1.bf16.msra.mxu0 %v20893_v26  ;;  %v17579_v26 = vld [vmem:[#allocation8 + $0x250] ss:$8 sps:$4 sm:$0xff]  }
 0x905   :  { %14306 = vmatprep.subr.bf16.mxu0 %v20896_v40  ;;  %v17580_v40 = vld [vmem:[#allocation8 + $0x244] ss:$8 sps:$4 sm:$0xff]  }
 0x906   :  { %16464 = vmatpush3.bf16.msra.mxu1 %v17477_v53 }
 0x907   :  { %16465 = vmatprep.subr.bf16.mxu1 %v17478_v32 }
 0x908   :  { %14307 = vmatpush1.bf16.msra.mxu0 %v20899_v36  ;;  %v17581_v36 = vld [vmem:[#allocation8 + $0x240] ss:$8 sps:$4 sm:$0xff]  }
 0x909   :  { %14308 = vmatprep.subr.bf16.mxu0 %v20902_v10  ;;  %v17582_v10 = vld [vmem:[#allocation8 + $0x234] ss:$8 sps:$4 sm:$0xff]  }
 0x90a   :  { %16466 = vmatpush3.bf16.msra.mxu1 %v17479_v28 }
 0x90b   :  { %16467 = vmatprep.subr.bf16.mxu1 %v17480_v47 }
 0x90c   :  { %14309 = vmatpush1.bf16.msra.mxu0 %v21877_v20  ;;  %v17586_v20 = vld [vmem:[#allocation8 + $0x214] ss:$8 sps:$4 sm:$0xff]  }
 0x90d   :  { %14310 = vmatprep.subr.bf16.mxu0 %v21878_v23  ;;  %v17587_v23 = vld [vmem:[#allocation8 + $0x210] ss:$8 sps:$4 sm:$0xff]  }
 0x90e   :  { %16468 = vmatpush3.bf16.msra.mxu1 %v17481_v48 }
 0x90f   :  { %16469 = vmatprep.subr.bf16.mxu1 %v17482_v56 }
 0x910   :  { %14311 = vmatpush2.bf16.msra.mxu0 %v21879_v14  ;;  %v17588_v14 = vld [vmem:[#allocation8 + $0x204] ss:$8 sps:$4 sm:$0xff]  }
 0x911   :  { %14312 = vmatprep.subr.bf16.mxu0 %v21880_v62  ;;  %v17589_v62 = vld [vmem:[#allocation8 + $0x200] ss:$8 sps:$4 sm:$0xff]  }
 0x912   :  { %16470 = vmatpush3.bf16.msra.mxu1 %v17483_v51 }
 0x914   :  { %14313 = vmatpush2.bf16.msra.mxu0 %v21881_v57  ;;  %v17590_v57 = vld [vmem:[#allocation8 + $0x2f4] ss:$8 sps:$4 sm:$0xff]  }
 0x915   :  { %14314 = vmatprep.subr.bf16.mxu0 %v21882_v9  ;;  %v17591_v9 = vld [vmem:[#allocation8 + $0x2f0] ss:$8 sps:$4 sm:$0xff]  }
 0x918   :  { %14315 = vmatpush2.bf16.msra.mxu0 %v21883_v46  ;;  %v17592_v46 = vld [vmem:[#allocation8 + $0x2e4] ss:$8 sps:$4 sm:$0xff]  }
 0x919   :  { %14316 = vmatprep.subr.bf16.mxu0 %v21884_v5  ;;  %v17593_v5 = vld [vmem:[#allocation8 + $0x2e0] ss:$8 sps:$4 sm:$0xff]  }
 0x91c   :  { %14317 = vmatpush2.bf16.msra.mxu0 %v21885_v39  ;;  %v17594_v39 = vld [vmem:[#allocation8 + $0x2d4] ss:$8 sps:$4 sm:$0xff]  }
 0x91d   :  { %14318 = vmatprep.subr.bf16.mxu0 %v21886_v54  ;;  %v17595_v54 = vld [vmem:[#allocation8 + $0x2d0] ss:$8 sps:$4 sm:$0xff]  }
 0x920   :  { %14319 = vmatpush2.bf16.msra.mxu0 %v21887_v45  ;;  %v17596_v45 = vld [vmem:[#allocation8 + $0x2c4] ss:$8 sps:$4 sm:$0xff]  }
 0x921   :  { %14320 = vmatprep.subr.bf16.mxu0 %v21888_v24  ;;  %v17597_v24 = vld [vmem:[#allocation8 + $0x2c0] ss:$8 sps:$4 sm:$0xff]  }
 0x924   :  { %14321 = vmatpush2.bf16.msra.mxu0 %v21889_v25  ;;  %v21271_v7 = vpop.f32.mrf.mxu1  ;;  %v17598_v25 = vld [vmem:[#allocation8 + $0x2b4] ss:$8 sps:$4 sm:$0xff]  }
 0x925   :  { %14322 = vmatprep.subr.bf16.mxu0 %v21890_v58  ;;  %v17600_v58 = vld [vmem:[#allocation8 + $0x2a4] ss:$8 sps:$4 sm:$0xff]  }
 0x926   :  { %v21274_v34 = vpop.f32.mrf.mxu1 }
 0x928   :  { %14323 = vmatpush2.bf16.msra.mxu0 %v20949_v35  ;;  %v14401_v52 = vpop.f32.mrf.mxu1  ;;  %v17584_v35 = vld [vmem:[#allocation8 + $0x224] ss:$8 sps:$4 sm:$0xff]  }
 0x929   :  { %14324 = vmatprep.subr.bf16.mxu0 %v20952_v21  ;;  %v17585_v21 = vld [vmem:[#allocation8 + $0x220] ss:$8 sps:$4 sm:$0xff]  }
 0x92a   :  { %v14402_v1 = vpop.f32.mrf.mxu1 }
 0x92c   :  { %14325 = vmatpush2.bf16.msra.mxu0 %v20957_v33  ;;  %v17583_v33 = vld [vmem:[#allocation8 + $0x230] ss:$8 sps:$4 sm:$0xff]  }
 0x92d   :  { %14432 = vmatprep.subr.bf16.mxu0 %v21132_v6  ;;  %v17602_v6 = vld [vmem:[#allocation8 + $0x294] ss:$8 sps:$4 sm:$0xff]  }
 0x92f   :  { %14327 = vmatmul.mubr.bf16.vlgmr.msra.gmra.mxu0 %v21178_v11  ;;  %v17605_v11 = vld [vmem:[#allocation8 + $0x280] ss:$8 sps:$4 sm:$0xff]  }
 0x930   :  { %14433 = vmatpush1.bf16.msra.mxu0 %v21139_v0  ;;  %14464 = vmatprep.mubr.bf16.mxu0 %v14429_v12  ;;  %v17604_v0 = vld [vmem:[#allocation8 + $0x284] ss:$8 sps:$4 sm:$0xff]  }
 0x931   :  { %14434 = vmatprep.subr.bf16.mxu0 %v17576_v19 }
 0x934   :  { %14435 = vmatpush1.bf16.msra.mxu0 %v17577_v13 }
 0x935   :  { %14436 = vmatprep.subr.bf16.mxu0 %v17578_v16 }
 0x938   :  { %14437 = vmatpush1.bf16.msra.mxu0 %v17579_v26 }
 0x939   :  { %14438 = vmatprep.subr.bf16.mxu0 %v17580_v40 }
 0x93c   :  { %14439 = vmatpush1.bf16.msra.mxu0 %v17581_v36 }
 0x93d   :  { %14440 = vmatprep.subr.bf16.mxu0 %v17582_v10 }
 0x940   :  { %14441 = vmatpush1.bf16.msra.mxu0 %v17583_v33 }
 0x941   :  { %14442 = vmatprep.subr.bf16.mxu0 %v17584_v35 }
 0x944   :  { %14443 = vmatpush1.bf16.msra.mxu0 %v17585_v21 }
 0x945   :  { %14444 = vmatprep.subr.bf16.mxu0 %v17586_v20 }
 0x948   :  { %14445 = vmatpush1.bf16.msra.mxu0 %v17587_v23 }
 0x949   :  { %14446 = vmatprep.subr.bf16.mxu0 %v17588_v14 }
 0x94c   :  { %14447 = vmatpush1.bf16.msra.mxu0 %v17589_v62 }
 0x94d   :  { %14448 = vmatprep.subr.bf16.mxu0 %v17590_v57 }
 0x950   :  { %14449 = vmatpush2.bf16.msra.mxu0 %v17591_v9 }
 0x951   :  { %14450 = vmatprep.subr.bf16.mxu0 %v17592_v46 }
 0x954   :  { %14451 = vmatpush2.bf16.msra.mxu0 %v17593_v5 }
 0x955   :  { %14452 = vmatprep.subr.bf16.mxu0 %v17594_v39 }
 0x958   :  { %14453 = vmatpush2.bf16.msra.mxu0 %v17595_v54 }
 0x959   :  { %14454 = vmatprep.subr.bf16.mxu0 %v17596_v45 }
 0x95c   :  { %14455 = vmatpush2.bf16.msra.mxu0 %v17597_v24 }
 0x95d   :  { %14456 = vmatprep.subr.bf16.mxu0 %v17598_v25 }
 0x960   :  { %14457 = vmatpush2.bf16.msra.mxu0 %v17599_v42 }
 0x961   :  { %14458 = vmatprep.subr.bf16.mxu0 %v17600_v58 }
 0x964   :  { %14459 = vmatpush2.bf16.msra.mxu0 %v17601_v30 }
 0x965   :  { %14460 = vmatprep.subr.bf16.mxu0 %v17602_v6 }
 0x968   :  { %14461 = vmatpush2.bf16.msra.mxu0 %v17603_v17 }
 0x969   :  { %14462 = vmatprep.subr.bf16.mxu0 %v17604_v0 }
 0x96c   :  { %14463 = vmatpush2.bf16.msra.mxu0 %v17605_v11 }
 0x96f   :  { %14465 = vmatmul.mubr.bf16.vlgmr.msra.gmra.mxu0 %v14422_v50 }
 0x9af   :  { %v16449_v29 = vpop.f32.mrf.mxu0 }
 0x9b1   :  { %v16450_v3 = vpop.f32.mrf.mxu0 }
 0x9b2   :  { %v16451_v44 = vadd.f32 %v16450_v3, %v16449_v29 }
 0x9b3   :  { %v16452_v15 = vpop.f32.mrf.mxu0 }
 0x9b4   :  { %v14293_v37 = vadd.f32 %v16451_v44, %v21233_v61 }
 0x9b5   :  { %v16453_v63 = vpop.f32.mrf.mxu0 }
 0x9ef   :  { %v14328_v60 = vpop.f32.mrf.mxu0 }
 0x9f0   :  { %v14335_v2 = vadd.f32 %v14328_v60, %v20856_v49 }
 0x9f1   :  { %v14330_v18 = vpop.f32.mrf.mxu0 }
 0x9f2   :  { %v14336_v12 = vadd.f32 %v14330_v18, %v20859_v27  ;;  %v14404_v61 = vadd.f32 %v21271_v7, %v14335_v2 }
 0x9f3   :  { %v14332_v52 = vpop.f32.mrf.mxu0 }
 0x9f4   :  { %v14405_v16 = vadd.f32 %v21274_v34, %v14336_v12 }
 0x9f5   :  { %v14333_v1 = vpop.f32.mrf.mxu0 }
 0xa2f   :  { %v14466_v19 = vpop.f32.mrf.mxu0 }
 0xa30   :  { %v14473_v13 = vadd.f32 %v14466_v19, %v14404_v61 }
 0xa31   :  { %v14468_v26 = vpop.f32.mrf.mxu0 }
 0xa32   :  { %vm14475_vm7 = vcmp.gt.f32.partialorder %v14473_v13, 0.0  ;;  %v14477_v40 = vmul.f32 0.01, %v14473_v13  ;;  %v14474_v36 = vadd.f32 %v14468_v26, %v14405_v16 }
 0xa33   :  { %v14470_v10 = vpop.f32.mrf.mxu0 }
 0xa34   :  { %vm14476_vm8 = vcmp.gt.f32.partialorder %v14474_v36, 0.0  ;;  %v14478_v33 = vmul.f32 0.01, %v14474_v36  ;;  %v14479_v35 = vsel %vm14475_vm7, %v14473_v13, %v14477_v40 }
 0xa35   :  { %v14471_v21 = vpop.f32.mrf.mxu0  ;;  %v14481_v49 = vpack.c.bf16 %v14479_v35, %v14479_v35 }
 0xa36   :  { %v14480_v20 = vsel %vm14476_vm8, %v14474_v36, %v14478_v33 }
 0xa37   :  { %v14482_v23 = vpack.c.bf16 %v14480_v20, %v14480_v20 }
 0xa39   :  { %14644 = vmatprep.mubr.bf16.mxu1 %v14482_v23 }
 0xa3a   :  { %14645 = vmatmul.mubr.bf16.vlgmr.msra.gmra.mxu1 %v14481_v49 }
 0xafa   :  { %v16471_v27 = vpop.f32.mrf.mxu1 }
 0xafc   :  { %v16472_v7 = vpop.f32.mrf.mxu1 }
 0xafd   :  { %v16473_v14 = vadd.f32 %v16472_v7, %v16471_v27 }
 0xafe   :  { %v16474_v62 = vpop.f32.mrf.mxu1 }
 0xaff   :  { %v14652_v57 = vadd.f32 %v16473_v14, %v14293_v37 }
 0xb00   :  { %v16475_v34 = vpop.f32.mrf.mxu1 }
 0xb01   :  { %14653 = vst [vmem:[%s21354_s9] sm:$0x3] %v14652_v57 }
 0xb02   :  { %14658 = vsyncpa [#allocation5], 1 }
 0xb03   :  { %14659 = vsyncpa [#allocation7], 1 }

</bundles_post_ra>
